<compile_context>
chip_gen: v6e
topology: v6e:2x2x1
jax: 0.10.0
libtpu: 0.0.40
codegen_flags: <defaults>
</compile_context>

<pallas_src>
import functools

import jax
import jax.numpy as jnp
from jax.experimental import pallas as pl
from jax.experimental.pallas import tpu as pltpu


# ----------------------------------------------------------------------------
# Pallas kernels
# ----------------------------------------------------------------------------
def _mm_bn_kernel(a_ref, b_ref, shift_ref, o_ref, acc_ref, *, relu):
    """Tiled matmul + per-output-channel shift (+ReLU); K is the innermost grid axis."""
    @pl.when(pl.program_id(2) == 0)
    def _init():
        acc_ref[...] = jnp.zeros_like(acc_ref)

    acc_ref[...] += jnp.dot(a_ref[...], b_ref[...],
                            preferred_element_type=jnp.float32)

    @pl.when(pl.program_id(2) == pl.num_programs(2) - 1)
    def _finalize():
        y = acc_ref[...] + shift_ref[...]
        if relu:
            y = jnp.maximum(y, 0.0)
        o_ref[...] = y.astype(o_ref.dtype)


def _mm_bn_res_kernel(a_ref, b_ref, shift_ref, res_ref, o_ref, acc_ref, *, relu):
    """Same as above, but fuses the residual add before the (optional) ReLU."""
    @pl.when(pl.program_id(2) == 0)
    def _init():
        acc_ref[...] = jnp.zeros_like(acc_ref)

    acc_ref[...] += jnp.dot(a_ref[...], b_ref[...],
                            preferred_element_type=jnp.float32)

    @pl.when(pl.program_id(2) == pl.num_programs(2) - 1)
    def _finalize():
        y = acc_ref[...] + shift_ref[...] + res_ref[...].astype(jnp.float32)
        if relu:
            y = jnp.maximum(y, 0.0)
        o_ref[...] = y.astype(o_ref.dtype)


def _gap_kernel(x_ref, o_ref):
    # global average pool over the spatial axis, x: (N, H*W, C) -> (N, C), f32 accumulate
    o_ref[...] = jnp.mean(x_ref[...].astype(jnp.float32), axis=1)


# ----------------------------------------------------------------------------
# Pallas wrappers
# ----------------------------------------------------------------------------
def _round_up(x, m):
    return (x + m - 1) // m * m


def _pad2d(x, rows, cols):
    pr, pc = rows - x.shape[0], cols - x.shape[1]
    if pr == 0 and pc == 0:
        return x
    return jnp.pad(x, ((0, pr), (0, pc)))


def matmul_affine(a, b, shift, residual=None, relu=False, out_dtype=jnp.bfloat16):
    """(a @ b) + shift [+ residual] [ReLU] as a tiled, pipelined bf16 MXU kernel.

    a: (M, K), b: (K, N) (BN scale is expected to be pre-folded into b),
    shift: (N,).  Operands are zero-padded to lane/sublane-friendly shapes and the
    result is sliced back to (M, N).
    """
    M, K = a.shape
    K2, N = b.shape
    assert K == K2

    # --- tile sizes (safe for 32 MiB scoped VMEM on v5e/v6e/v7x) ---
    Mp = _round_up(M, 8)
    tm = min(256, Mp)
    Mp = _round_up(Mp, tm)
    Np = _round_up(N, 128)
    tn = next(t for t in (256, 128) if Np % t == 0)
    Kp = _round_up(K, 128)
    tk = next(t for t in (512, 384, 256, 128) if Kp % t == 0)

    a_p = _pad2d(a.astype(jnp.bfloat16), Mp, Kp)
    b_p = _pad2d(b.astype(jnp.bfloat16), Kp, Np)
    shift_p = _pad2d(shift.reshape(1, N).astype(jnp.float32), 1, Np)

    ins = [a_p, b_p, shift_p]
    in_specs = [
        pl.BlockSpec((tm, tk), lambda i, j, k: (i, k)),
        pl.BlockSpec((tk, tn), lambda i, j, k: (k, j)),
        pl.BlockSpec((1, tn), lambda i, j, k: (0, j)),
    ]
    if residual is None:
        kernel = functools.partial(_mm_bn_kernel, relu=relu)
    else:
        kernel = functools.partial(_mm_bn_res_kernel, relu=relu)
        ins.append(_pad2d(residual.astype(jnp.bfloat16), Mp, Np))
        in_specs.append(pl.BlockSpec((tm, tn), lambda i, j, k: (i, j)))

    grid = (Mp // tm, Np // tn, Kp // tk)
    y = pl.pallas_call(
        kernel,
        out_shape=jax.ShapeDtypeStruct((Mp, Np), out_dtype),
        grid=grid,
        in_specs=in_specs,
        out_specs=pl.BlockSpec((tm, tn), lambda i, j, k: (i, j)),
        scratch_shapes=[pltpu.VMEM((tm, tn), jnp.float32)],
        compiler_params=pltpu.CompilerParams(
            dimension_semantics=("parallel", "parallel", "arbitrary")),
    )(*ins)
    return y[:M, :N]


def global_avg_pool(x):
    """x: (N, H*W, C) -> (N, C) float32."""
    N, HW, C = x.shape
    return pl.pallas_call(
        _gap_kernel,
        out_shape=jax.ShapeDtypeStruct((N, C), jnp.float32),
        grid=(1,),
        in_specs=[pl.BlockSpec((N, HW, C), lambda i: (0, 0, 0))],
        out_specs=pl.BlockSpec((N, C), lambda i: (0, 0)),
    )(x)


# ----------------------------------------------------------------------------
# Glue: im2col patch extraction and max-pool (plain JAX data movement only)
# ----------------------------------------------------------------------------
def _im2col(x_nhwc, kh, kw, stride, pad):
    N, H, W, C = x_nhwc.shape
    xp = jnp.pad(x_nhwc, ((0, 0), (pad, pad), (pad, pad), (0, 0)))
    Ho = (H + 2 * pad - kh) // stride + 1
    Wo = (W + 2 * pad - kw) // stride + 1
    cols = []
    for dy in range(kh):
        for dx in range(kw):
            cols.append(
                xp[:, dy:dy + stride * (Ho - 1) + 1:stride,
                      dx:dx + stride * (Wo - 1) + 1:stride, :])
    p = jnp.stack(cols, axis=0).reshape(kh, kw, N, Ho, Wo, C)
    # feature ordering (C, kh, kw) to match torch weight.reshape(Cout, Cin*kh*kw)
    p = p.transpose(2, 3, 4, 5, 0, 1).reshape(N * Ho * Wo, C * kh * kw)
    return p, Ho, Wo


def conv_bn(x_flat, shp, w, bn, stride, pad, relu, residual=None):
    """conv(bias=False) + eval-mode BN (+residual) (+ReLU). x_flat: (N*H*W, Cin) bf16."""
    N, H, W = shp
    Cin = x_flat.shape[1]
    Cout, Cin2, kh, kw = w.shape
    assert Cin == Cin2
    patches, Ho, Wo = _im2col(x_flat.reshape(N, H, W, Cin), kh, kw, stride, pad)
    scale = bn["gamma"] / jnp.sqrt(bn["var"] + 1e-5)
    shift = bn["beta"] - bn["mean"] * scale
    # Fold BN scale into the weight matrix at trace time (one-time transform).
    wmat = w.reshape(Cout, Cin * kh * kw).T * scale[None, :]
    y = matmul_affine(patches, wmat, shift, residual=residual, relu=relu,
                      out_dtype=jnp.bfloat16)
    return y, (N, Ho, Wo)


def maxpool_3x3_s2(x_flat, shp):
    """3x3 stride-2 pad-1 max-pool via lax.reduce_window (no 9x tap materialization)."""
    N, H, W = shp
    C = x_flat.shape[1]
    x4 = x_flat.reshape(N, H, W, C)
    y = jax.lax.reduce_window(
        x4, jnp.array(-jnp.inf, dtype=x4.dtype), jax.lax.max,
        window_dimensions=(1, 3, 3, 1), window_strides=(1, 2, 2, 1),
        padding=((0, 0), (1, 1), (1, 1), (0, 0)))
    Ho, Wo = y.shape[1], y.shape[2]
    return y.reshape(N * Ho * Wo, C), (N, Ho, Wo)


# ----------------------------------------------------------------------------
# ResNet18 backbone (fc = Identity) and MorphCLRDual forward
# ----------------------------------------------------------------------------
def basic_block(x, shp, blk, stride):
    identity = x
    out, shp1 = conv_bn(x, shp, blk["conv1_w"], blk["bn1"], stride, 1, relu=True)
    if "down_w" in blk:
        identity, _ = conv_bn(x, shp, blk["down_w"], blk["down_bn"], stride, 0,
                              relu=False)
    # residual add + final ReLU fused into the second conv's Pallas kernel
    out, shp2 = conv_bn(out, shp1, blk["conv2_w"], blk["bn2"], 1, 1,
                        relu=True, residual=identity)
    return out, shp2


def resnet18_forward(x_nchw, params):
    N, C, H, W = x_nchw.shape
    x = jnp.transpose(x_nchw, (0, 2, 3, 1)).astype(jnp.bfloat16).reshape(N * H * W, C)
    shp = (N, H, W)
    x, shp = conv_bn(x, shp, params["conv1_w"], params["bn1"], 2, 3, relu=True)
    x, shp = maxpool_3x3_s2(x, shp)
    for li, layer in enumerate(params["layers"]):
        for bi, blk in enumerate(layer):
            stride = 2 if (li > 0 and bi == 0) else 1
            x, shp = basic_block(x, shp, blk, stride)
    Nf, Hf, Wf = shp
    feat = global_avg_pool(x.reshape(Nf, Hf * Wf, x.shape[1]))  # (N, 512) f32
    return feat


def morphclr_dual_forward(x, params):
    """x: (2, N, 3, H, W) float32 (a stacked pair of NCHW batches, like torch x[0], x[1])."""
    x1 = resnet18_forward(x[0], params["backbone_1"])
    x2 = resnet18_forward(x[1], params["backbone_2"])
    x_cat = jnp.concatenate([x1, x2], axis=1)  # (N, 1024)
    w1, b1 = params["proj1"]
    w2, b2 = params["proj2"]
    h = matmul_affine(x_cat, w1, b1, relu=True, out_dtype=jnp.bfloat16)   # Linear + ReLU
    out = matmul_affine(h, w2, b2, relu=False, out_dtype=jnp.float32)     # Linear
    return out


# ----------------------------------------------------------------------------
# Deterministic parameter init (synthetic; shapes match torchvision resnet18)
# ----------------------------------------------------------------------------
def _init_bn(c):
    return dict(gamma=jnp.ones((c,), jnp.float32),
                beta=jnp.zeros((c,), jnp.float32),
                mean=jnp.zeros((c,), jnp.float32),
                var=jnp.ones((c,), jnp.float32))


def _init_conv(key, cout, cin, kh, kw):
    fan_out = cout * kh * kw
    return (jax.random.normal(key, (cout, cin, kh, kw), jnp.float32)
            * jnp.sqrt(2.0 / fan_out))


def _init_resnet18(key):
    keys = iter(jax.random.split(key, 64))
    p = {"conv1_w": _init_conv(next(keys), 64, 3, 7, 7), "bn1": _init_bn(64)}
    layers = []
    in_c = 64
    for out_c, n_blocks, first_stride in [(64, 2, 1), (128, 2, 2),
                                          (256, 2, 2), (512, 2, 2)]:
        layer = []
        for b in range(n_blocks):
            stride = first_stride if b == 0 else 1
            blk = {
                "conv1_w": _init_conv(next(keys), out_c, in_c, 3, 3),
                "bn1": _init_bn(out_c),
                "conv2_w": _init_conv(next(keys), out_c, out_c, 3, 3),
                "bn2": _init_bn(out_c),
            }
            if stride != 1 or in_c != out_c:
                blk["down_w"] = _init_conv(next(keys), out_c, in_c, 1, 1)
                blk["down_bn"] = _init_bn(out_c)
            layer.append(blk)
            in_c = out_c
        layers.append(layer)
    p["layers"] = layers
    return p


def _init_linear(key, fin, fout):
    k1, k2 = jax.random.split(key)
    w = jax.random.normal(k1, (fin, fout), jnp.float32) / jnp.sqrt(fin)
    b = jax.random.normal(k2, (fout,), jnp.float32) * 0.01
    return w, b


def init_morphclr_dual(key, out_dim):
    k1, k2, k3, k4 = jax.random.split(key, 4)
    dim_mlp = 512  # resnet18 fc.in_features
    return {
        "backbone_1": _init_resnet18(k1),
        "backbone_2": _init_resnet18(k2),
        "proj1": _init_linear(k3, dim_mlp * 2, dim_mlp * 2),
        "proj2": _init_linear(k4, dim_mlp * 2, out_dim),
    }


# ----------------------------------------------------------------------------
if __name__ == "__main__":
    key = jax.random.PRNGKey(0)
    kp, kx = jax.random.split(key)

    out_dim = 128
    params = init_morphclr_dual(kp, out_dim)

    # x[0], x[1] are two NCHW image batches: batch=2, 3 channels, 32x32 spatial
    x = jax.random.normal(kx, (2, 2, 3, 32, 32), jnp.float32)

    fwd = jax.jit(morphclr_dual_forward)
    out = fwd(x, params)
    out = jax.block_until_ready(out)

    assert out.shape == (2, out_dim), out.shape
    assert out.dtype == jnp.float32
    assert bool(jnp.all(jnp.isfinite(out)))
    print("KERNEL_OK")
</pallas_src>

<mosaic_0001>
module attributes {stable_mosaic.version = 11 : i64} {
  func.func @_mm_bn_kernel(%arg0: i32, %arg1: i32, %arg2: i32, %arg3: memref<256x256xbf16, #tpu.memory_space<vmem>>, %arg4: memref<256x128xbf16, #tpu.memory_space<vmem>>, %arg5: memref<1x128xf32, #tpu.memory_space<vmem>>, %arg6: memref<256x128xbf16, #tpu.memory_space<vmem>>, %arg7: memref<256x128xf32, #tpu.memory_space<vmem>>) attributes {dimension_semantics = [#tpu.dimension_semantics<parallel>, #tpu.dimension_semantics<parallel>, #tpu.dimension_semantics<arbitrary>], iteration_bounds = array<i64: 2, 1, 1>, scalar_prefetch = 0 : i64, scratch_operands = 1 : i64, tpu.core_type = #tpu.core_type<tc>, window_params = [{transform_indices = @transform_0, window_bounds = array<i64: 256, 256>}, {transform_indices = @transform_1, window_bounds = array<i64: 256, 128>}, {transform_indices = @transform_2, window_bounds = array<i64: 1, 128>}, {transform_indices = @transform_3, window_bounds = array<i64: 256, 128>}]} {
    %c0_i32 = arith.constant 0 : i32
    %0 = arith.cmpi eq, %arg2, %c0_i32 : i32
    %1 = arith.extui %0 : i1 to i32
    %c0_i32_0 = arith.constant 0 : i32
    %2 = arith.cmpi ne, %1, %c0_i32_0 : i32
    scf.if %2 {
      %cst_10 = arith.constant 0.000000e+00 : f32
      %12 = vector.broadcast %cst_10 : f32 to vector<256x128xf32>
      %c0_11 = arith.constant 0 : index
      %c0_12 = arith.constant 0 : index
      %13 = vector.load %arg7[%c0_11, %c0_12] : memref<256x128xf32, #tpu.memory_space<vmem>>, vector<256x128xf32>
      tpu.vector_store %arg7[%c0_11, %c0_12], %12 {strides = array<i32>} : memref<256x128xf32, #tpu.memory_space<vmem>>, vector<256x128xf32>,
    } else {
    }
    %c0 = arith.constant 0 : index
    %c0_1 = arith.constant 0 : index
    %3 = vector.load %arg7[%c0, %c0_1] : memref<256x128xf32, #tpu.memory_space<vmem>>, vector<256x128xf32>
    %c0_2 = arith.constant 0 : index
    %c0_3 = arith.constant 0 : index
    %4 = vector.load %arg3[%c0_2, %c0_3] : memref<256x256xbf16, #tpu.memory_space<vmem>>, vector<256x256xbf16>
    %c0_4 = arith.constant 0 : index
    %c0_5 = arith.constant 0 : index
    %5 = vector.load %arg4[%c0_4, %c0_5] : memref<256x128xbf16, #tpu.memory_space<vmem>>, vector<256x128xbf16>
    %cst = arith.constant dense<0.000000e+00> : vector<256x128xf32>
    %6 = tpu.matmul %4, %5, %cst {dimension_numbers = #tpu.dot_dimension_numbers<[1], [0], [0], [1], [0, 0, 1, 1], [], []>} : vector<256x256xbf16>, vector<256x128xbf16>, vector<256x128xf32> -> vector<256x128xf32>
    %7 = arith.addf %3, %6 : vector<256x128xf32>
    %c0_6 = arith.constant 0 : index
    %c0_7 = arith.constant 0 : index
    %8 = vector.load %arg7[%c0_6, %c0_7] : memref<256x128xf32, #tpu.memory_space<vmem>>, vector<256x128xf32>
    tpu.vector_store %arg7[%c0_6, %c0_7], %7 {strides = array<i32>} : memref<256x128xf32, #tpu.memory_space<vmem>>, vector<256x128xf32>,
    %c0_i32_8 = arith.constant 0 : i32
    %9 = arith.cmpi eq, %arg2, %c0_i32_8 : i32
    %10 = arith.extui %9 : i1 to i32
    %c0_i32_9 = arith.constant 0 : i32
    %11 = arith.cmpi ne, %10, %c0_i32_9 : i32
    scf.if %11 {
      %c0_10 = arith.constant 0 : index
      %c0_11 = arith.constant 0 : index
      %12 = vector.load %arg7[%c0_10, %c0_11] : memref<256x128xf32, #tpu.memory_space<vmem>>, vector<256x128xf32>
      %c0_12 = arith.constant 0 : index
      %c0_13 = arith.constant 0 : index
      %13 = vector.load %arg5[%c0_12, %c0_13] : memref<1x128xf32, #tpu.memory_space<vmem>>, vector<1x128xf32>
      %14 = vector.broadcast %13 : vector<1x128xf32> to vector<256x128xf32>
      %15 = arith.addf %12, %14 : vector<256x128xf32>
      %cst_14 = arith.constant 0.000000e+00 : f32
      %16 = vector.broadcast %cst_14 : f32 to vector<256x128xf32>
      %17 = arith.maximumf %15, %16 : vector<256x128xf32>
      %18 = arith.truncf %17 : vector<256x128xf32> to vector<256x128xbf16>
      %c0_15 = arith.constant 0 : index
      %c0_16 = arith.constant 0 : index
      %19 = vector.load %arg6[%c0_15, %c0_16] : memref<256x128xbf16, #tpu.memory_space<vmem>>, vector<256x128xbf16>
      tpu.vector_store %arg6[%c0_15, %c0_16], %18 {strides = array<i32>} : memref<256x128xbf16, #tpu.memory_space<vmem>>, vector<256x128xbf16>,
    } else {
    }
    return
  }
  func.func @transform_0(%arg0: i32, %arg1: i32, %arg2: i32) -> (i32, i32) {
    %c0_i32 = arith.constant 0 : i32
    return %arg0, %arg2 : i32, i32
  }
  func.func @transform_1(%arg0: i32, %arg1: i32, %arg2: i32) -> (i32, i32) {
    %c0_i32 = arith.constant 0 : i32
    return %arg2, %arg1 : i32, i32
  }
  func.func @transform_2(%arg0: i32, %arg1: i32, %arg2: i32) -> (i32, i32) {
    %c0_i32 = arith.constant 0 : i32
    %c0_i32_0 = arith.constant 0 : i32
    return %c0_i32, %arg1 : i32, i32
  }
  func.func @transform_3(%arg0: i32, %arg1: i32, %arg2: i32) -> (i32, i32) {
    %c0_i32 = arith.constant 0 : i32
    return %arg0, %arg1 : i32, i32
  }
}

module attributes {stable_mosaic.version = 11 : i64} {
  func.func @_mm_bn_kernel(%arg0: i32, %arg1: i32, %arg2: i32, %arg3: memref<128x128xbf16, #tpu.memory_space<vmem>>, %arg4: memref<128x128xbf16, #tpu.memory_space<vmem>>, %arg5: memref<1x128xf32, #tpu.memory_space<vmem>>, %arg6: memref<128x128xbf16, #tpu.memory_space<vmem>>, %arg7: memref<128x128xf32, #tpu.memory_space<vmem>>) attributes {dimension_semantics = [#tpu.dimension_semantics<parallel>, #tpu.dimension_semantics<parallel>, #tpu.dimension_semantics<arbitrary>], iteration_bounds = array<i64: 1, 1, 5>, scalar_prefetch = 0 : i64, scratch_operands = 1 : i64, tpu.core_type = #tpu.core_type<tc>, window_params = [{transform_indices = @transform_0, window_bounds = array<i64: 128, 128>}, {transform_indices = @transform_1, window_bounds = array<i64: 128, 128>}, {transform_indices = @transform_2, window_bounds = array<i64: 1, 128>}, {transform_indices = @transform_3, window_bounds = array<i64: 128, 128>}]} {
    %c0_i32 = arith.constant 0 : i32
    %0 = arith.cmpi eq, %arg2, %c0_i32 : i32
    %1 = arith.extui %0 : i1 to i32
    %c0_i32_0 = arith.constant 0 : i32
    %2 = arith.cmpi ne, %1, %c0_i32_0 : i32
    scf.if %2 {
      %cst_9 = arith.constant 0.000000e+00 : f32
      %12 = vector.broadcast %cst_9 : f32 to vector<128x128xf32>
      %c0_10 = arith.constant 0 : index
      %c0_11 = arith.constant 0 : index
      %13 = vector.load %arg7[%c0_10, %c0_11] : memref<128x128xf32, #tpu.memory_space<vmem>>, vector<128x128xf32>
      tpu.vector_store %arg7[%c0_10, %c0_11], %12 {strides = array<i32>} : memref<128x128xf32, #tpu.memory_space<vmem>>, vector<128x128xf32>,
    } else {
    }
    %c0 = arith.constant 0 : index
    %c0_1 = arith.constant 0 : index
    %3 = vector.load %arg7[%c0, %c0_1] : memref<128x128xf32, #tpu.memory_space<vmem>>, vector<128x128xf32>
    %c0_2 = arith.constant 0 : index
    %c0_3 = arith.constant 0 : index
    %4 = vector.load %arg3[%c0_2, %c0_3] : memref<128x128xbf16, #tpu.memory_space<vmem>>, vector<128x128xbf16>
    %c0_4 = arith.constant 0 : index
    %c0_5 = arith.constant 0 : index
    %5 = vector.load %arg4[%c0_4, %c0_5] : memref<128x128xbf16, #tpu.memory_space<vmem>>, vector<128x128xbf16>
    %cst = arith.constant dense<0.000000e+00> : vector<128x128xf32>
    %6 = tpu.matmul %4, %5, %cst {dimension_numbers = #tpu.dot_dimension_numbers<[1], [0], [0], [1], [0, 0, 1, 1], [], []>} : vector<128x128xbf16>, vector<128x128xbf16>, vector<128x128xf32> -> vector<128x128xf32>
    %7 = arith.addf %3, %6 : vector<128x128xf32>
    %c0_6 = arith.constant 0 : index
    %c0_7 = arith.constant 0 : index
    %8 = vector.load %arg7[%c0_6, %c0_7] : memref<128x128xf32, #tpu.memory_space<vmem>>, vector<128x128xf32>
    tpu.vector_store %arg7[%c0_6, %c0_7], %7 {strides = array<i32>} : memref<128x128xf32, #tpu.memory_space<vmem>>, vector<128x128xf32>,
    %c4_i32 = arith.constant 4 : i32
    %9 = arith.cmpi eq, %arg2, %c4_i32 : i32
    %10 = arith.extui %9 : i1 to i32
    %c0_i32_8 = arith.constant 0 : i32
    %11 = arith.cmpi ne, %10, %c0_i32_8 : i32
    scf.if %11 {
      %c0_9 = arith.constant 0 : index
      %c0_10 = arith.constant 0 : index
      %12 = vector.load %arg7[%c0_9, %c0_10] : memref<128x128xf32, #tpu.memory_space<vmem>>, vector<128x128xf32>
      %c0_11 = arith.constant 0 : index
      %c0_12 = arith.constant 0 : index
      %13 = vector.load %arg5[%c0_11, %c0_12] : memref<1x128xf32, #tpu.memory_space<vmem>>, vector<1x128xf32>
      %14 = vector.broadcast %13 : vector<1x128xf32> to vector<128x128xf32>
      %15 = arith.addf %12, %14 : vector<128x128xf32>
      %cst_13 = arith.constant 0.000000e+00 : f32
      %16 = vector.broadcast %cst_13 : f32 to vector<128x128xf32>
      %17 = arith.maximumf %15, %16 : vector<128x128xf32>
      %18 = arith.truncf %17 : vector<128x128xf32> to vector<128x128xbf16>
      %c0_14 = arith.constant 0 : index
      %c0_15 = arith.constant 0 : index
      %19 = vector.load %arg6[%c0_14, %c0_15] : memref<128x128xbf16, #tpu.memory_space<vmem>>, vector<128x128xbf16>
      tpu.vector_store %arg6[%c0_14, %c0_15], %18 {strides = array<i32>} : memref<128x128xbf16, #tpu.memory_space<vmem>>, vector<128x128xbf16>,
    } else {
    }
    return
  }
  func.func @transform_0(%arg0: i32, %arg1: i32, %arg2: i32) -> (i32, i32) {
    %c0_i32 = arith.constant 0 : i32
    return %arg0, %arg2 : i32, i32
  }
  func.func @transform_1(%arg0: i32, %arg1: i32, %arg2: i32) -> (i32, i32) {
    %c0_i32 = arith.constant 0 : i32
    return %arg2, %arg1 : i32, i32
  }
  func.func @transform_2(%arg0: i32, %arg1: i32, %arg2: i32) -> (i32, i32) {
    %c0_i32 = arith.constant 0 : i32
    %c0_i32_0 = arith.constant 0 : i32
    return %c0_i32, %arg1 : i32, i32
  }
  func.func @transform_3(%arg0: i32, %arg1: i32, %arg2: i32) -> (i32, i32) {
    %c0_i32 = arith.constant 0 : i32
    return %arg0, %arg1 : i32, i32
  }
}

module attributes {stable_mosaic.version = 11 : i64} {
  func.func @_mm_bn_res_kernel(%arg0: i32, %arg1: i32, %arg2: i32, %arg3: memref<128x128xbf16, #tpu.memory_space<vmem>>, %arg4: memref<128x128xbf16, #tpu.memory_space<vmem>>, %arg5: memref<1x128xf32, #tpu.memory_space<vmem>>, %arg6: memref<128x128xbf16, #tpu.memory_space<vmem>>, %arg7: memref<128x128xbf16, #tpu.memory_space<vmem>>, %arg8: memref<128x128xf32, #tpu.memory_space<vmem>>) attributes {dimension_semantics = [#tpu.dimension_semantics<parallel>, #tpu.dimension_semantics<parallel>, #tpu.dimension_semantics<arbitrary>], iteration_bounds = array<i64: 1, 1, 5>, scalar_prefetch = 0 : i64, scratch_operands = 1 : i64, tpu.core_type = #tpu.core_type<tc>, window_params = [{transform_indices = @transform_0, window_bounds = array<i64: 128, 128>}, {transform_indices = @transform_1, window_bounds = array<i64: 128, 128>}, {transform_indices = @transform_2, window_bounds = array<i64: 1, 128>}, {transform_indices = @transform_3, window_bounds = array<i64: 128, 128>}, {transform_indices = @transform_4, window_bounds = array<i64: 128, 128>}]} {
    %c0_i32 = arith.constant 0 : i32
    %0 = arith.cmpi eq, %arg2, %c0_i32 : i32
    %1 = arith.extui %0 : i1 to i32
    %c0_i32_0 = arith.constant 0 : i32
    %2 = arith.cmpi ne, %1, %c0_i32_0 : i32
    scf.if %2 {
      %cst_9 = arith.constant 0.000000e+00 : f32
      %12 = vector.broadcast %cst_9 : f32 to vector<128x128xf32>
      %c0_10 = arith.constant 0 : index
      %c0_11 = arith.constant 0 : index
      %13 = vector.load %arg8[%c0_10, %c0_11] : memref<128x128xf32, #tpu.memory_space<vmem>>, vector<128x128xf32>
      tpu.vector_store %arg8[%c0_10, %c0_11], %12 {strides = array<i32>} : memref<128x128xf32, #tpu.memory_space<vmem>>, vector<128x128xf32>,
    } else {
    }
    %c0 = arith.constant 0 : index
    %c0_1 = arith.constant 0 : index
    %3 = vector.load %arg8[%c0, %c0_1] : memref<128x128xf32, #tpu.memory_space<vmem>>, vector<128x128xf32>
    %c0_2 = arith.constant 0 : index
    %c0_3 = arith.constant 0 : index
    %4 = vector.load %arg3[%c0_2, %c0_3] : memref<128x128xbf16, #tpu.memory_space<vmem>>, vector<128x128xbf16>
    %c0_4 = arith.constant 0 : index
    %c0_5 = arith.constant 0 : index
    %5 = vector.load %arg4[%c0_4, %c0_5] : memref<128x128xbf16, #tpu.memory_space<vmem>>, vector<128x128xbf16>
    %cst = arith.constant dense<0.000000e+00> : vector<128x128xf32>
    %6 = tpu.matmul %4, %5, %cst {dimension_numbers = #tpu.dot_dimension_numbers<[1], [0], [0], [1], [0, 0, 1, 1], [], []>} : vector<128x128xbf16>, vector<128x128xbf16>, vector<128x128xf32> -> vector<128x128xf32>
    %7 = arith.addf %3, %6 : vector<128x128xf32>
    %c0_6 = arith.constant 0 : index
    %c0_7 = arith.constant 0 : index
    %8 = vector.load %arg8[%c0_6, %c0_7] : memref<128x128xf32, #tpu.memory_space<vmem>>, vector<128x128xf32>
    tpu.vector_store %arg8[%c0_6, %c0_7], %7 {strides = array<i32>} : memref<128x128xf32, #tpu.memory_space<vmem>>, vector<128x128xf32>,
    %c4_i32 = arith.constant 4 : i32
    %9 = arith.cmpi eq, %arg2, %c4_i32 : i32
    %10 = arith.extui %9 : i1 to i32
    %c0_i32_8 = arith.constant 0 : i32
    %11 = arith.cmpi ne, %10, %c0_i32_8 : i32
    scf.if %11 {
      %c0_9 = arith.constant 0 : index
      %c0_10 = arith.constant 0 : index
      %12 = vector.load %arg8[%c0_9, %c0_10] : memref<128x128xf32, #tpu.memory_space<vmem>>, vector<128x128xf32>
      %c0_11 = arith.constant 0 : index
      %c0_12 = arith.constant 0 : index
      %13 = vector.load %arg5[%c0_11, %c0_12] : memref<1x128xf32, #tpu.memory_space<vmem>>, vector<1x128xf32>
      %14 = vector.broadcast %13 : vector<1x128xf32> to vector<128x128xf32>
      %15 = arith.addf %12, %14 : vector<128x128xf32>
      %c0_13 = arith.constant 0 : index
      %c0_14 = arith.constant 0 : index
      %16 = vector.load %arg6[%c0_13, %c0_14] : memref<128x128xbf16, #tpu.memory_space<vmem>>, vector<128x128xbf16>
      %17 = arith.extf %16 : vector<128x128xbf16> to vector<128x128xf32>
      %18 = arith.addf %15, %17 : vector<128x128xf32>
      %cst_15 = arith.constant 0.000000e+00 : f32
      %19 = vector.broadcast %cst_15 : f32 to vector<128x128xf32>
      %20 = arith.maximumf %18, %19 : vector<128x128xf32>
      %21 = arith.truncf %20 : vector<128x128xf32> to vector<128x128xbf16>
      %c0_16 = arith.constant 0 : index
      %c0_17 = arith.constant 0 : index
      %22 = vector.load %arg7[%c0_16, %c0_17] : memref<128x128xbf16, #tpu.memory_space<vmem>>, vector<128x128xbf16>
      tpu.vector_store %arg7[%c0_16, %c0_17], %21 {strides = array<i32>} : memref<128x128xbf16, #tpu.memory_space<vmem>>, vector<128x128xbf16>,
    } else {
    }
    return
  }
  func.func @transform_0(%arg0: i32, %arg1: i32, %arg2: i32) -> (i32, i32) {
    %c0_i32 = arith.constant 0 : i32
    return %arg0, %arg2 : i32, i32
  }
  func.func @transform_1(%arg0: i32, %arg1: i32, %arg2: i32) -> (i32, i32) {
    %c0_i32 = arith.constant 0 : i32
    return %arg2, %arg1 : i32, i32
  }
  func.func @transform_2(%arg0: i32, %arg1: i32, %arg2: i32) -> (i32, i32) {
    %c0_i32 = arith.constant 0 : i32
    %c0_i32_0 = arith.constant 0 : i32
    return %c0_i32, %arg1 : i32, i32
  }
  func.func @transform_3(%arg0: i32, %arg1: i32, %arg2: i32) -> (i32, i32) {
    %c0_i32 = arith.constant 0 : i32
    return %arg0, %arg1 : i32, i32
  }
  func.func @transform_4(%arg0: i32, %arg1: i32, %arg2: i32) -> (i32, i32) {
    %c0_i32 = arith.constant 0 : i32
    return %arg0, %arg1 : i32, i32
  }
}

module attributes {stable_mosaic.version = 11 : i64} {
  func.func @_mm_bn_kernel(%arg0: i32, %arg1: i32, %arg2: i32, %arg3: memref<32x128xbf16, #tpu.memory_space<vmem>>, %arg4: memref<128x128xbf16, #tpu.memory_space<vmem>>, %arg5: memref<1x128xf32, #tpu.memory_space<vmem>>, %arg6: memref<32x128xbf16, #tpu.memory_space<vmem>>, %arg7: memref<32x128xf32, #tpu.memory_space<vmem>>) attributes {dimension_semantics = [#tpu.dimension_semantics<parallel>, #tpu.dimension_semantics<parallel>, #tpu.dimension_semantics<arbitrary>], iteration_bounds = array<i64: 1, 1, 5>, scalar_prefetch = 0 : i64, scratch_operands = 1 : i64, tpu.core_type = #tpu.core_type<tc>, window_params = [{transform_indices = @transform_0, window_bounds = array<i64: 32, 128>}, {transform_indices = @transform_1, window_bounds = array<i64: 128, 128>}, {transform_indices = @transform_2, window_bounds = array<i64: 1, 128>}, {transform_indices = @transform_3, window_bounds = array<i64: 32, 128>}]} {
    %c0_i32 = arith.constant 0 : i32
    %0 = arith.cmpi eq, %arg2, %c0_i32 : i32
    %1 = arith.extui %0 : i1 to i32
    %c0_i32_0 = arith.constant 0 : i32
    %2 = arith.cmpi ne, %1, %c0_i32_0 : i32
    scf.if %2 {
      %cst_9 = arith.constant 0.000000e+00 : f32
      %12 = vector.broadcast %cst_9 : f32 to vector<32x128xf32>
      %c0_10 = arith.constant 0 : index
      %c0_11 = arith.constant 0 : index
      %13 = vector.load %arg7[%c0_10, %c0_11] : memref<32x128xf32, #tpu.memory_space<vmem>>, vector<32x128xf32>
      tpu.vector_store %arg7[%c0_10, %c0_11], %12 {strides = array<i32>} : memref<32x128xf32, #tpu.memory_space<vmem>>, vector<32x128xf32>,
    } else {
    }
    %c0 = arith.constant 0 : index
    %c0_1 = arith.constant 0 : index
    %3 = vector.load %arg7[%c0, %c0_1] : memref<32x128xf32, #tpu.memory_space<vmem>>, vector<32x128xf32>
    %c0_2 = arith.constant 0 : index
    %c0_3 = arith.constant 0 : index
    %4 = vector.load %arg3[%c0_2, %c0_3] : memref<32x128xbf16, #tpu.memory_space<vmem>>, vector<32x128xbf16>
    %c0_4 = arith.constant 0 : index
    %c0_5 = arith.constant 0 : index
    %5 = vector.load %arg4[%c0_4, %c0_5] : memref<128x128xbf16, #tpu.memory_space<vmem>>, vector<128x128xbf16>
    %cst = arith.constant dense<0.000000e+00> : vector<32x128xf32>
    %6 = tpu.matmul %4, %5, %cst {dimension_numbers = #tpu.dot_dimension_numbers<[1], [0], [0], [1], [0, 0, 1, 1], [], []>} : vector<32x128xbf16>, vector<128x128xbf16>, vector<32x128xf32> -> vector<32x128xf32>
    %7 = arith.addf %3, %6 : vector<32x128xf32>
    %c0_6 = arith.constant 0 : index
    %c0_7 = arith.constant 0 : index
    %8 = vector.load %arg7[%c0_6, %c0_7] : memref<32x128xf32, #tpu.memory_space<vmem>>, vector<32x128xf32>
    tpu.vector_store %arg7[%c0_6, %c0_7], %7 {strides = array<i32>} : memref<32x128xf32, #tpu.memory_space<vmem>>, vector<32x128xf32>,
    %c4_i32 = arith.constant 4 : i32
    %9 = arith.cmpi eq, %arg2, %c4_i32 : i32
    %10 = arith.extui %9 : i1 to i32
    %c0_i32_8 = arith.constant 0 : i32
    %11 = arith.cmpi ne, %10, %c0_i32_8 : i32
    scf.if %11 {
      %c0_9 = arith.constant 0 : index
      %c0_10 = arith.constant 0 : index
      %12 = vector.load %arg7[%c0_9, %c0_10] : memref<32x128xf32, #tpu.memory_space<vmem>>, vector<32x128xf32>
      %c0_11 = arith.constant 0 : index
      %c0_12 = arith.constant 0 : index
      %13 = vector.load %arg5[%c0_11, %c0_12] : memref<1x128xf32, #tpu.memory_space<vmem>>, vector<1x128xf32>
      %14 = vector.broadcast %13 : vector<1x128xf32> to vector<32x128xf32>
      %15 = arith.addf %12, %14 : vector<32x128xf32>
      %cst_13 = arith.constant 0.000000e+00 : f32
      %16 = vector.broadcast %cst_13 : f32 to vector<32x128xf32>
      %17 = arith.maximumf %15, %16 : vector<32x128xf32>
      %18 = arith.truncf %17 : vector<32x128xf32> to vector<32x128xbf16>
      %c0_14 = arith.constant 0 : index
      %c0_15 = arith.constant 0 : index
      %19 = vector.load %arg6[%c0_14, %c0_15] : memref<32x128xbf16, #tpu.memory_space<vmem>>, vector<32x128xbf16>
      tpu.vector_store %arg6[%c0_14, %c0_15], %18 {strides = array<i32>} : memref<32x128xbf16, #tpu.memory_space<vmem>>, vector<32x128xbf16>,
    } else {
    }
    return
  }
  func.func @transform_0(%arg0: i32, %arg1: i32, %arg2: i32) -> (i32, i32) {
    %c0_i32 = arith.constant 0 : i32
    return %arg0, %arg2 : i32, i32
  }
  func.func @transform_1(%arg0: i32, %arg1: i32, %arg2: i32) -> (i32, i32) {
    %c0_i32 = arith.constant 0 : i32
    return %arg2, %arg1 : i32, i32
  }
  func.func @transform_2(%arg0: i32, %arg1: i32, %arg2: i32) -> (i32, i32) {
    %c0_i32 = arith.constant 0 : i32
    %c0_i32_0 = arith.constant 0 : i32
    return %c0_i32, %arg1 : i32, i32
  }
  func.func @transform_3(%arg0: i32, %arg1: i32, %arg2: i32) -> (i32, i32) {
    %c0_i32 = arith.constant 0 : i32
    return %arg0, %arg1 : i32, i32
  }
}

module attributes {stable_mosaic.version = 11 : i64} {
  func.func @_mm_bn_kernel(%arg0: i32, %arg1: i32, %arg2: i32, %arg3: memref<32x128xbf16, #tpu.memory_space<vmem>>, %arg4: memref<128x128xbf16, #tpu.memory_space<vmem>>, %arg5: memref<1x128xf32, #tpu.memory_space<vmem>>, %arg6: memref<32x128xbf16, #tpu.memory_space<vmem>>, %arg7: memref<32x128xf32, #tpu.memory_space<vmem>>) attributes {dimension_semantics = [#tpu.dimension_semantics<parallel>, #tpu.dimension_semantics<parallel>, #tpu.dimension_semantics<arbitrary>], iteration_bounds = array<i64: 1, 1, 1>, scalar_prefetch = 0 : i64, scratch_operands = 1 : i64, tpu.core_type = #tpu.core_type<tc>, window_params = [{transform_indices = @transform_0, window_bounds = array<i64: 32, 128>}, {transform_indices = @transform_1, window_bounds = array<i64: 128, 128>}, {transform_indices = @transform_2, window_bounds = array<i64: 1, 128>}, {transform_indices = @transform_3, window_bounds = array<i64: 32, 128>}]} {
    %c0_i32 = arith.constant 0 : i32
    %0 = arith.cmpi eq, %arg2, %c0_i32 : i32
    %1 = arith.extui %0 : i1 to i32
    %c0_i32_0 = arith.constant 0 : i32
    %2 = arith.cmpi ne, %1, %c0_i32_0 : i32
    scf.if %2 {
      %cst_10 = arith.constant 0.000000e+00 : f32
      %12 = vector.broadcast %cst_10 : f32 to vector<32x128xf32>
      %c0_11 = arith.constant 0 : index
      %c0_12 = arith.constant 0 : index
      %13 = vector.load %arg7[%c0_11, %c0_12] : memref<32x128xf32, #tpu.memory_space<vmem>>, vector<32x128xf32>
      tpu.vector_store %arg7[%c0_11, %c0_12], %12 {strides = array<i32>} : memref<32x128xf32, #tpu.memory_space<vmem>>, vector<32x128xf32>,
    } else {
    }
    %c0 = arith.constant 0 : index
    %c0_1 = arith.constant 0 : index
    %3 = vector.load %arg7[%c0, %c0_1] : memref<32x128xf32, #tpu.memory_space<vmem>>, vector<32x128xf32>
    %c0_2 = arith.constant 0 : index
    %c0_3 = arith.constant 0 : index
    %4 = vector.load %arg3[%c0_2, %c0_3] : memref<32x128xbf16, #tpu.memory_space<vmem>>, vector<32x128xbf16>
    %c0_4 = arith.constant 0 : index
    %c0_5 = arith.constant 0 : index
    %5 = vector.load %arg4[%c0_4, %c0_5] : memref<128x128xbf16, #tpu.memory_space<vmem>>, vector<128x128xbf16>
    %cst = arith.constant dense<0.000000e+00> : vector<32x128xf32>
    %6 = tpu.matmul %4, %5, %cst {dimension_numbers = #tpu.dot_dimension_numbers<[1], [0], [0], [1], [0, 0, 1, 1], [], []>} : vector<32x128xbf16>, vector<128x128xbf16>, vector<32x128xf32> -> vector<32x128xf32>
    %7 = arith.addf %3, %6 : vector<32x128xf32>
    %c0_6 = arith.constant 0 : index
    %c0_7 = arith.constant 0 : index
    %8 = vector.load %arg7[%c0_6, %c0_7] : memref<32x128xf32, #tpu.memory_space<vmem>>, vector<32x128xf32>
    tpu.vector_store %arg7[%c0_6, %c0_7], %7 {strides = array<i32>} : memref<32x128xf32, #tpu.memory_space<vmem>>, vector<32x128xf32>,
    %c0_i32_8 = arith.constant 0 : i32
    %9 = arith.cmpi eq, %arg2, %c0_i32_8 : i32
    %10 = arith.extui %9 : i1 to i32
    %c0_i32_9 = arith.constant 0 : i32
    %11 = arith.cmpi ne, %10, %c0_i32_9 : i32
    scf.if %11 {
      %c0_10 = arith.constant 0 : index
      %c0_11 = arith.constant 0 : index
      %12 = vector.load %arg7[%c0_10, %c0_11] : memref<32x128xf32, #tpu.memory_space<vmem>>, vector<32x128xf32>
      %c0_12 = arith.constant 0 : index
      %c0_13 = arith.constant 0 : index
      %13 = vector.load %arg5[%c0_12, %c0_13] : memref<1x128xf32, #tpu.memory_space<vmem>>, vector<1x128xf32>
      %14 = vector.broadcast %13 : vector<1x128xf32> to vector<32x128xf32>
      %15 = arith.addf %12, %14 : vector<32x128xf32>
      %16 = arith.truncf %15 : vector<32x128xf32> to vector<32x128xbf16>
      %c0_14 = arith.constant 0 : index
      %c0_15 = arith.constant 0 : index
      %17 = vector.load %arg6[%c0_14, %c0_15] : memref<32x128xbf16, #tpu.memory_space<vmem>>, vector<32x128xbf16>
      tpu.vector_store %arg6[%c0_14, %c0_15], %16 {strides = array<i32>} : memref<32x128xbf16, #tpu.memory_space<vmem>>, vector<32x128xbf16>,
    } else {
    }
    return
  }
  func.func @transform_0(%arg0: i32, %arg1: i32, %arg2: i32) -> (i32, i32) {
    %c0_i32 = arith.constant 0 : i32
    return %arg0, %arg2 : i32, i32
  }
  func.func @transform_1(%arg0: i32, %arg1: i32, %arg2: i32) -> (i32, i32) {
    %c0_i32 = arith.constant 0 : i32
    return %arg2, %arg1 : i32, i32
  }
  func.func @transform_2(%arg0: i32, %arg1: i32, %arg2: i32) -> (i32, i32) {
    %c0_i32 = arith.constant 0 : i32
    %c0_i32_0 = arith.constant 0 : i32
    return %c0_i32, %arg1 : i32, i32
  }
  func.func @transform_3(%arg0: i32, %arg1: i32, %arg2: i32) -> (i32, i32) {
    %c0_i32 = arith.constant 0 : i32
    return %arg0, %arg1 : i32, i32
  }
}

module attributes {stable_mosaic.version = 11 : i64} {
  func.func @_mm_bn_res_kernel(%arg0: i32, %arg1: i32, %arg2: i32, %arg3: memref<32x384xbf16, #tpu.memory_space<vmem>>, %arg4: memref<384x128xbf16, #tpu.memory_space<vmem>>, %arg5: memref<1x128xf32, #tpu.memory_space<vmem>>, %arg6: memref<32x128xbf16, #tpu.memory_space<vmem>>, %arg7: memref<32x128xbf16, #tpu.memory_space<vmem>>, %arg8: memref<32x128xf32, #tpu.memory_space<vmem>>) attributes {dimension_semantics = [#tpu.dimension_semantics<parallel>, #tpu.dimension_semantics<parallel>, #tpu.dimension_semantics<arbitrary>], iteration_bounds = array<i64: 1, 1, 3>, scalar_prefetch = 0 : i64, scratch_operands = 1 : i64, tpu.core_type = #tpu.core_type<tc>, window_params = [{transform_indices = @transform_0, window_bounds = array<i64: 32, 384>}, {transform_indices = @transform_1, window_bounds = array<i64: 384, 128>}, {transform_indices = @transform_2, window_bounds = array<i64: 1, 128>}, {transform_indices = @transform_3, window_bounds = array<i64: 32, 128>}, {transform_indices = @transform_4, window_bounds = array<i64: 32, 128>}]} {
    %c0_i32 = arith.constant 0 : i32
    %0 = arith.cmpi eq, %arg2, %c0_i32 : i32
    %1 = arith.extui %0 : i1 to i32
    %c0_i32_0 = arith.constant 0 : i32
    %2 = arith.cmpi ne, %1, %c0_i32_0 : i32
    scf.if %2 {
      %cst_9 = arith.constant 0.000000e+00 : f32
      %12 = vector.broadcast %cst_9 : f32 to vector<32x128xf32>
      %c0_10 = arith.constant 0 : index
      %c0_11 = arith.constant 0 : index
      %13 = vector.load %arg8[%c0_10, %c0_11] : memref<32x128xf32, #tpu.memory_space<vmem>>, vector<32x128xf32>
      tpu.vector_store %arg8[%c0_10, %c0_11], %12 {strides = array<i32>} : memref<32x128xf32, #tpu.memory_space<vmem>>, vector<32x128xf32>,
    } else {
    }
    %c0 = arith.constant 0 : index
    %c0_1 = arith.constant 0 : index
    %3 = vector.load %arg8[%c0, %c0_1] : memref<32x128xf32, #tpu.memory_space<vmem>>, vector<32x128xf32>
    %c0_2 = arith.constant 0 : index
    %c0_3 = arith.constant 0 : index
    %4 = vector.load %arg3[%c0_2, %c0_3] : memref<32x384xbf16, #tpu.memory_space<vmem>>, vector<32x384xbf16>
    %c0_4 = arith.constant 0 : index
    %c0_5 = arith.constant 0 : index
    %5 = vector.load %arg4[%c0_4, %c0_5] : memref<384x128xbf16, #tpu.memory_space<vmem>>, vector<384x128xbf16>
    %cst = arith.constant dense<0.000000e+00> : vector<32x128xf32>
    %6 = tpu.matmul %4, %5, %cst {dimension_numbers = #tpu.dot_dimension_numbers<[1], [0], [0], [1], [0, 0, 1, 1], [], []>} : vector<32x384xbf16>, vector<384x128xbf16>, vector<32x128xf32> -> vector<32x128xf32>
    %7 = arith.addf %3, %6 : vector<32x128xf32>
    %c0_6 = arith.constant 0 : index
    %c0_7 = arith.constant 0 : index
    %8 = vector.load %arg8[%c0_6, %c0_7] : memref<32x128xf32, #tpu.memory_space<vmem>>, vector<32x128xf32>
    tpu.vector_store %arg8[%c0_6, %c0_7], %7 {strides = array<i32>} : memref<32x128xf32, #tpu.memory_space<vmem>>, vector<32x128xf32>,
    %c2_i32 = arith.constant 2 : i32
    %9 = arith.cmpi eq, %arg2, %c2_i32 : i32
    %10 = arith.extui %9 : i1 to i32
    %c0_i32_8 = arith.constant 0 : i32
    %11 = arith.cmpi ne, %10, %c0_i32_8 : i32
    scf.if %11 {
      %c0_9 = arith.constant 0 : index
      %c0_10 = arith.constant 0 : index
      %12 = vector.load %arg8[%c0_9, %c0_10] : memref<32x128xf32, #tpu.memory_space<vmem>>, vector<32x128xf32>
      %c0_11 = arith.constant 0 : index
      %c0_12 = arith.constant 0 : index
      %13 = vector.load %arg5[%c0_11, %c0_12] : memref<1x128xf32, #tpu.memory_space<vmem>>, vector<1x128xf32>
      %14 = vector.broadcast %13 : vector<1x128xf32> to vector<32x128xf32>
      %15 = arith.addf %12, %14 : vector<32x128xf32>
      %c0_13 = arith.constant 0 : index
      %c0_14 = arith.constant 0 : index
      %16 = vector.load %arg6[%c0_13, %c0_14] : memref<32x128xbf16, #tpu.memory_space<vmem>>, vector<32x128xbf16>
      %17 = arith.extf %16 : vector<32x128xbf16> to vector<32x128xf32>
      %18 = arith.addf %15, %17 : vector<32x128xf32>
      %cst_15 = arith.constant 0.000000e+00 : f32
      %19 = vector.broadcast %cst_15 : f32 to vector<32x128xf32>
      %20 = arith.maximumf %18, %19 : vector<32x128xf32>
      %21 = arith.truncf %20 : vector<32x128xf32> to vector<32x128xbf16>
      %c0_16 = arith.constant 0 : index
      %c0_17 = arith.constant 0 : index
      %22 = vector.load %arg7[%c0_16, %c0_17] : memref<32x128xbf16, #tpu.memory_space<vmem>>, vector<32x128xbf16>
      tpu.vector_store %arg7[%c0_16, %c0_17], %21 {strides = array<i32>} : memref<32x128xbf16, #tpu.memory_space<vmem>>, vector<32x128xbf16>,
    } else {
    }
    return
  }
  func.func @transform_0(%arg0: i32, %arg1: i32, %arg2: i32) -> (i32, i32) {
    %c0_i32 = arith.constant 0 : i32
    return %arg0, %arg2 : i32, i32
  }
  func.func @transform_1(%arg0: i32, %arg1: i32, %arg2: i32) -> (i32, i32) {
    %c0_i32 = arith.constant 0 : i32
    return %arg2, %arg1 : i32, i32
  }
  func.func @transform_2(%arg0: i32, %arg1: i32, %arg2: i32) -> (i32, i32) {
    %c0_i32 = arith.constant 0 : i32
    %c0_i32_0 = arith.constant 0 : i32
    return %c0_i32, %arg1 : i32, i32
  }
  func.func @transform_3(%arg0: i32, %arg1: i32, %arg2: i32) -> (i32, i32) {
    %c0_i32 = arith.constant 0 : i32
    return %arg0, %arg1 : i32, i32
  }
  func.func @transform_4(%arg0: i32, %arg1: i32, %arg2: i32) -> (i32, i32) {
    %c0_i32 = arith.constant 0 : i32
    return %arg0, %arg1 : i32, i32
  }
}

module attributes {stable_mosaic.version = 11 : i64} {
  func.func @_mm_bn_kernel(%arg0: i32, %arg1: i32, %arg2: i32, %arg3: memref<32x384xbf16, #tpu.memory_space<vmem>>, %arg4: memref<384x128xbf16, #tpu.memory_space<vmem>>, %arg5: memref<1x128xf32, #tpu.memory_space<vmem>>, %arg6: memref<32x128xbf16, #tpu.memory_space<vmem>>, %arg7: memref<32x128xf32, #tpu.memory_space<vmem>>) attributes {dimension_semantics = [#tpu.dimension_semantics<parallel>, #tpu.dimension_semantics<parallel>, #tpu.dimension_semantics<arbitrary>], iteration_bounds = array<i64: 1, 1, 3>, scalar_prefetch = 0 : i64, scratch_operands = 1 : i64, tpu.core_type = #tpu.core_type<tc>, window_params = [{transform_indices = @transform_0, window_bounds = array<i64: 32, 384>}, {transform_indices = @transform_1, window_bounds = array<i64: 384, 128>}, {transform_indices = @transform_2, window_bounds = array<i64: 1, 128>}, {transform_indices = @transform_3, window_bounds = array<i64: 32, 128>}]} {
    %c0_i32 = arith.constant 0 : i32
    %0 = arith.cmpi eq, %arg2, %c0_i32 : i32
    %1 = arith.extui %0 : i1 to i32
    %c0_i32_0 = arith.constant 0 : i32
    %2 = arith.cmpi ne, %1, %c0_i32_0 : i32
    scf.if %2 {
      %cst_9 = arith.constant 0.000000e+00 : f32
      %12 = vector.broadcast %cst_9 : f32 to vector<32x128xf32>
      %c0_10 = arith.constant 0 : index
      %c0_11 = arith.constant 0 : index
      %13 = vector.load %arg7[%c0_10, %c0_11] : memref<32x128xf32, #tpu.memory_space<vmem>>, vector<32x128xf32>
      tpu.vector_store %arg7[%c0_10, %c0_11], %12 {strides = array<i32>} : memref<32x128xf32, #tpu.memory_space<vmem>>, vector<32x128xf32>,
    } else {
    }
    %c0 = arith.constant 0 : index
    %c0_1 = arith.constant 0 : index
    %3 = vector.load %arg7[%c0, %c0_1] : memref<32x128xf32, #tpu.memory_space<vmem>>, vector<32x128xf32>
    %c0_2 = arith.constant 0 : index
    %c0_3 = arith.constant 0 : index
    %4 = vector.load %arg3[%c0_2, %c0_3] : memref<32x384xbf16, #tpu.memory_space<vmem>>, vector<32x384xbf16>
    %c0_4 = arith.constant 0 : index
    %c0_5 = arith.constant 0 : index
    %5 = vector.load %arg4[%c0_4, %c0_5] : memref<384x128xbf16, #tpu.memory_space<vmem>>, vector<384x128xbf16>
    %cst = arith.constant dense<0.000000e+00> : vector<32x128xf32>
    %6 = tpu.matmul %4, %5, %cst {dimension_numbers = #tpu.dot_dimension_numbers<[1], [0], [0], [1], [0, 0, 1, 1], [], []>} : vector<32x384xbf16>, vector<384x128xbf16>, vector<32x128xf32> -> vector<32x128xf32>
    %7 = arith.addf %3, %6 : vector<32x128xf32>
    %c0_6 = arith.constant 0 : index
    %c0_7 = arith.constant 0 : index
    %8 = vector.load %arg7[%c0_6, %c0_7] : memref<32x128xf32, #tpu.memory_space<vmem>>, vector<32x128xf32>
    tpu.vector_store %arg7[%c0_6, %c0_7], %7 {strides = array<i32>} : memref<32x128xf32, #tpu.memory_space<vmem>>, vector<32x128xf32>,
    %c2_i32 = arith.constant 2 : i32
    %9 = arith.cmpi eq, %arg2, %c2_i32 : i32
    %10 = arith.extui %9 : i1 to i32
    %c0_i32_8 = arith.constant 0 : i32
    %11 = arith.cmpi ne, %10, %c0_i32_8 : i32
    scf.if %11 {
      %c0_9 = arith.constant 0 : index
      %c0_10 = arith.constant 0 : index
      %12 = vector.load %arg7[%c0_9, %c0_10] : memref<32x128xf32, #tpu.memory_space<vmem>>, vector<32x128xf32>
      %c0_11 = arith.constant 0 : index
      %c0_12 = arith.constant 0 : index
      %13 = vector.load %arg5[%c0_11, %c0_12] : memref<1x128xf32, #tpu.memory_space<vmem>>, vector<1x128xf32>
      %14 = vector.broadcast %13 : vector<1x128xf32> to vector<32x128xf32>
      %15 = arith.addf %12, %14 : vector<32x128xf32>
      %cst_13 = arith.constant 0.000000e+00 : f32
      %16 = vector.broadcast %cst_13 : f32 to vector<32x128xf32>
      %17 = arith.maximumf %15, %16 : vector<32x128xf32>
      %18 = arith.truncf %17 : vector<32x128xf32> to vector<32x128xbf16>
      %c0_14 = arith.constant 0 : index
      %c0_15 = arith.constant 0 : index
      %19 = vector.load %arg6[%c0_14, %c0_15] : memref<32x128xbf16, #tpu.memory_space<vmem>>, vector<32x128xbf16>
      tpu.vector_store %arg6[%c0_14, %c0_15], %18 {strides = array<i32>} : memref<32x128xbf16, #tpu.memory_space<vmem>>, vector<32x128xbf16>,
    } else {
    }
    return
  }
  func.func @transform_0(%arg0: i32, %arg1: i32, %arg2: i32) -> (i32, i32) {
    %c0_i32 = arith.constant 0 : i32
    return %arg0, %arg2 : i32, i32
  }
  func.func @transform_1(%arg0: i32, %arg1: i32, %arg2: i32) -> (i32, i32) {
    %c0_i32 = arith.constant 0 : i32
    return %arg2, %arg1 : i32, i32
  }
  func.func @transform_2(%arg0: i32, %arg1: i32, %arg2: i32) -> (i32, i32) {
    %c0_i32 = arith.constant 0 : i32
    %c0_i32_0 = arith.constant 0 : i32
    return %c0_i32, %arg1 : i32, i32
  }
  func.func @transform_3(%arg0: i32, %arg1: i32, %arg2: i32) -> (i32, i32) {
    %c0_i32 = arith.constant 0 : i32
    return %arg0, %arg1 : i32, i32
  }
}

module attributes {stable_mosaic.version = 11 : i64} {
  func.func @_mm_bn_kernel(%arg0: i32, %arg1: i32, %arg2: i32, %arg3: memref<8x384xbf16, #tpu.memory_space<vmem>>, %arg4: memref<384x256xbf16, #tpu.memory_space<vmem>>, %arg5: memref<1x256xf32, #tpu.memory_space<vmem>>, %arg6: memref<8x256xbf16, #tpu.memory_space<vmem>>, %arg7: memref<8x256xf32, #tpu.memory_space<vmem>>) attributes {dimension_semantics = [#tpu.dimension_semantics<parallel>, #tpu.dimension_semantics<parallel>, #tpu.dimension_semantics<arbitrary>], iteration_bounds = array<i64: 1, 1, 3>, scalar_prefetch = 0 : i64, scratch_operands = 1 : i64, tpu.core_type = #tpu.core_type<tc>, window_params = [{transform_indices = @transform_0, window_bounds = array<i64: 8, 384>}, {transform_indices = @transform_1, window_bounds = array<i64: 384, 256>}, {transform_indices = @transform_2, window_bounds = array<i64: 1, 256>}, {transform_indices = @transform_3, window_bounds = array<i64: 8, 256>}]} {
    %c0_i32 = arith.constant 0 : i32
    %0 = arith.cmpi eq, %arg2, %c0_i32 : i32
    %1 = arith.extui %0 : i1 to i32
    %c0_i32_0 = arith.constant 0 : i32
    %2 = arith.cmpi ne, %1, %c0_i32_0 : i32
    scf.if %2 {
      %cst_9 = arith.constant 0.000000e+00 : f32
      %12 = vector.broadcast %cst_9 : f32 to vector<8x256xf32>
      %c0_10 = arith.constant 0 : index
      %c0_11 = arith.constant 0 : index
      %13 = vector.load %arg7[%c0_10, %c0_11] : memref<8x256xf32, #tpu.memory_space<vmem>>, vector<8x256xf32>
      tpu.vector_store %arg7[%c0_10, %c0_11], %12 {strides = array<i32>} : memref<8x256xf32, #tpu.memory_space<vmem>>, vector<8x256xf32>,
    } else {
    }
    %c0 = arith.constant 0 : index
    %c0_1 = arith.constant 0 : index
    %3 = vector.load %arg7[%c0, %c0_1] : memref<8x256xf32, #tpu.memory_space<vmem>>, vector<8x256xf32>
    %c0_2 = arith.constant 0 : index
    %c0_3 = arith.constant 0 : index
    %4 = vector.load %arg3[%c0_2, %c0_3] : memref<8x384xbf16, #tpu.memory_space<vmem>>, vector<8x384xbf16>
    %c0_4 = arith.constant 0 : index
    %c0_5 = arith.constant 0 : index
    %5 = vector.load %arg4[%c0_4, %c0_5] : memref<384x256xbf16, #tpu.memory_space<vmem>>, vector<384x256xbf16>
    %cst = arith.constant dense<0.000000e+00> : vector<8x256xf32>
    %6 = tpu.matmul %4, %5, %cst {dimension_numbers = #tpu.dot_dimension_numbers<[1], [0], [0], [1], [0, 0, 1, 1], [], []>} : vector<8x384xbf16>, vector<384x256xbf16>, vector<8x256xf32> -> vector<8x256xf32>
    %7 = arith.addf %3, %6 : vector<8x256xf32>
    %c0_6 = arith.constant 0 : index
    %c0_7 = arith.constant 0 : index
    %8 = vector.load %arg7[%c0_6, %c0_7] : memref<8x256xf32, #tpu.memory_space<vmem>>, vector<8x256xf32>
    tpu.vector_store %arg7[%c0_6, %c0_7], %7 {strides = array<i32>} : memref<8x256xf32, #tpu.memory_space<vmem>>, vector<8x256xf32>,
    %c2_i32 = arith.constant 2 : i32
    %9 = arith.cmpi eq, %arg2, %c2_i32 : i32
    %10 = arith.extui %9 : i1 to i32
    %c0_i32_8 = arith.constant 0 : i32
    %11 = arith.cmpi ne, %10, %c0_i32_8 : i32
    scf.if %11 {
      %c0_9 = arith.constant 0 : index
      %c0_10 = arith.constant 0 : index
      %12 = vector.load %arg7[%c0_9, %c0_10] : memref<8x256xf32, #tpu.memory_space<vmem>>, vector<8x256xf32>
      %c0_11 = arith.constant 0 : index
      %c0_12 = arith.constant 0 : index
      %13 = vector.load %arg5[%c0_11, %c0_12] : memref<1x256xf32, #tpu.memory_space<vmem>>, vector<1x256xf32>
      %14 = vector.broadcast %13 : vector<1x256xf32> to vector<8x256xf32>
      %15 = arith.addf %12, %14 : vector<8x256xf32>
      %cst_13 = arith.constant 0.000000e+00 : f32
      %16 = vector.broadcast %cst_13 : f32 to vector<8x256xf32>
      %17 = arith.maximumf %15, %16 : vector<8x256xf32>
      %18 = arith.truncf %17 : vector<8x256xf32> to vector<8x256xbf16>
      %c0_14 = arith.constant 0 : index
      %c0_15 = arith.constant 0 : index
      %19 = vector.load %arg6[%c0_14, %c0_15] : memref<8x256xbf16, #tpu.memory_space<vmem>>, vector<8x256xbf16>
      tpu.vector_store %arg6[%c0_14, %c0_15], %18 {strides = array<i32>} : memref<8x256xbf16, #tpu.memory_space<vmem>>, vector<8x256xbf16>,
    } else {
    }
    return
  }
  func.func @transform_0(%arg0: i32, %arg1: i32, %arg2: i32) -> (i32, i32) {
    %c0_i32 = arith.constant 0 : i32
    return %arg0, %arg2 : i32, i32
  }
  func.func @transform_1(%arg0: i32, %arg1: i32, %arg2: i32) -> (i32, i32) {
    %c0_i32 = arith.constant 0 : i32
    return %arg2, %arg1 : i32, i32
  }
  func.func @transform_2(%arg0: i32, %arg1: i32, %arg2: i32) -> (i32, i32) {
    %c0_i32 = arith.constant 0 : i32
    %c0_i32_0 = arith.constant 0 : i32
    return %c0_i32, %arg1 : i32, i32
  }
  func.func @transform_3(%arg0: i32, %arg1: i32, %arg2: i32) -> (i32, i32) {
    %c0_i32 = arith.constant 0 : i32
    return %arg0, %arg1 : i32, i32
  }
}

module attributes {stable_mosaic.version = 11 : i64} {
  func.func @_mm_bn_kernel(%arg0: i32, %arg1: i32, %arg2: i32, %arg3: memref<8x128xbf16, #tpu.memory_space<vmem>>, %arg4: memref<128x256xbf16, #tpu.memory_space<vmem>>, %arg5: memref<1x256xf32, #tpu.memory_space<vmem>>, %arg6: memref<8x256xbf16, #tpu.memory_space<vmem>>, %arg7: memref<8x256xf32, #tpu.memory_space<vmem>>) attributes {dimension_semantics = [#tpu.dimension_semantics<parallel>, #tpu.dimension_semantics<parallel>, #tpu.dimension_semantics<arbitrary>], iteration_bounds = array<i64: 1, 1, 1>, scalar_prefetch = 0 : i64, scratch_operands = 1 : i64, tpu.core_type = #tpu.core_type<tc>, window_params = [{transform_indices = @transform_0, window_bounds = array<i64: 8, 128>}, {transform_indices = @transform_1, window_bounds = array<i64: 128, 256>}, {transform_indices = @transform_2, window_bounds = array<i64: 1, 256>}, {transform_indices = @transform_3, window_bounds = array<i64: 8, 256>}]} {
    %c0_i32 = arith.constant 0 : i32
    %0 = arith.cmpi eq, %arg2, %c0_i32 : i32
    %1 = arith.extui %0 : i1 to i32
    %c0_i32_0 = arith.constant 0 : i32
    %2 = arith.cmpi ne, %1, %c0_i32_0 : i32
    scf.if %2 {
      %cst_10 = arith.constant 0.000000e+00 : f32
      %12 = vector.broadcast %cst_10 : f32 to vector<8x256xf32>
      %c0_11 = arith.constant 0 : index
      %c0_12 = arith.constant 0 : index
      %13 = vector.load %arg7[%c0_11, %c0_12] : memref<8x256xf32, #tpu.memory_space<vmem>>, vector<8x256xf32>
      tpu.vector_store %arg7[%c0_11, %c0_12], %12 {strides = array<i32>} : memref<8x256xf32, #tpu.memory_space<vmem>>, vector<8x256xf32>,
    } else {
    }
    %c0 = arith.constant 0 : index
    %c0_1 = arith.constant 0 : index
    %3 = vector.load %arg7[%c0, %c0_1] : memref<8x256xf32, #tpu.memory_space<vmem>>, vector<8x256xf32>
    %c0_2 = arith.constant 0 : index
    %c0_3 = arith.constant 0 : index
    %4 = vector.load %arg3[%c0_2, %c0_3] : memref<8x128xbf16, #tpu.memory_space<vmem>>, vector<8x128xbf16>
    %c0_4 = arith.constant 0 : index
    %c0_5 = arith.constant 0 : index
    %5 = vector.load %arg4[%c0_4, %c0_5] : memref<128x256xbf16, #tpu.memory_space<vmem>>, vector<128x256xbf16>
    %cst = arith.constant dense<0.000000e+00> : vector<8x256xf32>
    %6 = tpu.matmul %4, %5, %cst {dimension_numbers = #tpu.dot_dimension_numbers<[1], [0], [0], [1], [0, 0, 1, 1], [], []>} : vector<8x128xbf16>, vector<128x256xbf16>, vector<8x256xf32> -> vector<8x256xf32>
    %7 = arith.addf %3, %6 : vector<8x256xf32>
    %c0_6 = arith.constant 0 : index
    %c0_7 = arith.constant 0 : index
    %8 = vector.load %arg7[%c0_6, %c0_7] : memref<8x256xf32, #tpu.memory_space<vmem>>, vector<8x256xf32>
    tpu.vector_store %arg7[%c0_6, %c0_7], %7 {strides = array<i32>} : memref<8x256xf32, #tpu.memory_space<vmem>>, vector<8x256xf32>,
    %c0_i32_8 = arith.constant 0 : i32
    %9 = arith.cmpi eq, %arg2, %c0_i32_8 : i32
    %10 = arith.extui %9 : i1 to i32
    %c0_i32_9 = arith.constant 0 : i32
    %11 = arith.cmpi ne, %10, %c0_i32_9 : i32
    scf.if %11 {
      %c0_10 = arith.constant 0 : index
      %c0_11 = arith.constant 0 : index
      %12 = vector.load %arg7[%c0_10, %c0_11] : memref<8x256xf32, #tpu.memory_space<vmem>>, vector<8x256xf32>
      %c0_12 = arith.constant 0 : index
      %c0_13 = arith.constant 0 : index
      %13 = vector.load %arg5[%c0_12, %c0_13] : memref<1x256xf32, #tpu.memory_space<vmem>>, vector<1x256xf32>
      %14 = vector.broadcast %13 : vector<1x256xf32> to vector<8x256xf32>
      %15 = arith.addf %12, %14 : vector<8x256xf32>
      %16 = arith.truncf %15 : vector<8x256xf32> to vector<8x256xbf16>
      %c0_14 = arith.constant 0 : index
      %c0_15 = arith.constant 0 : index
      %17 = vector.load %arg6[%c0_14, %c0_15] : memref<8x256xbf16, #tpu.memory_space<vmem>>, vector<8x256xbf16>
      tpu.vector_store %arg6[%c0_14, %c0_15], %16 {strides = array<i32>} : memref<8x256xbf16, #tpu.memory_space<vmem>>, vector<8x256xbf16>,
    } else {
    }
    return
  }
  func.func @transform_0(%arg0: i32, %arg1: i32, %arg2: i32) -> (i32, i32) {
    %c0_i32 = arith.constant 0 : i32
    return %arg0, %arg2 : i32, i32
  }
  func.func @transform_1(%arg0: i32, %arg1: i32, %arg2: i32) -> (i32, i32) {
    %c0_i32 = arith.constant 0 : i32
    return %arg2, %arg1 : i32, i32
  }
  func.func @transform_2(%arg0: i32, %arg1: i32, %arg2: i32) -> (i32, i32) {
    %c0_i32 = arith.constant 0 : i32
    %c0_i32_0 = arith.constant 0 : i32
    return %c0_i32, %arg1 : i32, i32
  }
  func.func @transform_3(%arg0: i32, %arg1: i32, %arg2: i32) -> (i32, i32) {
    %c0_i32 = arith.constant 0 : i32
    return %arg0, %arg1 : i32, i32
  }
}

module attributes {stable_mosaic.version = 11 : i64} {
  func.func @_mm_bn_res_kernel(%arg0: i32, %arg1: i32, %arg2: i32, %arg3: memref<8x384xbf16, #tpu.memory_space<vmem>>, %arg4: memref<384x256xbf16, #tpu.memory_space<vmem>>, %arg5: memref<1x256xf32, #tpu.memory_space<vmem>>, %arg6: memref<8x256xbf16, #tpu.memory_space<vmem>>, %arg7: memref<8x256xbf16, #tpu.memory_space<vmem>>, %arg8: memref<8x256xf32, #tpu.memory_space<vmem>>) attributes {dimension_semantics = [#tpu.dimension_semantics<parallel>, #tpu.dimension_semantics<parallel>, #tpu.dimension_semantics<arbitrary>], iteration_bounds = array<i64: 1, 1, 6>, scalar_prefetch = 0 : i64, scratch_operands = 1 : i64, tpu.core_type = #tpu.core_type<tc>, window_params = [{transform_indices = @transform_0, window_bounds = array<i64: 8, 384>}, {transform_indices = @transform_1, window_bounds = array<i64: 384, 256>}, {transform_indices = @transform_2, window_bounds = array<i64: 1, 256>}, {transform_indices = @transform_3, window_bounds = array<i64: 8, 256>}, {transform_indices = @transform_4, window_bounds = array<i64: 8, 256>}]} {
    %c0_i32 = arith.constant 0 : i32
    %0 = arith.cmpi eq, %arg2, %c0_i32 : i32
    %1 = arith.extui %0 : i1 to i32
    %c0_i32_0 = arith.constant 0 : i32
    %2 = arith.cmpi ne, %1, %c0_i32_0 : i32
    scf.if %2 {
      %cst_9 = arith.constant 0.000000e+00 : f32
      %12 = vector.broadcast %cst_9 : f32 to vector<8x256xf32>
      %c0_10 = arith.constant 0 : index
      %c0_11 = arith.constant 0 : index
      %13 = vector.load %arg8[%c0_10, %c0_11] : memref<8x256xf32, #tpu.memory_space<vmem>>, vector<8x256xf32>
      tpu.vector_store %arg8[%c0_10, %c0_11], %12 {strides = array<i32>} : memref<8x256xf32, #tpu.memory_space<vmem>>, vector<8x256xf32>,
    } else {
    }
    %c0 = arith.constant 0 : index
    %c0_1 = arith.constant 0 : index
    %3 = vector.load %arg8[%c0, %c0_1] : memref<8x256xf32, #tpu.memory_space<vmem>>, vector<8x256xf32>
    %c0_2 = arith.constant 0 : index
    %c0_3 = arith.constant 0 : index
    %4 = vector.load %arg3[%c0_2, %c0_3] : memref<8x384xbf16, #tpu.memory_space<vmem>>, vector<8x384xbf16>
    %c0_4 = arith.constant 0 : index
    %c0_5 = arith.constant 0 : index
    %5 = vector.load %arg4[%c0_4, %c0_5] : memref<384x256xbf16, #tpu.memory_space<vmem>>, vector<384x256xbf16>
    %cst = arith.constant dense<0.000000e+00> : vector<8x256xf32>
    %6 = tpu.matmul %4, %5, %cst {dimension_numbers = #tpu.dot_dimension_numbers<[1], [0], [0], [1], [0, 0, 1, 1], [], []>} : vector<8x384xbf16>, vector<384x256xbf16>, vector<8x256xf32> -> vector<8x256xf32>
    %7 = arith.addf %3, %6 : vector<8x256xf32>
    %c0_6 = arith.constant 0 : index
    %c0_7 = arith.constant 0 : index
    %8 = vector.load %arg8[%c0_6, %c0_7] : memref<8x256xf32, #tpu.memory_space<vmem>>, vector<8x256xf32>
    tpu.vector_store %arg8[%c0_6, %c0_7], %7 {strides = array<i32>} : memref<8x256xf32, #tpu.memory_space<vmem>>, vector<8x256xf32>,
    %c5_i32 = arith.constant 5 : i32
    %9 = arith.cmpi eq, %arg2, %c5_i32 : i32
    %10 = arith.extui %9 : i1 to i32
    %c0_i32_8 = arith.constant 0 : i32
    %11 = arith.cmpi ne, %10, %c0_i32_8 : i32
    scf.if %11 {
      %c0_9 = arith.constant 0 : index
      %c0_10 = arith.constant 0 : index
      %12 = vector.load %arg8[%c0_9, %c0_10] : memref<8x256xf32, #tpu.memory_space<vmem>>, vector<8x256xf32>
      %c0_11 = arith.constant 0 : index
      %c0_12 = arith.constant 0 : index
      %13 = vector.load %arg5[%c0_11, %c0_12] : memref<1x256xf32, #tpu.memory_space<vmem>>, vector<1x256xf32>
      %14 = vector.broadcast %13 : vector<1x256xf32> to vector<8x256xf32>
      %15 = arith.addf %12, %14 : vector<8x256xf32>
      %c0_13 = arith.constant 0 : index
      %c0_14 = arith.constant 0 : index
      %16 = vector.load %arg6[%c0_13, %c0_14] : memref<8x256xbf16, #tpu.memory_space<vmem>>, vector<8x256xbf16>
      %17 = arith.extf %16 : vector<8x256xbf16> to vector<8x256xf32>
      %18 = arith.addf %15, %17 : vector<8x256xf32>
      %cst_15 = arith.constant 0.000000e+00 : f32
      %19 = vector.broadcast %cst_15 : f32 to vector<8x256xf32>
      %20 = arith.maximumf %18, %19 : vector<8x256xf32>
      %21 = arith.truncf %20 : vector<8x256xf32> to vector<8x256xbf16>
      %c0_16 = arith.constant 0 : index
      %c0_17 = arith.constant 0 : index
      %22 = vector.load %arg7[%c0_16, %c0_17] : memref<8x256xbf16, #tpu.memory_space<vmem>>, vector<8x256xbf16>
      tpu.vector_store %arg7[%c0_16, %c0_17], %21 {strides = array<i32>} : memref<8x256xbf16, #tpu.memory_space<vmem>>, vector<8x256xbf16>,
    } else {
    }
    return
  }
  func.func @transform_0(%arg0: i32, %arg1: i32, %arg2: i32) -> (i32, i32) {
    %c0_i32 = arith.constant 0 : i32
    return %arg0, %arg2 : i32, i32
  }
  func.func @transform_1(%arg0: i32, %arg1: i32, %arg2: i32) -> (i32, i32) {
    %c0_i32 = arith.constant 0 : i32
    return %arg2, %arg1 : i32, i32
  }
  func.func @transform_2(%arg0: i32, %arg1: i32, %arg2: i32) -> (i32, i32) {
    %c0_i32 = arith.constant 0 : i32
    %c0_i32_0 = arith.constant 0 : i32
    return %c0_i32, %arg1 : i32, i32
  }
  func.func @transform_3(%arg0: i32, %arg1: i32, %arg2: i32) -> (i32, i32) {
    %c0_i32 = arith.constant 0 : i32
    return %arg0, %arg1 : i32, i32
  }
  func.func @transform_4(%arg0: i32, %arg1: i32, %arg2: i32) -> (i32, i32) {
    %c0_i32 = arith.constant 0 : i32
    return %arg0, %arg1 : i32, i32
  }
}

module attributes {stable_mosaic.version = 11 : i64} {
  func.func @_mm_bn_kernel(%arg0: i32, %arg1: i32, %arg2: i32, %arg3: memref<8x384xbf16, #tpu.memory_space<vmem>>, %arg4: memref<384x256xbf16, #tpu.memory_space<vmem>>, %arg5: memref<1x256xf32, #tpu.memory_space<vmem>>, %arg6: memref<8x256xbf16, #tpu.memory_space<vmem>>, %arg7: memref<8x256xf32, #tpu.memory_space<vmem>>) attributes {dimension_semantics = [#tpu.dimension_semantics<parallel>, #tpu.dimension_semantics<parallel>, #tpu.dimension_semantics<arbitrary>], iteration_bounds = array<i64: 1, 1, 6>, scalar_prefetch = 0 : i64, scratch_operands = 1 : i64, tpu.core_type = #tpu.core_type<tc>, window_params = [{transform_indices = @transform_0, window_bounds = array<i64: 8, 384>}, {transform_indices = @transform_1, window_bounds = array<i64: 384, 256>}, {transform_indices = @transform_2, window_bounds = array<i64: 1, 256>}, {transform_indices = @transform_3, window_bounds = array<i64: 8, 256>}]} {
    %c0_i32 = arith.constant 0 : i32
    %0 = arith.cmpi eq, %arg2, %c0_i32 : i32
    %1 = arith.extui %0 : i1 to i32
    %c0_i32_0 = arith.constant 0 : i32
    %2 = arith.cmpi ne, %1, %c0_i32_0 : i32
    scf.if %2 {
      %cst_9 = arith.constant 0.000000e+00 : f32
      %12 = vector.broadcast %cst_9 : f32 to vector<8x256xf32>
      %c0_10 = arith.constant 0 : index
      %c0_11 = arith.constant 0 : index
      %13 = vector.load %arg7[%c0_10, %c0_11] : memref<8x256xf32, #tpu.memory_space<vmem>>, vector<8x256xf32>
      tpu.vector_store %arg7[%c0_10, %c0_11], %12 {strides = array<i32>} : memref<8x256xf32, #tpu.memory_space<vmem>>, vector<8x256xf32>,
    } else {
    }
    %c0 = arith.constant 0 : index
    %c0_1 = arith.constant 0 : index
    %3 = vector.load %arg7[%c0, %c0_1] : memref<8x256xf32, #tpu.memory_space<vmem>>, vector<8x256xf32>
    %c0_2 = arith.constant 0 : index
    %c0_3 = arith.constant 0 : index
    %4 = vector.load %arg3[%c0_2, %c0_3] : memref<8x384xbf16, #tpu.memory_space<vmem>>, vector<8x384xbf16>
    %c0_4 = arith.constant 0 : index
    %c0_5 = arith.constant 0 : index
    %5 = vector.load %arg4[%c0_4, %c0_5] : memref<384x256xbf16, #tpu.memory_space<vmem>>, vector<384x256xbf16>
    %cst = arith.constant dense<0.000000e+00> : vector<8x256xf32>
    %6 = tpu.matmul %4, %5, %cst {dimension_numbers = #tpu.dot_dimension_numbers<[1], [0], [0], [1], [0, 0, 1, 1], [], []>} : vector<8x384xbf16>, vector<384x256xbf16>, vector<8x256xf32> -> vector<8x256xf32>
    %7 = arith.addf %3, %6 : vector<8x256xf32>
    %c0_6 = arith.constant 0 : index
    %c0_7 = arith.constant 0 : index
    %8 = vector.load %arg7[%c0_6, %c0_7] : memref<8x256xf32, #tpu.memory_space<vmem>>, vector<8x256xf32>
    tpu.vector_store %arg7[%c0_6, %c0_7], %7 {strides = array<i32>} : memref<8x256xf32, #tpu.memory_space<vmem>>, vector<8x256xf32>,
    %c5_i32 = arith.constant 5 : i32
    %9 = arith.cmpi eq, %arg2, %c5_i32 : i32
    %10 = arith.extui %9 : i1 to i32
    %c0_i32_8 = arith.constant 0 : i32
    %11 = arith.cmpi ne, %10, %c0_i32_8 : i32
    scf.if %11 {
      %c0_9 = arith.constant 0 : index
      %c0_10 = arith.constant 0 : index
      %12 = vector.load %arg7[%c0_9, %c0_10] : memref<8x256xf32, #tpu.memory_space<vmem>>, vector<8x256xf32>
      %c0_11 = arith.constant 0 : index
      %c0_12 = arith.constant 0 : index
      %13 = vector.load %arg5[%c0_11, %c0_12] : memref<1x256xf32, #tpu.memory_space<vmem>>, vector<1x256xf32>
      %14 = vector.broadcast %13 : vector<1x256xf32> to vector<8x256xf32>
      %15 = arith.addf %12, %14 : vector<8x256xf32>
      %cst_13 = arith.constant 0.000000e+00 : f32
      %16 = vector.broadcast %cst_13 : f32 to vector<8x256xf32>
      %17 = arith.maximumf %15, %16 : vector<8x256xf32>
      %18 = arith.truncf %17 : vector<8x256xf32> to vector<8x256xbf16>
      %c0_14 = arith.constant 0 : index
      %c0_15 = arith.constant 0 : index
      %19 = vector.load %arg6[%c0_14, %c0_15] : memref<8x256xbf16, #tpu.memory_space<vmem>>, vector<8x256xbf16>
      tpu.vector_store %arg6[%c0_14, %c0_15], %18 {strides = array<i32>} : memref<8x256xbf16, #tpu.memory_space<vmem>>, vector<8x256xbf16>,
    } else {
    }
    return
  }
  func.func @transform_0(%arg0: i32, %arg1: i32, %arg2: i32) -> (i32, i32) {
    %c0_i32 = arith.constant 0 : i32
    return %arg0, %arg2 : i32, i32
  }
  func.func @transform_1(%arg0: i32, %arg1: i32, %arg2: i32) -> (i32, i32) {
    %c0_i32 = arith.constant 0 : i32
    return %arg2, %arg1 : i32, i32
  }
  func.func @transform_2(%arg0: i32, %arg1: i32, %arg2: i32) -> (i32, i32) {
    %c0_i32 = arith.constant 0 : i32
    %c0_i32_0 = arith.constant 0 : i32
    return %c0_i32, %arg1 : i32, i32
  }
  func.func @transform_3(%arg0: i32, %arg1: i32, %arg2: i32) -> (i32, i32) {
    %c0_i32 = arith.constant 0 : i32
    return %arg0, %arg1 : i32, i32
  }
}

module attributes {stable_mosaic.version = 11 : i64} {
  func.func @_mm_bn_kernel(%arg0: i32, %arg1: i32, %arg2: i32, %arg3: memref<8x384xbf16, #tpu.memory_space<vmem>>, %arg4: memref<384x256xbf16, #tpu.memory_space<vmem>>, %arg5: memref<1x256xf32, #tpu.memory_space<vmem>>, %arg6: memref<8x256xbf16, #tpu.memory_space<vmem>>, %arg7: memref<8x256xf32, #tpu.memory_space<vmem>>) attributes {dimension_semantics = [#tpu.dimension_semantics<parallel>, #tpu.dimension_semantics<parallel>, #tpu.dimension_semantics<arbitrary>], iteration_bounds = array<i64: 1, 2, 6>, scalar_prefetch = 0 : i64, scratch_operands = 1 : i64, tpu.core_type = #tpu.core_type<tc>, window_params = [{transform_indices = @transform_0, window_bounds = array<i64: 8, 384>}, {transform_indices = @transform_1, window_bounds = array<i64: 384, 256>}, {transform_indices = @transform_2, window_bounds = array<i64: 1, 256>}, {transform_indices = @transform_3, window_bounds = array<i64: 8, 256>}]} {
    %c0_i32 = arith.constant 0 : i32
    %0 = arith.cmpi eq, %arg2, %c0_i32 : i32
    %1 = arith.extui %0 : i1 to i32
    %c0_i32_0 = arith.constant 0 : i32
    %2 = arith.cmpi ne, %1, %c0_i32_0 : i32
    scf.if %2 {
      %cst_9 = arith.constant 0.000000e+00 : f32
      %12 = vector.broadcast %cst_9 : f32 to vector<8x256xf32>
      %c0_10 = arith.constant 0 : index
      %c0_11 = arith.constant 0 : index
      %13 = vector.load %arg7[%c0_10, %c0_11] : memref<8x256xf32, #tpu.memory_space<vmem>>, vector<8x256xf32>
      tpu.vector_store %arg7[%c0_10, %c0_11], %12 {strides = array<i32>} : memref<8x256xf32, #tpu.memory_space<vmem>>, vector<8x256xf32>,
    } else {
    }
    %c0 = arith.constant 0 : index
    %c0_1 = arith.constant 0 : index
    %3 = vector.load %arg7[%c0, %c0_1] : memref<8x256xf32, #tpu.memory_space<vmem>>, vector<8x256xf32>
    %c0_2 = arith.constant 0 : index
    %c0_3 = arith.constant 0 : index
    %4 = vector.load %arg3[%c0_2, %c0_3] : memref<8x384xbf16, #tpu.memory_space<vmem>>, vector<8x384xbf16>
    %c0_4 = arith.constant 0 : index
    %c0_5 = arith.constant 0 : index
    %5 = vector.load %arg4[%c0_4, %c0_5] : memref<384x256xbf16, #tpu.memory_space<vmem>>, vector<384x256xbf16>
    %cst = arith.constant dense<0.000000e+00> : vector<8x256xf32>
    %6 = tpu.matmul %4, %5, %cst {dimension_numbers = #tpu.dot_dimension_numbers<[1], [0], [0], [1], [0, 0, 1, 1], [], []>} : vector<8x384xbf16>, vector<384x256xbf16>, vector<8x256xf32> -> vector<8x256xf32>
    %7 = arith.addf %3, %6 : vector<8x256xf32>
    %c0_6 = arith.constant 0 : index
    %c0_7 = arith.constant 0 : index
    %8 = vector.load %arg7[%c0_6, %c0_7] : memref<8x256xf32, #tpu.memory_space<vmem>>, vector<8x256xf32>
    tpu.vector_store %arg7[%c0_6, %c0_7], %7 {strides = array<i32>} : memref<8x256xf32, #tpu.memory_space<vmem>>, vector<8x256xf32>,
    %c5_i32 = arith.constant 5 : i32
    %9 = arith.cmpi eq, %arg2, %c5_i32 : i32
    %10 = arith.extui %9 : i1 to i32
    %c0_i32_8 = arith.constant 0 : i32
    %11 = arith.cmpi ne, %10, %c0_i32_8 : i32
    scf.if %11 {
      %c0_9 = arith.constant 0 : index
      %c0_10 = arith.constant 0 : index
      %12 = vector.load %arg7[%c0_9, %c0_10] : memref<8x256xf32, #tpu.memory_space<vmem>>, vector<8x256xf32>
      %c0_11 = arith.constant 0 : index
      %c0_12 = arith.constant 0 : index
      %13 = vector.load %arg5[%c0_11, %c0_12] : memref<1x256xf32, #tpu.memory_space<vmem>>, vector<1x256xf32>
      %14 = vector.broadcast %13 : vector<1x256xf32> to vector<8x256xf32>
      %15 = arith.addf %12, %14 : vector<8x256xf32>
      %cst_13 = arith.constant 0.000000e+00 : f32
      %16 = vector.broadcast %cst_13 : f32 to vector<8x256xf32>
      %17 = arith.maximumf %15, %16 : vector<8x256xf32>
      %18 = arith.truncf %17 : vector<8x256xf32> to vector<8x256xbf16>
      %c0_14 = arith.constant 0 : index
      %c0_15 = arith.constant 0 : index
      %19 = vector.load %arg6[%c0_14, %c0_15] : memref<8x256xbf16, #tpu.memory_space<vmem>>, vector<8x256xbf16>
      tpu.vector_store %arg6[%c0_14, %c0_15], %18 {strides = array<i32>} : memref<8x256xbf16, #tpu.memory_space<vmem>>, vector<8x256xbf16>,
    } else {
    }
    return
  }
  func.func @transform_0(%arg0: i32, %arg1: i32, %arg2: i32) -> (i32, i32) {
    %c0_i32 = arith.constant 0 : i32
    return %arg0, %arg2 : i32, i32
  }
  func.func @transform_1(%arg0: i32, %arg1: i32, %arg2: i32) -> (i32, i32) {
    %c0_i32 = arith.constant 0 : i32
    return %arg2, %arg1 : i32, i32
  }
  func.func @transform_2(%arg0: i32, %arg1: i32, %arg2: i32) -> (i32, i32) {
    %c0_i32 = arith.constant 0 : i32
    %c0_i32_0 = arith.constant 0 : i32
    return %c0_i32, %arg1 : i32, i32
  }
  func.func @transform_3(%arg0: i32, %arg1: i32, %arg2: i32) -> (i32, i32) {
    %c0_i32 = arith.constant 0 : i32
    return %arg0, %arg1 : i32, i32
  }
}

module attributes {stable_mosaic.version = 11 : i64} {
  func.func @_mm_bn_kernel(%arg0: i32, %arg1: i32, %arg2: i32, %arg3: memref<8x256xbf16, #tpu.memory_space<vmem>>, %arg4: memref<256x256xbf16, #tpu.memory_space<vmem>>, %arg5: memref<1x256xf32, #tpu.memory_space<vmem>>, %arg6: memref<8x256xbf16, #tpu.memory_space<vmem>>, %arg7: memref<8x256xf32, #tpu.memory_space<vmem>>) attributes {dimension_semantics = [#tpu.dimension_semantics<parallel>, #tpu.dimension_semantics<parallel>, #tpu.dimension_semantics<arbitrary>], iteration_bounds = array<i64: 1, 2, 1>, scalar_prefetch = 0 : i64, scratch_operands = 1 : i64, tpu.core_type = #tpu.core_type<tc>, window_params = [{transform_indices = @transform_0, window_bounds = array<i64: 8, 256>}, {transform_indices = @transform_1, window_bounds = array<i64: 256, 256>}, {transform_indices = @transform_2, window_bounds = array<i64: 1, 256>}, {transform_indices = @transform_3, window_bounds = array<i64: 8, 256>}]} {
    %c0_i32 = arith.constant 0 : i32
    %0 = arith.cmpi eq, %arg2, %c0_i32 : i32
    %1 = arith.extui %0 : i1 to i32
    %c0_i32_0 = arith.constant 0 : i32
    %2 = arith.cmpi ne, %1, %c0_i32_0 : i32
    scf.if %2 {
      %cst_10 = arith.constant 0.000000e+00 : f32
      %12 = vector.broadcast %cst_10 : f32 to vector<8x256xf32>
      %c0_11 = arith.constant 0 : index
      %c0_12 = arith.constant 0 : index
      %13 = vector.load %arg7[%c0_11, %c0_12] : memref<8x256xf32, #tpu.memory_space<vmem>>, vector<8x256xf32>
      tpu.vector_store %arg7[%c0_11, %c0_12], %12 {strides = array<i32>} : memref<8x256xf32, #tpu.memory_space<vmem>>, vector<8x256xf32>,
    } else {
    }
    %c0 = arith.constant 0 : index
    %c0_1 = arith.constant 0 : index
    %3 = vector.load %arg7[%c0, %c0_1] : memref<8x256xf32, #tpu.memory_space<vmem>>, vector<8x256xf32>
    %c0_2 = arith.constant 0 : index
    %c0_3 = arith.constant 0 : index
    %4 = vector.load %arg3[%c0_2, %c0_3] : memref<8x256xbf16, #tpu.memory_space<vmem>>, vector<8x256xbf16>
    %c0_4 = arith.constant 0 : index
    %c0_5 = arith.constant 0 : index
    %5 = vector.load %arg4[%c0_4, %c0_5] : memref<256x256xbf16, #tpu.memory_space<vmem>>, vector<256x256xbf16>
    %cst = arith.constant dense<0.000000e+00> : vector<8x256xf32>
    %6 = tpu.matmul %4, %5, %cst {dimension_numbers = #tpu.dot_dimension_numbers<[1], [0], [0], [1], [0, 0, 1, 1], [], []>} : vector<8x256xbf16>, vector<256x256xbf16>, vector<8x256xf32> -> vector<8x256xf32>
    %7 = arith.addf %3, %6 : vector<8x256xf32>
    %c0_6 = arith.constant 0 : index
    %c0_7 = arith.constant 0 : index
    %8 = vector.load %arg7[%c0_6, %c0_7] : memref<8x256xf32, #tpu.memory_space<vmem>>, vector<8x256xf32>
    tpu.vector_store %arg7[%c0_6, %c0_7], %7 {strides = array<i32>} : memref<8x256xf32, #tpu.memory_space<vmem>>, vector<8x256xf32>,
    %c0_i32_8 = arith.constant 0 : i32
    %9 = arith.cmpi eq, %arg2, %c0_i32_8 : i32
    %10 = arith.extui %9 : i1 to i32
    %c0_i32_9 = arith.constant 0 : i32
    %11 = arith.cmpi ne, %10, %c0_i32_9 : i32
    scf.if %11 {
      %c0_10 = arith.constant 0 : index
      %c0_11 = arith.constant 0 : index
      %12 = vector.load %arg7[%c0_10, %c0_11] : memref<8x256xf32, #tpu.memory_space<vmem>>, vector<8x256xf32>
      %c0_12 = arith.constant 0 : index
      %c0_13 = arith.constant 0 : index
      %13 = vector.load %arg5[%c0_12, %c0_13] : memref<1x256xf32, #tpu.memory_space<vmem>>, vector<1x256xf32>
      %14 = vector.broadcast %13 : vector<1x256xf32> to vector<8x256xf32>
      %15 = arith.addf %12, %14 : vector<8x256xf32>
      %16 = arith.truncf %15 : vector<8x256xf32> to vector<8x256xbf16>
      %c0_14 = arith.constant 0 : index
      %c0_15 = arith.constant 0 : index
      %17 = vector.load %arg6[%c0_14, %c0_15] : memref<8x256xbf16, #tpu.memory_space<vmem>>, vector<8x256xbf16>
      tpu.vector_store %arg6[%c0_14, %c0_15], %16 {strides = array<i32>} : memref<8x256xbf16, #tpu.memory_space<vmem>>, vector<8x256xbf16>,
    } else {
    }
    return
  }
  func.func @transform_0(%arg0: i32, %arg1: i32, %arg2: i32) -> (i32, i32) {
    %c0_i32 = arith.constant 0 : i32
    return %arg0, %arg2 : i32, i32
  }
  func.func @transform_1(%arg0: i32, %arg1: i32, %arg2: i32) -> (i32, i32) {
    %c0_i32 = arith.constant 0 : i32
    return %arg2, %arg1 : i32, i32
  }
  func.func @transform_2(%arg0: i32, %arg1: i32, %arg2: i32) -> (i32, i32) {
    %c0_i32 = arith.constant 0 : i32
    %c0_i32_0 = arith.constant 0 : i32
    return %c0_i32, %arg1 : i32, i32
  }
  func.func @transform_3(%arg0: i32, %arg1: i32, %arg2: i32) -> (i32, i32) {
    %c0_i32 = arith.constant 0 : i32
    return %arg0, %arg1 : i32, i32
  }
}

module attributes {stable_mosaic.version = 11 : i64} {
  func.func @_mm_bn_res_kernel(%arg0: i32, %arg1: i32, %arg2: i32, %arg3: memref<8x512xbf16, #tpu.memory_space<vmem>>, %arg4: memref<512x256xbf16, #tpu.memory_space<vmem>>, %arg5: memref<1x256xf32, #tpu.memory_space<vmem>>, %arg6: memref<8x256xbf16, #tpu.memory_space<vmem>>, %arg7: memref<8x256xbf16, #tpu.memory_space<vmem>>, %arg8: memref<8x256xf32, #tpu.memory_space<vmem>>) attributes {dimension_semantics = [#tpu.dimension_semantics<parallel>, #tpu.dimension_semantics<parallel>, #tpu.dimension_semantics<arbitrary>], iteration_bounds = array<i64: 1, 2, 9>, scalar_prefetch = 0 : i64, scratch_operands = 1 : i64, tpu.core_type = #tpu.core_type<tc>, window_params = [{transform_indices = @transform_0, window_bounds = array<i64: 8, 512>}, {transform_indices = @transform_1, window_bounds = array<i64: 512, 256>}, {transform_indices = @transform_2, window_bounds = array<i64: 1, 256>}, {transform_indices = @transform_3, window_bounds = array<i64: 8, 256>}, {transform_indices = @transform_4, window_bounds = array<i64: 8, 256>}]} {
    %c0_i32 = arith.constant 0 : i32
    %0 = arith.cmpi eq, %arg2, %c0_i32 : i32
    %1 = arith.extui %0 : i1 to i32
    %c0_i32_0 = arith.constant 0 : i32
    %2 = arith.cmpi ne, %1, %c0_i32_0 : i32
    scf.if %2 {
      %cst_9 = arith.constant 0.000000e+00 : f32
      %12 = vector.broadcast %cst_9 : f32 to vector<8x256xf32>
      %c0_10 = arith.constant 0 : index
      %c0_11 = arith.constant 0 : index
      %13 = vector.load %arg8[%c0_10, %c0_11] : memref<8x256xf32, #tpu.memory_space<vmem>>, vector<8x256xf32>
      tpu.vector_store %arg8[%c0_10, %c0_11], %12 {strides = array<i32>} : memref<8x256xf32, #tpu.memory_space<vmem>>, vector<8x256xf32>,
    } else {
    }
    %c0 = arith.constant 0 : index
    %c0_1 = arith.constant 0 : index
    %3 = vector.load %arg8[%c0, %c0_1] : memref<8x256xf32, #tpu.memory_space<vmem>>, vector<8x256xf32>
    %c0_2 = arith.constant 0 : index
    %c0_3 = arith.constant 0 : index
    %4 = vector.load %arg3[%c0_2, %c0_3] : memref<8x512xbf16, #tpu.memory_space<vmem>>, vector<8x512xbf16>
    %c0_4 = arith.constant 0 : index
    %c0_5 = arith.constant 0 : index
    %5 = vector.load %arg4[%c0_4, %c0_5] : memref<512x256xbf16, #tpu.memory_space<vmem>>, vector<512x256xbf16>
    %cst = arith.constant dense<0.000000e+00> : vector<8x256xf32>
    %6 = tpu.matmul %4, %5, %cst {dimension_numbers = #tpu.dot_dimension_numbers<[1], [0], [0], [1], [0, 0, 1, 1], [], []>} : vector<8x512xbf16>, vector<512x256xbf16>, vector<8x256xf32> -> vector<8x256xf32>
    %7 = arith.addf %3, %6 : vector<8x256xf32>
    %c0_6 = arith.constant 0 : index
    %c0_7 = arith.constant 0 : index
    %8 = vector.load %arg8[%c0_6, %c0_7] : memref<8x256xf32, #tpu.memory_space<vmem>>, vector<8x256xf32>
    tpu.vector_store %arg8[%c0_6, %c0_7], %7 {strides = array<i32>} : memref<8x256xf32, #tpu.memory_space<vmem>>, vector<8x256xf32>,
    %c8_i32 = arith.constant 8 : i32
    %9 = arith.cmpi eq, %arg2, %c8_i32 : i32
    %10 = arith.extui %9 : i1 to i32
    %c0_i32_8 = arith.constant 0 : i32
    %11 = arith.cmpi ne, %10, %c0_i32_8 : i32
    scf.if %11 {
      %c0_9 = arith.constant 0 : index
      %c0_10 = arith.constant 0 : index
      %12 = vector.load %arg8[%c0_9, %c0_10] : memref<8x256xf32, #tpu.memory_space<vmem>>, vector<8x256xf32>
      %c0_11 = arith.constant 0 : index
      %c0_12 = arith.constant 0 : index
      %13 = vector.load %arg5[%c0_11, %c0_12] : memref<1x256xf32, #tpu.memory_space<vmem>>, vector<1x256xf32>
      %14 = vector.broadcast %13 : vector<1x256xf32> to vector<8x256xf32>
      %15 = arith.addf %12, %14 : vector<8x256xf32>
      %c0_13 = arith.constant 0 : index
      %c0_14 = arith.constant 0 : index
      %16 = vector.load %arg6[%c0_13, %c0_14] : memref<8x256xbf16, #tpu.memory_space<vmem>>, vector<8x256xbf16>
      %17 = arith.extf %16 : vector<8x256xbf16> to vector<8x256xf32>
      %18 = arith.addf %15, %17 : vector<8x256xf32>
      %cst_15 = arith.constant 0.000000e+00 : f32
      %19 = vector.broadcast %cst_15 : f32 to vector<8x256xf32>
      %20 = arith.maximumf %18, %19 : vector<8x256xf32>
      %21 = arith.truncf %20 : vector<8x256xf32> to vector<8x256xbf16>
      %c0_16 = arith.constant 0 : index
      %c0_17 = arith.constant 0 : index
      %22 = vector.load %arg7[%c0_16, %c0_17] : memref<8x256xbf16, #tpu.memory_space<vmem>>, vector<8x256xbf16>
      tpu.vector_store %arg7[%c0_16, %c0_17], %21 {strides = array<i32>} : memref<8x256xbf16, #tpu.memory_space<vmem>>, vector<8x256xbf16>,
    } else {
    }
    return
  }
  func.func @transform_0(%arg0: i32, %arg1: i32, %arg2: i32) -> (i32, i32) {
    %c0_i32 = arith.constant 0 : i32
    return %arg0, %arg2 : i32, i32
  }
  func.func @transform_1(%arg0: i32, %arg1: i32, %arg2: i32) -> (i32, i32) {
    %c0_i32 = arith.constant 0 : i32
    return %arg2, %arg1 : i32, i32
  }
  func.func @transform_2(%arg0: i32, %arg1: i32, %arg2: i32) -> (i32, i32) {
    %c0_i32 = arith.constant 0 : i32
    %c0_i32_0 = arith.constant 0 : i32
    return %c0_i32, %arg1 : i32, i32
  }
  func.func @transform_3(%arg0: i32, %arg1: i32, %arg2: i32) -> (i32, i32) {
    %c0_i32 = arith.constant 0 : i32
    return %arg0, %arg1 : i32, i32
  }
  func.func @transform_4(%arg0: i32, %arg1: i32, %arg2: i32) -> (i32, i32) {
    %c0_i32 = arith.constant 0 : i32
    return %arg0, %arg1 : i32, i32
  }
}

module attributes {stable_mosaic.version = 11 : i64} {
  func.func @_mm_bn_kernel(%arg0: i32, %arg1: i32, %arg2: i32, %arg3: memref<8x512xbf16, #tpu.memory_space<vmem>>, %arg4: memref<512x256xbf16, #tpu.memory_space<vmem>>, %arg5: memref<1x256xf32, #tpu.memory_space<vmem>>, %arg6: memref<8x256xbf16, #tpu.memory_space<vmem>>, %arg7: memref<8x256xf32, #tpu.memory_space<vmem>>) attributes {dimension_semantics = [#tpu.dimension_semantics<parallel>, #tpu.dimension_semantics<parallel>, #tpu.dimension_semantics<arbitrary>], iteration_bounds = array<i64: 1, 2, 9>, scalar_prefetch = 0 : i64, scratch_operands = 1 : i64, tpu.core_type = #tpu.core_type<tc>, window_params = [{transform_indices = @transform_0, window_bounds = array<i64: 8, 512>}, {transform_indices = @transform_1, window_bounds = array<i64: 512, 256>}, {transform_indices = @transform_2, window_bounds = array<i64: 1, 256>}, {transform_indices = @transform_3, window_bounds = array<i64: 8, 256>}]} {
    %c0_i32 = arith.constant 0 : i32
    %0 = arith.cmpi eq, %arg2, %c0_i32 : i32
    %1 = arith.extui %0 : i1 to i32
    %c0_i32_0 = arith.constant 0 : i32
    %2 = arith.cmpi ne, %1, %c0_i32_0 : i32
    scf.if %2 {
      %cst_9 = arith.constant 0.000000e+00 : f32
      %12 = vector.broadcast %cst_9 : f32 to vector<8x256xf32>
      %c0_10 = arith.constant 0 : index
      %c0_11 = arith.constant 0 : index
      %13 = vector.load %arg7[%c0_10, %c0_11] : memref<8x256xf32, #tpu.memory_space<vmem>>, vector<8x256xf32>
      tpu.vector_store %arg7[%c0_10, %c0_11], %12 {strides = array<i32>} : memref<8x256xf32, #tpu.memory_space<vmem>>, vector<8x256xf32>,
    } else {
    }
    %c0 = arith.constant 0 : index
    %c0_1 = arith.constant 0 : index
    %3 = vector.load %arg7[%c0, %c0_1] : memref<8x256xf32, #tpu.memory_space<vmem>>, vector<8x256xf32>
    %c0_2 = arith.constant 0 : index
    %c0_3 = arith.constant 0 : index
    %4 = vector.load %arg3[%c0_2, %c0_3] : memref<8x512xbf16, #tpu.memory_space<vmem>>, vector<8x512xbf16>
    %c0_4 = arith.constant 0 : index
    %c0_5 = arith.constant 0 : index
    %5 = vector.load %arg4[%c0_4, %c0_5] : memref<512x256xbf16, #tpu.memory_space<vmem>>, vector<512x256xbf16>
    %cst = arith.constant dense<0.000000e+00> : vector<8x256xf32>
    %6 = tpu.matmul %4, %5, %cst {dimension_numbers = #tpu.dot_dimension_numbers<[1], [0], [0], [1], [0, 0, 1, 1], [], []>} : vector<8x512xbf16>, vector<512x256xbf16>, vector<8x256xf32> -> vector<8x256xf32>
    %7 = arith.addf %3, %6 : vector<8x256xf32>
    %c0_6 = arith.constant 0 : index
    %c0_7 = arith.constant 0 : index
    %8 = vector.load %arg7[%c0_6, %c0_7] : memref<8x256xf32, #tpu.memory_space<vmem>>, vector<8x256xf32>
    tpu.vector_store %arg7[%c0_6, %c0_7], %7 {strides = array<i32>} : memref<8x256xf32, #tpu.memory_space<vmem>>, vector<8x256xf32>,
    %c8_i32 = arith.constant 8 : i32
    %9 = arith.cmpi eq, %arg2, %c8_i32 : i32
    %10 = arith.extui %9 : i1 to i32
    %c0_i32_8 = arith.constant 0 : i32
    %11 = arith.cmpi ne, %10, %c0_i32_8 : i32
    scf.if %11 {
      %c0_9 = arith.constant 0 : index
      %c0_10 = arith.constant 0 : index
      %12 = vector.load %arg7[%c0_9, %c0_10] : memref<8x256xf32, #tpu.memory_space<vmem>>, vector<8x256xf32>
      %c0_11 = arith.constant 0 : index
      %c0_12 = arith.constant 0 : index
      %13 = vector.load %arg5[%c0_11, %c0_12] : memref<1x256xf32, #tpu.memory_space<vmem>>, vector<1x256xf32>
      %14 = vector.broadcast %13 : vector<1x256xf32> to vector<8x256xf32>
      %15 = arith.addf %12, %14 : vector<8x256xf32>
      %cst_13 = arith.constant 0.000000e+00 : f32
      %16 = vector.broadcast %cst_13 : f32 to vector<8x256xf32>
      %17 = arith.maximumf %15, %16 : vector<8x256xf32>
      %18 = arith.truncf %17 : vector<8x256xf32> to vector<8x256xbf16>
      %c0_14 = arith.constant 0 : index
      %c0_15 = arith.constant 0 : index
      %19 = vector.load %arg6[%c0_14, %c0_15] : memref<8x256xbf16, #tpu.memory_space<vmem>>, vector<8x256xbf16>
      tpu.vector_store %arg6[%c0_14, %c0_15], %18 {strides = array<i32>} : memref<8x256xbf16, #tpu.memory_space<vmem>>, vector<8x256xbf16>,
    } else {
    }
    return
  }
  func.func @transform_0(%arg0: i32, %arg1: i32, %arg2: i32) -> (i32, i32) {
    %c0_i32 = arith.constant 0 : i32
    return %arg0, %arg2 : i32, i32
  }
  func.func @transform_1(%arg0: i32, %arg1: i32, %arg2: i32) -> (i32, i32) {
    %c0_i32 = arith.constant 0 : i32
    return %arg2, %arg1 : i32, i32
  }
  func.func @transform_2(%arg0: i32, %arg1: i32, %arg2: i32) -> (i32, i32) {
    %c0_i32 = arith.constant 0 : i32
    %c0_i32_0 = arith.constant 0 : i32
    return %c0_i32, %arg1 : i32, i32
  }
  func.func @transform_3(%arg0: i32, %arg1: i32, %arg2: i32) -> (i32, i32) {
    %c0_i32 = arith.constant 0 : i32
    return %arg0, %arg1 : i32, i32
  }
}

module attributes {stable_mosaic.version = 11 : i64} {
  func.func @_gap_kernel(%arg0: i32, %arg1: memref<2x1x512xbf16, #tpu.memory_space<vmem>>, %arg2: memref<2x512xf32, #tpu.memory_space<vmem>>) attributes {dimension_semantics = [#tpu.dimension_semantics<arbitrary>], iteration_bounds = array<i64: 1>, scalar_prefetch = 0 : i64, scratch_operands = 0 : i64, tpu.core_type = #tpu.core_type<tc>, window_params = [{pipeline_mode = #tpu.pipeline_mode<synchronous>, transform_indices = @transform_0, window_bounds = array<i64: 2, 1, 512>}, {pipeline_mode = #tpu.pipeline_mode<synchronous>, transform_indices = @transform_1, window_bounds = array<i64: 2, 512>}]} {
    %c0 = arith.constant 0 : index
    %c0_0 = arith.constant 0 : index
    %c0_1 = arith.constant 0 : index
    %0 = vector.load %arg1[%c0, %c0_0, %c0_1] : memref<2x1x512xbf16, #tpu.memory_space<vmem>>, vector<2x1x512xbf16>
    %1 = arith.extf %0 : vector<2x1x512xbf16> to vector<2x1x512xf32>
    %cst = arith.constant dense<0.000000e+00> : vector<2x512xf32>
    %2 = vector.multi_reduction <add>, %1, %cst [1] : vector<2x1x512xf32> to vector<2x512xf32>
    %cst_2 = arith.constant 1.000000e+00 : f32
    %3 = vector.broadcast %cst_2 : f32 to vector<2x512xf32>
    %4 = arith.divf %2, %3 : vector<2x512xf32>
    %c0_3 = arith.constant 0 : index
    %c0_4 = arith.constant 0 : index
    %5 = vector.load %arg2[%c0_3, %c0_4] : memref<2x512xf32, #tpu.memory_space<vmem>>, vector<2x512xf32>
    tpu.vector_store %arg2[%c0_3, %c0_4], %4 {strides = array<i32>} : memref<2x512xf32, #tpu.memory_space<vmem>>, vector<2x512xf32>,
    return
  }
  func.func @transform_0(%arg0: i32) -> (i32, i32, i32) {
    %c0_i32 = arith.constant 0 : i32
    %c0_i32_0 = arith.constant 0 : i32
    %c0_i32_1 = arith.constant 0 : i32
    %c0_i32_2 = arith.constant 0 : i32
    return %c0_i32, %c0_i32_0, %c0_i32_1 : i32, i32, i32
  }
  func.func @transform_1(%arg0: i32) -> (i32, i32) {
    %c0_i32 = arith.constant 0 : i32
    %c0_i32_0 = arith.constant 0 : i32
    %c0_i32_1 = arith.constant 0 : i32
    return %c0_i32, %c0_i32_0 : i32, i32
  }
}

module attributes {stable_mosaic.version = 11 : i64} {
  func.func @_mm_bn_kernel(%arg0: i32, %arg1: i32, %arg2: i32, %arg3: memref<8x512xbf16, #tpu.memory_space<vmem>>, %arg4: memref<512x256xbf16, #tpu.memory_space<vmem>>, %arg5: memref<1x256xf32, #tpu.memory_space<vmem>>, %arg6: memref<8x256xbf16, #tpu.memory_space<vmem>>, %arg7: memref<8x256xf32, #tpu.memory_space<vmem>>) attributes {dimension_semantics = [#tpu.dimension_semantics<parallel>, #tpu.dimension_semantics<parallel>, #tpu.dimension_semantics<arbitrary>], iteration_bounds = array<i64: 1, 4, 2>, scalar_prefetch = 0 : i64, scratch_operands = 1 : i64, tpu.core_type = #tpu.core_type<tc>, window_params = [{transform_indices = @transform_0, window_bounds = array<i64: 8, 512>}, {transform_indices = @transform_1, window_bounds = array<i64: 512, 256>}, {transform_indices = @transform_2, window_bounds = array<i64: 1, 256>}, {transform_indices = @transform_3, window_bounds = array<i64: 8, 256>}]} {
    %c0_i32 = arith.constant 0 : i32
    %0 = arith.cmpi eq, %arg2, %c0_i32 : i32
    %1 = arith.extui %0 : i1 to i32
    %c0_i32_0 = arith.constant 0 : i32
    %2 = arith.cmpi ne, %1, %c0_i32_0 : i32
    scf.if %2 {
      %cst_9 = arith.constant 0.000000e+00 : f32
      %12 = vector.broadcast %cst_9 : f32 to vector<8x256xf32>
      %c0_10 = arith.constant 0 : index
      %c0_11 = arith.constant 0 : index
      %13 = vector.load %arg7[%c0_10, %c0_11] : memref<8x256xf32, #tpu.memory_space<vmem>>, vector<8x256xf32>
      tpu.vector_store %arg7[%c0_10, %c0_11], %12 {strides = array<i32>} : memref<8x256xf32, #tpu.memory_space<vmem>>, vector<8x256xf32>,
    } else {
    }
    %c0 = arith.constant 0 : index
    %c0_1 = arith.constant 0 : index
    %3 = vector.load %arg7[%c0, %c0_1] : memref<8x256xf32, #tpu.memory_space<vmem>>, vector<8x256xf32>
    %c0_2 = arith.constant 0 : index
    %c0_3 = arith.constant 0 : index
    %4 = vector.load %arg3[%c0_2, %c0_3] : memref<8x512xbf16, #tpu.memory_space<vmem>>, vector<8x512xbf16>
    %c0_4 = arith.constant 0 : index
    %c0_5 = arith.constant 0 : index
    %5 = vector.load %arg4[%c0_4, %c0_5] : memref<512x256xbf16, #tpu.memory_space<vmem>>, vector<512x256xbf16>
    %cst = arith.constant dense<0.000000e+00> : vector<8x256xf32>
    %6 = tpu.matmul %4, %5, %cst {dimension_numbers = #tpu.dot_dimension_numbers<[1], [0], [0], [1], [0, 0, 1, 1], [], []>} : vector<8x512xbf16>, vector<512x256xbf16>, vector<8x256xf32> -> vector<8x256xf32>
    %7 = arith.addf %3, %6 : vector<8x256xf32>
    %c0_6 = arith.constant 0 : index
    %c0_7 = arith.constant 0 : index
    %8 = vector.load %arg7[%c0_6, %c0_7] : memref<8x256xf32, #tpu.memory_space<vmem>>, vector<8x256xf32>
    tpu.vector_store %arg7[%c0_6, %c0_7], %7 {strides = array<i32>} : memref<8x256xf32, #tpu.memory_space<vmem>>, vector<8x256xf32>,
    %c1_i32 = arith.constant 1 : i32
    %9 = arith.cmpi eq, %arg2, %c1_i32 : i32
    %10 = arith.extui %9 : i1 to i32
    %c0_i32_8 = arith.constant 0 : i32
    %11 = arith.cmpi ne, %10, %c0_i32_8 : i32
    scf.if %11 {
      %c0_9 = arith.constant 0 : index
      %c0_10 = arith.constant 0 : index
      %12 = vector.load %arg7[%c0_9, %c0_10] : memref<8x256xf32, #tpu.memory_space<vmem>>, vector<8x256xf32>
      %c0_11 = arith.constant 0 : index
      %c0_12 = arith.constant 0 : index
      %13 = vector.load %arg5[%c0_11, %c0_12] : memref<1x256xf32, #tpu.memory_space<vmem>>, vector<1x256xf32>
      %14 = vector.broadcast %13 : vector<1x256xf32> to vector<8x256xf32>
      %15 = arith.addf %12, %14 : vector<8x256xf32>
      %cst_13 = arith.constant 0.000000e+00 : f32
      %16 = vector.broadcast %cst_13 : f32 to vector<8x256xf32>
      %17 = arith.maximumf %15, %16 : vector<8x256xf32>
      %18 = arith.truncf %17 : vector<8x256xf32> to vector<8x256xbf16>
      %c0_14 = arith.constant 0 : index
      %c0_15 = arith.constant 0 : index
      %19 = vector.load %arg6[%c0_14, %c0_15] : memref<8x256xbf16, #tpu.memory_space<vmem>>, vector<8x256xbf16>
      tpu.vector_store %arg6[%c0_14, %c0_15], %18 {strides = array<i32>} : memref<8x256xbf16, #tpu.memory_space<vmem>>, vector<8x256xbf16>,
    } else {
    }
    return
  }
  func.func @transform_0(%arg0: i32, %arg1: i32, %arg2: i32) -> (i32, i32) {
    %c0_i32 = arith.constant 0 : i32
    return %arg0, %arg2 : i32, i32
  }
  func.func @transform_1(%arg0: i32, %arg1: i32, %arg2: i32) -> (i32, i32) {
    %c0_i32 = arith.constant 0 : i32
    return %arg2, %arg1 : i32, i32
  }
  func.func @transform_2(%arg0: i32, %arg1: i32, %arg2: i32) -> (i32, i32) {
    %c0_i32 = arith.constant 0 : i32
    %c0_i32_0 = arith.constant 0 : i32
    return %c0_i32, %arg1 : i32, i32
  }
  func.func @transform_3(%arg0: i32, %arg1: i32, %arg2: i32) -> (i32, i32) {
    %c0_i32 = arith.constant 0 : i32
    return %arg0, %arg1 : i32, i32
  }
}

module attributes {stable_mosaic.version = 11 : i64} {
  func.func @_mm_bn_kernel(%arg0: i32, %arg1: i32, %arg2: i32, %arg3: memref<8x512xbf16, #tpu.memory_space<vmem>>, %arg4: memref<512x128xbf16, #tpu.memory_space<vmem>>, %arg5: memref<1x128xf32, #tpu.memory_space<vmem>>, %arg6: memref<8x128xf32, #tpu.memory_space<vmem>>, %arg7: memref<8x128xf32, #tpu.memory_space<vmem>>) attributes {dimension_semantics = [#tpu.dimension_semantics<parallel>, #tpu.dimension_semantics<parallel>, #tpu.dimension_semantics<arbitrary>], iteration_bounds = array<i64: 1, 1, 2>, scalar_prefetch = 0 : i64, scratch_operands = 1 : i64, tpu.core_type = #tpu.core_type<tc>, window_params = [{transform_indices = @transform_0, window_bounds = array<i64: 8, 512>}, {transform_indices = @transform_1, window_bounds = array<i64: 512, 128>}, {transform_indices = @transform_2, window_bounds = array<i64: 1, 128>}, {transform_indices = @transform_3, window_bounds = array<i64: 8, 128>}]} {
    %c0_i32 = arith.constant 0 : i32
    %0 = arith.cmpi eq, %arg2, %c0_i32 : i32
    %1 = arith.extui %0 : i1 to i32
    %c0_i32_0 = arith.constant 0 : i32
    %2 = arith.cmpi ne, %1, %c0_i32_0 : i32
    scf.if %2 {
      %cst_9 = arith.constant 0.000000e+00 : f32
      %12 = vector.broadcast %cst_9 : f32 to vector<8x128xf32>
      %c0_10 = arith.constant 0 : index
      %c0_11 = arith.constant 0 : index
      %13 = vector.load %arg7[%c0_10, %c0_11] : memref<8x128xf32, #tpu.memory_space<vmem>>, vector<8x128xf32>
      tpu.vector_store %arg7[%c0_10, %c0_11], %12 {strides = array<i32>} : memref<8x128xf32, #tpu.memory_space<vmem>>, vector<8x128xf32>,
    } else {
    }
    %c0 = arith.constant 0 : index
    %c0_1 = arith.constant 0 : index
    %3 = vector.load %arg7[%c0, %c0_1] : memref<8x128xf32, #tpu.memory_space<vmem>>, vector<8x128xf32>
    %c0_2 = arith.constant 0 : index
    %c0_3 = arith.constant 0 : index
    %4 = vector.load %arg3[%c0_2, %c0_3] : memref<8x512xbf16, #tpu.memory_space<vmem>>, vector<8x512xbf16>
    %c0_4 = arith.constant 0 : index
    %c0_5 = arith.constant 0 : index
    %5 = vector.load %arg4[%c0_4, %c0_5] : memref<512x128xbf16, #tpu.memory_space<vmem>>, vector<512x128xbf16>
    %cst = arith.constant dense<0.000000e+00> : vector<8x128xf32>
    %6 = tpu.matmul %4, %5, %cst {dimension_numbers = #tpu.dot_dimension_numbers<[1], [0], [0], [1], [0, 0, 1, 1], [], []>} : vector<8x512xbf16>, vector<512x128xbf16>, vector<8x128xf32> -> vector<8x128xf32>
    %7 = arith.addf %3, %6 : vector<8x128xf32>
    %c0_6 = arith.constant 0 : index
    %c0_7 = arith.constant 0 : index
    %8 = vector.load %arg7[%c0_6, %c0_7] : memref<8x128xf32, #tpu.memory_space<vmem>>, vector<8x128xf32>
    tpu.vector_store %arg7[%c0_6, %c0_7], %7 {strides = array<i32>} : memref<8x128xf32, #tpu.memory_space<vmem>>, vector<8x128xf32>,
    %c1_i32 = arith.constant 1 : i32
    %9 = arith.cmpi eq, %arg2, %c1_i32 : i32
    %10 = arith.extui %9 : i1 to i32
    %c0_i32_8 = arith.constant 0 : i32
    %11 = arith.cmpi ne, %10, %c0_i32_8 : i32
    scf.if %11 {
      %c0_9 = arith.constant 0 : index
      %c0_10 = arith.constant 0 : index
      %12 = vector.load %arg7[%c0_9, %c0_10] : memref<8x128xf32, #tpu.memory_space<vmem>>, vector<8x128xf32>
      %c0_11 = arith.constant 0 : index
      %c0_12 = arith.constant 0 : index
      %13 = vector.load %arg5[%c0_11, %c0_12] : memref<1x128xf32, #tpu.memory_space<vmem>>, vector<1x128xf32>
      %14 = vector.broadcast %13 : vector<1x128xf32> to vector<8x128xf32>
      %15 = arith.addf %12, %14 : vector<8x128xf32>
      %c0_13 = arith.constant 0 : index
      %c0_14 = arith.constant 0 : index
      %16 = vector.load %arg6[%c0_13, %c0_14] : memref<8x128xf32, #tpu.memory_space<vmem>>, vector<8x128xf32>
      tpu.vector_store %arg6[%c0_13, %c0_14], %15 {strides = array<i32>} : memref<8x128xf32, #tpu.memory_space<vmem>>, vector<8x128xf32>,
    } else {
    }
    return
  }
  func.func @transform_0(%arg0: i32, %arg1: i32, %arg2: i32) -> (i32, i32) {
    %c0_i32 = arith.constant 0 : i32
    return %arg0, %arg2 : i32, i32
  }
  func.func @transform_1(%arg0: i32, %arg1: i32, %arg2: i32) -> (i32, i32) {
    %c0_i32 = arith.constant 0 : i32
    return %arg2, %arg1 : i32, i32
  }
  func.func @transform_2(%arg0: i32, %arg1: i32, %arg2: i32) -> (i32, i32) {
    %c0_i32 = arith.constant 0 : i32
    %c0_i32_0 = arith.constant 0 : i32
    return %c0_i32, %arg1 : i32, i32
  }
  func.func @transform_3(%arg0: i32, %arg1: i32, %arg2: i32) -> (i32, i32) {
    %c0_i32 = arith.constant 0 : i32
    return %arg0, %arg1 : i32, i32
  }
}

</mosaic_0001>

<bundles_post_ra>
// kernel: morphclr_dual_forward.44
= control target key start
LH: loop header
LB: loop body
LE: loop exit
PB: predicated region body
PF: predicated region fallthrough
CT: control target
= control target key end

     0   :  { %s1744_s12 = smov 0   ;;  %s1746_s13 = smov 0   ;;  %s1918_s0 = inlined_call_operand.vmem [shape: bf16[512,256], index: 0, kind: input, shape index: {}]   ;;  %s1919_s1 = inlined_call_operand.vmem [shape: bf16[256,128], index: 1, kind: input, shape index: {}]   ;;  %s1920_s2 = inlined_call_operand.vmem [shape: f32[1,128], index: 2, kind: input, shape index: {}]   ;;  %s1921_s3 = inlined_call_operand.vmem [shape: bf16[512,128], index: 3, kind: output, shape index: {}]  }
   0x1   :  { %s1748_s14 = smov 0  }
   0x2 LB: > { %s32_s15 = sadd.s32 1, %s1718_s13  ;;  %p1267_p0 = scmp.ge.s32.totalorder %s1722_s14, 1  ;;  %s1722_s14 = sphi %s1748_s14, %s13_s14   ;;  %s1718_s13 = sphi %s1746_s13, %s1923_s13   ;;  %s1714_s12 = sphi %s1744_s12, %s1922_s12  }
   0x3   : > { %p34_p1 = scmp.ge.s32.totalorder %s32_s15, 2  ;;  %p191_p2 = scmp.lt.s32.totalorder %s1722_s14, 3 }
   0x5   : > { %s1925_s15 = smov (%p34_p1, %s32_s15), 0  ;;  %p192_p3 = pnand %p1267_p0, %p191_p2 }
   0x6   : > { %s1268_s18 = sshll.u32 (!%p192_p3), %s1714_s12, 5 }
   0x7   : > { %195 = sbr.rel (%p192_p3) target bundleno = 309 (0x135), region = 32  ;;  %p236_p4 = scmp.lt.s32.totalorder (!%p192_p3), %s1268_s18, 63 }
   0xc   : > { %v1636_v0 = vld [vmem:[%s1919_s1 + $0x78] sm:$0xff]   ;;  %v1638_v2 = vld [vmem:[%s1919_s1 + $0x70] sm:$0xff]   ;;  %v1640_v4 = vld [vmem:[%s1919_s1 + $0x68] sm:$0xff]   ;;  %s1927_s18 = smov (!%p236_p4, %s1268_s18), 63 }
   0xd   : > { %v1637_v1 = vld [vmem:[%s1919_s1 + $0x38] sm:$0xff]   ;;  %1484 = vmatprep.subr.bf16.mxu0 %v1636_v0  ;;  %1596 = vmatprep.subr.bf16.mxu1 %v1636_v0  ;;  %v1639_v3 = vld [vmem:[%s1919_s1 + $0x30] sm:$0xff]   ;;  %v1641_v5 = vld [vmem:[%s1919_s1 + $0x28] sm:$0xff]   ;;  %s1356_s6 = sshll.u32 %s1927_s18, 3  ;;  %s1272_s5 = sshll.u32 %s1927_s18, 2 }
   0xe   : > { %1485 = vmatpush3.bf16.msra.mxu0 %v1637_v1  ;;  %1604 = vmatpush3.bf16.msra.mxu1 %v1637_v1  ;;  %v1642_v6 = vld [vmem:[%s1919_s1 + $0x60] sm:$0xff]   ;;  %v1644_v8 = vld [vmem:[%s1919_s1 + $0x58] sm:$0xff]   ;;  %s1795_s11 = scalar_lea.vmem %s1918_s0, %s1356_s6  ;;  %v1646_v10 = vld [vmem:[%s1919_s1 + $0x50] sm:$0xff]   ;;  %s1863_s8 = scalar_lea.vmem %s1921_s3, %s1272_s5 }
   0xf   : > { %1486 = vmatprep.subr.bf16.mxu0 %v1638_v2  ;;  %1597 = vmatprep.subr.bf16.mxu1 %v1638_v2  ;;  %v1643_v7 = vld [vmem:[%s1919_s1 + $0x20] sm:$0xff]   ;;  %v1645_v9 = vld [vmem:[%s1919_s1 + $0x18] sm:$0xff]   ;;  %v1647_v13 = vld [vmem:[%s1919_s1 + $0x10] sm:$0xff]  }
  0x10   : > { %v1654_v11 = vld [vmem:[%s1795_s11 + $0x4] ss:$8 sps:$4 sm:$0xff]   ;;  %v1652_v18 = vld [vmem:[%s1795_s11] ss:$8 sps:$4 sm:$0xff]   ;;  %v1658_v20 = vld [vmem:[%s1795_s11 + $0x14] ss:$8 sps:$4 sm:$0xff]  }
  0x11   : > { %v1657_v12 = vld [vmem:[%s1795_s11 + $0x84] ss:$8 sps:$4 sm:$0xff]   ;;  %688 = vmatprep.mubr.bf16.mxu0 %v1654_v11  ;;  %v1655_v19 = vld [vmem:[%s1795_s11 + $0x80] ss:$8 sps:$4 sm:$0xff]   ;;  %v1660_v21 = vld [vmem:[%s1795_s11 + $0x94] ss:$8 sps:$4 sm:$0xff]  }
  0x12   : > { %1487 = vmatpush3.bf16.msra.mxu0 %v1639_v3  ;;  %1605 = vmatpush3.bf16.msra.mxu1 %v1639_v3  ;;  %v1648_v14 = vld [vmem:[%s1919_s1 + $0x48] sm:$0xff]   ;;  %v1650_v16 = vld [vmem:[%s1919_s1 + $0x40] sm:$0xff]   ;;  %v1662_v22 = vld [vmem:[%s1795_s11 + $0x10] ss:$8 sps:$4 sm:$0xff]  }
  0x13   : > { %1488 = vmatprep.subr.bf16.mxu0 %v1640_v4  ;;  %1598 = vmatprep.subr.bf16.mxu1 %v1640_v4  ;;  %v1649_v15 = vld [vmem:[%s1919_s1 + $0x8] sm:$0xff]   ;;  %v1651_v17 = vld [vmem:[%s1919_s1] sm:$0xff]   ;;  %v1663_v23 = vld [vmem:[%s1795_s11 + $0x90] ss:$8 sps:$4 sm:$0xff]  }
  0x14   : > { %752 = vmatprep.mubr.bf16.mxu1 %v1657_v12  ;;  %v1664_v24 = vld [vmem:[%s1795_s11 + $0x24] ss:$8 sps:$4 sm:$0xff]   ;;  %v1668_v26 = vld [vmem:[%s1795_s11 + $0x20] ss:$8 sps:$4 sm:$0xff]   ;;  %v1670_v28 = vld [vmem:[%s1795_s11 + $0x34] ss:$8 sps:$4 sm:$0xff]  }
  0x15   : > { %v1666_v25 = vld [vmem:[%s1795_s11 + $0xa4] ss:$8 sps:$4 sm:$0xff]   ;;  %v1669_v27 = vld [vmem:[%s1795_s11 + $0xa0] ss:$8 sps:$4 sm:$0xff]   ;;  %v1672_v29 = vld [vmem:[%s1795_s11 + $0xb4] ss:$8 sps:$4 sm:$0xff]  }
  0x16   : > { %1489 = vmatpush3.bf16.msra.mxu0 %v1641_v5  ;;  %1606 = vmatpush3.bf16.msra.mxu1 %v1641_v5  ;;  %v1674_v30 = vld [vmem:[%s1795_s11 + $0x30] ss:$8 sps:$4 sm:$0xff]   ;;  %v1676_v32 = vld [vmem:[%s1795_s11 + $0x44] ss:$8 sps:$4 sm:$0xff]   ;;  %v1680_v34 = vld [vmem:[%s1795_s11 + $0x40] ss:$8 sps:$4 sm:$0xff]  }
  0x17   : > { %1490 = vmatprep.subr.bf16.mxu0 %v1642_v6  ;;  %1599 = vmatprep.subr.bf16.mxu1 %v1642_v6  ;;  %v1675_v31 = vld [vmem:[%s1795_s11 + $0xb0] ss:$8 sps:$4 sm:$0xff]   ;;  %v1678_v33 = vld [vmem:[%s1795_s11 + $0xc4] ss:$8 sps:$4 sm:$0xff]   ;;  %v1681_v35 = vld [vmem:[%s1795_s11 + $0xc0] ss:$8 sps:$4 sm:$0xff]  }
  0x18   : > { %v1682_v36 = vld [vmem:[%s1795_s11 + $0x54] ss:$8 sps:$4 sm:$0xff]   ;;  %v1686_v38 = vld [vmem:[%s1795_s11 + $0x50] ss:$8 sps:$4 sm:$0xff]   ;;  %v1688_v40 = vld [vmem:[%s1795_s11 + $0x64] ss:$8 sps:$4 sm:$0xff]  }
  0x19   : > { %v1684_v37 = vld [vmem:[%s1795_s11 + $0xd4] ss:$8 sps:$4 sm:$0xff]   ;;  %v1687_v39 = vld [vmem:[%s1795_s11 + $0xd0] ss:$8 sps:$4 sm:$0xff]   ;;  %v1690_v41 = vld [vmem:[%s1795_s11 + $0xe4] ss:$8 sps:$4 sm:$0xff]  }
  0x1a   : > { %1491 = vmatpush3.bf16.msra.mxu0 %v1643_v7  ;;  %1607 = vmatpush3.bf16.msra.mxu1 %v1643_v7  ;;  %v1692_v42 = vld [vmem:[%s1795_s11 + $0x60] ss:$8 sps:$4 sm:$0xff]   ;;  %v1694_v44 = vld [vmem:[%s1795_s11 + $0x74] ss:$8 sps:$4 sm:$0xff]   ;;  %v1698_v46 = vld [vmem:[%s1795_s11 + $0x70] ss:$8 sps:$4 sm:$0xff]  }
  0x1b   : > { %1492 = vmatprep.subr.bf16.mxu0 %v1644_v8  ;;  %1600 = vmatprep.subr.bf16.mxu1 %v1644_v8  ;;  %v1693_v43 = vld [vmem:[%s1795_s11 + $0xe0] ss:$8 sps:$4 sm:$0xff]   ;;  %v1696_v45 = vld [vmem:[%s1795_s11 + $0xf4] ss:$8 sps:$4 sm:$0xff]   ;;  %v1699_v47 = vld [vmem:[%s1795_s11 + $0xf0] ss:$8 sps:$4 sm:$0xff]  }
  0x1c   : > { %v1853_v53 = vld [vmem:[%s1920_s2] ss:$0 sm:$0xff] }
  0x1e   : > { %1493 = vmatpush3.bf16.msra.mxu0 %v1645_v9  ;;  %1608 = vmatpush3.bf16.msra.mxu1 %v1645_v9 }
  0x1f   : > { %1494 = vmatprep.subr.bf16.mxu0 %v1646_v10  ;;  %1601 = vmatprep.subr.bf16.mxu1 %v1646_v10 }
  0x22   : > { %1495 = vmatpush3.bf16.msra.mxu0 %v1647_v13  ;;  %1609 = vmatpush3.bf16.msra.mxu1 %v1647_v13 }
  0x23   : > { %1496 = vmatprep.subr.bf16.mxu0 %v1648_v14  ;;  %1602 = vmatprep.subr.bf16.mxu1 %v1648_v14 }
  0x26   : > { %1497 = vmatpush3.bf16.msra.mxu0 %v1649_v15  ;;  %1610 = vmatpush3.bf16.msra.mxu1 %v1649_v15 }
  0x27   : > { %1498 = vmatprep.subr.bf16.mxu0 %v1650_v16  ;;  %1603 = vmatprep.subr.bf16.mxu1 %v1650_v16 }
  0x2a   : > { %1499 = vmatpush3.bf16.msra.mxu0 %v1651_v17  ;;  %1611 = vmatpush3.bf16.msra.mxu1 %v1651_v17 }
  0x2d   : > { %689 = vmatmul.mubr.bf16.vlgmr.msra.gmra.mxu0 %v1652_v18  ;;  %753 = vmatmul.mubr.bf16.vlgmr.msra.gmra.mxu1 %v1655_v19 }
  0x2e   : > { %696 = vmatprep.mubr.bf16.mxu0 %v1658_v20  ;;  %760 = vmatprep.mubr.bf16.mxu1 %v1660_v21 }
  0x35   : > { %697 = vmatmul.mubr.bf16.gmra.mxu0 %v1662_v22  ;;  %761 = vmatmul.mubr.bf16.gmra.mxu1 %v1663_v23 }
  0x36   : > { %704 = vmatprep.mubr.bf16.mxu0 %v1664_v24  ;;  %768 = vmatprep.mubr.bf16.mxu1 %v1666_v25 }
  0x3d   : > { %705 = vmatmul.mubr.bf16.gmra.mxu0 %v1668_v26  ;;  %769 = vmatmul.mubr.bf16.gmra.mxu1 %v1669_v27 }
  0x3e   : > { %712 = vmatprep.mubr.bf16.mxu0 %v1670_v28  ;;  %776 = vmatprep.mubr.bf16.mxu1 %v1672_v29 }
  0x45   : > { %713 = vmatmul.mubr.bf16.gmra.mxu0 %v1674_v30  ;;  %777 = vmatmul.mubr.bf16.gmra.mxu1 %v1675_v31 }
  0x46   : > { %720 = vmatprep.mubr.bf16.mxu0 %v1676_v32  ;;  %784 = vmatprep.mubr.bf16.mxu1 %v1678_v33 }
  0x4d   : > { %721 = vmatmul.mubr.bf16.gmra.mxu0 %v1680_v34  ;;  %785 = vmatmul.mubr.bf16.gmra.mxu1 %v1681_v35 }
  0x4e   : > { %728 = vmatprep.mubr.bf16.mxu0 %v1682_v36  ;;  %792 = vmatprep.mubr.bf16.mxu1 %v1684_v37 }
  0x55   : > { %729 = vmatmul.mubr.bf16.gmra.mxu0 %v1686_v38  ;;  %793 = vmatmul.mubr.bf16.gmra.mxu1 %v1687_v39 }
  0x56   : > { %736 = vmatprep.mubr.bf16.mxu0 %v1688_v40  ;;  %800 = vmatprep.mubr.bf16.mxu1 %v1690_v41 }
  0x5d   : > { %737 = vmatmul.mubr.bf16.gmra.mxu0 %v1692_v42  ;;  %801 = vmatmul.mubr.bf16.gmra.mxu1 %v1693_v43 }
  0x5e   : > { %744 = vmatprep.mubr.bf16.mxu0 %v1694_v44  ;;  %808 = vmatprep.mubr.bf16.mxu1 %v1696_v45 }
  0x65   : > { %745 = vmatmul.mubr.bf16.gmra.mxu0 %v1698_v46  ;;  %809 = vmatmul.mubr.bf16.gmra.mxu1 %v1699_v47 }
  0xed   : > { %v1500_v48 = vpop.f32.mrf.mxu0  ;;  %v1548_v49 = vpop.f32.mrf.mxu1 }
  0xef   : > { %v1501_v50 = vpop.f32.mrf.mxu0  ;;  %v1549_v51 = vpop.f32.mrf.mxu1 }
  0xf0   : > { %v1502_v52 = vadd.f32 %v1501_v50, %v1500_v48  ;;  %v1550_v54 = vadd.f32 %v1549_v51, %v1548_v49 }
  0xf1   : > { %v1503_v55 = vpop.f32.mrf.mxu0  ;;  %v1551_v56 = vpop.f32.mrf.mxu1 }
  0xf2   : > { %v923_v57 = vadd.f32 %v1502_v52, %v1853_v53  ;;  %v939_v58 = vadd.f32 %v1550_v54, %v1853_v53 }
  0xf3   : > { %v1504_v59 = vpop.f32.mrf.mxu0  ;;  %v1552_v60 = vpop.f32.mrf.mxu1 }
  0xf4   : > { %v1505_v61 = vadd.f32 %v1504_v59, %v1503_v55  ;;  %v1553_v62 = vadd.f32 %v1552_v60, %v1551_v56  ;;  %v955_v3 = vmax.f32 %v923_v57, 0.0  ;;  %v971_v4 = vmax.f32 %v939_v58, 0.0 }
  0xf5   : > { %v1506_v63 = vpop.f32.mrf.mxu0  ;;  %v1554_v0 = vpop.f32.mrf.mxu1 }
  0xf6   : > { %v924_v1 = vadd.f32 %v1505_v61, %v1853_v53  ;;  %v940_v2 = vadd.f32 %v1553_v62, %v1853_v53 }
  0xf7   : > { %v1507_v5 = vpop.f32.mrf.mxu0  ;;  %v1555_v6 = vpop.f32.mrf.mxu1 }
  0xf8   : > { %v956_v7 = vmax.f32 %v924_v1, 0.0  ;;  %v972_v8 = vmax.f32 %v940_v2, 0.0  ;;  %v1508_v9 = vadd.f32 %v1507_v5, %v1506_v63  ;;  %v1556_v10 = vadd.f32 %v1555_v6, %v1554_v0 }
  0xf9   : > { %v1509_v11 = vpop.f32.mrf.mxu0  ;;  %v1557_v12 = vpop.f32.mrf.mxu1 }
  0xfa   : > { %v1392_v13 = vpack.c.bf16 %v956_v7, %v955_v3  ;;  %v1432_v14 = vpack.c.bf16 %v972_v8, %v971_v4  ;;  %v925_v15 = vadd.f32 %v1508_v9, %v1853_v53  ;;  %v941_v16 = vadd.f32 %v1556_v10, %v1853_v53 }
  0xfb   : > { %v1510_v17 = vpop.f32.mrf.mxu0  ;;  %v1558_v18 = vpop.f32.mrf.mxu1 }
  0xfc   : > { %1393 = vst [vmem:[%s1863_s8] sm:$0xff] %v1392_v13   ;;  %1476 = vst [vmem:[%s1863_s8 + $0x40] sm:$0xff] %v1432_v14   ;;  %v1511_v19 = vadd.f32 %v1510_v17, %v1509_v11  ;;  %v1559_v20 = vadd.f32 %v1558_v18, %v1557_v12  ;;  %v957_v25 = vmax.f32 %v925_v15, 0.0  ;;  %v973_v26 = vmax.f32 %v941_v16, 0.0 }
  0xfd   : > { %v1512_v21 = vpop.f32.mrf.mxu0  ;;  %v1560_v22 = vpop.f32.mrf.mxu1 }
  0xfe   : > { %v926_v23 = vadd.f32 %v1511_v19, %v1853_v53  ;;  %v942_v24 = vadd.f32 %v1559_v20, %v1853_v53 }
  0xff   : > { %v1513_v27 = vpop.f32.mrf.mxu0  ;;  %v1561_v28 = vpop.f32.mrf.mxu1 }
 0x100   : > { %v958_v29 = vmax.f32 %v926_v23, 0.0  ;;  %v974_v30 = vmax.f32 %v942_v24, 0.0  ;;  %v1514_v31 = vadd.f32 %v1513_v27, %v1512_v21  ;;  %v1562_v32 = vadd.f32 %v1561_v28, %v1560_v22 }
 0x101   : > { %v1515_v33 = vpop.f32.mrf.mxu0  ;;  %v1563_v34 = vpop.f32.mrf.mxu1 }
 0x102   : > { %v1397_v35 = vpack.c.bf16 %v958_v29, %v957_v25  ;;  %v1437_v36 = vpack.c.bf16 %v974_v30, %v973_v26  ;;  %v927_v37 = vadd.f32 %v1514_v31, %v1853_v53  ;;  %v943_v38 = vadd.f32 %v1562_v32, %v1853_v53 }
 0x103   : > { %v1516_v39 = vpop.f32.mrf.mxu0  ;;  %v1564_v40 = vpop.f32.mrf.mxu1 }
 0x104   : > { %1469 = vst [vmem:[%s1863_s8 + $0x8] sm:$0xff] %v1397_v35   ;;  %1477 = vst [vmem:[%s1863_s8 + $0x48] sm:$0xff] %v1437_v36   ;;  %v1517_v41 = vadd.f32 %v1516_v39, %v1515_v33  ;;  %v1565_v42 = vadd.f32 %v1564_v40, %v1563_v34  ;;  %v959_v47 = vmax.f32 %v927_v37, 0.0  ;;  %v975_v48 = vmax.f32 %v943_v38, 0.0 }
 0x105   : > { %v1518_v43 = vpop.f32.mrf.mxu0  ;;  %v1566_v44 = vpop.f32.mrf.mxu1 }
 0x106   : > { %v928_v45 = vadd.f32 %v1517_v41, %v1853_v53  ;;  %v944_v46 = vadd.f32 %v1565_v42, %v1853_v53 }
 0x107   : > { %v1519_v49 = vpop.f32.mrf.mxu0  ;;  %v1567_v50 = vpop.f32.mrf.mxu1 }
 0x108   : > { %v960_v51 = vmax.f32 %v928_v45, 0.0  ;;  %v976_v52 = vmax.f32 %v944_v46, 0.0  ;;  %v1520_v54 = vadd.f32 %v1519_v49, %v1518_v43  ;;  %v1568_v55 = vadd.f32 %v1567_v50, %v1566_v44 }
 0x109   : > { %v1521_v56 = vpop.f32.mrf.mxu0  ;;  %v1569_v57 = vpop.f32.mrf.mxu1 }
 0x10a   : > { %v1402_v58 = vpack.c.bf16 %v960_v51, %v959_v47  ;;  %v1442_v59 = vpack.c.bf16 %v976_v52, %v975_v48  ;;  %v929_v60 = vadd.f32 %v1520_v54, %v1853_v53  ;;  %v945_v61 = vadd.f32 %v1568_v55, %v1853_v53 }
 0x10b   : > { %v1522_v62 = vpop.f32.mrf.mxu0  ;;  %v1570_v63 = vpop.f32.mrf.mxu1 }
 0x10c   : > { %1470 = vst [vmem:[%s1863_s8 + $0x10] sm:$0xff] %v1402_v58   ;;  %1478 = vst [vmem:[%s1863_s8 + $0x50] sm:$0xff] %v1442_v59   ;;  %v1523_v0 = vadd.f32 %v1522_v62, %v1521_v56  ;;  %v1571_v1 = vadd.f32 %v1570_v63, %v1569_v57  ;;  %v961_v6 = vmax.f32 %v929_v60, 0.0  ;;  %v977_v7 = vmax.f32 %v945_v61, 0.0 }
 0x10d   : > { %v1524_v2 = vpop.f32.mrf.mxu0  ;;  %v1572_v3 = vpop.f32.mrf.mxu1 }
 0x10e   : > { %v930_v4 = vadd.f32 %v1523_v0, %v1853_v53  ;;  %v946_v5 = vadd.f32 %v1571_v1, %v1853_v53 }
 0x10f   : > { %v1525_v8 = vpop.f32.mrf.mxu0  ;;  %v1573_v9 = vpop.f32.mrf.mxu1 }
 0x110   : > { %v962_v10 = vmax.f32 %v930_v4, 0.0  ;;  %v978_v11 = vmax.f32 %v946_v5, 0.0  ;;  %v1526_v12 = vadd.f32 %v1525_v8, %v1524_v2  ;;  %v1574_v13 = vadd.f32 %v1573_v9, %v1572_v3 }
 0x111   : > { %v1527_v14 = vpop.f32.mrf.mxu0  ;;  %v1575_v15 = vpop.f32.mrf.mxu1 }
 0x112   : > { %v1407_v16 = vpack.c.bf16 %v962_v10, %v961_v6  ;;  %v1447_v17 = vpack.c.bf16 %v978_v11, %v977_v7  ;;  %v931_v18 = vadd.f32 %v1526_v12, %v1853_v53  ;;  %v947_v19 = vadd.f32 %v1574_v13, %v1853_v53 }
 0x113   : > { %v1528_v20 = vpop.f32.mrf.mxu0  ;;  %v1576_v21 = vpop.f32.mrf.mxu1 }
 0x114   : > { %1471 = vst [vmem:[%s1863_s8 + $0x18] sm:$0xff] %v1407_v16   ;;  %1479 = vst [vmem:[%s1863_s8 + $0x58] sm:$0xff] %v1447_v17   ;;  %v1529_v22 = vadd.f32 %v1528_v20, %v1527_v14  ;;  %v1577_v23 = vadd.f32 %v1576_v21, %v1575_v15  ;;  %v963_v28 = vmax.f32 %v931_v18, 0.0  ;;  %v979_v29 = vmax.f32 %v947_v19, 0.0 }
 0x115   : > { %v1530_v24 = vpop.f32.mrf.mxu0  ;;  %v1578_v25 = vpop.f32.mrf.mxu1 }
 0x116   : > { %v932_v26 = vadd.f32 %v1529_v22, %v1853_v53  ;;  %v948_v27 = vadd.f32 %v1577_v23, %v1853_v53 }
 0x117   : > { %v1531_v30 = vpop.f32.mrf.mxu0  ;;  %v1579_v31 = vpop.f32.mrf.mxu1 }
 0x118   : > { %v964_v32 = vmax.f32 %v932_v26, 0.0  ;;  %v980_v33 = vmax.f32 %v948_v27, 0.0  ;;  %v1532_v34 = vadd.f32 %v1531_v30, %v1530_v24  ;;  %v1580_v35 = vadd.f32 %v1579_v31, %v1578_v25 }
 0x119   : > { %v1533_v36 = vpop.f32.mrf.mxu0  ;;  %v1581_v37 = vpop.f32.mrf.mxu1 }
 0x11a   : > { %v1412_v38 = vpack.c.bf16 %v964_v32, %v963_v28  ;;  %v1452_v39 = vpack.c.bf16 %v980_v33, %v979_v29  ;;  %v933_v40 = vadd.f32 %v1532_v34, %v1853_v53  ;;  %v949_v41 = vadd.f32 %v1580_v35, %v1853_v53 }
 0x11b   : > { %v1534_v42 = vpop.f32.mrf.mxu0  ;;  %v1582_v43 = vpop.f32.mrf.mxu1 }
 0x11c   : > { %1472 = vst [vmem:[%s1863_s8 + $0x20] sm:$0xff] %v1412_v38   ;;  %1480 = vst [vmem:[%s1863_s8 + $0x60] sm:$0xff] %v1452_v39   ;;  %v1535_v44 = vadd.f32 %v1534_v42, %v1533_v36  ;;  %v1583_v45 = vadd.f32 %v1582_v43, %v1581_v37  ;;  %v965_v50 = vmax.f32 %v933_v40, 0.0  ;;  %v981_v51 = vmax.f32 %v949_v41, 0.0 }
 0x11d   : > { %v1536_v46 = vpop.f32.mrf.mxu0  ;;  %v1584_v47 = vpop.f32.mrf.mxu1 }
 0x11e   : > { %v934_v48 = vadd.f32 %v1535_v44, %v1853_v53  ;;  %v950_v49 = vadd.f32 %v1583_v45, %v1853_v53 }
 0x11f   : > { %v1537_v52 = vpop.f32.mrf.mxu0  ;;  %v1585_v54 = vpop.f32.mrf.mxu1 }
 0x120   : > { %v966_v55 = vmax.f32 %v934_v48, 0.0  ;;  %v982_v56 = vmax.f32 %v950_v49, 0.0  ;;  %v1538_v57 = vadd.f32 %v1537_v52, %v1536_v46  ;;  %v1586_v58 = vadd.f32 %v1585_v54, %v1584_v47 }
 0x121   : > { %v1539_v59 = vpop.f32.mrf.mxu0  ;;  %v1587_v60 = vpop.f32.mrf.mxu1 }
 0x122   : > { %v1417_v61 = vpack.c.bf16 %v966_v55, %v965_v50  ;;  %v1457_v62 = vpack.c.bf16 %v982_v56, %v981_v51  ;;  %v935_v63 = vadd.f32 %v1538_v57, %v1853_v53  ;;  %v951_v0 = vadd.f32 %v1586_v58, %v1853_v53 }
 0x123   : > { %v1540_v1 = vpop.f32.mrf.mxu0  ;;  %v1588_v2 = vpop.f32.mrf.mxu1 }
 0x124   : > { %1473 = vst [vmem:[%s1863_s8 + $0x28] sm:$0xff] %v1417_v61   ;;  %1481 = vst [vmem:[%s1863_s8 + $0x68] sm:$0xff] %v1457_v62   ;;  %v1541_v3 = vadd.f32 %v1540_v1, %v1539_v59  ;;  %v1589_v4 = vadd.f32 %v1588_v2, %v1587_v60  ;;  %v967_v9 = vmax.f32 %v935_v63, 0.0  ;;  %v983_v10 = vmax.f32 %v951_v0, 0.0 }
 0x125   : > { %v1542_v5 = vpop.f32.mrf.mxu0  ;;  %v1590_v6 = vpop.f32.mrf.mxu1 }
 0x126   : > { %v936_v7 = vadd.f32 %v1541_v3, %v1853_v53  ;;  %v952_v8 = vadd.f32 %v1589_v4, %v1853_v53 }
 0x127   : > { %v1543_v11 = vpop.f32.mrf.mxu0  ;;  %v1591_v12 = vpop.f32.mrf.mxu1 }
 0x128   : > { %v968_v13 = vmax.f32 %v936_v7, 0.0  ;;  %v984_v14 = vmax.f32 %v952_v8, 0.0  ;;  %v1544_v15 = vadd.f32 %v1543_v11, %v1542_v5  ;;  %v1592_v16 = vadd.f32 %v1591_v12, %v1590_v6 }
 0x129   : > { %v1545_v17 = vpop.f32.mrf.mxu0  ;;  %v1593_v18 = vpop.f32.mrf.mxu1 }
 0x12a   : > { %v1422_v19 = vpack.c.bf16 %v968_v13, %v967_v9  ;;  %v1462_v20 = vpack.c.bf16 %v984_v14, %v983_v10  ;;  %v937_v23 = vadd.f32 %v1544_v15, %v1853_v53  ;;  %v953_v24 = vadd.f32 %v1592_v16, %v1853_v53 }
 0x12b   : > { %v1546_v21 = vpop.f32.mrf.mxu0  ;;  %v1594_v22 = vpop.f32.mrf.mxu1 }
 0x12c   : > { %1474 = vst [vmem:[%s1863_s8 + $0x30] sm:$0xff] %v1422_v19   ;;  %1482 = vst [vmem:[%s1863_s8 + $0x70] sm:$0xff] %v1462_v20   ;;  %v1547_v25 = vadd.f32 %v1546_v21, %v1545_v17  ;;  %v1595_v26 = vadd.f32 %v1594_v22, %v1593_v18  ;;  %v969_v29 = vmax.f32 %v937_v23, 0.0  ;;  %v985_v30 = vmax.f32 %v953_v24, 0.0 }
 0x12e   : > { %v938_v27 = vadd.f32 %v1547_v25, %v1853_v53  ;;  %v954_v28 = vadd.f32 %v1595_v26, %v1853_v53 }
 0x130   : > { %v970_v31 = vmax.f32 %v938_v27, 0.0  ;;  %v986_v32 = vmax.f32 %v954_v28, 0.0 }
 0x132   : > { %v1427_v33 = vpack.c.bf16 %v970_v31, %v969_v29  ;;  %v1467_v34 = vpack.c.bf16 %v986_v32, %v985_v30 }
 0x134   : > { %1475 = vst [vmem:[%s1863_s8 + $0x38] sm:$0xff] %v1427_v33   ;;  %1483 = vst [vmem:[%s1863_s8 + $0x78] sm:$0xff] %v1467_v34  }
 0x135 PF: > { %s13_s14 = sadd.s32 1, %s1722_s14   ;;  %s1922_s12 = smov %s1718_s13 }
 0x136   : > { %p10_p5 = scmp.ge.s32.totalorder %s13_s14, 4   ;;  %s1923_s13 = smov %s1925_s15 }
 0x138   :  { %12 = sbr.rel (!%p10_p5) target bundleno = 2 (0x2), region = 76 }

// kernel: morphclr_dual_forward.45
= control target key start
LH: loop header
LB: loop body
LE: loop exit
PB: predicated region body
PF: predicated region fallthrough
CT: control target
= control target key end

     0   :  { %s1192_s12 = smov 0   ;;  %s1194_s13 = smov 0   ;;  %s1324_s0 = inlined_call_operand.vmem [shape: bf16[128,640], index: 0, kind: input, shape index: {}]   ;;  %s1325_s1 = inlined_call_operand.vmem [shape: bf16[640,128], index: 1, kind: input, shape index: {}]   ;;  %s1326_s2 = inlined_call_operand.vmem [shape: f32[1,128], index: 2, kind: input, shape index: {}]   ;;  %s1327_s3 = inlined_call_operand.vmem [shape: bf16[128,128], index: 3, kind: output, shape index: {}]  }
   0x1   :  { %s1196_s14 = smov 0   ;;  %s1198_s15 = smov 0  }
   0x2   :  { %s1200_s16 = smov 0  }
   0x3 LB: > { %s25_s17 = sadd.s32 1, %s1165_s15  ;;  %p48_p1 = scmp.ne.s32.totalorder %s1157_s13, %s1153_s12  ;;  %s1169_s16 = sphi %s1200_s16, %s13_s16   ;;  %s1165_s15 = sphi %s1198_s15, %s1331_s15   ;;  %s1161_s14 = sphi %s1196_s14, %s1330_s14   ;;  %s1157_s13 = sphi %s1194_s13, %s1329_s13   ;;  %s1153_s12 = sphi %s1192_s12, %s1328_s12  }
   0x4   : > { %p26_p0 = scmp.ge.s32.totalorder %s25_s17, 5  ;;  %p49_p2 = scmp.eq.s32.totalorder %s1169_s16, 0 }
   0x5   : > { %s41_s19 = sadd.s32 1, %s1157_s13  ;;  %p901_p5 = scmp.ge.s32.totalorder %s1169_s16, 5 }
   0x6   : > { %s1333_s17 = smov (%p26_p0, %s25_s17), 0  ;;  %p50_p3 = por %p49_p2, %p48_p1 }
   0x7   : > { %s37_s18 = ssub.s32 %s1165_s15, %s1333_s17  ;;  %162 = sbr.rel (%p901_p5) target bundleno = 26 (0x1a), region = 20 }
   0x8   : > { %p39_p4 = scmp.eq.s32.totalorder %s37_s18, 0 }
   0xa   : > { %s1227_s20 = scalar_select %p39_p4, %s1157_s13, %s41_s19  }
   0xc   : > { %165 = sbr.rel (!%p50_p3) target bundleno = 26 (0x1a), region = 24  ;;  %s167_s21 = sand.u32 (%p50_p3), 1, %s1157_s13  }
   0xd   : > { %s903_s22 = sshll.u32 (%p50_p3), %s1165_s15, 2  ;;  %s902_s23 = sshll.u32 (%p50_p3), %s167_s21, 6 }
   0xe   : > { %s1235_s26 = scalar_lea.vmem (%p50_p3), %s1324_s0, %s903_s22  ;;  %s169_s27 = scalar_lea.vmem (%p50_p3), [#allocation3], %s902_s23 }
   0xf   : > { %v191_v0 = vld [vmem:[%s1235_s26] sm:$0xf] (%p50_p3)  ;;  %v193_v1 = vld [vmem:[%s1235_s26 + $0x14] sm:$0xf] (%p50_p3)  ;;  %v195_v2 = vld [vmem:[%s1235_s26 + $0x28] sm:$0xf] (%p50_p3) }
  0x10   : > { %192 = vst [vmem:[%s169_s27] sm:$0xf] (%p50_p3), %v191_v0  ;;  %194 = vst [vmem:[%s169_s27 + $0x4] sm:$0xf] (%p50_p3), %v193_v1  ;;  %v197_v3 = vld [vmem:[%s1235_s26 + $0x3c] sm:$0xf] (%p50_p3) }
  0x11   : > { %v199_v4 = vld [vmem:[%s1235_s26 + $0x50] sm:$0xf]  ;;  %196 = vst [vmem:[%s169_s27 + $0x8] sm:$0xf] %v195_v2  ;;  %198 = vst [vmem:[%s169_s27 + $0xc] sm:$0xf] %v197_v3 }
  0x12   : > { %200 = vst [vmem:[%s169_s27 + $0x10] sm:$0xf] %v199_v4  ;;  %v201_v5 = vld [vmem:[%s1235_s26 + $0x64] sm:$0xf]  ;;  %v203_v6 = vld [vmem:[%s1235_s26 + $0x78] sm:$0xf] }
  0x13   : > { %v205_v7 = vld [vmem:[%s1235_s26 + $0x8c] sm:$0xf]  ;;  %202 = vst [vmem:[%s169_s27 + $0x14] sm:$0xf] %v201_v5  ;;  %204 = vst [vmem:[%s169_s27 + $0x18] sm:$0xf] %v203_v6 }
  0x14   : > { %206 = vst [vmem:[%s169_s27 + $0x1c] sm:$0xf] %v205_v7  ;;  %v207_v8 = vld [vmem:[%s1235_s26 + $0xa0] sm:$0xf]  ;;  %v209_v9 = vld [vmem:[%s1235_s26 + $0xb4] sm:$0xf] }
  0x15   : > { %v211_v10 = vld [vmem:[%s1235_s26 + $0xc8] sm:$0xf]  ;;  %208 = vst [vmem:[%s169_s27 + $0x20] sm:$0xf] %v207_v8  ;;  %210 = vst [vmem:[%s169_s27 + $0x24] sm:$0xf] %v209_v9 }
  0x16   : > { %212 = vst [vmem:[%s169_s27 + $0x28] sm:$0xf] %v211_v10  ;;  %v213_v11 = vld [vmem:[%s1235_s26 + $0xdc] sm:$0xf]  ;;  %v215_v12 = vld [vmem:[%s1235_s26 + $0xf0] sm:$0xf] }
  0x17   : > { %v217_v13 = vld [vmem:[%s1235_s26 + $0x104] sm:$0xf]  ;;  %214 = vst [vmem:[%s169_s27 + $0x2c] sm:$0xf] %v213_v11  ;;  %216 = vst [vmem:[%s169_s27 + $0x30] sm:$0xf] %v215_v12 }
  0x18   : > { %218 = vst [vmem:[%s169_s27 + $0x34] sm:$0xf] %v217_v13  ;;  %v219_v14 = vld [vmem:[%s1235_s26 + $0x118] sm:$0xf]  ;;  %v221_v15 = vld [vmem:[%s1235_s26 + $0x12c] sm:$0xf] }
  0x19   : > { %220 = vst [vmem:[%s169_s27 + $0x38] sm:$0xf] %v219_v14  ;;  %222 = vst [vmem:[%s169_s27 + $0x3c] sm:$0xf] %v221_v15 }
  0x1a PF: > { %p904_p6 = scmp.ge.s32.totalorder %s1169_s16, 1  ;;  %p289_p7 = scmp.lt.s32.totalorder %s1169_s16, 6 }
  0x1c   : > { %p290_p8 = pnand %p904_p6, %p289_p7 }
  0x1d   : > { %s296_s28 = sand.u32 (!%p290_p8), 1, %s1153_s12   ;;  %s906_s29 = sshll.u32 (!%p290_p8), %s1161_s14, 4 }
  0x1e   : > { %293 = sbr.rel (%p290_p8) target bundleno = 308 (0x134), region = 69  ;;  %s905_s30 = sshll.u32 (!%p290_p8), %s296_s28, 6 }
  0x1f   : > { %p335_p9 = scmp.lt.s32.totalorder (!%p290_p8), %s906_s29, 79  ;;  %s1262_s8 = scalar_lea.vmem (!%p290_p8), [#allocation3], %s905_s30 }
  0x20   : > { %p908_p10 = scmp.ne.s32.totalorder (!%p290_p8), %s1161_s14, 0 }
  0x23   : > { %s1335_s29 = smov (!%p335_p9, %s906_s29), 79  ;;  %359 = sbr.rel (%p908_p10) target bundleno = 49 (0x31), region = 77 }
  0x24   : > { %s907_s4 = sshll.u32 %s1335_s29, 2 }
  0x25   : > { %s1260_s7 = scalar_lea.vmem %s1325_s1, %s907_s4 }
  0x28   : > { %v1171_v16 = vmov 0.0  }
  0x29   : > { %360 = vst [vmem:[#allocation2 + $0x30] sm:$0xff] %v1171_v16  ;;  %361 = vst [vmem:[#allocation2] sm:$0xff] %v1171_v16 }
  0x2a   : > { %362 = vst [vmem:[#allocation2 + $0x58] sm:$0xff] %v1171_v16  ;;  %363 = vst [vmem:[#allocation2 + $0x18] sm:$0xff] %v1171_v16 }
  0x2b   : > { %364 = vst [vmem:[#allocation2 + $0x50] sm:$0xff] %v1171_v16  ;;  %365 = vst [vmem:[#allocation2 + $0x68] sm:$0xff] %v1171_v16 }
  0x2c   : > { %366 = vst [vmem:[#allocation2 + $0x8] sm:$0xff] %v1171_v16  ;;  %367 = vst [vmem:[#allocation2 + $0x48] sm:$0xff] %v1171_v16 }
  0x2d   : > { %368 = vst [vmem:[#allocation2 + $0x40] sm:$0xff] %v1171_v16  ;;  %369 = vst [vmem:[#allocation2 + $0x20] sm:$0xff] %v1171_v16 }
  0x2e   : > { %370 = vst [vmem:[#allocation2 + $0x10] sm:$0xff] %v1171_v16  ;;  %371 = vst [vmem:[#allocation2 + $0x38] sm:$0xff] %v1171_v16 }
  0x2f   : > { %372 = vst [vmem:[#allocation2 + $0x60] sm:$0xff] %v1171_v16  ;;  %373 = vst [vmem:[#allocation2 + $0x70] sm:$0xff] %v1171_v16 }
  0x30   : > { %374 = vst [vmem:[#allocation2 + $0x78] sm:$0xff] %v1171_v16  ;;  %375 = vst [vmem:[#allocation2 + $0x28] sm:$0xff] %v1171_v16 }
  0x31 PF: > { %v1115_v17 = vld [vmem:[%s1260_s7 + $0x38] sm:$0xff]   ;;  %v1116_v18 = vld [vmem:[%s1260_s7 + $0x30] sm:$0xff]   ;;  %v1117_v19 = vld [vmem:[%s1260_s7 + $0x28] sm:$0xff]   ;;  %p925_p11 = scmp.ne.s32.totalorder %s1161_s14, 4 }
  0x32   : > { %1026 = vmatprep.subr.bf16.mxu0 %v1115_v17  ;;  %1058 = vmatprep.subr.bf16.mxu1 %v1115_v17  ;;  %v1118_v20 = vld [vmem:[%s1260_s7 + $0x20] sm:$0xff]   ;;  %v1119_v23 = vld [vmem:[%s1260_s7 + $0x18] sm:$0xff]   ;;  %v1120_v24 = vld [vmem:[%s1260_s7 + $0x10] sm:$0xff]  }
  0x33   : > { %1027 = vmatpush3.bf16.msra.mxu0 %v1115_v17  ;;  %1066 = vmatpush3.bf16.msra.mxu1 %v1115_v17  ;;  %v1123_v21 = vld [vmem:[%s1262_s8] sm:$0xff]   ;;  %v1121_v25 = vld [vmem:[%s1260_s7 + $0x8] sm:$0xff]   ;;  %v1127_v29 = vld [vmem:[%s1262_s8 + $0x10] sm:$0xff]  }
  0x34   : > { %1028 = vmatprep.subr.bf16.mxu0 %v1116_v18  ;;  %1059 = vmatprep.subr.bf16.mxu1 %v1116_v18  ;;  %v1124_v22 = vld [vmem:[%s1262_s8 + $0x20] sm:$0xff]   ;;  %v1125_v27 = vld [vmem:[%s1262_s8 + $0x8] sm:$0xff]   ;;  %v1128_v30 = vld [vmem:[%s1262_s8 + $0x30] sm:$0xff]  }
  0x35   : > { %1042 = vmatprep.mubr.bf16.mxu0 %v1123_v21  ;;  %1050 = vmatprep.mubr.bf16.mxu1 %v1124_v22  ;;  %v1122_v26 = vld [vmem:[%s1260_s7] sm:$0xff]   ;;  %v1126_v28 = vld [vmem:[%s1262_s8 + $0x28] sm:$0xff]   ;;  %v1129_v31 = vld [vmem:[%s1262_s8 + $0x18] sm:$0xff]  }
  0x36   : > { %v1130_v32 = vld [vmem:[%s1262_s8 + $0x38] sm:$0xff]   ;;  %v386_v34 = vld [vmem:[#allocation2 + $0x10] sm:$0xff]  ;;  %v384_v38 = vld [vmem:[#allocation2 + $0x40] sm:$0xff] }
  0x37   : > { %1029 = vmatpush3.bf16.msra.mxu0 %v1116_v18  ;;  %1067 = vmatpush3.bf16.msra.mxu1 %v1116_v18  ;;  %v378_v33 = vld [vmem:[#allocation2 + $0x58] sm:$0xff]  ;;  %v376_v37 = vld [vmem:[#allocation2 + $0x30] sm:$0xff]  ;;  %v377_v49 = vld [vmem:[#allocation2] sm:$0xff] }
  0x38   : > { %1030 = vmatprep.subr.bf16.mxu0 %v1117_v19  ;;  %1060 = vmatprep.subr.bf16.mxu1 %v1117_v19  ;;  %v379_v43 = vld [vmem:[#allocation2 + $0x18] sm:$0xff]  ;;  %v385_v50 = vld [vmem:[#allocation2 + $0x20] sm:$0xff]  ;;  %v382_v55 = vld [vmem:[#allocation2 + $0x8] sm:$0xff] }
  0x39   : > { %v387_v44 = vld [vmem:[#allocation2 + $0x38] sm:$0xff]  ;;  %v380_v61 = vld [vmem:[#allocation2 + $0x50] sm:$0xff]  ;;  %v388_v62 = vld [vmem:[#allocation2 + $0x60] sm:$0xff] }
  0x3a   : > { %v390_v56 = vld [vmem:[#allocation2 + $0x78] sm:$0xff]  ;;  %v383_v3 = vld [vmem:[#allocation2 + $0x48] sm:$0xff]  ;;  %v389_v10 = vld [vmem:[#allocation2 + $0x70] sm:$0xff] }
  0x3b   : > { %1031 = vmatpush3.bf16.msra.mxu0 %v1117_v19  ;;  %1068 = vmatpush3.bf16.msra.mxu1 %v1117_v19  ;;  %v391_v4 = vld [vmem:[#allocation2 + $0x28] sm:$0xff] }
  0x3c   : > { %1032 = vmatprep.subr.bf16.mxu0 %v1118_v20  ;;  %1061 = vmatprep.subr.bf16.mxu1 %v1118_v20  ;;  %v381_v9 = vld [vmem:[#allocation2 + $0x68] sm:$0xff] }
  0x3f   : > { %1033 = vmatpush3.bf16.msra.mxu0 %v1118_v20  ;;  %1069 = vmatpush3.bf16.msra.mxu1 %v1118_v20 }
  0x40   : > { %1034 = vmatprep.subr.bf16.mxu0 %v1119_v23  ;;  %1062 = vmatprep.subr.bf16.mxu1 %v1119_v23 }
  0x43   : > { %1035 = vmatpush3.bf16.msra.mxu0 %v1119_v23  ;;  %1070 = vmatpush3.bf16.msra.mxu1 %v1119_v23 }
  0x44   : > { %1036 = vmatprep.subr.bf16.mxu0 %v1120_v24  ;;  %1063 = vmatprep.subr.bf16.mxu1 %v1120_v24 }
  0x47   : > { %1037 = vmatpush3.bf16.msra.mxu0 %v1120_v24  ;;  %1071 = vmatpush3.bf16.msra.mxu1 %v1120_v24 }
  0x48   : > { %1038 = vmatprep.subr.bf16.mxu0 %v1121_v25  ;;  %1064 = vmatprep.subr.bf16.mxu1 %v1121_v25 }
  0x4b   : > { %1039 = vmatpush3.bf16.msra.mxu0 %v1121_v25  ;;  %1072 = vmatpush3.bf16.msra.mxu1 %v1121_v25 }
  0x4c   : > { %1040 = vmatprep.subr.bf16.mxu0 %v1122_v26  ;;  %1065 = vmatprep.subr.bf16.mxu1 %v1122_v26 }
  0x4f   : > { %1041 = vmatpush3.bf16.msra.mxu0 %v1122_v26  ;;  %1073 = vmatpush3.bf16.msra.mxu1 %v1122_v26 }
  0x52   : > { %1043 = vmatmul.mubr.bf16.vlgmr.msra.gmra.mxu0 %v1125_v27  ;;  %1051 = vmatmul.mubr.bf16.vlgmr.msra.gmra.mxu1 %v1126_v28 }
  0x53   : > { %1046 = vmatprep.mubr.bf16.mxu0 %v1127_v29  ;;  %1054 = vmatprep.mubr.bf16.mxu1 %v1128_v30 }
  0x5a   : > { %1047 = vmatmul.mubr.bf16.gmra.mxu0 %v1129_v31  ;;  %1055 = vmatmul.mubr.bf16.gmra.mxu1 %v1130_v32 }
 0x112   : > { %v1044_v35 = vpop.f32.mrf.mxu0  ;;  %v1052_v36 = vpop.f32.mrf.mxu1 }
 0x113   : > { %v619_v39 = vadd.f32 %v1044_v35, %v378_v33  ;;  %v627_v40 = vadd.f32 %v1052_v36, %v386_v34 }
 0x114   : > { %v554_v41 = vpop.f32.mrf.mxu0  ;;  %v586_v42 = vpop.f32.mrf.mxu1 }
 0x115   : > { %635 = vst [vmem:[#allocation2 + $0x58] sm:$0xff] %v619_v39  ;;  %643 = vst [vmem:[#allocation2 + $0x10] sm:$0xff] %v627_v40  ;;  %v617_v45 = vadd.f32 %v554_v41, %v376_v37  ;;  %v625_v46 = vadd.f32 %v586_v42, %v384_v38 }
 0x116   : > { %v1045_v47 = vpop.f32.mrf.mxu0  ;;  %v1053_v48 = vpop.f32.mrf.mxu1 }
 0x117   : > { %633 = vst [vmem:[#allocation2 + $0x30] sm:$0xff] %v617_v45  ;;  %641 = vst [vmem:[#allocation2 + $0x40] sm:$0xff] %v625_v46  ;;  %v620_v51 = vadd.f32 %v1045_v47, %v379_v43  ;;  %v628_v52 = vadd.f32 %v1053_v48, %v387_v44 }
 0x118   : > { %v557_v53 = vpop.f32.mrf.mxu0  ;;  %v589_v54 = vpop.f32.mrf.mxu1 }
 0x119   : > { %636 = vst [vmem:[#allocation2 + $0x18] sm:$0xff] %v620_v51  ;;  %644 = vst [vmem:[#allocation2 + $0x38] sm:$0xff] %v628_v52  ;;  %v618_v57 = vadd.f32 %v557_v53, %v377_v49  ;;  %v626_v58 = vadd.f32 %v589_v54, %v385_v50 }
 0x11a   : > { %v1048_v59 = vpop.f32.mrf.mxu0  ;;  %v1056_v60 = vpop.f32.mrf.mxu1 }
 0x11b   : > { %634 = vst [vmem:[#allocation2] sm:$0xff] %v618_v57  ;;  %642 = vst [vmem:[#allocation2 + $0x20] sm:$0xff] %v626_v58  ;;  %v623_v63 = vadd.f32 %v1048_v59, %v382_v55  ;;  %v631_v0 = vadd.f32 %v1056_v60, %v390_v56 }
 0x11c   : > { %v570_v1 = vpop.f32.mrf.mxu0  ;;  %v602_v2 = vpop.f32.mrf.mxu1 }
 0x11d   : > { %639 = vst [vmem:[#allocation2 + $0x8] sm:$0xff] %v623_v63  ;;  %647 = vst [vmem:[#allocation2 + $0x78] sm:$0xff] %v631_v0  ;;  %v621_v5 = vadd.f32 %v570_v1, %v380_v61  ;;  %v629_v6 = vadd.f32 %v602_v2, %v388_v62 }
 0x11e   : > { %v1049_v7 = vpop.f32.mrf.mxu0  ;;  %v1057_v8 = vpop.f32.mrf.mxu1 }
 0x11f   : > { %637 = vst [vmem:[#allocation2 + $0x50] sm:$0xff] %v621_v5  ;;  %645 = vst [vmem:[#allocation2 + $0x60] sm:$0xff] %v629_v6  ;;  %v624_v11 = vadd.f32 %v1049_v7, %v383_v3  ;;  %v632_v12 = vadd.f32 %v1057_v8, %v391_v4  ;;  %652 = sbr.rel (%p925_p11) target bundleno = 308 (0x134), region = 81 }
 0x120   : > { %v573_v13 = vpop.f32.mrf.mxu0  ;;  %v605_v14 = vpop.f32.mrf.mxu1 }
 0x121   : > { %640 = vst [vmem:[#allocation2 + $0x48] sm:$0xff] %v624_v11  ;;  %648 = vst [vmem:[#allocation2 + $0x28] sm:$0xff] %v632_v12  ;;  %v622_v15 = vadd.f32 %v573_v13, %v381_v9  ;;  %v630_v16 = vadd.f32 %v605_v14, %v389_v10 }
 0x123   : > { %638 = vst [vmem:[#allocation2 + $0x68] sm:$0xff] %v622_v15  ;;  %646 = vst [vmem:[#allocation2 + $0x70] sm:$0xff] %v630_v16 }
 0x124   : > { %v653_v17 = vld [vmem:[#allocation2 + $0x30] sm:$0xff]  ;;  %v654_v18 = vld [vmem:[#allocation2] sm:$0xff]  ;;  %v655_v22 = vld [vmem:[#allocation2 + $0x58] sm:$0xff] }
 0x125   : > { %v926_v19 = vld [vmem:[%s1326_s2] ss:$0 sm:$0xff]  ;;  %v656_v23 = vld [vmem:[#allocation2 + $0x18] sm:$0xff]  ;;  %v659_v29 = vld [vmem:[#allocation2 + $0x8] sm:$0xff] }
 0x126   : > { %v676_v20 = vadd.f32 %v926_v19, %v653_v17  ;;  %v677_v21 = vadd.f32 %v926_v19, %v654_v18  ;;  %v657_v24 = vld [vmem:[#allocation2 + $0x50] sm:$0xff]  ;;  %v678_v25 = vadd.f32 %v926_v19, %v655_v22  ;;  %v679_v26 = vadd.f32 %v926_v19, %v656_v23  ;;  %v661_v35 = vld [vmem:[#allocation2 + $0x40] sm:$0xff]  ;;  %v664_v42 = vld [vmem:[#allocation2 + $0x38] sm:$0xff] }
 0x127   : > { %v680_v28 = vadd.f32 %v926_v19, %v657_v24  ;;  %v682_v34 = vadd.f32 %v926_v19, %v659_v29  ;;  %v662_v36 = vld [vmem:[#allocation2 + $0x20] sm:$0xff]  ;;  %v663_v37 = vld [vmem:[#allocation2 + $0x10] sm:$0xff]  ;;  %v684_v47 = vadd.f32 %v926_v19, %v661_v35  ;;  %v667_v53 = vld [vmem:[#allocation2 + $0x78] sm:$0xff]  ;;  %v687_v57 = vadd.f32 %v926_v19, %v664_v42 }
 0x128   : > { %v660_v30 = vld [vmem:[#allocation2 + $0x48] sm:$0xff]  ;;  %v692_v31 = vmax.f32 %v676_v20, 0.0  ;;  %v693_v32 = vmax.f32 %v677_v21, 0.0  ;;  %v694_v38 = vmax.f32 %v678_v25, 0.0  ;;  %v695_v39 = vmax.f32 %v679_v26, 0.0  ;;  %v665_v43 = vld [vmem:[#allocation2 + $0x60] sm:$0xff] }
 0x129   : > { %v696_v40 = vmax.f32 %v680_v28, 0.0  ;;  %v683_v41 = vadd.f32 %v926_v19, %v660_v30  ;;  %v698_v46 = vmax.f32 %v682_v34, 0.0  ;;  %v685_v51 = vadd.f32 %v926_v19, %v662_v36  ;;  %v668_v54 = vld [vmem:[#allocation2 + $0x28] sm:$0xff] }
 0x12a   : > { %v658_v27 = vld [vmem:[#allocation2 + $0x68] sm:$0xff]  ;;  %v966_v44 = vpack.c.bf16 %v693_v32, %v692_v31  ;;  %v666_v48 = vld [vmem:[#allocation2 + $0x70] sm:$0xff]  ;;  %v971_v49 = vpack.c.bf16 %v695_v39, %v694_v38  ;;  %v686_v52 = vadd.f32 %v926_v19, %v663_v37  ;;  %v700_v56 = vmax.f32 %v684_v47, 0.0 }
 0x12b   : > { %v681_v33 = vadd.f32 %v926_v19, %v658_v27  ;;  %v699_v50 = vmax.f32 %v683_v41, 0.0  ;;  %v688_v58 = vadd.f32 %v926_v19, %v665_v43  ;;  %v701_v60 = vmax.f32 %v685_v51, 0.0 }
 0x12c   : > { %967 = vst [vmem:[%s1327_s3] sm:$0xff] %v966_v44   ;;  %1003 = vst [vmem:[%s1327_s3 + $0x8] sm:$0xff] %v971_v49   ;;  %v702_v61 = vmax.f32 %v686_v52, 0.0  ;;  %v689_v62 = vadd.f32 %v926_v19, %v666_v48  ;;  %v703_v63 = vmax.f32 %v687_v57, 0.0  ;;  %v690_v1 = vadd.f32 %v926_v19, %v667_v53 }
 0x12d   : > { %v697_v45 = vmax.f32 %v681_v33, 0.0  ;;  %v981_v59 = vpack.c.bf16 %v699_v50, %v698_v46  ;;  %v704_v0 = vmax.f32 %v688_v58, 0.0  ;;  %v691_v2 = vadd.f32 %v926_v19, %v668_v54 }
 0x12e   : > { %v986_v3 = vpack.c.bf16 %v701_v60, %v700_v56  ;;  %v705_v4 = vmax.f32 %v689_v62, 0.0  ;;  %v991_v5 = vpack.c.bf16 %v703_v63, %v702_v61  ;;  %v706_v6 = vmax.f32 %v690_v1, 0.0 }
 0x12f   : > { %v976_v55 = vpack.c.bf16 %v697_v45, %v696_v40  ;;  %1005 = vst [vmem:[%s1327_s3 + $0x18] sm:$0xff] %v981_v59   ;;  %v707_v7 = vmax.f32 %v691_v2, 0.0 }
 0x130   : > { %1006 = vst [vmem:[%s1327_s3 + $0x20] sm:$0xff] %v986_v3   ;;  %v996_v8 = vpack.c.bf16 %v705_v4, %v704_v0  ;;  %1007 = vst [vmem:[%s1327_s3 + $0x28] sm:$0xff] %v991_v5  }
 0x131   : > { %1004 = vst [vmem:[%s1327_s3 + $0x10] sm:$0xff] %v976_v55   ;;  %v1001_v9 = vpack.c.bf16 %v707_v7, %v706_v6 }
 0x132   : > { %1008 = vst [vmem:[%s1327_s3 + $0x30] sm:$0xff] %v996_v8  }
 0x133   : > { %1009 = vst [vmem:[%s1327_s3 + $0x38] sm:$0xff] %v1001_v9  }
 0x134 PF: > { %s13_s16 = sadd.s32 1, %s1169_s16   ;;  %s1328_s12 = smov %s1157_s13 }
 0x135   : > { %p10_p12 = scmp.ge.s32.totalorder %s13_s16, 7   ;;  %s1329_s13 = smov %s1227_s20 }
 0x136   : > { %s1330_s14 = smov %s1165_s15  ;;  %s1331_s15 = smov %s1333_s17 }
 0x137   :  { %12 = sbr.rel (!%p10_p12) target bundleno = 3 (0x3), region = 122 }

// kernel: morphclr_dual_forward.46
= control target key start
LH: loop header
LB: loop body
LE: loop exit
PB: predicated region body
PF: predicated region fallthrough
CT: control target
= control target key end

     0   :  { %s1363_s15 = smov 0   ;;  %s1365_s16 = smov 0   ;;  %s1537_s0 = inlined_call_operand.vmem [shape: bf16[128,640], index: 0, kind: input, shape index: {}]   ;;  %s1538_s1 = inlined_call_operand.vmem [shape: bf16[640,128], index: 1, kind: input, shape index: {}]   ;;  %s1539_s2 = inlined_call_operand.vmem [shape: f32[1,128], index: 2, kind: input, shape index: {}]   ;;  %s1540_s3 = inlined_call_operand.vmem [shape: bf16[128,128], index: 3, kind: input, shape index: {}]   ;;  %s1541_s4 = inlined_call_operand.vmem [shape: bf16[128,128], index: 4, kind: output, shape index: {}]  }
   0x1   :  { %s1367_s17 = smov 0   ;;  %s1369_s18 = smov 0  }
   0x2   :  { %s1371_s19 = smov 0  }
   0x3 LB: > { %s26_s20 = sadd.s32 1, %s1331_s18  ;;  %p49_p1 = scmp.ne.s32.totalorder %s1323_s16, %s1319_s15  ;;  %s1335_s19 = sphi %s1371_s19, %s14_s19   ;;  %s1331_s18 = sphi %s1369_s18, %s1545_s18   ;;  %s1327_s17 = sphi %s1367_s17, %s1544_s17   ;;  %s1323_s16 = sphi %s1365_s16, %s1543_s16   ;;  %s1319_s15 = sphi %s1363_s15, %s1542_s15  }
   0x4   : > { %p27_p0 = scmp.ge.s32.totalorder %s26_s20, 5  ;;  %p50_p2 = scmp.eq.s32.totalorder %s1335_s19, 0 }
   0x5   : > { %s42_s22 = sadd.s32 1, %s1323_s16  ;;  %p1028_p5 = scmp.ge.s32.totalorder %s1335_s19, 5 }
   0x6   : > { %s1547_s20 = smov (%p27_p0, %s26_s20), 0  ;;  %p51_p3 = por %p50_p2, %p49_p1 }
   0x7   : > { %s38_s21 = ssub.s32 %s1331_s18, %s1547_s20  ;;  %203 = sbr.rel (%p1028_p5) target bundleno = 26 (0x1a), region = 24 }
   0x8   : > { %p40_p4 = scmp.eq.s32.totalorder %s38_s21, 0 }
   0xa   : > { %s1398_s23 = scalar_select %p40_p4, %s1323_s16, %s42_s22  }
   0xc   : > { %206 = sbr.rel (!%p51_p3) target bundleno = 26 (0x1a), region = 28  ;;  %s208_s24 = sand.u32 (%p51_p3), 1, %s1323_s16  }
   0xd   : > { %s1030_s25 = sshll.u32 (%p51_p3), %s1331_s18, 2  ;;  %s1029_s26 = sshll.u32 (%p51_p3), %s208_s24, 6 }
   0xe   : > { %s1406_s29 = scalar_lea.vmem (%p51_p3), %s1537_s0, %s1030_s25  ;;  %s210_s30 = scalar_lea.vmem (%p51_p3), [#allocation3], %s1029_s26 }
   0xf   : > { %v232_v0 = vld [vmem:[%s1406_s29] sm:$0xf] (%p51_p3)  ;;  %v234_v1 = vld [vmem:[%s1406_s29 + $0x14] sm:$0xf] (%p51_p3)  ;;  %v236_v2 = vld [vmem:[%s1406_s29 + $0x28] sm:$0xf] (%p51_p3) }
  0x10   : > { %233 = vst [vmem:[%s210_s30] sm:$0xf] (%p51_p3), %v232_v0  ;;  %235 = vst [vmem:[%s210_s30 + $0x4] sm:$0xf] (%p51_p3), %v234_v1  ;;  %v238_v3 = vld [vmem:[%s1406_s29 + $0x3c] sm:$0xf] (%p51_p3) }
  0x11   : > { %v240_v4 = vld [vmem:[%s1406_s29 + $0x50] sm:$0xf]  ;;  %237 = vst [vmem:[%s210_s30 + $0x8] sm:$0xf] %v236_v2  ;;  %239 = vst [vmem:[%s210_s30 + $0xc] sm:$0xf] %v238_v3 }
  0x12   : > { %241 = vst [vmem:[%s210_s30 + $0x10] sm:$0xf] %v240_v4  ;;  %v242_v5 = vld [vmem:[%s1406_s29 + $0x64] sm:$0xf]  ;;  %v244_v6 = vld [vmem:[%s1406_s29 + $0x78] sm:$0xf] }
  0x13   : > { %v246_v7 = vld [vmem:[%s1406_s29 + $0x8c] sm:$0xf]  ;;  %243 = vst [vmem:[%s210_s30 + $0x14] sm:$0xf] %v242_v5  ;;  %245 = vst [vmem:[%s210_s30 + $0x18] sm:$0xf] %v244_v6 }
  0x14   : > { %247 = vst [vmem:[%s210_s30 + $0x1c] sm:$0xf] %v246_v7  ;;  %v248_v8 = vld [vmem:[%s1406_s29 + $0xa0] sm:$0xf]  ;;  %v250_v9 = vld [vmem:[%s1406_s29 + $0xb4] sm:$0xf] }
  0x15   : > { %v252_v10 = vld [vmem:[%s1406_s29 + $0xc8] sm:$0xf]  ;;  %249 = vst [vmem:[%s210_s30 + $0x20] sm:$0xf] %v248_v8  ;;  %251 = vst [vmem:[%s210_s30 + $0x24] sm:$0xf] %v250_v9 }
  0x16   : > { %253 = vst [vmem:[%s210_s30 + $0x28] sm:$0xf] %v252_v10  ;;  %v254_v11 = vld [vmem:[%s1406_s29 + $0xdc] sm:$0xf]  ;;  %v256_v12 = vld [vmem:[%s1406_s29 + $0xf0] sm:$0xf] }
  0x17   : > { %v258_v13 = vld [vmem:[%s1406_s29 + $0x104] sm:$0xf]  ;;  %255 = vst [vmem:[%s210_s30 + $0x2c] sm:$0xf] %v254_v11  ;;  %257 = vst [vmem:[%s210_s30 + $0x30] sm:$0xf] %v256_v12 }
  0x18   : > { %259 = vst [vmem:[%s210_s30 + $0x34] sm:$0xf] %v258_v13  ;;  %v260_v14 = vld [vmem:[%s1406_s29 + $0x118] sm:$0xf]  ;;  %v262_v15 = vld [vmem:[%s1406_s29 + $0x12c] sm:$0xf] }
  0x19   : > { %261 = vst [vmem:[%s210_s30 + $0x38] sm:$0xf] %v260_v14  ;;  %263 = vst [vmem:[%s210_s30 + $0x3c] sm:$0xf] %v262_v15 }
  0x1a PF: > { %p1031_p6 = scmp.ge.s32.totalorder %s1335_s19, 1  ;;  %p330_p7 = scmp.lt.s32.totalorder %s1335_s19, 6 }
  0x1c   : > { %p331_p8 = pnand %p1031_p6, %p330_p7 }
  0x1d   : > { %s337_s5 = sand.u32 (!%p331_p8), 1, %s1319_s15   ;;  %s1033_s6 = sshll.u32 (!%p331_p8), %s1327_s17, 4 }
  0x1e   : > { %334 = sbr.rel (%p331_p8) target bundleno = 318 (0x13e), region = 73  ;;  %s1032_s7 = sshll.u32 (!%p331_p8), %s337_s5, 6 }
  0x1f   : > { %p386_p9 = scmp.lt.s32.totalorder (!%p331_p8), %s1033_s6, 79  ;;  %s1433_s12 = scalar_lea.vmem (!%p331_p8), [#allocation3], %s1032_s7 }
  0x20   : > { %p1035_p10 = scmp.ne.s32.totalorder (!%p331_p8), %s1327_s17, 0 }
  0x23   : > { %s1549_s6 = smov (!%p386_p9, %s1033_s6), 79  ;;  %419 = sbr.rel (%p1035_p10) target bundleno = 49 (0x31), region = 81 }
  0x24   : > { %s1034_s8 = sshll.u32 %s1549_s6, 2 }
  0x25   : > { %s1431_s11 = scalar_lea.vmem %s1538_s1, %s1034_s8 }
  0x28   : > { %v1337_v16 = vmov 0.0  }
  0x29   : > { %420 = vst [vmem:[#allocation2 + $0x30] sm:$0xff] %v1337_v16  ;;  %421 = vst [vmem:[#allocation2] sm:$0xff] %v1337_v16 }
  0x2a   : > { %422 = vst [vmem:[#allocation2 + $0x58] sm:$0xff] %v1337_v16  ;;  %423 = vst [vmem:[#allocation2 + $0x18] sm:$0xff] %v1337_v16 }
  0x2b   : > { %424 = vst [vmem:[#allocation2 + $0x50] sm:$0xff] %v1337_v16  ;;  %425 = vst [vmem:[#allocation2 + $0x68] sm:$0xff] %v1337_v16 }
  0x2c   : > { %426 = vst [vmem:[#allocation2 + $0x8] sm:$0xff] %v1337_v16  ;;  %427 = vst [vmem:[#allocation2 + $0x48] sm:$0xff] %v1337_v16 }
  0x2d   : > { %428 = vst [vmem:[#allocation2 + $0x40] sm:$0xff] %v1337_v16  ;;  %429 = vst [vmem:[#allocation2 + $0x20] sm:$0xff] %v1337_v16 }
  0x2e   : > { %430 = vst [vmem:[#allocation2 + $0x10] sm:$0xff] %v1337_v16  ;;  %431 = vst [vmem:[#allocation2 + $0x38] sm:$0xff] %v1337_v16 }
  0x2f   : > { %432 = vst [vmem:[#allocation2 + $0x60] sm:$0xff] %v1337_v16  ;;  %433 = vst [vmem:[#allocation2 + $0x70] sm:$0xff] %v1337_v16 }
  0x30   : > { %434 = vst [vmem:[#allocation2 + $0x78] sm:$0xff] %v1337_v16  ;;  %435 = vst [vmem:[#allocation2 + $0x28] sm:$0xff] %v1337_v16 }
  0x31 PF: > { %v1281_v17 = vld [vmem:[%s1431_s11 + $0x38] sm:$0xff]   ;;  %v1282_v18 = vld [vmem:[%s1431_s11 + $0x30] sm:$0xff]   ;;  %v1283_v19 = vld [vmem:[%s1431_s11 + $0x28] sm:$0xff]   ;;  %p1052_p11 = scmp.ne.s32.totalorder %s1327_s17, 4 }
  0x32   : > { %1192 = vmatprep.subr.bf16.mxu0 %v1281_v17  ;;  %1224 = vmatprep.subr.bf16.mxu1 %v1281_v17  ;;  %v1284_v20 = vld [vmem:[%s1431_s11 + $0x20] sm:$0xff]   ;;  %v1285_v23 = vld [vmem:[%s1431_s11 + $0x18] sm:$0xff]   ;;  %v1286_v24 = vld [vmem:[%s1431_s11 + $0x10] sm:$0xff]  }
  0x33   : > { %1193 = vmatpush3.bf16.msra.mxu0 %v1281_v17  ;;  %1232 = vmatpush3.bf16.msra.mxu1 %v1281_v17  ;;  %v1289_v21 = vld [vmem:[%s1433_s12] sm:$0xff]   ;;  %v1287_v25 = vld [vmem:[%s1431_s11 + $0x8] sm:$0xff]   ;;  %v1293_v29 = vld [vmem:[%s1433_s12 + $0x10] sm:$0xff]  }
  0x34   : > { %1194 = vmatprep.subr.bf16.mxu0 %v1282_v18  ;;  %1225 = vmatprep.subr.bf16.mxu1 %v1282_v18  ;;  %v1290_v22 = vld [vmem:[%s1433_s12 + $0x20] sm:$0xff]   ;;  %v1291_v27 = vld [vmem:[%s1433_s12 + $0x8] sm:$0xff]   ;;  %v1294_v30 = vld [vmem:[%s1433_s12 + $0x30] sm:$0xff]  }
  0x35   : > { %1208 = vmatprep.mubr.bf16.mxu0 %v1289_v21  ;;  %1216 = vmatprep.mubr.bf16.mxu1 %v1290_v22  ;;  %v1288_v26 = vld [vmem:[%s1431_s11] sm:$0xff]   ;;  %v1292_v28 = vld [vmem:[%s1433_s12 + $0x28] sm:$0xff]   ;;  %v1295_v31 = vld [vmem:[%s1433_s12 + $0x18] sm:$0xff]  }
  0x36   : > { %v1296_v32 = vld [vmem:[%s1433_s12 + $0x38] sm:$0xff]   ;;  %v446_v34 = vld [vmem:[#allocation2 + $0x10] sm:$0xff]  ;;  %v444_v38 = vld [vmem:[#allocation2 + $0x40] sm:$0xff] }
  0x37   : > { %1195 = vmatpush3.bf16.msra.mxu0 %v1282_v18  ;;  %1233 = vmatpush3.bf16.msra.mxu1 %v1282_v18  ;;  %v438_v33 = vld [vmem:[#allocation2 + $0x58] sm:$0xff]  ;;  %v436_v37 = vld [vmem:[#allocation2 + $0x30] sm:$0xff]  ;;  %v437_v49 = vld [vmem:[#allocation2] sm:$0xff] }
  0x38   : > { %1196 = vmatprep.subr.bf16.mxu0 %v1283_v19  ;;  %1226 = vmatprep.subr.bf16.mxu1 %v1283_v19  ;;  %v439_v43 = vld [vmem:[#allocation2 + $0x18] sm:$0xff]  ;;  %v445_v50 = vld [vmem:[#allocation2 + $0x20] sm:$0xff]  ;;  %v442_v55 = vld [vmem:[#allocation2 + $0x8] sm:$0xff] }
  0x39   : > { %v447_v44 = vld [vmem:[#allocation2 + $0x38] sm:$0xff]  ;;  %v440_v61 = vld [vmem:[#allocation2 + $0x50] sm:$0xff]  ;;  %v448_v62 = vld [vmem:[#allocation2 + $0x60] sm:$0xff] }
  0x3a   : > { %v450_v56 = vld [vmem:[#allocation2 + $0x78] sm:$0xff]  ;;  %v443_v3 = vld [vmem:[#allocation2 + $0x48] sm:$0xff]  ;;  %v449_v10 = vld [vmem:[#allocation2 + $0x70] sm:$0xff] }
  0x3b   : > { %1197 = vmatpush3.bf16.msra.mxu0 %v1283_v19  ;;  %1234 = vmatpush3.bf16.msra.mxu1 %v1283_v19  ;;  %v451_v4 = vld [vmem:[#allocation2 + $0x28] sm:$0xff] }
  0x3c   : > { %1198 = vmatprep.subr.bf16.mxu0 %v1284_v20  ;;  %1227 = vmatprep.subr.bf16.mxu1 %v1284_v20  ;;  %v441_v9 = vld [vmem:[#allocation2 + $0x68] sm:$0xff] }
  0x3f   : > { %1199 = vmatpush3.bf16.msra.mxu0 %v1284_v20  ;;  %1235 = vmatpush3.bf16.msra.mxu1 %v1284_v20 }
  0x40   : > { %1200 = vmatprep.subr.bf16.mxu0 %v1285_v23  ;;  %1228 = vmatprep.subr.bf16.mxu1 %v1285_v23 }
  0x43   : > { %1201 = vmatpush3.bf16.msra.mxu0 %v1285_v23  ;;  %1236 = vmatpush3.bf16.msra.mxu1 %v1285_v23 }
  0x44   : > { %1202 = vmatprep.subr.bf16.mxu0 %v1286_v24  ;;  %1229 = vmatprep.subr.bf16.mxu1 %v1286_v24 }
  0x47   : > { %1203 = vmatpush3.bf16.msra.mxu0 %v1286_v24  ;;  %1237 = vmatpush3.bf16.msra.mxu1 %v1286_v24 }
  0x48   : > { %1204 = vmatprep.subr.bf16.mxu0 %v1287_v25  ;;  %1230 = vmatprep.subr.bf16.mxu1 %v1287_v25 }
  0x4b   : > { %1205 = vmatpush3.bf16.msra.mxu0 %v1287_v25  ;;  %1238 = vmatpush3.bf16.msra.mxu1 %v1287_v25 }
  0x4c   : > { %1206 = vmatprep.subr.bf16.mxu0 %v1288_v26  ;;  %1231 = vmatprep.subr.bf16.mxu1 %v1288_v26 }
  0x4f   : > { %1207 = vmatpush3.bf16.msra.mxu0 %v1288_v26  ;;  %1239 = vmatpush3.bf16.msra.mxu1 %v1288_v26 }
  0x52   : > { %1209 = vmatmul.mubr.bf16.vlgmr.msra.gmra.mxu0 %v1291_v27  ;;  %1217 = vmatmul.mubr.bf16.vlgmr.msra.gmra.mxu1 %v1292_v28 }
  0x53   : > { %1212 = vmatprep.mubr.bf16.mxu0 %v1293_v29  ;;  %1220 = vmatprep.mubr.bf16.mxu1 %v1294_v30 }
  0x5a   : > { %1213 = vmatmul.mubr.bf16.gmra.mxu0 %v1295_v31  ;;  %1221 = vmatmul.mubr.bf16.gmra.mxu1 %v1296_v32 }
 0x112   : > { %v1210_v35 = vpop.f32.mrf.mxu0  ;;  %v1218_v36 = vpop.f32.mrf.mxu1 }
 0x113   : > { %v679_v39 = vadd.f32 %v1210_v35, %v438_v33  ;;  %v687_v40 = vadd.f32 %v1218_v36, %v446_v34 }
 0x114   : > { %v614_v41 = vpop.f32.mrf.mxu0  ;;  %v646_v42 = vpop.f32.mrf.mxu1 }
 0x115   : > { %695 = vst [vmem:[#allocation2 + $0x58] sm:$0xff] %v679_v39  ;;  %703 = vst [vmem:[#allocation2 + $0x10] sm:$0xff] %v687_v40  ;;  %v677_v45 = vadd.f32 %v614_v41, %v436_v37  ;;  %v685_v46 = vadd.f32 %v646_v42, %v444_v38 }
 0x116   : > { %v1211_v47 = vpop.f32.mrf.mxu0  ;;  %v1219_v48 = vpop.f32.mrf.mxu1 }
 0x117   : > { %693 = vst [vmem:[#allocation2 + $0x30] sm:$0xff] %v677_v45  ;;  %701 = vst [vmem:[#allocation2 + $0x40] sm:$0xff] %v685_v46  ;;  %v680_v51 = vadd.f32 %v1211_v47, %v439_v43  ;;  %v688_v52 = vadd.f32 %v1219_v48, %v447_v44 }
 0x118   : > { %v617_v53 = vpop.f32.mrf.mxu0  ;;  %v649_v54 = vpop.f32.mrf.mxu1 }
 0x119   : > { %696 = vst [vmem:[#allocation2 + $0x18] sm:$0xff] %v680_v51  ;;  %704 = vst [vmem:[#allocation2 + $0x38] sm:$0xff] %v688_v52  ;;  %v678_v57 = vadd.f32 %v617_v53, %v437_v49  ;;  %v686_v58 = vadd.f32 %v649_v54, %v445_v50 }
 0x11a   : > { %v1214_v59 = vpop.f32.mrf.mxu0  ;;  %v1222_v60 = vpop.f32.mrf.mxu1 }
 0x11b   : > { %694 = vst [vmem:[#allocation2] sm:$0xff] %v678_v57  ;;  %702 = vst [vmem:[#allocation2 + $0x20] sm:$0xff] %v686_v58  ;;  %v683_v63 = vadd.f32 %v1214_v59, %v442_v55  ;;  %v691_v0 = vadd.f32 %v1222_v60, %v450_v56 }
 0x11c   : > { %v630_v1 = vpop.f32.mrf.mxu0  ;;  %v662_v2 = vpop.f32.mrf.mxu1 }
 0x11d   : > { %699 = vst [vmem:[#allocation2 + $0x8] sm:$0xff] %v683_v63  ;;  %707 = vst [vmem:[#allocation2 + $0x78] sm:$0xff] %v691_v0  ;;  %v681_v5 = vadd.f32 %v630_v1, %v440_v61  ;;  %v689_v6 = vadd.f32 %v662_v2, %v448_v62 }
 0x11e   : > { %v1215_v7 = vpop.f32.mrf.mxu0  ;;  %v1223_v8 = vpop.f32.mrf.mxu1 }
 0x11f   : > { %697 = vst [vmem:[#allocation2 + $0x50] sm:$0xff] %v681_v5  ;;  %705 = vst [vmem:[#allocation2 + $0x60] sm:$0xff] %v689_v6  ;;  %v684_v11 = vadd.f32 %v1215_v7, %v443_v3  ;;  %v692_v12 = vadd.f32 %v1223_v8, %v451_v4  ;;  %712 = sbr.rel (%p1052_p11) target bundleno = 318 (0x13e), region = 85 }
 0x120   : > { %v633_v13 = vpop.f32.mrf.mxu0  ;;  %v665_v14 = vpop.f32.mrf.mxu1 }
 0x121   : > { %700 = vst [vmem:[#allocation2 + $0x48] sm:$0xff] %v684_v11  ;;  %708 = vst [vmem:[#allocation2 + $0x28] sm:$0xff] %v692_v12  ;;  %v682_v15 = vadd.f32 %v633_v13, %v441_v9  ;;  %v690_v16 = vadd.f32 %v665_v14, %v449_v10 }
 0x123   : > { %698 = vst [vmem:[#allocation2 + $0x68] sm:$0xff] %v682_v15  ;;  %706 = vst [vmem:[#allocation2 + $0x70] sm:$0xff] %v690_v16 }
 0x124   : > { %v713_v17 = vld [vmem:[#allocation2 + $0x30] sm:$0xff]  ;;  %v714_v18 = vld [vmem:[#allocation2] sm:$0xff]  ;;  %v715_v23 = vld [vmem:[#allocation2 + $0x58] sm:$0xff] }
 0x125   : > { %v1456_v19 = vld [vmem:[%s1539_s2] ss:$0 sm:$0xff]  ;;  %v716_v24 = vld [vmem:[#allocation2 + $0x18] sm:$0xff]  ;;  %v1162_v29 = vld [vmem:[%s1540_s3 + $0x8] sm:$0xff]  }
 0x126   : > { %v736_v20 = vadd.f32 %v1456_v19, %v713_v17  ;;  %v737_v21 = vadd.f32 %v1456_v19, %v714_v18  ;;  %v1091_v22 = vld [vmem:[%s1540_s3] sm:$0xff]   ;;  %v738_v27 = vadd.f32 %v1456_v19, %v715_v23  ;;  %v739_v28 = vadd.f32 %v1456_v19, %v716_v24  ;;  %v717_v30 = vld [vmem:[#allocation2 + $0x50] sm:$0xff]  ;;  %v719_v37 = vld [vmem:[#allocation2 + $0x8] sm:$0xff] }
 0x127   : > { %v1092_v25 = vunpack.c.l.bf16 %v1091_v22  ;;  %v1093_v26 = vunpack.c.h.bf16 %v1091_v22  ;;  %v1096_v32 = vunpack.c.l.bf16 %v1162_v29  ;;  %v1097_v33 = vunpack.c.h.bf16 %v1162_v29  ;;  %v1163_v36 = vld [vmem:[%s1540_s3 + $0x10] sm:$0xff]   ;;  %v1164_v43 = vld [vmem:[%s1540_s3 + $0x18] sm:$0xff]   ;;  %v721_v48 = vld [vmem:[#allocation2 + $0x40] sm:$0xff] }
 0x128   : > { %v740_v34 = vadd.f32 %v1456_v19, %v717_v30  ;;  %v720_v38 = vld [vmem:[#allocation2 + $0x48] sm:$0xff]  ;;  %v1100_v41 = vunpack.c.l.bf16 %v1163_v36  ;;  %v1101_v42 = vunpack.c.h.bf16 %v1163_v36  ;;  %v742_v46 = vadd.f32 %v1456_v19, %v719_v37  ;;  %v722_v53 = vld [vmem:[#allocation2 + $0x20] sm:$0xff]  ;;  %v723_v59 = vld [vmem:[#allocation2 + $0x10] sm:$0xff] }
 0x129   : > { %v784_v39 = vadd.f32 %v1092_v25, %v736_v20  ;;  %v785_v40 = vadd.f32 %v1093_v26, %v737_v21  ;;  %v786_v44 = vadd.f32 %v1096_v32, %v738_v27  ;;  %v787_v45 = vadd.f32 %v1097_v33, %v739_v28  ;;  %v1165_v58 = vld [vmem:[%s1540_s3 + $0x20] sm:$0xff]   ;;  %v724_v0 = vld [vmem:[#allocation2 + $0x38] sm:$0xff]  ;;  %v1166_v1 = vld [vmem:[%s1540_s3 + $0x28] sm:$0xff]  }
 0x12a   : > { %v718_v31 = vld [vmem:[#allocation2 + $0x68] sm:$0xff]  ;;  %v743_v47 = vadd.f32 %v1456_v19, %v720_v38  ;;  %v788_v51 = vadd.f32 %v1100_v41, %v740_v34  ;;  %v1104_v56 = vunpack.c.l.bf16 %v1164_v43  ;;  %v1105_v57 = vunpack.c.h.bf16 %v1164_v43  ;;  %v725_v6 = vld [vmem:[#allocation2 + $0x60] sm:$0xff]  ;;  %v726_v11 = vld [vmem:[#allocation2 + $0x70] sm:$0xff] }
 0x12b   : > { %v741_v35 = vadd.f32 %v1456_v19, %v718_v31  ;;  %v800_v49 = vmax.f32 %v784_v39, 0.0  ;;  %v801_v50 = vmax.f32 %v785_v40, 0.0  ;;  %v802_v54 = vmax.f32 %v786_v44, 0.0  ;;  %v1167_v12 = vld [vmem:[%s1540_s3 + $0x30] sm:$0xff]   ;;  %v727_v22 = vld [vmem:[#allocation2 + $0x78] sm:$0xff]  ;;  %v728_v23 = vld [vmem:[#allocation2 + $0x28] sm:$0xff] }
 0x12c   : > { %v803_v55 = vmax.f32 %v787_v45, 0.0  ;;  %v804_v61 = vmax.f32 %v788_v51, 0.0  ;;  %v744_v63 = vadd.f32 %v1456_v19, %v721_v48  ;;  %v790_v3 = vadd.f32 %v1104_v56, %v742_v46  ;;  %v1168_v28 = vld [vmem:[%s1540_s3 + $0x38] sm:$0xff]  }
 0x12d   : > { %v789_v52 = vadd.f32 %v1101_v42, %v741_v35  ;;  %v1125_v60 = vpack.c.bf16 %v801_v50, %v800_v49  ;;  %v791_v4 = vadd.f32 %v1105_v57, %v743_v47  ;;  %v745_v5 = vadd.f32 %v1456_v19, %v722_v53 }
 0x12e   : > { %v1130_v2 = vpack.c.bf16 %v803_v55, %v802_v54  ;;  %v1108_v8 = vunpack.c.l.bf16 %v1165_v58  ;;  %v1109_v9 = vunpack.c.h.bf16 %v1165_v58  ;;  %v746_v10 = vadd.f32 %v1456_v19, %v723_v59 }
 0x12f   : > { %v805_v62 = vmax.f32 %v789_v52, 0.0  ;;  %1126 = vst [vmem:[%s1541_s4] sm:$0xff] %v1125_v60   ;;  %v806_v13 = vmax.f32 %v790_v3, 0.0  ;;  %v807_v14 = vmax.f32 %v791_v4, 0.0  ;;  %v747_v15 = vadd.f32 %v1456_v19, %v724_v0 }
 0x130   : > { %1169 = vst [vmem:[%s1541_s4 + $0x8] sm:$0xff] %v1130_v2   ;;  %v1112_v16 = vunpack.c.l.bf16 %v1166_v1  ;;  %v792_v17 = vadd.f32 %v1108_v8, %v744_v63  ;;  %v793_v18 = vadd.f32 %v1109_v9, %v745_v5  ;;  %v1113_v20 = vunpack.c.h.bf16 %v1166_v1 }
 0x131   : > { %v1135_v7 = vpack.c.bf16 %v805_v62, %v804_v61  ;;  %v748_v21 = vadd.f32 %v1456_v19, %v725_v6  ;;  %v1140_v24 = vpack.c.bf16 %v807_v14, %v806_v13  ;;  %v749_v26 = vadd.f32 %v1456_v19, %v726_v11 }
 0x132   : > { %v794_v25 = vadd.f32 %v1112_v16, %v746_v10  ;;  %v1116_v27 = vunpack.c.l.bf16 %v1167_v12  ;;  %v808_v29 = vmax.f32 %v792_v17, 0.0  ;;  %v809_v30 = vmax.f32 %v793_v18, 0.0 }
 0x133   : > { %1170 = vst [vmem:[%s1541_s4 + $0x10] sm:$0xff] %v1135_v7   ;;  %v795_v31 = vadd.f32 %v1113_v20, %v747_v15  ;;  %v1117_v32 = vunpack.c.h.bf16 %v1167_v12  ;;  %1171 = vst [vmem:[%s1541_s4 + $0x18] sm:$0xff] %v1140_v24   ;;  %v750_v35 = vadd.f32 %v1456_v19, %v727_v22  ;;  %v751_v36 = vadd.f32 %v1456_v19, %v728_v23 }
 0x134   : > { %v810_v33 = vmax.f32 %v794_v25, 0.0  ;;  %v796_v34 = vadd.f32 %v1116_v27, %v748_v21  ;;  %v1145_v37 = vpack.c.bf16 %v809_v30, %v808_v29  ;;  %v1120_v40 = vunpack.c.l.bf16 %v1168_v28 }
 0x135   : > { %v811_v38 = vmax.f32 %v795_v31, 0.0  ;;  %v797_v39 = vadd.f32 %v1117_v32, %v749_v26  ;;  %v1121_v42 = vunpack.c.h.bf16 %v1168_v28 }
 0x136   : > { %v812_v41 = vmax.f32 %v796_v34, 0.0  ;;  %1172 = vst [vmem:[%s1541_s4 + $0x20] sm:$0xff] %v1145_v37   ;;  %v798_v45 = vadd.f32 %v1120_v40, %v750_v35 }
 0x137   : > { %v1150_v43 = vpack.c.bf16 %v811_v38, %v810_v33  ;;  %v813_v44 = vmax.f32 %v797_v39, 0.0  ;;  %v799_v46 = vadd.f32 %v1121_v42, %v751_v36 }
 0x138   : > { %v814_v19 = vmax.f32 %v798_v45, 0.0 }
 0x139   : > { %1173 = vst [vmem:[%s1541_s4 + $0x28] sm:$0xff] %v1150_v43   ;;  %v1155_v47 = vpack.c.bf16 %v813_v44, %v812_v41  ;;  %v815_v48 = vmax.f32 %v799_v46, 0.0 }
 0x13b   : > { %1174 = vst [vmem:[%s1541_s4 + $0x30] sm:$0xff] %v1155_v47   ;;  %v1160_v49 = vpack.c.bf16 %v815_v48, %v814_v19 }
 0x13d   : > { %1175 = vst [vmem:[%s1541_s4 + $0x38] sm:$0xff] %v1160_v49  }
 0x13e PF: > { %s14_s19 = sadd.s32 1, %s1335_s19   ;;  %s1542_s15 = smov %s1323_s16 }
 0x13f   : > { %p11_p12 = scmp.ge.s32.totalorder %s14_s19, 7   ;;  %s1543_s16 = smov %s1398_s23 }
 0x140   : > { %s1544_s17 = smov %s1331_s18  ;;  %s1545_s18 = smov %s1547_s20 }
 0x141   :  { %13 = sbr.rel (!%p11_p12) target bundleno = 3 (0x3), region = 129 }

// kernel: morphclr_dual_forward.49
= control target key start
LH: loop header
LB: loop body
LE: loop exit
PB: predicated region body
PF: predicated region fallthrough
CT: control target
= control target key end

     0   :  { %s798_s12 = smov 0   ;;  %s800_s13 = smov 0   ;;  %s891_s0 = inlined_call_operand.vmem [shape: bf16[32,640], index: 0, kind: input, shape index: {}]   ;;  %s892_s1 = inlined_call_operand.vmem [shape: bf16[640,128], index: 1, kind: input, shape index: {}]   ;;  %s893_s2 = inlined_call_operand.vmem [shape: f32[1,128], index: 2, kind: input, shape index: {}]   ;;  %s894_s3 = inlined_call_operand.vmem [shape: bf16[32,128], index: 3, kind: output, shape index: {}]  }
   0x1   :  { %s802_s14 = smov 0   ;;  %s804_s15 = smov 0  }
   0x2   :  { %s806_s16 = smov 0  }
   0x3 LB: > { %s25_s17 = sadd.s32 1, %s771_s15  ;;  %p48_p1 = scmp.ne.s32.totalorder %s763_s13, %s759_s12  ;;  %s775_s16 = sphi %s806_s16, %s13_s16   ;;  %s771_s15 = sphi %s804_s15, %s898_s15   ;;  %s767_s14 = sphi %s802_s14, %s897_s14   ;;  %s763_s13 = sphi %s800_s13, %s896_s13   ;;  %s759_s12 = sphi %s798_s12, %s895_s12  }
   0x4   : > { %p26_p0 = scmp.ge.s32.totalorder %s25_s17, 5  ;;  %p49_p2 = scmp.eq.s32.totalorder %s775_s16, 0 }
   0x5   : > { %s41_s19 = sadd.s32 1, %s763_s13  ;;  %p613_p5 = scmp.ge.s32.totalorder %s775_s16, 5 }
   0x6   : > { %s900_s17 = smov (%p26_p0, %s25_s17), 0  ;;  %p50_p3 = por %p49_p2, %p48_p1 }
   0x7   : > { %s37_s18 = ssub.s32 %s771_s15, %s900_s17  ;;  %162 = sbr.rel (%p613_p5) target bundleno = 18 (0x12), region = 20 }
   0x8   : > { %p39_p4 = scmp.eq.s32.totalorder %s37_s18, 0 }
   0xa   : > { %s833_s20 = scalar_select %p39_p4, %s763_s13, %s41_s19  }
   0xc   : > { %165 = sbr.rel (!%p50_p3) target bundleno = 18 (0x12), region = 24  ;;  %s167_s21 = sand.u32 (%p50_p3), 1, %s763_s13  }
   0xd   : > { %s615_s22 = sshll.u32 (%p50_p3), %s771_s15, 2  ;;  %s614_s23 = sshll.u32 (%p50_p3), %s167_s21, 4 }
   0xe   : > { %s174_s26 = scalar_lea.vmem (%p50_p3), %s891_s0, %s615_s22  ;;  %s169_s27 = scalar_lea.vmem (%p50_p3), [#allocation3], %s614_s23 }
   0xf   : > { %v191_v0 = vld [vmem:[%s174_s26] sm:$0xf] (%p50_p3)  ;;  %v193_v1 = vld [vmem:[%s174_s26 + $0x14] sm:$0xf] (%p50_p3)  ;;  %v195_v2 = vld [vmem:[%s174_s26 + $0x28] sm:$0xf] (%p50_p3) }
  0x10   : > { %192 = vst [vmem:[%s169_s27] sm:$0xf] (%p50_p3), %v191_v0  ;;  %194 = vst [vmem:[%s169_s27 + $0x4] sm:$0xf] (%p50_p3), %v193_v1  ;;  %v197_v3 = vld [vmem:[%s174_s26 + $0x3c] sm:$0xf] (%p50_p3) }
  0x11   : > { %196 = vst [vmem:[%s169_s27 + $0x8] sm:$0xf] %v195_v2  ;;  %198 = vst [vmem:[%s169_s27 + $0xc] sm:$0xf] %v197_v3 }
  0x12 PF: > { %p616_p6 = scmp.ge.s32.totalorder %s775_s16, 1  ;;  %p241_p7 = scmp.lt.s32.totalorder %s775_s16, 6 }
  0x14   : > { %p242_p8 = pnand %p616_p6, %p241_p7 }
  0x15   : > { %s248_s28 = sand.u32 (!%p242_p8), 1, %s759_s12   ;;  %s618_s29 = sshll.u32 (!%p242_p8), %s767_s14, 4 }
  0x16   : > { %245 = sbr.rel (%p242_p8) target bundleno = 284 (0x11c), region = 69  ;;  %s845_s30 = sshll.u32 (!%p242_p8), %s248_s28, 4 }
  0x17   : > { %p287_p9 = scmp.lt.s32.totalorder (!%p242_p8), %s618_s29, 79  ;;  %s250_s8 = scalar_lea.vmem (!%p242_p8), [#allocation3], %s845_s30 }
  0x18   : > { %p620_p10 = scmp.ne.s32.totalorder (!%p242_p8), %s767_s14, 0 }
  0x1b   : > { %s902_s29 = smov (!%p287_p9, %s618_s29), 79  ;;  %311 = sbr.rel (%p620_p10) target bundleno = 35 (0x23), region = 77 }
  0x1c   : > { %s619_s4 = sshll.u32 %s902_s29, 2 }
  0x1d   : > { %s850_s7 = scalar_lea.vmem %s892_s1, %s619_s4 }
  0x20   : > { %v777_v4 = vmov 0.0  }
  0x21   : > { %312 = vst [vmem:[#allocation2 + $0x10] sm:$0xff] %v777_v4  ;;  %313 = vst [vmem:[#allocation2] sm:$0xff] %v777_v4 }
  0x22   : > { %314 = vst [vmem:[#allocation2 + $0x18] sm:$0xff] %v777_v4  ;;  %315 = vst [vmem:[#allocation2 + $0x8] sm:$0xff] %v777_v4 }
  0x23 PF: > { %v727_v5 = vld [vmem:[%s850_s7 + $0x38] sm:$0xff]   ;;  %v728_v6 = vld [vmem:[%s850_s7 + $0x30] sm:$0xff]   ;;  %v729_v7 = vld [vmem:[%s850_s7 + $0x28] sm:$0xff]   ;;  %p631_p11 = scmp.ne.s32.totalorder %s767_s14, 4 }
  0x24   : > { %666 = vmatprep.subr.bf16.mxu0 %v727_v5  ;;  %v730_v8 = vld [vmem:[%s850_s7 + $0x20] sm:$0xff]   ;;  %v731_v10 = vld [vmem:[%s850_s7 + $0x18] sm:$0xff]   ;;  %v732_v11 = vld [vmem:[%s850_s7 + $0x10] sm:$0xff]  }
  0x25   : > { %667 = vmatpush3.bf16.msra.mxu0 %v727_v5  ;;  %v735_v9 = vld [vmem:[%s250_s8] sm:$0xff]   ;;  %v733_v12 = vld [vmem:[%s850_s7 + $0x8] sm:$0xff]  }
  0x26   : > { %668 = vmatprep.subr.bf16.mxu0 %v728_v6  ;;  %682 = vmatprep.mubr.bf16.mxu0 %v735_v9  ;;  %v734_v13 = vld [vmem:[%s850_s7] sm:$0xff]   ;;  %v736_v14 = vld [vmem:[%s250_s8 + $0x8] sm:$0xff]  }
  0x28   : > { %v316_v17 = vld [vmem:[#allocation2 + $0x10] sm:$0xff]  ;;  %v317_v23 = vld [vmem:[#allocation2] sm:$0xff] }
  0x29   : > { %669 = vmatpush3.bf16.msra.mxu0 %v728_v6  ;;  %v318_v15 = vld [vmem:[#allocation2 + $0x18] sm:$0xff]  ;;  %v319_v20 = vld [vmem:[#allocation2 + $0x8] sm:$0xff] }
  0x2a   : > { %670 = vmatprep.subr.bf16.mxu0 %v729_v7 }
  0x2d   : > { %671 = vmatpush3.bf16.msra.mxu0 %v729_v7 }
  0x2e   : > { %672 = vmatprep.subr.bf16.mxu0 %v730_v8 }
  0x31   : > { %673 = vmatpush3.bf16.msra.mxu0 %v730_v8 }
  0x32   : > { %674 = vmatprep.subr.bf16.mxu0 %v731_v10 }
  0x35   : > { %675 = vmatpush3.bf16.msra.mxu0 %v731_v10 }
  0x36   : > { %676 = vmatprep.subr.bf16.mxu0 %v732_v11 }
  0x39   : > { %677 = vmatpush3.bf16.msra.mxu0 %v732_v11 }
  0x3a   : > { %678 = vmatprep.subr.bf16.mxu0 %v733_v12 }
  0x3d   : > { %679 = vmatpush3.bf16.msra.mxu0 %v733_v12 }
  0x3e   : > { %680 = vmatprep.subr.bf16.mxu0 %v734_v13 }
  0x41   : > { %681 = vmatpush3.bf16.msra.mxu0 %v734_v13 }
  0x44   : > { %683 = vmatmul.mubr.bf16.vlgmr.msra.gmra.mxu0 %v736_v14 }
 0x104   : > { %v684_v16 = vpop.f32.mrf.mxu0 }
 0x105   : > { %v451_v18 = vadd.f32 %v684_v16, %v318_v15 }
 0x106   : > { %v434_v19 = vpop.f32.mrf.mxu0 }
 0x107   : > { %455 = vst [vmem:[#allocation2 + $0x18] sm:$0xff] %v451_v18  ;;  %v449_v21 = vadd.f32 %v434_v19, %v316_v17 }
 0x108   : > { %v685_v22 = vpop.f32.mrf.mxu0 }
 0x109   : > { %453 = vst [vmem:[#allocation2 + $0x10] sm:$0xff] %v449_v21  ;;  %v452_v24 = vadd.f32 %v685_v22, %v319_v20  ;;  %460 = sbr.rel (%p631_p11) target bundleno = 284 (0x11c), region = 81 }
 0x10a   : > { %v437_v25 = vpop.f32.mrf.mxu0 }
 0x10b   : > { %456 = vst [vmem:[#allocation2 + $0x8] sm:$0xff] %v452_v24  ;;  %v450_v26 = vadd.f32 %v437_v25, %v317_v23 }
 0x10d   : > { %454 = vst [vmem:[#allocation2] sm:$0xff] %v450_v26 }
 0x10e   : > { %v632_v29 = vld [vmem:[%s893_s2] ss:$0 sm:$0xff]  ;;  %v463_v32 = vld [vmem:[#allocation2 + $0x18] sm:$0xff] }
 0x10f   : > { %v474_v34 = vadd.f32 %v632_v29, %v463_v32 }
 0x110   : > { %v461_v27 = vld [vmem:[#allocation2 + $0x10] sm:$0xff] }
 0x111   : > { %v472_v30 = vadd.f32 %v632_v29, %v461_v27  ;;  %v478_v38 = vmax.f32 %v474_v34, 0.0 }
 0x112   : > { %v464_v33 = vld [vmem:[#allocation2 + $0x8] sm:$0xff] }
 0x113   : > { %v475_v35 = vadd.f32 %v632_v29, %v464_v33  ;;  %v476_v36 = vmax.f32 %v472_v30, 0.0 }
 0x114   : > { %v462_v28 = vld [vmem:[#allocation2] sm:$0xff] }
 0x115   : > { %v473_v31 = vadd.f32 %v632_v29, %v462_v28  ;;  %v479_v39 = vmax.f32 %v475_v35, 0.0 }
 0x117   : > { %v477_v37 = vmax.f32 %v473_v31, 0.0  ;;  %v653_v41 = vpack.c.bf16 %v479_v39, %v478_v38 }
 0x119   : > { %v648_v40 = vpack.c.bf16 %v477_v37, %v476_v36  ;;  %655 = vst [vmem:[%s894_s3 + $0x8] sm:$0xff] %v653_v41  }
 0x11b   : > { %649 = vst [vmem:[%s894_s3] sm:$0xff] %v648_v40  }
 0x11c PF: > { %s13_s16 = sadd.s32 1, %s775_s16   ;;  %s895_s12 = smov %s763_s13 }
 0x11d   : > { %p10_p12 = scmp.ge.s32.totalorder %s13_s16, 7   ;;  %s896_s13 = smov %s833_s20 }
 0x11e   : > { %s897_s14 = smov %s771_s15  ;;  %s898_s15 = smov %s900_s17 }
 0x11f   :  { %12 = sbr.rel (!%p10_p12) target bundleno = 3 (0x3), region = 122 }

// kernel: morphclr_dual_forward.50
= control target key start
LH: loop header
LB: loop body
LE: loop exit
PB: predicated region body
PF: predicated region fallthrough
CT: control target
= control target key end

     0   :  { %s335_s1 = inlined_call_operand.vmem [shape: bf16[128,128], index: 1, kind: input, shape index: {}]   ;;  %s336_s0 = inlined_call_operand.vmem [shape: bf16[32,128], index: 0, kind: input, shape index: {}]   ;;  %s337_s2 = inlined_call_operand.vmem [shape: f32[1,128], index: 2, kind: input, shape index: {}]   ;;  %s338_s3 = inlined_call_operand.vmem [shape: bf16[32,128], index: 3, kind: output, shape index: {}]  }
   0x1   :  { %v266_v0 = vld [vmem:[%s335_s1 + $0x38] sm:$0xff]   ;;  %v267_v1 = vld [vmem:[%s335_s1 + $0x30] sm:$0xff]   ;;  %v268_v2 = vld [vmem:[%s335_s1 + $0x28] sm:$0xff]  }
   0x2   :  { %246 = vmatprep.subr.bf16.mxu0 %v266_v0  ;;  %v269_v3 = vld [vmem:[%s335_s1 + $0x20] sm:$0xff]   ;;  %v270_v5 = vld [vmem:[%s335_s1 + $0x18] sm:$0xff]   ;;  %v271_v6 = vld [vmem:[%s335_s1 + $0x10] sm:$0xff]  }
   0x3   :  { %247 = vmatpush3.bf16.msra.mxu0 %v266_v0  ;;  %v274_v4 = vld [vmem:[%s336_s0] sm:$0xff]   ;;  %v272_v7 = vld [vmem:[%s335_s1 + $0x8] sm:$0xff]  }
   0x4   :  { %248 = vmatprep.subr.bf16.mxu0 %v267_v1  ;;  %262 = vmatprep.mubr.bf16.mxu0 %v274_v4  ;;  %v273_v8 = vld [vmem:[%s335_s1] sm:$0xff]   ;;  %v275_v9 = vld [vmem:[%s336_s0 + $0x8] sm:$0xff]  }
   0x5   :  { %v216_v11 = vld [vmem:[%s337_s2] ss:$0 sm:$0xff] }
   0x7   :  { %249 = vmatpush3.bf16.msra.mxu0 %v267_v1 }
   0x8   :  { %250 = vmatprep.subr.bf16.mxu0 %v268_v2 }
   0xb   :  { %251 = vmatpush3.bf16.msra.mxu0 %v268_v2 }
   0xc   :  { %252 = vmatprep.subr.bf16.mxu0 %v269_v3 }
   0xf   :  { %253 = vmatpush3.bf16.msra.mxu0 %v269_v3 }
  0x10   :  { %254 = vmatprep.subr.bf16.mxu0 %v270_v5 }
  0x13   :  { %255 = vmatpush3.bf16.msra.mxu0 %v270_v5 }
  0x14   :  { %256 = vmatprep.subr.bf16.mxu0 %v271_v6 }
  0x17   :  { %257 = vmatpush3.bf16.msra.mxu0 %v271_v6 }
  0x18   :  { %258 = vmatprep.subr.bf16.mxu0 %v272_v7 }
  0x1b   :  { %259 = vmatpush3.bf16.msra.mxu0 %v272_v7 }
  0x1c   :  { %260 = vmatprep.subr.bf16.mxu0 %v273_v8 }
  0x1f   :  { %261 = vmatpush3.bf16.msra.mxu0 %v273_v8 }
  0x22   :  { %263 = vmatmul.mubr.bf16.vlgmr.msra.gmra.mxu0 %v275_v9 }
  0xe2   :  { %v264_v10 = vpop.f32.mrf.mxu0 }
  0xe3   :  { %v180_v14 = vadd.f32 %v264_v10, %v216_v11 }
  0xe4   :  { %v141_v12 = vpop.f32.mrf.mxu0 }
  0xe5   :  { %v178_v17 = vadd.f32 %v216_v11, %v141_v12 }
  0xe6   :  { %v265_v13 = vpop.f32.mrf.mxu0 }
  0xe7   :  { %v181_v15 = vadd.f32 %v265_v13, %v216_v11 }
  0xe8   :  { %v144_v16 = vpop.f32.mrf.mxu0 }
  0xe9   :  { %v233_v18 = vpack.c.bf16 %v181_v15, %v180_v14  ;;  %v179_v19 = vadd.f32 %v216_v11, %v144_v16 }
  0xeb   :  { %235 = vst [vmem:[%s338_s3 + $0x8] sm:$0xff] %v233_v18   ;;  %v228_v20 = vpack.c.bf16 %v179_v19, %v178_v17 }
  0xed   :  { %229 = vst [vmem:[%s338_s3] sm:$0xff] %v228_v20  }

// kernel: morphclr_dual_forward.51
= control target key start
LH: loop header
LB: loop body
LE: loop exit
PB: predicated region body
PF: predicated region fallthrough
CT: control target
= control target key end

     0   :  { %s1177_s15 = smov 0   ;;  %s1179_s16 = smov 0   ;;  %s1293_s0 = inlined_call_operand.vmem [shape: bf16[32,1152], index: 0, kind: input, shape index: {}]   ;;  %s1294_s1 = inlined_call_operand.vmem [shape: bf16[1152,128], index: 1, kind: input, shape index: {}]   ;;  %s1295_s2 = inlined_call_operand.vmem [shape: f32[1,128], index: 2, kind: input, shape index: {}]   ;;  %s1296_s3 = inlined_call_operand.vmem [shape: bf16[32,128], index: 3, kind: input, shape index: {}]   ;;  %s1297_s4 = inlined_call_operand.vmem [shape: bf16[32,128], index: 4, kind: output, shape index: {}]  }
   0x1   :  { %s1181_s17 = smov 0   ;;  %s1183_s18 = smov 0  }
   0x2   :  { %s1185_s19 = smov 0  }
   0x3 LB: > { %s26_s20 = sadd.s32 1, %s1145_s18  ;;  %p49_p1 = scmp.ne.s32.totalorder %s1137_s16, %s1133_s15  ;;  %s1149_s19 = sphi %s1185_s19, %s14_s19   ;;  %s1145_s18 = sphi %s1183_s18, %s1301_s18   ;;  %s1141_s17 = sphi %s1181_s17, %s1300_s17   ;;  %s1137_s16 = sphi %s1179_s16, %s1299_s16   ;;  %s1133_s15 = sphi %s1177_s15, %s1298_s15  }
   0x4   : > { %p27_p0 = scmp.ge.s32.totalorder %s26_s20, 3  ;;  %p50_p2 = scmp.eq.s32.totalorder %s1149_s19, 0 }
   0x5   : > { %s42_s22 = sadd.s32 1, %s1137_s16  ;;  %p900_p5 = scmp.ge.s32.totalorder %s1149_s19, 3 }
   0x6   : > { %s1303_s20 = smov (%p27_p0, %s26_s20), 0  ;;  %p51_p3 = por %p50_p2, %p49_p1 }
   0x7   : > { %s38_s21 = ssub.s32 %s1145_s18, %s1303_s20  ;;  %203 = sbr.rel (%p900_p5) target bundleno = 21 (0x15), region = 24 }
   0x8   : > { %p40_p4 = scmp.eq.s32.totalorder %s38_s21, 0 }
   0xa   : > { %s1212_s23 = scalar_select %p40_p4, %s1137_s16, %s42_s22  }
   0xc   : > { %206 = sbr.rel (!%p51_p3) target bundleno = 21 (0x15), region = 28  ;;  %s208_s24 = sand.u32 (%p51_p3), 1, %s1137_s16  }
   0xd   : > { %s953_s25 = smul.u32 (%p51_p3), 12, %s1145_s18 }
   0xe   : > { %s1036_s26 = smul.u32 (%p51_p3), 48, %s208_s24 }
   0xf   : > { %s216_s29 = scalar_lea.vmem (%p51_p3), %s1293_s0, %s953_s25 }
  0x10   : > { %v231_v0 = vld [vmem:[%s216_s29] sm:$0xff] (%p51_p3)  ;;  %v235_v2 = vld [vmem:[%s216_s29 + $0x48] sm:$0xff] (%p51_p3)  ;;  %s210_s30 = scalar_lea.vmem (%p51_p3), [#allocation3], %s1036_s26  ;;  %v906_v6 = vld [vmem:[%s216_s29 + $0x50] sm:$0xf] (%p51_p3) }
  0x11   : > { %v233_v1 = vld [vmem:[%s216_s29 + $0x24] sm:$0xff]  ;;  %232 = vst [vmem:[%s210_s30] sm:$0xff] %v231_v0  ;;  %236 = vst [vmem:[%s210_s30 + $0x18] sm:$0xff] %v235_v2  ;;  %v237_v3 = vld [vmem:[%s216_s29 + $0x6c] sm:$0xff] }
  0x12   : > { %234 = vst [vmem:[%s210_s30 + $0xc] sm:$0xff] %v233_v1  ;;  %v902_v4 = vld [vmem:[%s216_s29 + $0x8] sm:$0xf]  ;;  %v904_v5 = vld [vmem:[%s216_s29 + $0x2c] sm:$0xf]  ;;  %238 = vst [vmem:[%s210_s30 + $0x24] sm:$0xff] %v237_v3 }
  0x13   : > { %903 = vst [vmem:[%s210_s30 + $0x8] sm:$0xf] %v902_v4  ;;  %905 = vst [vmem:[%s210_s30 + $0x14] sm:$0xf] %v904_v5  ;;  %v908_v7 = vld [vmem:[%s216_s29 + $0x74] sm:$0xf] }
  0x14   : > { %907 = vst [vmem:[%s210_s30 + $0x20] sm:$0xf] %v906_v6  ;;  %909 = vst [vmem:[%s210_s30 + $0x2c] sm:$0xf] %v908_v7 }
  0x15 PF: > { %p910_p6 = scmp.ge.s32.totalorder %s1149_s19, 1  ;;  %p271_p7 = scmp.lt.s32.totalorder %s1149_s19, 4 }
  0x17   : > { %p272_p8 = pnand %p910_p6, %p271_p7 }
  0x18   : > { %s278_s5 = sand.u32 (!%p272_p8), 1, %s1133_s15   ;;  %s327_s6 = smul.u32 (!%p272_p8), 48, %s1141_s17 }
  0x19   : > { %275 = sbr.rel (%p272_p8) target bundleno = 301 (0x12d), region = 58  ;;  %p912_p10 = scmp.ne.s32.totalorder (!%p272_p8), %s1141_s17, 0 }
  0x1a   : > { %s1037_s7 = smul.u32 (!%p272_p8), 48, %s278_s5  ;;  %p328_p9 = scmp.lt.s32.totalorder (!%p272_p8), %s327_s6, 143 }
  0x1c   : > { %s1229_s12 = scalar_lea.vmem (!%p272_p8), [#allocation3], %s1037_s7 }
  0x1e   : > { %s1305_s6 = smov (!%p328_p9, %s327_s6), 143  ;;  %361 = sbr.rel (%p912_p10) target bundleno = 38 (0x26), region = 66 }
  0x1f   : > { %s911_s8 = sshll.u32 %s1305_s6, 2 }
  0x20   : > { %s1227_s11 = scalar_lea.vmem %s1294_s1, %s911_s8 }
  0x23   : > { %v1151_v8 = vmov 0.0  }
  0x24   : > { %362 = vst [vmem:[#allocation2 + $0x10] sm:$0xff] %v1151_v8  ;;  %363 = vst [vmem:[#allocation2] sm:$0xff] %v1151_v8 }
  0x25   : > { %364 = vst [vmem:[#allocation2 + $0x18] sm:$0xff] %v1151_v8  ;;  %365 = vst [vmem:[#allocation2 + $0x8] sm:$0xff] %v1151_v8 }
  0x26 PF: > { %v1079_v9 = vld [vmem:[%s1227_s11 + $0x78] sm:$0xff]   ;;  %v1082_v12 = vld [vmem:[%s1227_s11 + $0x70] sm:$0xff]   ;;  %v1085_v15 = vld [vmem:[%s1227_s11 + $0x68] sm:$0xff]   ;;  %p943_p11 = scmp.ne.s32.totalorder %s1141_s17, 2 }
  0x27   : > { %v1080_v10 = vld [vmem:[%s1227_s11 + $0x38] sm:$0xff]   ;;  %978 = vmatprep.subr.bf16.mxu0 %v1079_v9  ;;  %v1083_v13 = vld [vmem:[%s1227_s11 + $0x30] sm:$0xff]   ;;  %v1086_v16 = vld [vmem:[%s1227_s11 + $0x28] sm:$0xff]  }
  0x28   : > { %v1081_v11 = vld [vmem:[%s1227_s11 + $0xb8] sm:$0xff]   ;;  %979 = vmatpush3.bf16.msra.mxu0 %v1080_v10  ;;  %v1084_v14 = vld [vmem:[%s1227_s11 + $0xb0] sm:$0xff]   ;;  %v1087_v17 = vld [vmem:[%s1227_s11 + $0xa8] sm:$0xff]  }
  0x29   : > { %1016 = vmatprep.subr.bf16.mxu1 %v1081_v11  ;;  %980 = vmatprep.subr.bf16.mxu0 %v1082_v12  ;;  %v1088_v18 = vld [vmem:[%s1227_s11 + $0x60] sm:$0xff]   ;;  %v1091_v21 = vld [vmem:[%s1227_s11 + $0x58] sm:$0xff]   ;;  %v1094_v24 = vld [vmem:[%s1227_s11 + $0x50] sm:$0xff]  }
  0x2a   : > { %1017 = vmatpush3.bf16.msra.mxu1 %v1081_v11  ;;  %v1089_v19 = vld [vmem:[%s1227_s11 + $0x20] sm:$0xff]   ;;  %v1093_v22 = vld [vmem:[%s1227_s11 + $0x98] sm:$0xff]   ;;  %v1096_v25 = vld [vmem:[%s1227_s11 + $0x90] sm:$0xff]  }
  0x2b   : > { %1018 = vmatprep.subr.bf16.mxu1 %v1084_v14  ;;  %v1090_v20 = vld [vmem:[%s1227_s11 + $0xa0] sm:$0xff]   ;;  %v1092_v23 = vld [vmem:[%s1227_s11 + $0x18] sm:$0xff]   ;;  %v1095_v26 = vld [vmem:[%s1227_s11 + $0x10] sm:$0xff]  }
  0x2c   : > { %981 = vmatpush3.bf16.msra.mxu0 %v1083_v13  ;;  %v1097_v27 = vld [vmem:[%s1227_s11 + $0x48] sm:$0xff]   ;;  %v1100_v30 = vld [vmem:[%s1227_s11 + $0x40] sm:$0xff]   ;;  %v366_v44 = vld [vmem:[#allocation2 + $0x10] sm:$0xff] }
  0x2d   : > { %982 = vmatprep.subr.bf16.mxu0 %v1085_v15  ;;  %v1098_v28 = vld [vmem:[%s1227_s11 + $0x8] sm:$0xff]   ;;  %v1102_v31 = vld [vmem:[%s1227_s11 + $0x80] sm:$0xff]   ;;  %v368_v58 = vld [vmem:[#allocation2 + $0x18] sm:$0xff] }
  0x2e   : > { %1019 = vmatpush3.bf16.msra.mxu1 %v1084_v14  ;;  %v1099_v29 = vld [vmem:[%s1227_s11 + $0x88] sm:$0xff]   ;;  %v1105_v32 = vld [vmem:[%s1229_s12 + $0x4] ss:$12 sps:$4 sm:$0xff]  }
  0x2f   : > { %1020 = vmatprep.subr.bf16.mxu1 %v1087_v17  ;;  %v1106_v33 = vld [vmem:[%s1229_s12 + $0x8] ss:$12 sps:$4 sm:$0xff]   ;;  %634 = vmatprep.mubr.bf16.mxu0 %v1105_v32  ;;  %v1103_v35 = vld [vmem:[%s1229_s12] ss:$12 sps:$4 sm:$0xff]   ;;  %v1110_v38 = vld [vmem:[%s1229_s12 + $0x18] ss:$12 sps:$4 sm:$0xff]  }
  0x30   : > { %983 = vmatpush3.bf16.msra.mxu0 %v1086_v16  ;;  %v1101_v34 = vld [vmem:[%s1227_s11] sm:$0xff]   ;;  %1032 = vmatprep.mubr.bf16.mxu1 %v1106_v33  ;;  %v1108_v36 = vld [vmem:[%s1229_s12 + $0x1c] ss:$12 sps:$4 sm:$0xff]  }
  0x31   : > { %984 = vmatprep.subr.bf16.mxu0 %v1088_v18  ;;  %v1107_v37 = vld [vmem:[%s1229_s12 + $0x20] ss:$12 sps:$4 sm:$0xff]  }
  0x32   : > { %1021 = vmatpush3.bf16.msra.mxu1 %v1087_v17  ;;  %v367_v52 = vld [vmem:[#allocation2] sm:$0xff]  ;;  %v369_v0 = vld [vmem:[#allocation2 + $0x8] sm:$0xff] }
  0x33   : > { %1022 = vmatprep.subr.bf16.mxu1 %v1090_v20 }
  0x34   : > { %985 = vmatpush3.bf16.msra.mxu0 %v1089_v19 }
  0x35   : > { %986 = vmatprep.subr.bf16.mxu0 %v1091_v21 }
  0x36   : > { %1023 = vmatpush3.bf16.msra.mxu1 %v1090_v20 }
  0x37   : > { %1024 = vmatprep.subr.bf16.mxu1 %v1093_v22 }
  0x38   : > { %987 = vmatpush3.bf16.msra.mxu0 %v1092_v23 }
  0x39   : > { %988 = vmatprep.subr.bf16.mxu0 %v1094_v24 }
  0x3a   : > { %1025 = vmatpush3.bf16.msra.mxu1 %v1093_v22 }
  0x3b   : > { %1026 = vmatprep.subr.bf16.mxu1 %v1096_v25 }
  0x3c   : > { %989 = vmatpush3.bf16.msra.mxu0 %v1095_v26 }
  0x3d   : > { %990 = vmatprep.subr.bf16.mxu0 %v1097_v27 }
  0x3e   : > { %1027 = vmatpush3.bf16.msra.mxu1 %v1096_v25 }
  0x3f   : > { %1028 = vmatprep.subr.bf16.mxu1 %v1099_v29 }
  0x40   : > { %991 = vmatpush3.bf16.msra.mxu0 %v1098_v28 }
  0x41   : > { %992 = vmatprep.subr.bf16.mxu0 %v1100_v30 }
  0x42   : > { %1029 = vmatpush3.bf16.msra.mxu1 %v1099_v29 }
  0x43   : > { %1030 = vmatprep.subr.bf16.mxu1 %v1102_v31 }
  0x44   : > { %993 = vmatpush3.bf16.msra.mxu0 %v1101_v34 }
  0x46   : > { %1031 = vmatpush3.bf16.msra.mxu1 %v1102_v31 }
  0x47   : > { %635 = vmatmul.mubr.bf16.vlgmr.msra.gmra.mxu0 %v1103_v35 }
  0x48   : > { %642 = vmatprep.mubr.bf16.mxu0 %v1108_v36 }
  0x49   : > { %1033 = vmatmul.mubr.bf16.vlgmr.msra.gmra.mxu1 %v1107_v37 }
  0x4f   : > { %643 = vmatmul.mubr.bf16.gmra.mxu0 %v1110_v38 }
 0x107   : > { %v994_v39 = vpop.f32.mrf.mxu0 }
 0x109   : > { %v995_v40 = vpop.f32.mrf.mxu0  ;;  %v1034_v41 = vpop.f32.mrf.mxu1 }
 0x10a   : > { %v996_v42 = vadd.f32 %v995_v40, %v994_v39 }
 0x10b   : > { %v997_v43 = vpop.f32.mrf.mxu0  ;;  %v685_v45 = vpop.f32.mrf.mxu1 }
 0x10c   : > { %v686_v46 = vadd.f32 %v996_v42, %v685_v45 }
 0x10d   : > { %v998_v47 = vpop.f32.mrf.mxu0  ;;  %v1035_v48 = vpop.f32.mrf.mxu1 }
 0x10e   : > { %v700_v49 = vadd.f32 %v686_v46, %v366_v44  ;;  %v999_v50 = vadd.f32 %v998_v47, %v997_v43 }
 0x10f   : > { %v1000_v51 = vpop.f32.mrf.mxu0  ;;  %v688_v53 = vpop.f32.mrf.mxu1 }
 0x110   : > { %704 = vst [vmem:[#allocation2 + $0x10] sm:$0xff] %v700_v49  ;;  %v689_v54 = vadd.f32 %v999_v50, %v688_v53 }
 0x111   : > { %v1001_v55 = vpop.f32.mrf.mxu0 }
 0x112   : > { %v701_v56 = vadd.f32 %v689_v54, %v367_v52  ;;  %v1002_v57 = vadd.f32 %v1001_v55, %v1000_v51 }
 0x113   : > { %v1003_v59 = vpop.f32.mrf.mxu0 }
 0x114   : > { %705 = vst [vmem:[#allocation2] sm:$0xff] %v701_v56  ;;  %v694_v60 = vadd.f32 %v1034_v41, %v1002_v57 }
 0x115   : > { %v1004_v61 = vpop.f32.mrf.mxu0 }
 0x116   : > { %v702_v62 = vadd.f32 %v694_v60, %v368_v58  ;;  %v1005_v63 = vadd.f32 %v1004_v61, %v1003_v59 }
 0x118   : > { %706 = vst [vmem:[#allocation2 + $0x18] sm:$0xff] %v702_v62  ;;  %v697_v1 = vadd.f32 %v1035_v48, %v1005_v63  ;;  %711 = sbr.rel (%p943_p11) target bundleno = 301 (0x12d), region = 70 }
 0x11a   : > { %v703_v2 = vadd.f32 %v697_v1, %v369_v0 }
 0x11c   : > { %707 = vst [vmem:[#allocation2 + $0x8] sm:$0xff] %v703_v2 }
 0x11d   : > { %v712_v3 = vld [vmem:[#allocation2 + $0x10] sm:$0xff]  ;;  %v713_v4 = vld [vmem:[#allocation2] sm:$0xff]  ;;  %v976_v15 = vld [vmem:[%s1296_s3 + $0x8] sm:$0xff]  }
 0x11e   : > { %v944_v5 = vld [vmem:[%s1295_s2] ss:$0 sm:$0xff]  ;;  %v964_v16 = vunpack.c.l.bf16 %v976_v15  ;;  %v965_v17 = vunpack.c.h.bf16 %v976_v15 }
 0x11f   : > { %v723_v6 = vadd.f32 %v944_v5, %v712_v3  ;;  %v724_v7 = vadd.f32 %v944_v5, %v713_v4  ;;  %v959_v8 = vld [vmem:[%s1296_s3] sm:$0xff]   ;;  %v714_v9 = vld [vmem:[#allocation2 + $0x18] sm:$0xff] }
 0x120   : > { %v960_v11 = vunpack.c.l.bf16 %v959_v8  ;;  %v961_v12 = vunpack.c.h.bf16 %v959_v8  ;;  %v725_v13 = vadd.f32 %v944_v5, %v714_v9 }
 0x122   : > { %v735_v18 = vadd.f32 %v960_v11, %v723_v6  ;;  %v736_v19 = vadd.f32 %v961_v12, %v724_v7  ;;  %v737_v20 = vadd.f32 %v964_v16, %v725_v13 }
 0x123   : > { %v715_v10 = vld [vmem:[#allocation2 + $0x8] sm:$0xff] }
 0x124   : > { %v726_v14 = vadd.f32 %v944_v5, %v715_v10  ;;  %v739_v22 = vmax.f32 %v735_v18, 0.0  ;;  %v740_v23 = vmax.f32 %v736_v19, 0.0  ;;  %v741_v24 = vmax.f32 %v737_v20, 0.0 }
 0x126   : > { %v738_v21 = vadd.f32 %v965_v17, %v726_v14  ;;  %v969_v26 = vpack.c.bf16 %v740_v23, %v739_v22 }
 0x128   : > { %v742_v25 = vmax.f32 %v738_v21, 0.0  ;;  %970 = vst [vmem:[%s1297_s4] sm:$0xff] %v969_v26  }
 0x12a   : > { %v974_v27 = vpack.c.bf16 %v742_v25, %v741_v24 }
 0x12c   : > { %977 = vst [vmem:[%s1297_s4 + $0x8] sm:$0xff] %v974_v27  }
 0x12d PF: > { %s14_s19 = sadd.s32 1, %s1149_s19   ;;  %s1298_s15 = smov %s1137_s16 }
 0x12e   : > { %p11_p12 = scmp.ge.s32.totalorder %s14_s19, 5   ;;  %s1299_s16 = smov %s1212_s23 }
 0x12f   : > { %s1300_s17 = smov %s1145_s18  ;;  %s1301_s18 = smov %s1303_s20 }
 0x130   :  { %13 = sbr.rel (!%p11_p12) target bundleno = 3 (0x3), region = 120 }

// kernel: morphclr_dual_forward.52
= control target key start
LH: loop header
LB: loop body
LE: loop exit
PB: predicated region body
PF: predicated region fallthrough
CT: control target
= control target key end

     0   :  { %s1072_s12 = smov 0   ;;  %s1074_s13 = smov 0   ;;  %s1182_s0 = inlined_call_operand.vmem [shape: bf16[32,1152], index: 0, kind: input, shape index: {}]   ;;  %s1183_s1 = inlined_call_operand.vmem [shape: bf16[1152,128], index: 1, kind: input, shape index: {}]   ;;  %s1184_s2 = inlined_call_operand.vmem [shape: f32[1,128], index: 2, kind: input, shape index: {}]   ;;  %s1185_s3 = inlined_call_operand.vmem [shape: bf16[32,128], index: 3, kind: output, shape index: {}]  }
   0x1   :  { %s1076_s14 = smov 0   ;;  %s1078_s15 = smov 0  }
   0x2   :  { %s1080_s16 = smov 0  }
   0x3 LB: > { %s25_s17 = sadd.s32 1, %s1045_s15  ;;  %p48_p1 = scmp.ne.s32.totalorder %s1037_s13, %s1033_s12  ;;  %s1049_s16 = sphi %s1080_s16, %s13_s16   ;;  %s1045_s15 = sphi %s1078_s15, %s1189_s15   ;;  %s1041_s14 = sphi %s1076_s14, %s1188_s14   ;;  %s1037_s13 = sphi %s1074_s13, %s1187_s13   ;;  %s1033_s12 = sphi %s1072_s12, %s1186_s12  }
   0x4   : > { %p26_p0 = scmp.ge.s32.totalorder %s25_s17, 3  ;;  %p49_p2 = scmp.eq.s32.totalorder %s1049_s16, 0 }
   0x5   : > { %s41_s19 = sadd.s32 1, %s1037_s13  ;;  %p809_p5 = scmp.ge.s32.totalorder %s1049_s16, 3 }
   0x6   : > { %s1191_s17 = smov (%p26_p0, %s25_s17), 0  ;;  %p50_p3 = por %p49_p2, %p48_p1 }
   0x7   : > { %s37_s18 = ssub.s32 %s1045_s15, %s1191_s17  ;;  %162 = sbr.rel (%p809_p5) target bundleno = 21 (0x15), region = 20 }
   0x8   : > { %p39_p4 = scmp.eq.s32.totalorder %s37_s18, 0 }
   0xa   : > { %s1107_s20 = scalar_select %p39_p4, %s1037_s13, %s41_s19  }
   0xc   : > { %165 = sbr.rel (!%p50_p3) target bundleno = 21 (0x15), region = 24  ;;  %s167_s21 = sand.u32 (%p50_p3), 1, %s1037_s13  }
   0xd   : > { %s862_s22 = smul.u32 (%p50_p3), 12, %s1045_s15 }
   0xe   : > { %s936_s23 = smul.u32 (%p50_p3), 48, %s167_s21 }
   0xf   : > { %s175_s26 = scalar_lea.vmem (%p50_p3), %s1182_s0, %s862_s22 }
  0x10   : > { %v190_v0 = vld [vmem:[%s175_s26] sm:$0xff] (%p50_p3)  ;;  %v194_v2 = vld [vmem:[%s175_s26 + $0x48] sm:$0xff] (%p50_p3)  ;;  %s169_s27 = scalar_lea.vmem (%p50_p3), [#allocation3], %s936_s23  ;;  %v815_v6 = vld [vmem:[%s175_s26 + $0x50] sm:$0xf] (%p50_p3) }
  0x11   : > { %v192_v1 = vld [vmem:[%s175_s26 + $0x24] sm:$0xff]  ;;  %191 = vst [vmem:[%s169_s27] sm:$0xff] %v190_v0  ;;  %195 = vst [vmem:[%s169_s27 + $0x18] sm:$0xff] %v194_v2  ;;  %v196_v3 = vld [vmem:[%s175_s26 + $0x6c] sm:$0xff] }
  0x12   : > { %193 = vst [vmem:[%s169_s27 + $0xc] sm:$0xff] %v192_v1  ;;  %v811_v4 = vld [vmem:[%s175_s26 + $0x8] sm:$0xf]  ;;  %v813_v5 = vld [vmem:[%s175_s26 + $0x2c] sm:$0xf]  ;;  %197 = vst [vmem:[%s169_s27 + $0x24] sm:$0xff] %v196_v3 }
  0x13   : > { %812 = vst [vmem:[%s169_s27 + $0x8] sm:$0xf] %v811_v4  ;;  %814 = vst [vmem:[%s169_s27 + $0x14] sm:$0xf] %v813_v5  ;;  %v817_v7 = vld [vmem:[%s175_s26 + $0x74] sm:$0xf] }
  0x14   : > { %816 = vst [vmem:[%s169_s27 + $0x20] sm:$0xf] %v815_v6  ;;  %818 = vst [vmem:[%s169_s27 + $0x2c] sm:$0xf] %v817_v7 }
  0x15 PF: > { %p819_p6 = scmp.ge.s32.totalorder %s1049_s16, 1  ;;  %p230_p7 = scmp.lt.s32.totalorder %s1049_s16, 4 }
  0x17   : > { %p231_p8 = pnand %p819_p6, %p230_p7 }
  0x18   : > { %s237_s28 = sand.u32 (!%p231_p8), 1, %s1033_s12   ;;  %s276_s29 = smul.u32 (!%p231_p8), 48, %s1041_s14 }
  0x19   : > { %234 = sbr.rel (%p231_p8) target bundleno = 299 (0x12b), region = 54  ;;  %p821_p10 = scmp.ne.s32.totalorder (!%p231_p8), %s1041_s14, 0 }
  0x1a   : > { %s937_s30 = smul.u32 (!%p231_p8), 48, %s237_s28  ;;  %p277_p9 = scmp.lt.s32.totalorder (!%p231_p8), %s276_s29, 143 }
  0x1c   : > { %s1124_s8 = scalar_lea.vmem (!%p231_p8), [#allocation3], %s937_s30 }
  0x1e   : > { %s1193_s29 = smov (!%p277_p9, %s276_s29), 143  ;;  %301 = sbr.rel (%p821_p10) target bundleno = 38 (0x26), region = 62 }
  0x1f   : > { %s820_s4 = sshll.u32 %s1193_s29, 2 }
  0x20   : > { %s1122_s7 = scalar_lea.vmem %s1183_s1, %s820_s4 }
  0x23   : > { %v1051_v8 = vmov 0.0  }
  0x24   : > { %302 = vst [vmem:[#allocation2 + $0x10] sm:$0xff] %v1051_v8  ;;  %303 = vst [vmem:[#allocation2] sm:$0xff] %v1051_v8 }
  0x25   : > { %304 = vst [vmem:[#allocation2 + $0x18] sm:$0xff] %v1051_v8  ;;  %305 = vst [vmem:[#allocation2 + $0x8] sm:$0xff] %v1051_v8 }
  0x26 PF: > { %v979_v9 = vld [vmem:[%s1122_s7 + $0x78] sm:$0xff]   ;;  %v982_v12 = vld [vmem:[%s1122_s7 + $0x70] sm:$0xff]   ;;  %v985_v15 = vld [vmem:[%s1122_s7 + $0x68] sm:$0xff]   ;;  %p852_p11 = scmp.ne.s32.totalorder %s1041_s14, 2 }
  0x27   : > { %v980_v10 = vld [vmem:[%s1122_s7 + $0x38] sm:$0xff]   ;;  %878 = vmatprep.subr.bf16.mxu0 %v979_v9  ;;  %v983_v13 = vld [vmem:[%s1122_s7 + $0x30] sm:$0xff]   ;;  %v986_v16 = vld [vmem:[%s1122_s7 + $0x28] sm:$0xff]  }
  0x28   : > { %v981_v11 = vld [vmem:[%s1122_s7 + $0xb8] sm:$0xff]   ;;  %879 = vmatpush3.bf16.msra.mxu0 %v980_v10  ;;  %v984_v14 = vld [vmem:[%s1122_s7 + $0xb0] sm:$0xff]   ;;  %v987_v17 = vld [vmem:[%s1122_s7 + $0xa8] sm:$0xff]  }
  0x29   : > { %916 = vmatprep.subr.bf16.mxu1 %v981_v11  ;;  %880 = vmatprep.subr.bf16.mxu0 %v982_v12  ;;  %v988_v18 = vld [vmem:[%s1122_s7 + $0x60] sm:$0xff]   ;;  %v991_v21 = vld [vmem:[%s1122_s7 + $0x58] sm:$0xff]   ;;  %v994_v24 = vld [vmem:[%s1122_s7 + $0x50] sm:$0xff]  }
  0x2a   : > { %917 = vmatpush3.bf16.msra.mxu1 %v981_v11  ;;  %v989_v19 = vld [vmem:[%s1122_s7 + $0x20] sm:$0xff]   ;;  %v993_v22 = vld [vmem:[%s1122_s7 + $0x98] sm:$0xff]   ;;  %v996_v25 = vld [vmem:[%s1122_s7 + $0x90] sm:$0xff]  }
  0x2b   : > { %918 = vmatprep.subr.bf16.mxu1 %v984_v14  ;;  %v990_v20 = vld [vmem:[%s1122_s7 + $0xa0] sm:$0xff]   ;;  %v992_v23 = vld [vmem:[%s1122_s7 + $0x18] sm:$0xff]   ;;  %v995_v26 = vld [vmem:[%s1122_s7 + $0x10] sm:$0xff]  }
  0x2c   : > { %881 = vmatpush3.bf16.msra.mxu0 %v983_v13  ;;  %v997_v27 = vld [vmem:[%s1122_s7 + $0x48] sm:$0xff]   ;;  %v1000_v30 = vld [vmem:[%s1122_s7 + $0x40] sm:$0xff]   ;;  %v306_v44 = vld [vmem:[#allocation2 + $0x10] sm:$0xff] }
  0x2d   : > { %882 = vmatprep.subr.bf16.mxu0 %v985_v15  ;;  %v998_v28 = vld [vmem:[%s1122_s7 + $0x8] sm:$0xff]   ;;  %v1002_v31 = vld [vmem:[%s1122_s7 + $0x80] sm:$0xff]   ;;  %v308_v58 = vld [vmem:[#allocation2 + $0x18] sm:$0xff] }
  0x2e   : > { %919 = vmatpush3.bf16.msra.mxu1 %v984_v14  ;;  %v999_v29 = vld [vmem:[%s1122_s7 + $0x88] sm:$0xff]   ;;  %v1005_v32 = vld [vmem:[%s1124_s8 + $0x4] ss:$12 sps:$4 sm:$0xff]  }
  0x2f   : > { %920 = vmatprep.subr.bf16.mxu1 %v987_v17  ;;  %v1006_v33 = vld [vmem:[%s1124_s8 + $0x8] ss:$12 sps:$4 sm:$0xff]   ;;  %574 = vmatprep.mubr.bf16.mxu0 %v1005_v32  ;;  %v1003_v35 = vld [vmem:[%s1124_s8] ss:$12 sps:$4 sm:$0xff]   ;;  %v1010_v38 = vld [vmem:[%s1124_s8 + $0x18] ss:$12 sps:$4 sm:$0xff]  }
  0x30   : > { %883 = vmatpush3.bf16.msra.mxu0 %v986_v16  ;;  %v1001_v34 = vld [vmem:[%s1122_s7] sm:$0xff]   ;;  %932 = vmatprep.mubr.bf16.mxu1 %v1006_v33  ;;  %v1008_v36 = vld [vmem:[%s1124_s8 + $0x1c] ss:$12 sps:$4 sm:$0xff]  }
  0x31   : > { %884 = vmatprep.subr.bf16.mxu0 %v988_v18  ;;  %v1007_v37 = vld [vmem:[%s1124_s8 + $0x20] ss:$12 sps:$4 sm:$0xff]  }
  0x32   : > { %921 = vmatpush3.bf16.msra.mxu1 %v987_v17  ;;  %v307_v52 = vld [vmem:[#allocation2] sm:$0xff]  ;;  %v309_v0 = vld [vmem:[#allocation2 + $0x8] sm:$0xff] }
  0x33   : > { %922 = vmatprep.subr.bf16.mxu1 %v990_v20 }
  0x34   : > { %885 = vmatpush3.bf16.msra.mxu0 %v989_v19 }
  0x35   : > { %886 = vmatprep.subr.bf16.mxu0 %v991_v21 }
  0x36   : > { %923 = vmatpush3.bf16.msra.mxu1 %v990_v20 }
  0x37   : > { %924 = vmatprep.subr.bf16.mxu1 %v993_v22 }
  0x38   : > { %887 = vmatpush3.bf16.msra.mxu0 %v992_v23 }
  0x39   : > { %888 = vmatprep.subr.bf16.mxu0 %v994_v24 }
  0x3a   : > { %925 = vmatpush3.bf16.msra.mxu1 %v993_v22 }
  0x3b   : > { %926 = vmatprep.subr.bf16.mxu1 %v996_v25 }
  0x3c   : > { %889 = vmatpush3.bf16.msra.mxu0 %v995_v26 }
  0x3d   : > { %890 = vmatprep.subr.bf16.mxu0 %v997_v27 }
  0x3e   : > { %927 = vmatpush3.bf16.msra.mxu1 %v996_v25 }
  0x3f   : > { %928 = vmatprep.subr.bf16.mxu1 %v999_v29 }
  0x40   : > { %891 = vmatpush3.bf16.msra.mxu0 %v998_v28 }
  0x41   : > { %892 = vmatprep.subr.bf16.mxu0 %v1000_v30 }
  0x42   : > { %929 = vmatpush3.bf16.msra.mxu1 %v999_v29 }
  0x43   : > { %930 = vmatprep.subr.bf16.mxu1 %v1002_v31 }
  0x44   : > { %893 = vmatpush3.bf16.msra.mxu0 %v1001_v34 }
  0x46   : > { %931 = vmatpush3.bf16.msra.mxu1 %v1002_v31 }
  0x47   : > { %575 = vmatmul.mubr.bf16.vlgmr.msra.gmra.mxu0 %v1003_v35 }
  0x48   : > { %582 = vmatprep.mubr.bf16.mxu0 %v1008_v36 }
  0x49   : > { %933 = vmatmul.mubr.bf16.vlgmr.msra.gmra.mxu1 %v1007_v37 }
  0x4f   : > { %583 = vmatmul.mubr.bf16.gmra.mxu0 %v1010_v38 }
 0x107   : > { %v894_v39 = vpop.f32.mrf.mxu0 }
 0x109   : > { %v895_v40 = vpop.f32.mrf.mxu0  ;;  %v934_v41 = vpop.f32.mrf.mxu1 }
 0x10a   : > { %v896_v42 = vadd.f32 %v895_v40, %v894_v39 }
 0x10b   : > { %v897_v43 = vpop.f32.mrf.mxu0  ;;  %v625_v45 = vpop.f32.mrf.mxu1 }
 0x10c   : > { %v626_v46 = vadd.f32 %v896_v42, %v625_v45 }
 0x10d   : > { %v898_v47 = vpop.f32.mrf.mxu0  ;;  %v935_v48 = vpop.f32.mrf.mxu1 }
 0x10e   : > { %v640_v49 = vadd.f32 %v626_v46, %v306_v44  ;;  %v899_v50 = vadd.f32 %v898_v47, %v897_v43 }
 0x10f   : > { %v900_v51 = vpop.f32.mrf.mxu0  ;;  %v628_v53 = vpop.f32.mrf.mxu1 }
 0x110   : > { %644 = vst [vmem:[#allocation2 + $0x10] sm:$0xff] %v640_v49  ;;  %v629_v54 = vadd.f32 %v899_v50, %v628_v53 }
 0x111   : > { %v901_v55 = vpop.f32.mrf.mxu0 }
 0x112   : > { %v641_v56 = vadd.f32 %v629_v54, %v307_v52  ;;  %v902_v57 = vadd.f32 %v901_v55, %v900_v51 }
 0x113   : > { %v903_v59 = vpop.f32.mrf.mxu0 }
 0x114   : > { %645 = vst [vmem:[#allocation2] sm:$0xff] %v641_v56  ;;  %v634_v60 = vadd.f32 %v934_v41, %v902_v57 }
 0x115   : > { %v904_v61 = vpop.f32.mrf.mxu0 }
 0x116   : > { %v642_v62 = vadd.f32 %v634_v60, %v308_v58  ;;  %v905_v63 = vadd.f32 %v904_v61, %v903_v59 }
 0x118   : > { %646 = vst [vmem:[#allocation2 + $0x18] sm:$0xff] %v642_v62  ;;  %v637_v1 = vadd.f32 %v935_v48, %v905_v63  ;;  %651 = sbr.rel (%p852_p11) target bundleno = 299 (0x12b), region = 66 }
 0x11a   : > { %v643_v2 = vadd.f32 %v637_v1, %v309_v0 }
 0x11c   : > { %647 = vst [vmem:[#allocation2 + $0x8] sm:$0xff] %v643_v2 }
 0x11d   : > { %v652_v3 = vld [vmem:[#allocation2 + $0x10] sm:$0xff]  ;;  %v653_v4 = vld [vmem:[#allocation2] sm:$0xff] }
 0x11e   : > { %v853_v5 = vld [vmem:[%s1184_s2] ss:$0 sm:$0xff] }
 0x11f   : > { %v663_v6 = vadd.f32 %v853_v5, %v652_v3  ;;  %v664_v7 = vadd.f32 %v853_v5, %v653_v4  ;;  %v654_v8 = vld [vmem:[#allocation2 + $0x18] sm:$0xff] }
 0x120   : > { %v665_v10 = vadd.f32 %v853_v5, %v654_v8 }
 0x121   : > { %v667_v12 = vmax.f32 %v663_v6, 0.0  ;;  %v668_v13 = vmax.f32 %v664_v7, 0.0 }
 0x122   : > { %v669_v14 = vmax.f32 %v665_v10, 0.0 }
 0x123   : > { %v655_v9 = vld [vmem:[#allocation2 + $0x8] sm:$0xff]  ;;  %v870_v16 = vpack.c.bf16 %v668_v13, %v667_v12 }
 0x124   : > { %v666_v11 = vadd.f32 %v853_v5, %v655_v9 }
 0x125   : > { %871 = vst [vmem:[%s1185_s3] sm:$0xff] %v870_v16  }
 0x126   : > { %v670_v15 = vmax.f32 %v666_v11, 0.0 }
 0x128   : > { %v875_v17 = vpack.c.bf16 %v670_v15, %v669_v14 }
 0x12a   : > { %877 = vst [vmem:[%s1185_s3 + $0x8] sm:$0xff] %v875_v17  }
 0x12b PF: > { %s13_s16 = sadd.s32 1, %s1049_s16   ;;  %s1186_s12 = smov %s1037_s13 }
 0x12c   : > { %p10_p12 = scmp.ge.s32.totalorder %s13_s16, 5   ;;  %s1187_s13 = smov %s1107_s20 }
 0x12d   : > { %s1188_s14 = smov %s1045_s15  ;;  %s1189_s15 = smov %s1191_s17 }
 0x12e   :  { %12 = sbr.rel (!%p10_p12) target bundleno = 3 (0x3), region = 113 }

// kernel: morphclr_dual_forward.54
= control target key start
LH: loop header
LB: loop body
LE: loop exit
PB: predicated region body
PF: predicated region fallthrough
CT: control target
= control target key end

     0   :  { %s1036_s12 = smov 0   ;;  %s1038_s13 = smov 0   ;;  %s1135_s0 = inlined_call_operand.vmem [shape: bf16[8,1152], index: 0, kind: input, shape index: {}]   ;;  %s1136_s1 = inlined_call_operand.vmem [shape: bf16[1152,256], index: 1, kind: input, shape index: {}]   ;;  %s1137_s2 = inlined_call_operand.vmem [shape: f32[1,256], index: 2, kind: input, shape index: {}]   ;;  %s1138_s3 = inlined_call_operand.vmem [shape: bf16[8,256], index: 3, kind: output, shape index: {}]  }
   0x1   :  { %s1040_s14 = smov 0  }
   0x2 LB: > { %s25_s15 = sadd.s32 1, %s1008_s13  ;;  %p825_p0 = scmp.ge.s32.totalorder %s1012_s14, 1  ;;  %s1012_s14 = sphi %s1040_s14, %s13_s14   ;;  %s1008_s13 = sphi %s1038_s13, %s1140_s13   ;;  %s1004_s12 = sphi %s1036_s12, %s1139_s12  }
   0x3   : > { %p26_p1 = scmp.ge.s32.totalorder %s25_s15, 3  ;;  %p194_p2 = scmp.lt.s32.totalorder %s1012_s14, 4 }
   0x5   : > { %s1142_s15 = smov (%p26_p1, %s25_s15), 0  ;;  %p195_p3 = pnand %p825_p0, %p194_p2 }
   0x6   : > { %s240_s16 = smul.u32 (!%p195_p3), 3, %s1004_s12  ;;  %p829_p6 = scmp.ne.s32.totalorder (!%p195_p3), %s1004_s12, 0 }
   0x7   : > { %198 = sbr.rel (%p195_p3) target bundleno = 302 (0x12e), region = 32 }
   0x8   : > { %s250_s17 = smul.u32 (!%p195_p3), 48, %s1004_s12  ;;  %p243_p4 = scmp.lt.s32.totalorder (!%p195_p3), %s240_s16, 8 }
   0xa   : > { %p252_p5 = scmp.lt.s32.totalorder (!%p195_p3), %s250_s17, 143 }
   0xc   : > { %s1144_s16 = smov (!%p243_p4, %s240_s16), 8  ;;  %s1146_s17 = smov (!%p252_p5, %s250_s17), 143 }
   0xd   : > { %s826_s18 = sshll.u32 %s1144_s16, 2  ;;  %s887_s22 = sshll.u32 %s1146_s17, 3 }
   0xe   : > { %s1061_s21 = scalar_lea.vmem %s1135_s0, %s826_s18  ;;  %s1066_s25 = scalar_lea.vmem %s1136_s1, %s887_s22 }
   0xf   : > { %281 = sbr.rel (%p829_p6) target bundleno = 22 (0x16), region = 36 }
  0x14   : > { %v1014_v0 = vmov 0.0  }
  0x15   : > { %282 = vst [vmem:[#allocation2] sm:$0xff] %v1014_v0  ;;  %283 = vst [vmem:[#allocation2 + $0x8] sm:$0xff] %v1014_v0 }
  0x16 PF: > { %v915_v1 = vld [vmem:[%s1066_s25 + $0x74] ss:$8 sps:$4 sm:$0xff]   ;;  %v917_v2 = vld [vmem:[%s1066_s25 + $0x70] ss:$8 sps:$4 sm:$0xff]   ;;  %v1015_v3 = vmov 0   ;;  %v286_v34 = vld [vmem:[%s1061_s21] sm:$0xff] }
  0x17   : > { %660 = vmatprep.mubr.bf16.mxu1 %v1015_v3  ;;  %587 = vmatprep.subr.bf16.mxu0 %v915_v1  ;;  %v918_v4 = vld [vmem:[%s1066_s25 + $0x64] ss:$8 sps:$4 sm:$0xff]   ;;  %v920_v5 = vld [vmem:[%s1066_s25 + $0x60] ss:$8 sps:$4 sm:$0xff]   ;;  %v921_v6 = vld [vmem:[%s1066_s25 + $0x54] ss:$8 sps:$4 sm:$0xff]   ;;  %v831_v36 = vcombine.high %v286_v34, %v286_v34  ;;  %v830_v53 = vcombine.low %v286_v34, %v286_v34 }
  0x18   : > { %588 = vmatpush1.bf16.msra.mxu0 %v917_v2  ;;  %v923_v7 = vld [vmem:[%s1066_s25 + $0x50] ss:$8 sps:$4 sm:$0xff]   ;;  %v924_v8 = vld [vmem:[%s1066_s25 + $0x44] ss:$8 sps:$4 sm:$0xff]   ;;  %v936_v9 = vld [vmem:[%s1066_s25 + $0x174] ss:$8 sps:$4 sm:$0xff]  }
  0x19   : > { %589 = vmatprep.subr.bf16.mxu0 %v918_v4  ;;  %v938_v10 = vld [vmem:[%s1066_s25 + $0x170] ss:$8 sps:$4 sm:$0xff]   ;;  %v926_v11 = vld [vmem:[%s1066_s25 + $0x40] ss:$8 sps:$4 sm:$0xff]   ;;  %v927_v12 = vld [vmem:[%s1066_s25 + $0x34] ss:$8 sps:$4 sm:$0xff]   ;;  %628 = vmatprep.subr.bf16.mxu1 %v936_v9 }
  0x1a   : > { %v942_v13 = vld [vmem:[%s1066_s25 + $0x164] ss:$8 sps:$4 sm:$0xff]   ;;  %629 = vmatpush1.bf16.msra.mxu1 %v938_v10  ;;  %v944_v14 = vld [vmem:[%s1066_s25 + $0x160] ss:$8 sps:$4 sm:$0xff]   ;;  %v929_v15 = vld [vmem:[%s1066_s25 + $0x30] ss:$8 sps:$4 sm:$0xff]   ;;  %619 = vmatprep.mubr.bf16.mxu0 %v831_v36 }
  0x1b   : > { %630 = vmatprep.subr.bf16.mxu1 %v942_v13  ;;  %v948_v16 = vld [vmem:[%s1066_s25 + $0x154] ss:$8 sps:$4 sm:$0xff]   ;;  %v930_v17 = vld [vmem:[%s1066_s25 + $0x24] ss:$8 sps:$4 sm:$0xff]   ;;  %v950_v18 = vld [vmem:[%s1066_s25 + $0x150] ss:$8 sps:$4 sm:$0xff]  }
  0x1c   : > { %590 = vmatpush1.bf16.msra.mxu0 %v920_v5  ;;  %v954_v19 = vld [vmem:[%s1066_s25 + $0x144] ss:$8 sps:$4 sm:$0xff]   ;;  %v932_v20 = vld [vmem:[%s1066_s25 + $0x20] ss:$8 sps:$4 sm:$0xff]   ;;  %v933_v21 = vld [vmem:[%s1066_s25 + $0x14] ss:$8 sps:$4 sm:$0xff]  }
  0x1d   : > { %591 = vmatprep.subr.bf16.mxu0 %v921_v6  ;;  %v956_v22 = vld [vmem:[%s1066_s25 + $0x140] ss:$8 sps:$4 sm:$0xff]   ;;  %v960_v23 = vld [vmem:[%s1066_s25 + $0x134] ss:$8 sps:$4 sm:$0xff]   ;;  %v935_v24 = vld [vmem:[%s1066_s25 + $0x10] ss:$8 sps:$4 sm:$0xff]  }
  0x1e   : > { %631 = vmatpush1.bf16.msra.mxu1 %v944_v14  ;;  %v939_v25 = vld [vmem:[%s1066_s25 + $0x4] ss:$8 sps:$4 sm:$0xff]   ;;  %v962_v26 = vld [vmem:[%s1066_s25 + $0x130] ss:$8 sps:$4 sm:$0xff]   ;;  %v941_v28 = vld [vmem:[%s1066_s25] ss:$8 sps:$4 sm:$0xff]  }
  0x1f   : > { %632 = vmatprep.subr.bf16.mxu1 %v948_v16  ;;  %v966_v27 = vld [vmem:[%s1066_s25 + $0x124] ss:$8 sps:$4 sm:$0xff]   ;;  %v945_v29 = vld [vmem:[%s1066_s25 + $0xf4] ss:$8 sps:$4 sm:$0xff]   ;;  %v968_v30 = vld [vmem:[%s1066_s25 + $0x120] ss:$8 sps:$4 sm:$0xff]  }
  0x20   : > { %592 = vmatpush1.bf16.msra.mxu0 %v923_v7  ;;  %v972_v31 = vld [vmem:[%s1066_s25 + $0x114] ss:$8 sps:$4 sm:$0xff]   ;;  %v947_v32 = vld [vmem:[%s1066_s25 + $0xf0] ss:$8 sps:$4 sm:$0xff]   ;;  %v951_v33 = vld [vmem:[%s1066_s25 + $0xe4] ss:$8 sps:$4 sm:$0xff]  }
  0x21   : > { %593 = vmatprep.subr.bf16.mxu0 %v924_v8  ;;  %v974_v35 = vld [vmem:[%s1066_s25 + $0x110] ss:$8 sps:$4 sm:$0xff]   ;;  %v978_v37 = vld [vmem:[%s1066_s25 + $0x104] ss:$8 sps:$4 sm:$0xff]   ;;  %v953_v38 = vld [vmem:[%s1066_s25 + $0xe0] ss:$8 sps:$4 sm:$0xff]  }
  0x22   : > { %633 = vmatpush1.bf16.msra.mxu1 %v950_v18  ;;  %v957_v39 = vld [vmem:[%s1066_s25 + $0xd4] ss:$8 sps:$4 sm:$0xff]   ;;  %v980_v40 = vld [vmem:[%s1066_s25 + $0x100] ss:$8 sps:$4 sm:$0xff]   ;;  %v959_v41 = vld [vmem:[%s1066_s25 + $0xd0] ss:$8 sps:$4 sm:$0xff]  }
  0x23   : > { %634 = vmatprep.subr.bf16.mxu1 %v954_v19  ;;  %v963_v42 = vld [vmem:[%s1066_s25 + $0xc4] ss:$8 sps:$4 sm:$0xff]   ;;  %v984_v43 = vld [vmem:[%s1061_s21 + $0x8] ss:$0 sps:$4 sm:$0xff]   ;;  %v969_v45 = vld [vmem:[%s1066_s25 + $0xb4] ss:$8 sps:$4 sm:$0xff]  }
  0x24   : > { %594 = vmatpush1.bf16.msra.mxu0 %v926_v11  ;;  %v965_v44 = vld [vmem:[%s1066_s25 + $0xc0] ss:$8 sps:$4 sm:$0xff]   ;;  %v971_v46 = vld [vmem:[%s1066_s25 + $0xb0] ss:$8 sps:$4 sm:$0xff]   ;;  %v975_v47 = vld [vmem:[%s1066_s25 + $0xa4] ss:$8 sps:$4 sm:$0xff]  }
  0x25   : > { %595 = vmatprep.subr.bf16.mxu0 %v927_v12  ;;  %v977_v48 = vld [vmem:[%s1066_s25 + $0xa0] ss:$8 sps:$4 sm:$0xff]   ;;  %v981_v49 = vld [vmem:[%s1066_s25 + $0x94] ss:$8 sps:$4 sm:$0xff]   ;;  %v983_v50 = vld [vmem:[%s1066_s25 + $0x90] ss:$8 sps:$4 sm:$0xff]  }
  0x26   : > { %635 = vmatpush1.bf16.msra.mxu1 %v956_v22  ;;  %v985_v51 = vld [vmem:[%s1066_s25 + $0x84] ss:$8 sps:$4 sm:$0xff]   ;;  %v987_v52 = vld [vmem:[%s1066_s25 + $0x80] ss:$8 sps:$4 sm:$0xff]   ;;  %p881_p7 = scmp.ne.s32.totalorder %s1004_s12, 2 }
  0x27   : > { %636 = vmatprep.subr.bf16.mxu1 %v960_v23  ;;  %v284_v58 = vld [vmem:[#allocation2] sm:$0xff]  ;;  %v285_v61 = vld [vmem:[#allocation2 + $0x8] sm:$0xff] }
  0x28   : > { %596 = vmatpush1.bf16.msra.mxu0 %v929_v15 }
  0x29   : > { %597 = vmatprep.subr.bf16.mxu0 %v930_v17 }
  0x2a   : > { %637 = vmatpush1.bf16.msra.mxu1 %v962_v26 }
  0x2b   : > { %638 = vmatprep.subr.bf16.mxu1 %v966_v27 }
  0x2c   : > { %598 = vmatpush1.bf16.msra.mxu0 %v932_v20 }
  0x2d   : > { %599 = vmatprep.subr.bf16.mxu0 %v933_v21 }
  0x2e   : > { %639 = vmatpush1.bf16.msra.mxu1 %v968_v30 }
  0x2f   : > { %640 = vmatprep.subr.bf16.mxu1 %v972_v31 }
  0x30   : > { %600 = vmatpush1.bf16.msra.mxu0 %v935_v24 }
  0x31   : > { %601 = vmatprep.subr.bf16.mxu0 %v939_v25 }
  0x32   : > { %641 = vmatpush1.bf16.msra.mxu1 %v974_v35 }
  0x33   : > { %642 = vmatprep.subr.bf16.mxu1 %v978_v37 }
  0x34   : > { %602 = vmatpush1.bf16.msra.mxu0 %v941_v28 }
  0x35   : > { %603 = vmatprep.subr.bf16.mxu0 %v945_v29 }
  0x36   : > { %643 = vmatpush1.bf16.msra.mxu1 %v980_v40 }
  0x38   : > { %604 = vmatpush2.bf16.msra.mxu0 %v947_v32 }
  0x39   : > { %605 = vmatprep.subr.bf16.mxu0 %v951_v33  ;;  %661 = vmatmul.mubr.bf16.vlgmr.msra.gmra.mxu1 %v984_v43 }
  0x3c   : > { %606 = vmatpush2.bf16.msra.mxu0 %v953_v38 }
  0x3d   : > { %607 = vmatprep.subr.bf16.mxu0 %v957_v39 }
  0x40   : > { %608 = vmatpush2.bf16.msra.mxu0 %v959_v41 }
  0x41   : > { %609 = vmatprep.subr.bf16.mxu0 %v963_v42 }
  0x44   : > { %610 = vmatpush2.bf16.msra.mxu0 %v965_v44 }
  0x45   : > { %611 = vmatprep.subr.bf16.mxu0 %v969_v45 }
  0x48   : > { %612 = vmatpush2.bf16.msra.mxu0 %v971_v46 }
  0x49   : > { %613 = vmatprep.subr.bf16.mxu0 %v975_v47 }
  0x4c   : > { %614 = vmatpush2.bf16.msra.mxu0 %v977_v48 }
  0x4d   : > { %615 = vmatprep.subr.bf16.mxu0 %v981_v49 }
  0x50   : > { %616 = vmatpush2.bf16.msra.mxu0 %v983_v50 }
  0x51   : > { %617 = vmatprep.subr.bf16.mxu0 %v985_v51 }
  0x54   : > { %618 = vmatpush2.bf16.msra.mxu0 %v987_v52 }
  0x57   : > { %620 = vmatmul.mubr.bf16.vlgmr.msra.gmra.mxu0 %v830_v53 }
  0xf9   : > { %v662_v54 = vpop.f32.mrf.mxu1 }
  0xfb   : > { %v664_v55 = vpop.f32.mrf.mxu1 }
  0xfd   : > { %v666_v56 = vpop.f32.mrf.mxu1 }
  0xff   : > { %v667_v57 = vpop.f32.mrf.mxu1 }
 0x117   : > { %v621_v59 = vpop.f32.mrf.mxu0 }
 0x118   : > { %v663_v60 = vadd.f32 %v662_v54, %v621_v59 }
 0x119   : > { %v623_v62 = vpop.f32.mrf.mxu0 }
 0x11a   : > { %v669_v63 = vadd.f32 %v663_v60, %v284_v58  ;;  %v665_v0 = vadd.f32 %v664_v55, %v623_v62  ;;  %676 = sbr.rel (%p881_p7) target bundleno = 302 (0x12e), region = 40 }
 0x11b   : > { %v625_v1 = vpop.f32.mrf.mxu0 }
 0x11c   : > { %671 = vst [vmem:[#allocation2] sm:$0xff] %v669_v63  ;;  %v670_v2 = vadd.f32 %v665_v0, %v285_v61 }
 0x11d   : > { %v626_v3 = vpop.f32.mrf.mxu0 }
 0x11e   : > { %672 = vst [vmem:[#allocation2 + $0x8] sm:$0xff] %v670_v2 }
 0x11f   : > { %v681_v4 = vlaneseq  ;;  %v679_v6 = vld [vmem:[%s1137_s2] sm:$0x3] }
 0x121   : > { %v682_v5 = vshrl.u32 %v681_v4, 7 }
 0x123   : > { %v683_v7 = vsub.s32 0, %v682_v5  ;;  %v687_v8 = vsub.s32 1, %v682_v5  ;;  %v677_v9 = vld [vmem:[#allocation2] sm:$0xff] }
 0x125   : > { %v678_v10 = vld [vmem:[#allocation2 + $0x8] sm:$0xff]  ;;  %v684_v11 = vrot.slane %v679_v6, %v683_v7  ;;  %v688_v12 = vrot.slane %v679_v6, %v687_v8 }
 0x127   : > { %v691_v13 = vadd.f32 %v684_v11, %v677_v9  ;;  %v692_v14 = vadd.f32 %v688_v12, %v678_v10 }
 0x129   : > { %v693_v15 = vmax.f32 %v691_v13, 0.0  ;;  %v694_v16 = vmax.f32 %v692_v14, 0.0 }
 0x12b   : > { %v888_v17 = vpack.c.bf16 %v694_v16, %v693_v15 }
 0x12d   : > { %703 = vst [vmem:[%s1138_s3] sm:$0xff] %v888_v17 }
 0x12e PF: > { %s13_s14 = sadd.s32 1, %s1012_s14   ;;  %s1139_s12 = smov %s1008_s13 }
 0x12f   : > { %p10_p8 = scmp.ge.s32.totalorder %s13_s14, 5   ;;  %s1140_s13 = smov %s1142_s15 }
 0x131   :  { %12 = sbr.rel (!%p10_p8) target bundleno = 2 (0x2), region = 76 }

// kernel: morphclr_dual_forward.55
= control target key start
LH: loop header
LB: loop body
LE: loop exit
PB: predicated region body
PF: predicated region fallthrough
CT: control target
= control target key end

     0   :  { %v240_v1 = vmov 0   ;;  %v172_v18 = vlaneseq  ;;  %s318_s1 = inlined_call_operand.vmem [shape: bf16[128,256], index: 1, kind: input, shape index: {}]   ;;  %s319_s0 = inlined_call_operand.vmem [shape: bf16[8,128], index: 0, kind: input, shape index: {}]   ;;  %s320_s2 = inlined_call_operand.vmem [shape: f32[1,256], index: 2, kind: input, shape index: {}]   ;;  %s321_s3 = inlined_call_operand.vmem [shape: bf16[8,256], index: 3, kind: output, shape index: {}]  }
   0x1   :  { %v216_v0 = vld [vmem:[%s318_s1 + $0x74] ss:$8 sps:$4 sm:$0xff]   ;;  %152 = vmatprep.mubr.bf16.mxu0 %v240_v1  ;;  %v218_v2 = vld [vmem:[%s318_s1 + $0x70] ss:$8 sps:$4 sm:$0xff]   ;;  %v219_v3 = vld [vmem:[%s318_s1 + $0x64] ss:$8 sps:$4 sm:$0xff]  }
   0x2   :  { %120 = vmatprep.subr.bf16.mxu0 %v216_v0  ;;  %v221_v4 = vld [vmem:[%s318_s1 + $0x60] ss:$8 sps:$4 sm:$0xff]   ;;  %v222_v5 = vld [vmem:[%s318_s1 + $0x54] ss:$8 sps:$4 sm:$0xff]   ;;  %v224_v6 = vld [vmem:[%s318_s1 + $0x50] ss:$8 sps:$4 sm:$0xff]  }
   0x3   :  { %121 = vmatpush1.bf16.msra.mxu0 %v218_v2  ;;  %v225_v7 = vld [vmem:[%s318_s1 + $0x44] ss:$8 sps:$4 sm:$0xff]   ;;  %v227_v8 = vld [vmem:[%s318_s1 + $0x40] ss:$8 sps:$4 sm:$0xff]   ;;  %v228_v9 = vld [vmem:[%s318_s1 + $0x34] ss:$8 sps:$4 sm:$0xff]  }
   0x4   :  { %122 = vmatprep.subr.bf16.mxu0 %v219_v3  ;;  %v230_v10 = vld [vmem:[%s318_s1 + $0x30] ss:$8 sps:$4 sm:$0xff]   ;;  %v231_v11 = vld [vmem:[%s318_s1 + $0x24] ss:$8 sps:$4 sm:$0xff]   ;;  %v233_v12 = vld [vmem:[%s318_s1 + $0x20] ss:$8 sps:$4 sm:$0xff]  }
   0x5   :  { %v234_v13 = vld [vmem:[%s318_s1 + $0x14] ss:$8 sps:$4 sm:$0xff]   ;;  %v236_v14 = vld [vmem:[%s318_s1 + $0x10] ss:$8 sps:$4 sm:$0xff]   ;;  %v237_v15 = vld [vmem:[%s318_s1 + $0x4] ss:$8 sps:$4 sm:$0xff]  }
   0x6   :  { %v239_v16 = vld [vmem:[%s318_s1] ss:$8 sps:$4 sm:$0xff]   ;;  %v173_v19 = vshrl.u32 %v172_v18, 7 }
   0x7   :  { %123 = vmatpush1.bf16.msra.mxu0 %v221_v4  ;;  %v23_v17 = vld [vmem:[%s319_s0] sm:$0xf] }
   0x8   :  { %124 = vmatprep.subr.bf16.mxu0 %v222_v5  ;;  %v174_v20 = vsub.s32 0, %v173_v19  ;;  %v178_v21 = vsub.s32 1, %v173_v19  ;;  %v170_v22 = vld [vmem:[%s320_s2] sm:$0x3] }
   0xa   :  { %v175_v23 = vrot.slane %v170_v22, %v174_v20  ;;  %v179_v24 = vrot.slane %v170_v22, %v178_v21 }
   0xb   :  { %125 = vmatpush1.bf16.msra.mxu0 %v224_v6 }
   0xc   :  { %126 = vmatprep.subr.bf16.mxu0 %v225_v7 }
   0xf   :  { %127 = vmatpush1.bf16.msra.mxu0 %v227_v8 }
  0x10   :  { %128 = vmatprep.subr.bf16.mxu0 %v228_v9 }
  0x13   :  { %129 = vmatpush1.bf16.msra.mxu0 %v230_v10 }
  0x14   :  { %130 = vmatprep.subr.bf16.mxu0 %v231_v11 }
  0x17   :  { %131 = vmatpush1.bf16.msra.mxu0 %v233_v12 }
  0x18   :  { %132 = vmatprep.subr.bf16.mxu0 %v234_v13 }
  0x1b   :  { %133 = vmatpush1.bf16.msra.mxu0 %v236_v14 }
  0x1c   :  { %134 = vmatprep.subr.bf16.mxu0 %v237_v15 }
  0x1f   :  { %135 = vmatpush1.bf16.msra.mxu0 %v239_v16 }
  0x22   :  { %153 = vmatmul.mubr.bf16.vlgmr.msra.gmra.mxu0 %v23_v17 }
  0xe2   :  { %v154_v25 = vpop.f32.mrf.mxu0 }
  0xe3   :  { %v182_v27 = vadd.f32 %v175_v23, %v154_v25 }
  0xe4   :  { %v156_v26 = vpop.f32.mrf.mxu0 }
  0xe5   :  { %v183_v28 = vadd.f32 %v179_v24, %v156_v26 }
  0xe6   :  { %v158_v29 = vpop.f32.mrf.mxu0 }
  0xe7   :  { %v214_v30 = vpack.c.bf16 %v183_v28, %v182_v27 }
  0xe8   :  { %v159_v31 = vpop.f32.mrf.mxu0 }
  0xe9   :  { %192 = vst [vmem:[%s321_s3] sm:$0xff] %v214_v30 }

// kernel: morphclr_dual_forward.56
= control target key start
LH: loop header
LB: loop body
LE: loop exit
PB: predicated region body
PF: predicated region fallthrough
CT: control target
= control target key end

     0   :  { %s1131_s15 = smov 0   ;;  %s1133_s16 = smov 0   ;;  %s1233_s0 = inlined_call_operand.vmem [shape: bf16[8,2304], index: 0, kind: input, shape index: {}]   ;;  %s1234_s1 = inlined_call_operand.vmem [shape: bf16[2304,256], index: 1, kind: input, shape index: {}]   ;;  %s1235_s2 = inlined_call_operand.vmem [shape: f32[1,256], index: 2, kind: input, shape index: {}]   ;;  %s1236_s3 = inlined_call_operand.vmem [shape: bf16[8,256], index: 3, kind: input, shape index: {}]   ;;  %s1237_s4 = inlined_call_operand.vmem [shape: bf16[8,256], index: 4, kind: output, shape index: {}]  }
   0x1   :  { %s1135_s17 = smov 0  }
   0x2 LB: > { %s26_s18 = sadd.s32 1, %s1098_s16  ;;  %p915_p0 = scmp.ge.s32.totalorder %s1102_s17, 1  ;;  %s1102_s17 = sphi %s1135_s17, %s14_s17   ;;  %s1098_s16 = sphi %s1133_s16, %s1239_s16   ;;  %s1094_s15 = sphi %s1131_s15, %s1238_s15  }
   0x3   : > { %p27_p1 = scmp.ge.s32.totalorder %s26_s18, 6  ;;  %p236_p2 = scmp.lt.s32.totalorder %s1102_s17, 7 }
   0x5   : > { %s1241_s18 = smov (%p27_p1, %s26_s18), 0  ;;  %p237_p3 = pnand %p915_p0, %p236_p2 }
   0x6   : > { %s293_s19 = smul.u32 (!%p237_p3), 3, %s1094_s15  ;;  %p919_p6 = scmp.ne.s32.totalorder (!%p237_p3), %s1094_s15, 0 }
   0x7   : > { %240 = sbr.rel (%p237_p3) target bundleno = 304 (0x130), region = 36 }
   0x8   : > { %s303_s20 = smul.u32 (!%p237_p3), 48, %s1094_s15  ;;  %p296_p4 = scmp.lt.s32.totalorder (!%p237_p3), %s293_s19, 17 }
   0xa   : > { %p305_p5 = scmp.lt.s32.totalorder (!%p237_p3), %s303_s20, 287 }
   0xc   : > { %s1243_s19 = smov (!%p296_p4, %s293_s19), 17  ;;  %s1245_s20 = smov (!%p305_p5, %s303_s20), 287 }
   0xd   : > { %s916_s21 = sshll.u32 %s1243_s19, 2  ;;  %s977_s25 = sshll.u32 %s1245_s20, 3 }
   0xe   : > { %s1156_s24 = scalar_lea.vmem %s1233_s0, %s916_s21  ;;  %s1161_s28 = scalar_lea.vmem %s1234_s1, %s977_s25 }
   0xf   : > { %344 = sbr.rel (%p919_p6) target bundleno = 22 (0x16), region = 40 }
  0x14   : > { %v1104_v0 = vmov 0.0  }
  0x15   : > { %345 = vst [vmem:[#allocation2] sm:$0xff] %v1104_v0  ;;  %346 = vst [vmem:[#allocation2 + $0x8] sm:$0xff] %v1104_v0 }
  0x16 PF: > { %v1005_v1 = vld [vmem:[%s1161_s28 + $0x74] ss:$8 sps:$4 sm:$0xff]   ;;  %v1007_v2 = vld [vmem:[%s1161_s28 + $0x70] ss:$8 sps:$4 sm:$0xff]   ;;  %v1105_v3 = vmov 0   ;;  %v349_v34 = vld [vmem:[%s1156_s24] sm:$0xff] }
  0x17   : > { %723 = vmatprep.mubr.bf16.mxu1 %v1105_v3  ;;  %650 = vmatprep.subr.bf16.mxu0 %v1005_v1  ;;  %v1008_v4 = vld [vmem:[%s1161_s28 + $0x64] ss:$8 sps:$4 sm:$0xff]   ;;  %v1010_v5 = vld [vmem:[%s1161_s28 + $0x60] ss:$8 sps:$4 sm:$0xff]   ;;  %v1011_v6 = vld [vmem:[%s1161_s28 + $0x54] ss:$8 sps:$4 sm:$0xff]   ;;  %v921_v36 = vcombine.high %v349_v34, %v349_v34  ;;  %v920_v53 = vcombine.low %v349_v34, %v349_v34 }
  0x18   : > { %651 = vmatpush1.bf16.msra.mxu0 %v1007_v2  ;;  %v1013_v7 = vld [vmem:[%s1161_s28 + $0x50] ss:$8 sps:$4 sm:$0xff]   ;;  %v1014_v8 = vld [vmem:[%s1161_s28 + $0x44] ss:$8 sps:$4 sm:$0xff]   ;;  %v1026_v9 = vld [vmem:[%s1161_s28 + $0x174] ss:$8 sps:$4 sm:$0xff]  }
  0x19   : > { %652 = vmatprep.subr.bf16.mxu0 %v1008_v4  ;;  %v1028_v10 = vld [vmem:[%s1161_s28 + $0x170] ss:$8 sps:$4 sm:$0xff]   ;;  %v1016_v11 = vld [vmem:[%s1161_s28 + $0x40] ss:$8 sps:$4 sm:$0xff]   ;;  %v1017_v12 = vld [vmem:[%s1161_s28 + $0x34] ss:$8 sps:$4 sm:$0xff]   ;;  %691 = vmatprep.subr.bf16.mxu1 %v1026_v9 }
  0x1a   : > { %v1032_v13 = vld [vmem:[%s1161_s28 + $0x164] ss:$8 sps:$4 sm:$0xff]   ;;  %692 = vmatpush1.bf16.msra.mxu1 %v1028_v10  ;;  %v1034_v14 = vld [vmem:[%s1161_s28 + $0x160] ss:$8 sps:$4 sm:$0xff]   ;;  %v1019_v15 = vld [vmem:[%s1161_s28 + $0x30] ss:$8 sps:$4 sm:$0xff]   ;;  %682 = vmatprep.mubr.bf16.mxu0 %v921_v36 }
  0x1b   : > { %693 = vmatprep.subr.bf16.mxu1 %v1032_v13  ;;  %v1038_v16 = vld [vmem:[%s1161_s28 + $0x154] ss:$8 sps:$4 sm:$0xff]   ;;  %v1020_v17 = vld [vmem:[%s1161_s28 + $0x24] ss:$8 sps:$4 sm:$0xff]   ;;  %v1040_v18 = vld [vmem:[%s1161_s28 + $0x150] ss:$8 sps:$4 sm:$0xff]  }
  0x1c   : > { %653 = vmatpush1.bf16.msra.mxu0 %v1010_v5  ;;  %v1044_v19 = vld [vmem:[%s1161_s28 + $0x144] ss:$8 sps:$4 sm:$0xff]   ;;  %v1022_v20 = vld [vmem:[%s1161_s28 + $0x20] ss:$8 sps:$4 sm:$0xff]   ;;  %v1023_v21 = vld [vmem:[%s1161_s28 + $0x14] ss:$8 sps:$4 sm:$0xff]  }
  0x1d   : > { %654 = vmatprep.subr.bf16.mxu0 %v1011_v6  ;;  %v1046_v22 = vld [vmem:[%s1161_s28 + $0x140] ss:$8 sps:$4 sm:$0xff]   ;;  %v1050_v23 = vld [vmem:[%s1161_s28 + $0x134] ss:$8 sps:$4 sm:$0xff]   ;;  %v1025_v24 = vld [vmem:[%s1161_s28 + $0x10] ss:$8 sps:$4 sm:$0xff]  }
  0x1e   : > { %694 = vmatpush1.bf16.msra.mxu1 %v1034_v14  ;;  %v1029_v25 = vld [vmem:[%s1161_s28 + $0x4] ss:$8 sps:$4 sm:$0xff]   ;;  %v1052_v26 = vld [vmem:[%s1161_s28 + $0x130] ss:$8 sps:$4 sm:$0xff]   ;;  %v1031_v28 = vld [vmem:[%s1161_s28] ss:$8 sps:$4 sm:$0xff]  }
  0x1f   : > { %695 = vmatprep.subr.bf16.mxu1 %v1038_v16  ;;  %v1056_v27 = vld [vmem:[%s1161_s28 + $0x124] ss:$8 sps:$4 sm:$0xff]   ;;  %v1035_v29 = vld [vmem:[%s1161_s28 + $0xf4] ss:$8 sps:$4 sm:$0xff]   ;;  %v1058_v30 = vld [vmem:[%s1161_s28 + $0x120] ss:$8 sps:$4 sm:$0xff]  }
  0x20   : > { %655 = vmatpush1.bf16.msra.mxu0 %v1013_v7  ;;  %v1062_v31 = vld [vmem:[%s1161_s28 + $0x114] ss:$8 sps:$4 sm:$0xff]   ;;  %v1037_v32 = vld [vmem:[%s1161_s28 + $0xf0] ss:$8 sps:$4 sm:$0xff]   ;;  %v1041_v33 = vld [vmem:[%s1161_s28 + $0xe4] ss:$8 sps:$4 sm:$0xff]  }
  0x21   : > { %656 = vmatprep.subr.bf16.mxu0 %v1014_v8  ;;  %v1064_v35 = vld [vmem:[%s1161_s28 + $0x110] ss:$8 sps:$4 sm:$0xff]   ;;  %v1068_v37 = vld [vmem:[%s1161_s28 + $0x104] ss:$8 sps:$4 sm:$0xff]   ;;  %v1043_v38 = vld [vmem:[%s1161_s28 + $0xe0] ss:$8 sps:$4 sm:$0xff]  }
  0x22   : > { %696 = vmatpush1.bf16.msra.mxu1 %v1040_v18  ;;  %v1047_v39 = vld [vmem:[%s1161_s28 + $0xd4] ss:$8 sps:$4 sm:$0xff]   ;;  %v1070_v40 = vld [vmem:[%s1161_s28 + $0x100] ss:$8 sps:$4 sm:$0xff]   ;;  %v1049_v41 = vld [vmem:[%s1161_s28 + $0xd0] ss:$8 sps:$4 sm:$0xff]  }
  0x23   : > { %697 = vmatprep.subr.bf16.mxu1 %v1044_v19  ;;  %v1053_v42 = vld [vmem:[%s1161_s28 + $0xc4] ss:$8 sps:$4 sm:$0xff]   ;;  %v1074_v43 = vld [vmem:[%s1156_s24 + $0x8] ss:$0 sps:$4 sm:$0xff]   ;;  %v1059_v45 = vld [vmem:[%s1161_s28 + $0xb4] ss:$8 sps:$4 sm:$0xff]  }
  0x24   : > { %657 = vmatpush1.bf16.msra.mxu0 %v1016_v11  ;;  %v1055_v44 = vld [vmem:[%s1161_s28 + $0xc0] ss:$8 sps:$4 sm:$0xff]   ;;  %v1061_v46 = vld [vmem:[%s1161_s28 + $0xb0] ss:$8 sps:$4 sm:$0xff]   ;;  %v1065_v47 = vld [vmem:[%s1161_s28 + $0xa4] ss:$8 sps:$4 sm:$0xff]  }
  0x25   : > { %658 = vmatprep.subr.bf16.mxu0 %v1017_v12  ;;  %v1067_v48 = vld [vmem:[%s1161_s28 + $0xa0] ss:$8 sps:$4 sm:$0xff]   ;;  %v1071_v49 = vld [vmem:[%s1161_s28 + $0x94] ss:$8 sps:$4 sm:$0xff]   ;;  %v1073_v50 = vld [vmem:[%s1161_s28 + $0x90] ss:$8 sps:$4 sm:$0xff]  }
  0x26   : > { %698 = vmatpush1.bf16.msra.mxu1 %v1046_v22  ;;  %v1075_v51 = vld [vmem:[%s1161_s28 + $0x84] ss:$8 sps:$4 sm:$0xff]   ;;  %v1077_v52 = vld [vmem:[%s1161_s28 + $0x80] ss:$8 sps:$4 sm:$0xff]   ;;  %p971_p7 = scmp.ne.s32.totalorder %s1094_s15, 5 }
  0x27   : > { %699 = vmatprep.subr.bf16.mxu1 %v1050_v23  ;;  %v347_v58 = vld [vmem:[#allocation2] sm:$0xff]  ;;  %v348_v61 = vld [vmem:[#allocation2 + $0x8] sm:$0xff] }
  0x28   : > { %659 = vmatpush1.bf16.msra.mxu0 %v1019_v15 }
  0x29   : > { %660 = vmatprep.subr.bf16.mxu0 %v1020_v17 }
  0x2a   : > { %700 = vmatpush1.bf16.msra.mxu1 %v1052_v26 }
  0x2b   : > { %701 = vmatprep.subr.bf16.mxu1 %v1056_v27 }
  0x2c   : > { %661 = vmatpush1.bf16.msra.mxu0 %v1022_v20 }
  0x2d   : > { %662 = vmatprep.subr.bf16.mxu0 %v1023_v21 }
  0x2e   : > { %702 = vmatpush1.bf16.msra.mxu1 %v1058_v30 }
  0x2f   : > { %703 = vmatprep.subr.bf16.mxu1 %v1062_v31 }
  0x30   : > { %663 = vmatpush1.bf16.msra.mxu0 %v1025_v24 }
  0x31   : > { %664 = vmatprep.subr.bf16.mxu0 %v1029_v25 }
  0x32   : > { %704 = vmatpush1.bf16.msra.mxu1 %v1064_v35 }
  0x33   : > { %705 = vmatprep.subr.bf16.mxu1 %v1068_v37 }
  0x34   : > { %665 = vmatpush1.bf16.msra.mxu0 %v1031_v28 }
  0x35   : > { %666 = vmatprep.subr.bf16.mxu0 %v1035_v29 }
  0x36   : > { %706 = vmatpush1.bf16.msra.mxu1 %v1070_v40 }
  0x38   : > { %667 = vmatpush2.bf16.msra.mxu0 %v1037_v32 }
  0x39   : > { %668 = vmatprep.subr.bf16.mxu0 %v1041_v33  ;;  %724 = vmatmul.mubr.bf16.vlgmr.msra.gmra.mxu1 %v1074_v43 }
  0x3c   : > { %669 = vmatpush2.bf16.msra.mxu0 %v1043_v38 }
  0x3d   : > { %670 = vmatprep.subr.bf16.mxu0 %v1047_v39 }
  0x40   : > { %671 = vmatpush2.bf16.msra.mxu0 %v1049_v41 }
  0x41   : > { %672 = vmatprep.subr.bf16.mxu0 %v1053_v42 }
  0x44   : > { %673 = vmatpush2.bf16.msra.mxu0 %v1055_v44 }
  0x45   : > { %674 = vmatprep.subr.bf16.mxu0 %v1059_v45 }
  0x48   : > { %675 = vmatpush2.bf16.msra.mxu0 %v1061_v46 }
  0x49   : > { %676 = vmatprep.subr.bf16.mxu0 %v1065_v47 }
  0x4c   : > { %677 = vmatpush2.bf16.msra.mxu0 %v1067_v48 }
  0x4d   : > { %678 = vmatprep.subr.bf16.mxu0 %v1071_v49 }
  0x50   : > { %679 = vmatpush2.bf16.msra.mxu0 %v1073_v50 }
  0x51   : > { %680 = vmatprep.subr.bf16.mxu0 %v1075_v51 }
  0x54   : > { %681 = vmatpush2.bf16.msra.mxu0 %v1077_v52 }
  0x57   : > { %683 = vmatmul.mubr.bf16.vlgmr.msra.gmra.mxu0 %v920_v53 }
  0xf9   : > { %v725_v54 = vpop.f32.mrf.mxu1 }
  0xfb   : > { %v727_v55 = vpop.f32.mrf.mxu1 }
  0xfd   : > { %v729_v56 = vpop.f32.mrf.mxu1 }
  0xff   : > { %v730_v57 = vpop.f32.mrf.mxu1 }
 0x117   : > { %v684_v59 = vpop.f32.mrf.mxu0 }
 0x118   : > { %v726_v60 = vadd.f32 %v725_v54, %v684_v59 }
 0x119   : > { %v686_v62 = vpop.f32.mrf.mxu0 }
 0x11a   : > { %v732_v63 = vadd.f32 %v726_v60, %v347_v58  ;;  %v728_v0 = vadd.f32 %v727_v55, %v686_v62  ;;  %739 = sbr.rel (%p971_p7) target bundleno = 304 (0x130), region = 44 }
 0x11b   : > { %v688_v1 = vpop.f32.mrf.mxu0 }
 0x11c   : > { %734 = vst [vmem:[#allocation2] sm:$0xff] %v732_v63  ;;  %v733_v2 = vadd.f32 %v728_v0, %v348_v61 }
 0x11d   : > { %v689_v3 = vpop.f32.mrf.mxu0 }
 0x11e   : > { %735 = vst [vmem:[#allocation2 + $0x8] sm:$0xff] %v733_v2 }
 0x11f   : > { %v744_v4 = vlaneseq  ;;  %v742_v6 = vld [vmem:[%s1235_s2] sm:$0x3] }
 0x120   : > { %v756_v7 = vld [vmem:[%s1236_s3] sm:$0xff] }
 0x121   : > { %v745_v5 = vshrl.u32 %v744_v4, 7  ;;  %v757_v14 = vunpack.c.l.bf16 %v756_v7  ;;  %v758_v15 = vunpack.c.h.bf16 %v756_v7 }
 0x123   : > { %v746_v8 = vsub.s32 0, %v745_v5  ;;  %v750_v9 = vsub.s32 1, %v745_v5  ;;  %v740_v10 = vld [vmem:[#allocation2] sm:$0xff] }
 0x125   : > { %v741_v11 = vld [vmem:[#allocation2 + $0x8] sm:$0xff]  ;;  %v747_v12 = vrot.slane %v742_v6, %v746_v8  ;;  %v751_v13 = vrot.slane %v742_v6, %v750_v9 }
 0x127   : > { %v754_v16 = vadd.f32 %v747_v12, %v740_v10  ;;  %v755_v17 = vadd.f32 %v751_v13, %v741_v11 }
 0x129   : > { %v759_v18 = vadd.f32 %v757_v14, %v754_v16  ;;  %v760_v19 = vadd.f32 %v758_v15, %v755_v17 }
 0x12b   : > { %v761_v20 = vmax.f32 %v759_v18, 0.0  ;;  %v762_v21 = vmax.f32 %v760_v19, 0.0 }
 0x12d   : > { %v978_v22 = vpack.c.bf16 %v762_v21, %v761_v20 }
 0x12f   : > { %771 = vst [vmem:[%s1237_s4] sm:$0xff] %v978_v22 }
 0x130 PF: > { %s14_s17 = sadd.s32 1, %s1102_s17   ;;  %s1238_s15 = smov %s1098_s16 }
 0x131   : > { %p11_p8 = scmp.ge.s32.totalorder %s14_s17, 8   ;;  %s1239_s16 = smov %s1241_s18 }
 0x133   :  { %13 = sbr.rel (!%p11_p8) target bundleno = 2 (0x2), region = 83 }

// kernel: morphclr_dual_forward.57
= control target key start
LH: loop header
LB: loop body
LE: loop exit
PB: predicated region body
PF: predicated region fallthrough
CT: control target
= control target key end

     0   :  { %s1036_s12 = smov 0   ;;  %s1038_s13 = smov 0   ;;  %s1135_s0 = inlined_call_operand.vmem [shape: bf16[8,2304], index: 0, kind: input, shape index: {}]   ;;  %s1136_s1 = inlined_call_operand.vmem [shape: bf16[2304,256], index: 1, kind: input, shape index: {}]   ;;  %s1137_s2 = inlined_call_operand.vmem [shape: f32[1,256], index: 2, kind: input, shape index: {}]   ;;  %s1138_s3 = inlined_call_operand.vmem [shape: bf16[8,256], index: 3, kind: output, shape index: {}]  }
   0x1   :  { %s1040_s14 = smov 0  }
   0x2 LB: > { %s25_s15 = sadd.s32 1, %s1008_s13  ;;  %p825_p0 = scmp.ge.s32.totalorder %s1012_s14, 1  ;;  %s1012_s14 = sphi %s1040_s14, %s13_s14   ;;  %s1008_s13 = sphi %s1038_s13, %s1140_s13   ;;  %s1004_s12 = sphi %s1036_s12, %s1139_s12  }
   0x3   : > { %p26_p1 = scmp.ge.s32.totalorder %s25_s15, 6  ;;  %p194_p2 = scmp.lt.s32.totalorder %s1012_s14, 7 }
   0x5   : > { %s1142_s15 = smov (%p26_p1, %s25_s15), 0  ;;  %p195_p3 = pnand %p825_p0, %p194_p2 }
   0x6   : > { %s240_s16 = smul.u32 (!%p195_p3), 3, %s1004_s12  ;;  %p829_p6 = scmp.ne.s32.totalorder (!%p195_p3), %s1004_s12, 0 }
   0x7   : > { %198 = sbr.rel (%p195_p3) target bundleno = 302 (0x12e), region = 32 }
   0x8   : > { %s250_s17 = smul.u32 (!%p195_p3), 48, %s1004_s12  ;;  %p243_p4 = scmp.lt.s32.totalorder (!%p195_p3), %s240_s16, 17 }
   0xa   : > { %p252_p5 = scmp.lt.s32.totalorder (!%p195_p3), %s250_s17, 287 }
   0xc   : > { %s1144_s16 = smov (!%p243_p4, %s240_s16), 17  ;;  %s1146_s17 = smov (!%p252_p5, %s250_s17), 287 }
   0xd   : > { %s826_s18 = sshll.u32 %s1144_s16, 2  ;;  %s887_s22 = sshll.u32 %s1146_s17, 3 }
   0xe   : > { %s1061_s21 = scalar_lea.vmem %s1135_s0, %s826_s18  ;;  %s1066_s25 = scalar_lea.vmem %s1136_s1, %s887_s22 }
   0xf   : > { %281 = sbr.rel (%p829_p6) target bundleno = 22 (0x16), region = 36 }
  0x14   : > { %v1014_v0 = vmov 0.0  }
  0x15   : > { %282 = vst [vmem:[#allocation2] sm:$0xff] %v1014_v0  ;;  %283 = vst [vmem:[#allocation2 + $0x8] sm:$0xff] %v1014_v0 }
  0x16 PF: > { %v915_v1 = vld [vmem:[%s1066_s25 + $0x74] ss:$8 sps:$4 sm:$0xff]   ;;  %v917_v2 = vld [vmem:[%s1066_s25 + $0x70] ss:$8 sps:$4 sm:$0xff]   ;;  %v1015_v3 = vmov 0   ;;  %v286_v34 = vld [vmem:[%s1061_s21] sm:$0xff] }
  0x17   : > { %660 = vmatprep.mubr.bf16.mxu1 %v1015_v3  ;;  %587 = vmatprep.subr.bf16.mxu0 %v915_v1  ;;  %v918_v4 = vld [vmem:[%s1066_s25 + $0x64] ss:$8 sps:$4 sm:$0xff]   ;;  %v920_v5 = vld [vmem:[%s1066_s25 + $0x60] ss:$8 sps:$4 sm:$0xff]   ;;  %v921_v6 = vld [vmem:[%s1066_s25 + $0x54] ss:$8 sps:$4 sm:$0xff]   ;;  %v831_v36 = vcombine.high %v286_v34, %v286_v34  ;;  %v830_v53 = vcombine.low %v286_v34, %v286_v34 }
  0x18   : > { %588 = vmatpush1.bf16.msra.mxu0 %v917_v2  ;;  %v923_v7 = vld [vmem:[%s1066_s25 + $0x50] ss:$8 sps:$4 sm:$0xff]   ;;  %v924_v8 = vld [vmem:[%s1066_s25 + $0x44] ss:$8 sps:$4 sm:$0xff]   ;;  %v936_v9 = vld [vmem:[%s1066_s25 + $0x174] ss:$8 sps:$4 sm:$0xff]  }
  0x19   : > { %589 = vmatprep.subr.bf16.mxu0 %v918_v4  ;;  %v938_v10 = vld [vmem:[%s1066_s25 + $0x170] ss:$8 sps:$4 sm:$0xff]   ;;  %v926_v11 = vld [vmem:[%s1066_s25 + $0x40] ss:$8 sps:$4 sm:$0xff]   ;;  %v927_v12 = vld [vmem:[%s1066_s25 + $0x34] ss:$8 sps:$4 sm:$0xff]   ;;  %628 = vmatprep.subr.bf16.mxu1 %v936_v9 }
  0x1a   : > { %v942_v13 = vld [vmem:[%s1066_s25 + $0x164] ss:$8 sps:$4 sm:$0xff]   ;;  %629 = vmatpush1.bf16.msra.mxu1 %v938_v10  ;;  %v944_v14 = vld [vmem:[%s1066_s25 + $0x160] ss:$8 sps:$4 sm:$0xff]   ;;  %v929_v15 = vld [vmem:[%s1066_s25 + $0x30] ss:$8 sps:$4 sm:$0xff]   ;;  %619 = vmatprep.mubr.bf16.mxu0 %v831_v36 }
  0x1b   : > { %630 = vmatprep.subr.bf16.mxu1 %v942_v13  ;;  %v948_v16 = vld [vmem:[%s1066_s25 + $0x154] ss:$8 sps:$4 sm:$0xff]   ;;  %v930_v17 = vld [vmem:[%s1066_s25 + $0x24] ss:$8 sps:$4 sm:$0xff]   ;;  %v950_v18 = vld [vmem:[%s1066_s25 + $0x150] ss:$8 sps:$4 sm:$0xff]  }
  0x1c   : > { %590 = vmatpush1.bf16.msra.mxu0 %v920_v5  ;;  %v954_v19 = vld [vmem:[%s1066_s25 + $0x144] ss:$8 sps:$4 sm:$0xff]   ;;  %v932_v20 = vld [vmem:[%s1066_s25 + $0x20] ss:$8 sps:$4 sm:$0xff]   ;;  %v933_v21 = vld [vmem:[%s1066_s25 + $0x14] ss:$8 sps:$4 sm:$0xff]  }
  0x1d   : > { %591 = vmatprep.subr.bf16.mxu0 %v921_v6  ;;  %v956_v22 = vld [vmem:[%s1066_s25 + $0x140] ss:$8 sps:$4 sm:$0xff]   ;;  %v960_v23 = vld [vmem:[%s1066_s25 + $0x134] ss:$8 sps:$4 sm:$0xff]   ;;  %v935_v24 = vld [vmem:[%s1066_s25 + $0x10] ss:$8 sps:$4 sm:$0xff]  }
  0x1e   : > { %631 = vmatpush1.bf16.msra.mxu1 %v944_v14  ;;  %v939_v25 = vld [vmem:[%s1066_s25 + $0x4] ss:$8 sps:$4 sm:$0xff]   ;;  %v962_v26 = vld [vmem:[%s1066_s25 + $0x130] ss:$8 sps:$4 sm:$0xff]   ;;  %v941_v28 = vld [vmem:[%s1066_s25] ss:$8 sps:$4 sm:$0xff]  }
  0x1f   : > { %632 = vmatprep.subr.bf16.mxu1 %v948_v16  ;;  %v966_v27 = vld [vmem:[%s1066_s25 + $0x124] ss:$8 sps:$4 sm:$0xff]   ;;  %v945_v29 = vld [vmem:[%s1066_s25 + $0xf4] ss:$8 sps:$4 sm:$0xff]   ;;  %v968_v30 = vld [vmem:[%s1066_s25 + $0x120] ss:$8 sps:$4 sm:$0xff]  }
  0x20   : > { %592 = vmatpush1.bf16.msra.mxu0 %v923_v7  ;;  %v972_v31 = vld [vmem:[%s1066_s25 + $0x114] ss:$8 sps:$4 sm:$0xff]   ;;  %v947_v32 = vld [vmem:[%s1066_s25 + $0xf0] ss:$8 sps:$4 sm:$0xff]   ;;  %v951_v33 = vld [vmem:[%s1066_s25 + $0xe4] ss:$8 sps:$4 sm:$0xff]  }
  0x21   : > { %593 = vmatprep.subr.bf16.mxu0 %v924_v8  ;;  %v974_v35 = vld [vmem:[%s1066_s25 + $0x110] ss:$8 sps:$4 sm:$0xff]   ;;  %v978_v37 = vld [vmem:[%s1066_s25 + $0x104] ss:$8 sps:$4 sm:$0xff]   ;;  %v953_v38 = vld [vmem:[%s1066_s25 + $0xe0] ss:$8 sps:$4 sm:$0xff]  }
  0x22   : > { %633 = vmatpush1.bf16.msra.mxu1 %v950_v18  ;;  %v957_v39 = vld [vmem:[%s1066_s25 + $0xd4] ss:$8 sps:$4 sm:$0xff]   ;;  %v980_v40 = vld [vmem:[%s1066_s25 + $0x100] ss:$8 sps:$4 sm:$0xff]   ;;  %v959_v41 = vld [vmem:[%s1066_s25 + $0xd0] ss:$8 sps:$4 sm:$0xff]  }
  0x23   : > { %634 = vmatprep.subr.bf16.mxu1 %v954_v19  ;;  %v963_v42 = vld [vmem:[%s1066_s25 + $0xc4] ss:$8 sps:$4 sm:$0xff]   ;;  %v984_v43 = vld [vmem:[%s1061_s21 + $0x8] ss:$0 sps:$4 sm:$0xff]   ;;  %v969_v45 = vld [vmem:[%s1066_s25 + $0xb4] ss:$8 sps:$4 sm:$0xff]  }
  0x24   : > { %594 = vmatpush1.bf16.msra.mxu0 %v926_v11  ;;  %v965_v44 = vld [vmem:[%s1066_s25 + $0xc0] ss:$8 sps:$4 sm:$0xff]   ;;  %v971_v46 = vld [vmem:[%s1066_s25 + $0xb0] ss:$8 sps:$4 sm:$0xff]   ;;  %v975_v47 = vld [vmem:[%s1066_s25 + $0xa4] ss:$8 sps:$4 sm:$0xff]  }
  0x25   : > { %595 = vmatprep.subr.bf16.mxu0 %v927_v12  ;;  %v977_v48 = vld [vmem:[%s1066_s25 + $0xa0] ss:$8 sps:$4 sm:$0xff]   ;;  %v981_v49 = vld [vmem:[%s1066_s25 + $0x94] ss:$8 sps:$4 sm:$0xff]   ;;  %v983_v50 = vld [vmem:[%s1066_s25 + $0x90] ss:$8 sps:$4 sm:$0xff]  }
  0x26   : > { %635 = vmatpush1.bf16.msra.mxu1 %v956_v22  ;;  %v985_v51 = vld [vmem:[%s1066_s25 + $0x84] ss:$8 sps:$4 sm:$0xff]   ;;  %v987_v52 = vld [vmem:[%s1066_s25 + $0x80] ss:$8 sps:$4 sm:$0xff]   ;;  %p881_p7 = scmp.ne.s32.totalorder %s1004_s12, 5 }
  0x27   : > { %636 = vmatprep.subr.bf16.mxu1 %v960_v23  ;;  %v284_v58 = vld [vmem:[#allocation2] sm:$0xff]  ;;  %v285_v61 = vld [vmem:[#allocation2 + $0x8] sm:$0xff] }
  0x28   : > { %596 = vmatpush1.bf16.msra.mxu0 %v929_v15 }
  0x29   : > { %597 = vmatprep.subr.bf16.mxu0 %v930_v17 }
  0x2a   : > { %637 = vmatpush1.bf16.msra.mxu1 %v962_v26 }
  0x2b   : > { %638 = vmatprep.subr.bf16.mxu1 %v966_v27 }
  0x2c   : > { %598 = vmatpush1.bf16.msra.mxu0 %v932_v20 }
  0x2d   : > { %599 = vmatprep.subr.bf16.mxu0 %v933_v21 }
  0x2e   : > { %639 = vmatpush1.bf16.msra.mxu1 %v968_v30 }
  0x2f   : > { %640 = vmatprep.subr.bf16.mxu1 %v972_v31 }
  0x30   : > { %600 = vmatpush1.bf16.msra.mxu0 %v935_v24 }
  0x31   : > { %601 = vmatprep.subr.bf16.mxu0 %v939_v25 }
  0x32   : > { %641 = vmatpush1.bf16.msra.mxu1 %v974_v35 }
  0x33   : > { %642 = vmatprep.subr.bf16.mxu1 %v978_v37 }
  0x34   : > { %602 = vmatpush1.bf16.msra.mxu0 %v941_v28 }
  0x35   : > { %603 = vmatprep.subr.bf16.mxu0 %v945_v29 }
  0x36   : > { %643 = vmatpush1.bf16.msra.mxu1 %v980_v40 }
  0x38   : > { %604 = vmatpush2.bf16.msra.mxu0 %v947_v32 }
  0x39   : > { %605 = vmatprep.subr.bf16.mxu0 %v951_v33  ;;  %661 = vmatmul.mubr.bf16.vlgmr.msra.gmra.mxu1 %v984_v43 }
  0x3c   : > { %606 = vmatpush2.bf16.msra.mxu0 %v953_v38 }
  0x3d   : > { %607 = vmatprep.subr.bf16.mxu0 %v957_v39 }
  0x40   : > { %608 = vmatpush2.bf16.msra.mxu0 %v959_v41 }
  0x41   : > { %609 = vmatprep.subr.bf16.mxu0 %v963_v42 }
  0x44   : > { %610 = vmatpush2.bf16.msra.mxu0 %v965_v44 }
  0x45   : > { %611 = vmatprep.subr.bf16.mxu0 %v969_v45 }
  0x48   : > { %612 = vmatpush2.bf16.msra.mxu0 %v971_v46 }
  0x49   : > { %613 = vmatprep.subr.bf16.mxu0 %v975_v47 }
  0x4c   : > { %614 = vmatpush2.bf16.msra.mxu0 %v977_v48 }
  0x4d   : > { %615 = vmatprep.subr.bf16.mxu0 %v981_v49 }
  0x50   : > { %616 = vmatpush2.bf16.msra.mxu0 %v983_v50 }
  0x51   : > { %617 = vmatprep.subr.bf16.mxu0 %v985_v51 }
  0x54   : > { %618 = vmatpush2.bf16.msra.mxu0 %v987_v52 }
  0x57   : > { %620 = vmatmul.mubr.bf16.vlgmr.msra.gmra.mxu0 %v830_v53 }
  0xf9   : > { %v662_v54 = vpop.f32.mrf.mxu1 }
  0xfb   : > { %v664_v55 = vpop.f32.mrf.mxu1 }
  0xfd   : > { %v666_v56 = vpop.f32.mrf.mxu1 }
  0xff   : > { %v667_v57 = vpop.f32.mrf.mxu1 }
 0x117   : > { %v621_v59 = vpop.f32.mrf.mxu0 }
 0x118   : > { %v663_v60 = vadd.f32 %v662_v54, %v621_v59 }
 0x119   : > { %v623_v62 = vpop.f32.mrf.mxu0 }
 0x11a   : > { %v669_v63 = vadd.f32 %v663_v60, %v284_v58  ;;  %v665_v0 = vadd.f32 %v664_v55, %v623_v62  ;;  %676 = sbr.rel (%p881_p7) target bundleno = 302 (0x12e), region = 40 }
 0x11b   : > { %v625_v1 = vpop.f32.mrf.mxu0 }
 0x11c   : > { %671 = vst [vmem:[#allocation2] sm:$0xff] %v669_v63  ;;  %v670_v2 = vadd.f32 %v665_v0, %v285_v61 }
 0x11d   : > { %v626_v3 = vpop.f32.mrf.mxu0 }
 0x11e   : > { %672 = vst [vmem:[#allocation2 + $0x8] sm:$0xff] %v670_v2 }
 0x11f   : > { %v681_v4 = vlaneseq  ;;  %v679_v6 = vld [vmem:[%s1137_s2] sm:$0x3] }
 0x121   : > { %v682_v5 = vshrl.u32 %v681_v4, 7 }
 0x123   : > { %v683_v7 = vsub.s32 0, %v682_v5  ;;  %v687_v8 = vsub.s32 1, %v682_v5  ;;  %v677_v9 = vld [vmem:[#allocation2] sm:$0xff] }
 0x125   : > { %v678_v10 = vld [vmem:[#allocation2 + $0x8] sm:$0xff]  ;;  %v684_v11 = vrot.slane %v679_v6, %v683_v7  ;;  %v688_v12 = vrot.slane %v679_v6, %v687_v8 }
 0x127   : > { %v691_v13 = vadd.f32 %v684_v11, %v677_v9  ;;  %v692_v14 = vadd.f32 %v688_v12, %v678_v10 }
 0x129   : > { %v693_v15 = vmax.f32 %v691_v13, 0.0  ;;  %v694_v16 = vmax.f32 %v692_v14, 0.0 }
 0x12b   : > { %v888_v17 = vpack.c.bf16 %v694_v16, %v693_v15 }
 0x12d   : > { %703 = vst [vmem:[%s1138_s3] sm:$0xff] %v888_v17 }
 0x12e PF: > { %s13_s14 = sadd.s32 1, %s1012_s14   ;;  %s1139_s12 = smov %s1008_s13 }
 0x12f   : > { %p10_p8 = scmp.ge.s32.totalorder %s13_s14, 8   ;;  %s1140_s13 = smov %s1142_s15 }
 0x131   :  { %12 = sbr.rel (!%p10_p8) target bundleno = 2 (0x2), region = 76 }

// kernel: morphclr_dual_forward.59
= control target key start
LH: loop header
LB: loop body
LE: loop exit
PB: predicated region body
PF: predicated region fallthrough
CT: control target
= control target key end

     0   :  { %s1320_s12 = smov 0   ;;  %s1322_s13 = smov 0   ;;  %s1583_s0 = inlined_call_operand.vmem [shape: bf16[8,2304], index: 0, kind: input, shape index: {}]   ;;  %s1584_s1 = inlined_call_operand.vmem [shape: bf16[2304,512], index: 1, kind: input, shape index: {}]   ;;  %s1585_s2 = inlined_call_operand.vmem [shape: f32[1,512], index: 2, kind: input, shape index: {}]   ;;  %s1586_s3 = inlined_call_operand.vmem [shape: bf16[8,512], index: 3, kind: output, shape index: {}]  }
   0x1   :  { %s1324_s14 = smov 0   ;;  %s1326_s15 = smov 0  }
   0x2   :  { %s1328_s16 = smov 0   ;;  %s1330_s17 = smov 0  }
   0x3   :  { %s1332_s18 = smov 0  }
   0x4 LB: > { %s25_s19 = sadd.s32 1, %s1288_s16  ;;  %s28_s20 = sadd.s32 1, %s1292_s17  ;;  %s1296_s18 = sphi %s1332_s18, %s13_s18   ;;  %s1292_s17 = sphi %s1330_s17, %s1592_s17   ;;  %s1288_s16 = sphi %s1328_s16, %s1591_s16   ;;  %s1284_s15 = sphi %s1326_s15, %s1590_s15   ;;  %s1280_s14 = sphi %s1324_s14, %s1589_s14   ;;  %s1276_s13 = sphi %s1322_s13, %s1588_s13   ;;  %s1272_s12 = sphi %s1320_s12, %s1587_s12  }
   0x5   : > { %p26_p0 = scmp.ge.s32.totalorder %s25_s19, 6  ;;  %p76_p1 = scmp.ne.s32.totalorder %s1276_s13, %s1272_s12 }
   0x6   : > { %p77_p2 = scmp.eq.s32.totalorder %s1296_s18, 0  ;;  %s69_s24 = sadd.s32 1, %s1276_s13 }
   0x7   : > { %s1594_s19 = smov (%p26_p0, %s25_s19), 0  ;;  %s1596_s20 = smov (!%p26_p0, %s28_s20), %s1292_s17 }
   0x8   : > { %p78_p3 = por %p77_p2, %p76_p1  ;;  %p30_p4 = scmp.ge.s32.totalorder %s1596_s20, 2 }
   0x9   : > { %s64_s21 = ssub.s32 %s1288_s16, %s1594_s19  ;;  %p1040_p6 = scmp.ge.s32.totalorder %s1296_s18, 12 }
   0xa   : > { %s1598_s20 = smov (%p30_p4, %s1596_s20), 0 }
   0xb   : > { %s65_s22 = ssub.s32 %s1292_s17, %s1598_s20  ;;  %156 = sbr.rel (%p1040_p6) target bundleno = 48 (0x30), region = 16 }
   0xc   : > { %s66_s23 = sor.u32 %s65_s22, %s64_s21 }
   0xd   : > { %p67_p5 = scmp.eq.s32.totalorder %s66_s23, 0 }
   0xf   : > { %s1371_s25 = scalar_select %p67_p5, %s1276_s13, %s69_s24  }
  0x10   : > { %172 = sbr.rel (!%p78_p3) target bundleno = 48 (0x30), region = 24  ;;  %s174_s26 = sand.u32 (%p78_p3), 1, %s1276_s13  }
  0x11   : > { %s1107_s27 = smul.u32 (%p78_p3), 384, %s174_s26  ;;  %s1041_s28 = sshll.u32 (%p78_p3), %s1292_s17, 1 }
  0x12   : > { %s1105_s29 = smul.u32 (%p78_p3), 192, %s1288_s16 }
  0x13   : > { %s1385_s8 = scalar_lea.vmem (%p78_p3), [#allocation3], %s1107_s27 }
  0x14   : > { %s180_s30 = sadd.s32 (%p78_p3), %s1105_s29, %s1041_s28 }
  0x15   : > { %s1043_s4 = sshll.u32 %s180_s30, 2 }
  0x16   : > { %s1380_s7 = scalar_lea.vmem %s1584_s1, %s1043_s4 }
  0x17   : > { %v305_v0 = vld [vmem:[%s1380_s7] sm:$0xff]  ;;  %v307_v1 = vld [vmem:[%s1380_s7 + $0x10] sm:$0xff] }
  0x18   : > { %v309_v2 = vld [vmem:[%s1380_s7 + $0x20] sm:$0xff]  ;;  %306 = vst [vmem:[%s1385_s8] sm:$0xff] %v305_v0  ;;  %308 = vst [vmem:[%s1385_s8 + $0x8] sm:$0xff] %v307_v1  ;;  %v311_v3 = vld [vmem:[%s1380_s7 + $0x30] sm:$0xff] }
  0x19   : > { %310 = vst [vmem:[%s1385_s8 + $0x10] sm:$0xff] %v309_v2  ;;  %v313_v4 = vld [vmem:[%s1380_s7 + $0x40] sm:$0xff]  ;;  %v315_v5 = vld [vmem:[%s1380_s7 + $0x50] sm:$0xff]  ;;  %312 = vst [vmem:[%s1385_s8 + $0x18] sm:$0xff] %v311_v3 }
  0x1a   : > { %314 = vst [vmem:[%s1385_s8 + $0x20] sm:$0xff] %v313_v4  ;;  %316 = vst [vmem:[%s1385_s8 + $0x28] sm:$0xff] %v315_v5  ;;  %v317_v6 = vld [vmem:[%s1380_s7 + $0x60] sm:$0xff]  ;;  %v319_v7 = vld [vmem:[%s1380_s7 + $0x70] sm:$0xff] }
  0x1b   : > { %v321_v8 = vld [vmem:[%s1380_s7 + $0x80] sm:$0xff]  ;;  %318 = vst [vmem:[%s1385_s8 + $0x30] sm:$0xff] %v317_v6  ;;  %320 = vst [vmem:[%s1385_s8 + $0x38] sm:$0xff] %v319_v7  ;;  %v323_v9 = vld [vmem:[%s1380_s7 + $0x90] sm:$0xff] }
  0x1c   : > { %322 = vst [vmem:[%s1385_s8 + $0x40] sm:$0xff] %v321_v8  ;;  %v325_v10 = vld [vmem:[%s1380_s7 + $0xa0] sm:$0xff]  ;;  %v327_v11 = vld [vmem:[%s1380_s7 + $0xb0] sm:$0xff]  ;;  %324 = vst [vmem:[%s1385_s8 + $0x48] sm:$0xff] %v323_v9 }
  0x1d   : > { %326 = vst [vmem:[%s1385_s8 + $0x50] sm:$0xff] %v325_v10  ;;  %328 = vst [vmem:[%s1385_s8 + $0x58] sm:$0xff] %v327_v11  ;;  %v329_v12 = vld [vmem:[%s1380_s7 + $0xc0] sm:$0xff]  ;;  %v331_v13 = vld [vmem:[%s1380_s7 + $0xd0] sm:$0xff] }
  0x1e   : > { %v333_v14 = vld [vmem:[%s1380_s7 + $0xe0] sm:$0xff]  ;;  %330 = vst [vmem:[%s1385_s8 + $0x60] sm:$0xff] %v329_v12  ;;  %332 = vst [vmem:[%s1385_s8 + $0x68] sm:$0xff] %v331_v13  ;;  %v335_v15 = vld [vmem:[%s1380_s7 + $0xf0] sm:$0xff] }
  0x1f   : > { %334 = vst [vmem:[%s1385_s8 + $0x70] sm:$0xff] %v333_v14  ;;  %v337_v16 = vld [vmem:[%s1380_s7 + $0x100] sm:$0xff]  ;;  %v339_v17 = vld [vmem:[%s1380_s7 + $0x110] sm:$0xff]  ;;  %336 = vst [vmem:[%s1385_s8 + $0x78] sm:$0xff] %v335_v15 }
  0x20   : > { %338 = vst [vmem:[%s1385_s8 + $0x80] sm:$0xff] %v337_v16  ;;  %340 = vst [vmem:[%s1385_s8 + $0x88] sm:$0xff] %v339_v17  ;;  %v341_v18 = vld [vmem:[%s1380_s7 + $0x120] sm:$0xff]  ;;  %v343_v19 = vld [vmem:[%s1380_s7 + $0x130] sm:$0xff] }
  0x21   : > { %v345_v20 = vld [vmem:[%s1380_s7 + $0x140] sm:$0xff]  ;;  %342 = vst [vmem:[%s1385_s8 + $0x90] sm:$0xff] %v341_v18  ;;  %344 = vst [vmem:[%s1385_s8 + $0x98] sm:$0xff] %v343_v19  ;;  %v347_v21 = vld [vmem:[%s1380_s7 + $0x150] sm:$0xff] }
  0x22   : > { %346 = vst [vmem:[%s1385_s8 + $0xa0] sm:$0xff] %v345_v20  ;;  %v349_v22 = vld [vmem:[%s1380_s7 + $0x160] sm:$0xff]  ;;  %v351_v23 = vld [vmem:[%s1380_s7 + $0x170] sm:$0xff]  ;;  %348 = vst [vmem:[%s1385_s8 + $0xa8] sm:$0xff] %v347_v21 }
  0x23   : > { %350 = vst [vmem:[%s1385_s8 + $0xb0] sm:$0xff] %v349_v22  ;;  %352 = vst [vmem:[%s1385_s8 + $0xb8] sm:$0xff] %v351_v23  ;;  %v353_v24 = vld [vmem:[%s1380_s7 + $0x180] sm:$0xff]  ;;  %v355_v25 = vld [vmem:[%s1380_s7 + $0x190] sm:$0xff] }
  0x24   : > { %v357_v26 = vld [vmem:[%s1380_s7 + $0x1a0] sm:$0xff]  ;;  %354 = vst [vmem:[%s1385_s8 + $0xc0] sm:$0xff] %v353_v24  ;;  %356 = vst [vmem:[%s1385_s8 + $0xc8] sm:$0xff] %v355_v25  ;;  %v359_v27 = vld [vmem:[%s1380_s7 + $0x1b0] sm:$0xff] }
  0x25   : > { %358 = vst [vmem:[%s1385_s8 + $0xd0] sm:$0xff] %v357_v26  ;;  %v361_v28 = vld [vmem:[%s1380_s7 + $0x1c0] sm:$0xff]  ;;  %v363_v29 = vld [vmem:[%s1380_s7 + $0x1d0] sm:$0xff]  ;;  %360 = vst [vmem:[%s1385_s8 + $0xd8] sm:$0xff] %v359_v27 }
  0x26   : > { %362 = vst [vmem:[%s1385_s8 + $0xe0] sm:$0xff] %v361_v28  ;;  %364 = vst [vmem:[%s1385_s8 + $0xe8] sm:$0xff] %v363_v29  ;;  %v365_v30 = vld [vmem:[%s1380_s7 + $0x1e0] sm:$0xff]  ;;  %v367_v31 = vld [vmem:[%s1380_s7 + $0x1f0] sm:$0xff] }
  0x27   : > { %v369_v32 = vld [vmem:[%s1380_s7 + $0x200] sm:$0xff]  ;;  %366 = vst [vmem:[%s1385_s8 + $0xf0] sm:$0xff] %v365_v30  ;;  %368 = vst [vmem:[%s1385_s8 + $0xf8] sm:$0xff] %v367_v31  ;;  %v371_v33 = vld [vmem:[%s1380_s7 + $0x210] sm:$0xff] }
  0x28   : > { %370 = vst [vmem:[%s1385_s8 + $0x100] sm:$0xff] %v369_v32  ;;  %v373_v34 = vld [vmem:[%s1380_s7 + $0x220] sm:$0xff]  ;;  %v375_v35 = vld [vmem:[%s1380_s7 + $0x230] sm:$0xff]  ;;  %372 = vst [vmem:[%s1385_s8 + $0x108] sm:$0xff] %v371_v33 }
  0x29   : > { %374 = vst [vmem:[%s1385_s8 + $0x110] sm:$0xff] %v373_v34  ;;  %376 = vst [vmem:[%s1385_s8 + $0x118] sm:$0xff] %v375_v35  ;;  %v377_v36 = vld [vmem:[%s1380_s7 + $0x240] sm:$0xff]  ;;  %v379_v37 = vld [vmem:[%s1380_s7 + $0x250] sm:$0xff] }
  0x2a   : > { %v381_v38 = vld [vmem:[%s1380_s7 + $0x260] sm:$0xff]  ;;  %378 = vst [vmem:[%s1385_s8 + $0x120] sm:$0xff] %v377_v36  ;;  %380 = vst [vmem:[%s1385_s8 + $0x128] sm:$0xff] %v379_v37  ;;  %v383_v39 = vld [vmem:[%s1380_s7 + $0x270] sm:$0xff] }
  0x2b   : > { %382 = vst [vmem:[%s1385_s8 + $0x130] sm:$0xff] %v381_v38  ;;  %v385_v40 = vld [vmem:[%s1380_s7 + $0x280] sm:$0xff]  ;;  %v387_v41 = vld [vmem:[%s1380_s7 + $0x290] sm:$0xff]  ;;  %384 = vst [vmem:[%s1385_s8 + $0x138] sm:$0xff] %v383_v39 }
  0x2c   : > { %386 = vst [vmem:[%s1385_s8 + $0x140] sm:$0xff] %v385_v40  ;;  %388 = vst [vmem:[%s1385_s8 + $0x148] sm:$0xff] %v387_v41  ;;  %v389_v42 = vld [vmem:[%s1380_s7 + $0x2a0] sm:$0xff]  ;;  %v391_v43 = vld [vmem:[%s1380_s7 + $0x2b0] sm:$0xff] }
  0x2d   : > { %v393_v44 = vld [vmem:[%s1380_s7 + $0x2c0] sm:$0xff]  ;;  %390 = vst [vmem:[%s1385_s8 + $0x150] sm:$0xff] %v389_v42  ;;  %392 = vst [vmem:[%s1385_s8 + $0x158] sm:$0xff] %v391_v43  ;;  %v395_v45 = vld [vmem:[%s1380_s7 + $0x2d0] sm:$0xff] }
  0x2e   : > { %394 = vst [vmem:[%s1385_s8 + $0x160] sm:$0xff] %v393_v44  ;;  %v397_v46 = vld [vmem:[%s1380_s7 + $0x2e0] sm:$0xff]  ;;  %v399_v47 = vld [vmem:[%s1380_s7 + $0x2f0] sm:$0xff]  ;;  %396 = vst [vmem:[%s1385_s8 + $0x168] sm:$0xff] %v395_v45 }
  0x2f   : > { %398 = vst [vmem:[%s1385_s8 + $0x170] sm:$0xff] %v397_v46  ;;  %400 = vst [vmem:[%s1385_s8 + $0x178] sm:$0xff] %v399_v47 }
  0x30 PF: > { %p1044_p7 = scmp.ge.s32.totalorder %s1296_s18, 1  ;;  %p413_p8 = scmp.lt.s32.totalorder %s1296_s18, 13 }
  0x32   : > { %p414_p9 = pnand %p1044_p7, %p413_p8 }
  0x33   : > { %s420_s9 = sand.u32 (!%p414_p9), 1, %s1272_s12   ;;  %s460_s10 = smul.u32 (!%p414_p9), 3, %s1280_s14 }
  0x34   : > { %417 = sbr.rel (%p414_p9) target bundleno = 347 (0x15b), region = 66  ;;  %s1046_s21 = sshll.u32 (!%p414_p9), %s1284_s15, 1 }
  0x35   : > { %s1108_s11 = smul.u32 (!%p414_p9), 384, %s420_s9  ;;  %p463_p10 = scmp.lt.s32.totalorder (!%p414_p9), %s460_s10, 17 }
  0x36   : > { %p473_p11 = scmp.lt.s32.totalorder (!%p414_p9), %s1046_s21, 3  ;;  %p1049_p12 = scmp.ne.s32.totalorder (!%p414_p9), %s1280_s14, 0 }
  0x37   : > { %s1502_s5 = scalar_lea.vmem (!%p414_p9), [#allocation3], %s1108_s11 }
  0x39   : > { %s1600_s10 = smov (!%p463_p10, %s460_s10), 17  ;;  %s1602_s21 = smov (!%p473_p11, %s1046_s21), 3 }
  0x3a   : > { %s1045_s22 = sshll.u32 %s1600_s10, 2  ;;  %s475_s12 = scalar_lea.vmem %s1585_s2, %s1602_s21 }
  0x3b   : > { %s1490_s26 = scalar_lea.vmem %s1583_s0, %s1045_s22  ;;  %s1048_s29 = sshll.u32 %s1602_s21, 2 }
  0x3c   : > { %s1500_s4 = scalar_lea.vmem %s1586_s3, %s1048_s29  ;;  %491 = sbr.rel (%p1049_p12) target bundleno = 67 (0x43), region = 74 }
  0x41   : > { %v1298_v48 = vmov 0.0  }
  0x42   : > { %492 = vst [vmem:[#allocation2] sm:$0xff] %v1298_v48  ;;  %493 = vst [vmem:[#allocation2 + $0x8] sm:$0xff] %v1298_v48 }
  0x43 PF: > { %v1167_v49 = vld [vmem:[%s1502_s5 + $0x74] ss:$8 sps:$4 sm:$0xff]   ;;  %v1169_v50 = vld [vmem:[%s1502_s5 + $0x70] ss:$8 sps:$4 sm:$0xff]   ;;  %v1299_v51 = vmov 0   ;;  %p1101_p13 = scmp.ne.s32.totalorder %s1280_s14, 5 }
  0x44   : > { %870 = vmatprep.mubr.bf16.mxu1 %v1299_v51  ;;  %797 = vmatprep.subr.bf16.mxu0 %v1167_v49  ;;  %v1170_v52 = vld [vmem:[%s1502_s5 + $0x64] ss:$8 sps:$4 sm:$0xff]   ;;  %v1172_v53 = vld [vmem:[%s1502_s5 + $0x60] ss:$8 sps:$4 sm:$0xff]   ;;  %v1173_v54 = vld [vmem:[%s1502_s5 + $0x54] ss:$8 sps:$4 sm:$0xff]  }
  0x45   : > { %798 = vmatpush1.bf16.msra.mxu0 %v1169_v50  ;;  %v1175_v55 = vld [vmem:[%s1502_s5 + $0x50] ss:$8 sps:$4 sm:$0xff]   ;;  %v1176_v56 = vld [vmem:[%s1502_s5 + $0x44] ss:$8 sps:$4 sm:$0xff]   ;;  %v1188_v57 = vld [vmem:[%s1502_s5 + $0x174] ss:$8 sps:$4 sm:$0xff]  }
  0x46   : > { %799 = vmatprep.subr.bf16.mxu0 %v1170_v52  ;;  %v1190_v58 = vld [vmem:[%s1502_s5 + $0x170] ss:$8 sps:$4 sm:$0xff]   ;;  %v1178_v59 = vld [vmem:[%s1502_s5 + $0x40] ss:$8 sps:$4 sm:$0xff]   ;;  %v1179_v60 = vld [vmem:[%s1502_s5 + $0x34] ss:$8 sps:$4 sm:$0xff]   ;;  %838 = vmatprep.subr.bf16.mxu1 %v1188_v57 }
  0x47   : > { %v1194_v61 = vld [vmem:[%s1502_s5 + $0x164] ss:$8 sps:$4 sm:$0xff]   ;;  %839 = vmatpush1.bf16.msra.mxu1 %v1190_v58  ;;  %v1196_v62 = vld [vmem:[%s1502_s5 + $0x160] ss:$8 sps:$4 sm:$0xff]   ;;  %v1181_v63 = vld [vmem:[%s1502_s5 + $0x30] ss:$8 sps:$4 sm:$0xff]  }
  0x48   : > { %840 = vmatprep.subr.bf16.mxu1 %v1194_v61  ;;  %v1200_v0 = vld [vmem:[%s1502_s5 + $0x154] ss:$8 sps:$4 sm:$0xff]   ;;  %v1182_v1 = vld [vmem:[%s1502_s5 + $0x24] ss:$8 sps:$4 sm:$0xff]   ;;  %v1202_v2 = vld [vmem:[%s1502_s5 + $0x150] ss:$8 sps:$4 sm:$0xff]  }
  0x49   : > { %800 = vmatpush1.bf16.msra.mxu0 %v1172_v53  ;;  %v1206_v3 = vld [vmem:[%s1502_s5 + $0x144] ss:$8 sps:$4 sm:$0xff]   ;;  %v1184_v4 = vld [vmem:[%s1502_s5 + $0x20] ss:$8 sps:$4 sm:$0xff]   ;;  %v1185_v5 = vld [vmem:[%s1502_s5 + $0x14] ss:$8 sps:$4 sm:$0xff]  }
  0x4a   : > { %801 = vmatprep.subr.bf16.mxu0 %v1173_v54  ;;  %v1208_v6 = vld [vmem:[%s1502_s5 + $0x140] ss:$8 sps:$4 sm:$0xff]   ;;  %v1212_v7 = vld [vmem:[%s1502_s5 + $0x134] ss:$8 sps:$4 sm:$0xff]   ;;  %v1187_v8 = vld [vmem:[%s1502_s5 + $0x10] ss:$8 sps:$4 sm:$0xff]  }
  0x4b   : > { %841 = vmatpush1.bf16.msra.mxu1 %v1196_v62  ;;  %v1191_v9 = vld [vmem:[%s1502_s5 + $0x4] ss:$8 sps:$4 sm:$0xff]   ;;  %v1214_v10 = vld [vmem:[%s1502_s5 + $0x130] ss:$8 sps:$4 sm:$0xff]   ;;  %v1193_v12 = vld [vmem:[%s1502_s5] ss:$8 sps:$4 sm:$0xff]  }
  0x4c   : > { %842 = vmatprep.subr.bf16.mxu1 %v1200_v0  ;;  %v1218_v11 = vld [vmem:[%s1502_s5 + $0x124] ss:$8 sps:$4 sm:$0xff]   ;;  %v1197_v13 = vld [vmem:[%s1502_s5 + $0xf4] ss:$8 sps:$4 sm:$0xff]   ;;  %v1220_v14 = vld [vmem:[%s1502_s5 + $0x120] ss:$8 sps:$4 sm:$0xff]  }
  0x4d   : > { %802 = vmatpush1.bf16.msra.mxu0 %v1175_v55  ;;  %v1224_v15 = vld [vmem:[%s1502_s5 + $0x114] ss:$8 sps:$4 sm:$0xff]   ;;  %v1199_v16 = vld [vmem:[%s1502_s5 + $0xf0] ss:$8 sps:$4 sm:$0xff]   ;;  %v1203_v17 = vld [vmem:[%s1502_s5 + $0xe4] ss:$8 sps:$4 sm:$0xff]  }
  0x4e   : > { %803 = vmatprep.subr.bf16.mxu0 %v1176_v56  ;;  %v496_v18 = vld [vmem:[%s1490_s26] sm:$0xff]  ;;  %v1230_v21 = vld [vmem:[%s1502_s5 + $0x104] ss:$8 sps:$4 sm:$0xff]   ;;  %v1205_v22 = vld [vmem:[%s1502_s5 + $0xe0] ss:$8 sps:$4 sm:$0xff]  }
  0x4f   : > { %843 = vmatpush1.bf16.msra.mxu1 %v1202_v2  ;;  %v1226_v19 = vld [vmem:[%s1502_s5 + $0x110] ss:$8 sps:$4 sm:$0xff]   ;;  %v1051_v20 = vcombine.high %v496_v18, %v496_v18  ;;  %v1209_v23 = vld [vmem:[%s1502_s5 + $0xd4] ss:$8 sps:$4 sm:$0xff]   ;;  %v1232_v24 = vld [vmem:[%s1502_s5 + $0x100] ss:$8 sps:$4 sm:$0xff]   ;;  %v1050_v37 = vcombine.low %v496_v18, %v496_v18 }
  0x50   : > { %844 = vmatprep.subr.bf16.mxu1 %v1206_v3  ;;  %v1211_v25 = vld [vmem:[%s1502_s5 + $0xd0] ss:$8 sps:$4 sm:$0xff]   ;;  %v1215_v26 = vld [vmem:[%s1502_s5 + $0xc4] ss:$8 sps:$4 sm:$0xff]   ;;  %v1217_v28 = vld [vmem:[%s1502_s5 + $0xc0] ss:$8 sps:$4 sm:$0xff]  }
  0x51   : > { %804 = vmatpush1.bf16.msra.mxu0 %v1178_v59  ;;  %829 = vmatprep.mubr.bf16.mxu0 %v1051_v20  ;;  %v1236_v27 = vld [vmem:[%s1490_s26 + $0x8] ss:$0 sps:$4 sm:$0xff]   ;;  %v1221_v29 = vld [vmem:[%s1502_s5 + $0xb4] ss:$8 sps:$4 sm:$0xff]   ;;  %v1227_v31 = vld [vmem:[%s1502_s5 + $0xa4] ss:$8 sps:$4 sm:$0xff]  }
  0x52   : > { %805 = vmatprep.subr.bf16.mxu0 %v1179_v60  ;;  %v1223_v30 = vld [vmem:[%s1502_s5 + $0xb0] ss:$8 sps:$4 sm:$0xff]   ;;  %v1229_v32 = vld [vmem:[%s1502_s5 + $0xa0] ss:$8 sps:$4 sm:$0xff]   ;;  %v1233_v33 = vld [vmem:[%s1502_s5 + $0x94] ss:$8 sps:$4 sm:$0xff]  }
  0x53   : > { %845 = vmatpush1.bf16.msra.mxu1 %v1208_v6  ;;  %v1235_v34 = vld [vmem:[%s1502_s5 + $0x90] ss:$8 sps:$4 sm:$0xff]   ;;  %v1237_v35 = vld [vmem:[%s1502_s5 + $0x84] ss:$8 sps:$4 sm:$0xff]   ;;  %v1239_v36 = vld [vmem:[%s1502_s5 + $0x80] ss:$8 sps:$4 sm:$0xff]  }
  0x54   : > { %846 = vmatprep.subr.bf16.mxu1 %v1212_v7  ;;  %v494_v42 = vld [vmem:[#allocation2] sm:$0xff]  ;;  %v495_v45 = vld [vmem:[#allocation2 + $0x8] sm:$0xff] }
  0x55   : > { %806 = vmatpush1.bf16.msra.mxu0 %v1181_v63 }
  0x56   : > { %807 = vmatprep.subr.bf16.mxu0 %v1182_v1 }
  0x57   : > { %847 = vmatpush1.bf16.msra.mxu1 %v1214_v10 }
  0x58   : > { %848 = vmatprep.subr.bf16.mxu1 %v1218_v11 }
  0x59   : > { %808 = vmatpush1.bf16.msra.mxu0 %v1184_v4 }
  0x5a   : > { %809 = vmatprep.subr.bf16.mxu0 %v1185_v5 }
  0x5b   : > { %849 = vmatpush1.bf16.msra.mxu1 %v1220_v14 }
  0x5c   : > { %850 = vmatprep.subr.bf16.mxu1 %v1224_v15 }
  0x5d   : > { %810 = vmatpush1.bf16.msra.mxu0 %v1187_v8 }
  0x5e   : > { %811 = vmatprep.subr.bf16.mxu0 %v1191_v9 }
  0x5f   : > { %851 = vmatpush1.bf16.msra.mxu1 %v1226_v19 }
  0x60   : > { %852 = vmatprep.subr.bf16.mxu1 %v1230_v21 }
  0x61   : > { %812 = vmatpush1.bf16.msra.mxu0 %v1193_v12 }
  0x62   : > { %813 = vmatprep.subr.bf16.mxu0 %v1197_v13 }
  0x63   : > { %853 = vmatpush1.bf16.msra.mxu1 %v1232_v24 }
  0x65   : > { %814 = vmatpush2.bf16.msra.mxu0 %v1199_v16 }
  0x66   : > { %815 = vmatprep.subr.bf16.mxu0 %v1203_v17  ;;  %871 = vmatmul.mubr.bf16.vlgmr.msra.gmra.mxu1 %v1236_v27 }
  0x69   : > { %816 = vmatpush2.bf16.msra.mxu0 %v1205_v22 }
  0x6a   : > { %817 = vmatprep.subr.bf16.mxu0 %v1209_v23 }
  0x6d   : > { %818 = vmatpush2.bf16.msra.mxu0 %v1211_v25 }
  0x6e   : > { %819 = vmatprep.subr.bf16.mxu0 %v1215_v26 }
  0x71   : > { %820 = vmatpush2.bf16.msra.mxu0 %v1217_v28 }
  0x72   : > { %821 = vmatprep.subr.bf16.mxu0 %v1221_v29 }
  0x75   : > { %822 = vmatpush2.bf16.msra.mxu0 %v1223_v30 }
  0x76   : > { %823 = vmatprep.subr.bf16.mxu0 %v1227_v31 }
  0x79   : > { %824 = vmatpush2.bf16.msra.mxu0 %v1229_v32 }
  0x7a   : > { %825 = vmatprep.subr.bf16.mxu0 %v1233_v33 }
  0x7d   : > { %826 = vmatpush2.bf16.msra.mxu0 %v1235_v34 }
  0x7e   : > { %827 = vmatprep.subr.bf16.mxu0 %v1237_v35 }
  0x81   : > { %828 = vmatpush2.bf16.msra.mxu0 %v1239_v36 }
  0x84   : > { %830 = vmatmul.mubr.bf16.vlgmr.msra.gmra.mxu0 %v1050_v37 }
 0x126   : > { %v872_v38 = vpop.f32.mrf.mxu1 }
 0x128   : > { %v874_v39 = vpop.f32.mrf.mxu1 }
 0x12a   : > { %v876_v40 = vpop.f32.mrf.mxu1 }
 0x12c   : > { %v877_v41 = vpop.f32.mrf.mxu1 }
 0x144   : > { %v831_v43 = vpop.f32.mrf.mxu0 }
 0x145   : > { %v873_v44 = vadd.f32 %v872_v38, %v831_v43 }
 0x146   : > { %v833_v46 = vpop.f32.mrf.mxu0 }
 0x147   : > { %v879_v47 = vadd.f32 %v873_v44, %v494_v42  ;;  %v875_v48 = vadd.f32 %v874_v39, %v833_v46  ;;  %886 = sbr.rel (%p1101_p13) target bundleno = 347 (0x15b), region = 78 }
 0x148   : > { %v835_v49 = vpop.f32.mrf.mxu0 }
 0x149   : > { %881 = vst [vmem:[#allocation2] sm:$0xff] %v879_v47  ;;  %v880_v50 = vadd.f32 %v875_v48, %v495_v45 }
 0x14a   : > { %v836_v51 = vpop.f32.mrf.mxu0 }
 0x14b   : > { %882 = vst [vmem:[#allocation2 + $0x8] sm:$0xff] %v880_v50 }
 0x14c   : > { %v891_v52 = vlaneseq  ;;  %v889_v54 = vld [vmem:[%s475_s12] sm:$0x3] }
 0x14e   : > { %v892_v53 = vshrl.u32 %v891_v52, 7 }
 0x150   : > { %v893_v55 = vsub.s32 0, %v892_v53  ;;  %v897_v56 = vsub.s32 1, %v892_v53  ;;  %v887_v57 = vld [vmem:[#allocation2] sm:$0xff] }
 0x152   : > { %v888_v58 = vld [vmem:[#allocation2 + $0x8] sm:$0xff]  ;;  %v894_v59 = vrot.slane %v889_v54, %v893_v55  ;;  %v898_v60 = vrot.slane %v889_v54, %v897_v56 }
 0x154   : > { %v901_v61 = vadd.f32 %v894_v59, %v887_v57  ;;  %v902_v62 = vadd.f32 %v898_v60, %v888_v58 }
 0x156   : > { %v903_v63 = vmax.f32 %v901_v61, 0.0  ;;  %v904_v0 = vmax.f32 %v902_v62, 0.0 }
 0x158   : > { %v1106_v1 = vpack.c.bf16 %v904_v0, %v903_v63 }
 0x15a   : > { %913 = vst [vmem:[%s1500_s4] sm:$0xff] %v1106_v1 }
 0x15b PF: > { %s13_s18 = sadd.s32 1, %s1296_s18   ;;  %s1587_s12 = smov %s1276_s13 }
 0x15c   : > { %p10_p0 = scmp.ge.s32.totalorder %s13_s18, 14   ;;  %s1588_s13 = smov %s1371_s25 }
 0x15d   : > { %s1589_s14 = smov %s1288_s16  ;;  %s1590_s15 = smov %s1292_s17 }
 0x15e   : > { %s1591_s16 = smov %s1594_s19  ;;  %s1592_s17 = smov %s1598_s20 }
 0x15f   :  { %12 = sbr.rel (!%p10_p0) target bundleno = 4 (0x4), region = 119 }

// kernel: morphclr_dual_forward.60
= control target key start
LH: loop header
LB: loop body
LE: loop exit
PB: predicated region body
PF: predicated region fallthrough
CT: control target
= control target key end

     0   :  { %s1029_s12 = smov 0   ;;  %s1031_s13 = smov 0   ;;  %s1208_s0 = inlined_call_operand.vmem [shape: bf16[8,256], index: 0, kind: input, shape index: {}]   ;;  %s1209_s1 = inlined_call_operand.vmem [shape: bf16[256,512], index: 1, kind: input, shape index: {}]   ;;  %s1210_s2 = inlined_call_operand.vmem [shape: f32[1,512], index: 2, kind: input, shape index: {}]   ;;  %s1211_s3 = inlined_call_operand.vmem [shape: bf16[8,512], index: 3, kind: output, shape index: {}]  }
   0x1   :  { %s1033_s14 = smov 0   ;;  %s1035_s15 = smov 0  }
   0x2   :  { %s1037_s16 = smov 0  }
   0x3 LB: > { %s28_s17 = sadd.s32 1, %s1003_s15  ;;  %p76_p1 = scmp.ne.s32.totalorder %s995_s13, %s991_s12  ;;  %s1007_s16 = sphi %s1037_s16, %s13_s16   ;;  %s1003_s15 = sphi %s1035_s15, %s1215_s15   ;;  %s999_s14 = sphi %s1033_s14, %s1214_s14   ;;  %s995_s13 = sphi %s1031_s13, %s1213_s13   ;;  %s991_s12 = sphi %s1029_s12, %s1212_s12  }
   0x4   : > { %p30_p0 = scmp.ge.s32.totalorder %s28_s17, 2  ;;  %p77_p2 = scmp.eq.s32.totalorder %s1007_s16, 0 }
   0x5   : > { %s69_s19 = sadd.s32 1, %s995_s13  ;;  %p831_p5 = scmp.ge.s32.totalorder %s1007_s16, 2 }
   0x6   : > { %s1217_s17 = smov (%p30_p0, %s28_s17), 0  ;;  %p78_p3 = por %p77_p2, %p76_p1 }
   0x7   : > { %s65_s18 = ssub.s32 %s1003_s15, %s1217_s17  ;;  %169 = sbr.rel (%p831_p5) target bundleno = 32 (0x20), region = 20 }
   0x8   : > { %p67_p4 = scmp.eq.s32.totalorder %s65_s18, 0 }
   0xa   : > { %s1064_s20 = scalar_select %p67_p4, %s995_s13, %s69_s19  }
   0xc   : > { %172 = sbr.rel (!%p78_p3) target bundleno = 32 (0x20), region = 24  ;;  %s174_s21 = sand.u32 (%p78_p3), 1, %s995_s13  }
   0xd   : > { %s877_s22 = sshll.u32 (%p78_p3), %s1003_s15, 3  ;;  %s832_s23 = sshll.u32 (%p78_p3), %s174_s21, 8 }
   0xe   : > { %s1072_s26 = scalar_lea.vmem (%p78_p3), %s1209_s1, %s877_s22  ;;  %s1077_s27 = scalar_lea.vmem (%p78_p3), [#allocation3], %s832_s23 }
   0xf   : > { %v273_v0 = vld [vmem:[%s1072_s26] sm:$0xff] (%p78_p3)  ;;  %v275_v1 = vld [vmem:[%s1072_s26 + $0x10] sm:$0xff] (%p78_p3) }
  0x10   : > { %v277_v2 = vld [vmem:[%s1072_s26 + $0x20] sm:$0xff] (%p78_p3)  ;;  %274 = vst [vmem:[%s1077_s27] sm:$0xff] (%p78_p3), %v273_v0  ;;  %276 = vst [vmem:[%s1077_s27 + $0x8] sm:$0xff] (%p78_p3), %v275_v1  ;;  %v279_v3 = vld [vmem:[%s1072_s26 + $0x30] sm:$0xff] (%p78_p3) }
  0x11   : > { %278 = vst [vmem:[%s1077_s27 + $0x10] sm:$0xff] %v277_v2  ;;  %v281_v4 = vld [vmem:[%s1072_s26 + $0x40] sm:$0xff]  ;;  %v283_v5 = vld [vmem:[%s1072_s26 + $0x50] sm:$0xff]  ;;  %280 = vst [vmem:[%s1077_s27 + $0x18] sm:$0xff] %v279_v3 }
  0x12   : > { %282 = vst [vmem:[%s1077_s27 + $0x20] sm:$0xff] %v281_v4  ;;  %284 = vst [vmem:[%s1077_s27 + $0x28] sm:$0xff] %v283_v5  ;;  %v285_v6 = vld [vmem:[%s1072_s26 + $0x60] sm:$0xff]  ;;  %v287_v7 = vld [vmem:[%s1072_s26 + $0x70] sm:$0xff] }
  0x13   : > { %v289_v8 = vld [vmem:[%s1072_s26 + $0x80] sm:$0xff]  ;;  %286 = vst [vmem:[%s1077_s27 + $0x30] sm:$0xff] %v285_v6  ;;  %288 = vst [vmem:[%s1077_s27 + $0x38] sm:$0xff] %v287_v7  ;;  %v291_v9 = vld [vmem:[%s1072_s26 + $0x90] sm:$0xff] }
  0x14   : > { %290 = vst [vmem:[%s1077_s27 + $0x40] sm:$0xff] %v289_v8  ;;  %v293_v10 = vld [vmem:[%s1072_s26 + $0xa0] sm:$0xff]  ;;  %v295_v11 = vld [vmem:[%s1072_s26 + $0xb0] sm:$0xff]  ;;  %292 = vst [vmem:[%s1077_s27 + $0x48] sm:$0xff] %v291_v9 }
  0x15   : > { %294 = vst [vmem:[%s1077_s27 + $0x50] sm:$0xff] %v293_v10  ;;  %296 = vst [vmem:[%s1077_s27 + $0x58] sm:$0xff] %v295_v11  ;;  %v297_v12 = vld [vmem:[%s1072_s26 + $0xc0] sm:$0xff]  ;;  %v299_v13 = vld [vmem:[%s1072_s26 + $0xd0] sm:$0xff] }
  0x16   : > { %v301_v14 = vld [vmem:[%s1072_s26 + $0xe0] sm:$0xff]  ;;  %298 = vst [vmem:[%s1077_s27 + $0x60] sm:$0xff] %v297_v12  ;;  %300 = vst [vmem:[%s1077_s27 + $0x68] sm:$0xff] %v299_v13  ;;  %v303_v15 = vld [vmem:[%s1072_s26 + $0xf0] sm:$0xff] }
  0x17   : > { %302 = vst [vmem:[%s1077_s27 + $0x70] sm:$0xff] %v301_v14  ;;  %v305_v16 = vld [vmem:[%s1072_s26 + $0x100] sm:$0xff]  ;;  %v307_v17 = vld [vmem:[%s1072_s26 + $0x110] sm:$0xff]  ;;  %304 = vst [vmem:[%s1077_s27 + $0x78] sm:$0xff] %v303_v15 }
  0x18   : > { %306 = vst [vmem:[%s1077_s27 + $0x80] sm:$0xff] %v305_v16  ;;  %308 = vst [vmem:[%s1077_s27 + $0x88] sm:$0xff] %v307_v17  ;;  %v309_v18 = vld [vmem:[%s1072_s26 + $0x120] sm:$0xff]  ;;  %v311_v19 = vld [vmem:[%s1072_s26 + $0x130] sm:$0xff] }
  0x19   : > { %v313_v20 = vld [vmem:[%s1072_s26 + $0x140] sm:$0xff]  ;;  %310 = vst [vmem:[%s1077_s27 + $0x90] sm:$0xff] %v309_v18  ;;  %312 = vst [vmem:[%s1077_s27 + $0x98] sm:$0xff] %v311_v19  ;;  %v315_v21 = vld [vmem:[%s1072_s26 + $0x150] sm:$0xff] }
  0x1a   : > { %314 = vst [vmem:[%s1077_s27 + $0xa0] sm:$0xff] %v313_v20  ;;  %v317_v22 = vld [vmem:[%s1072_s26 + $0x160] sm:$0xff]  ;;  %v319_v23 = vld [vmem:[%s1072_s26 + $0x170] sm:$0xff]  ;;  %316 = vst [vmem:[%s1077_s27 + $0xa8] sm:$0xff] %v315_v21 }
  0x1b   : > { %318 = vst [vmem:[%s1077_s27 + $0xb0] sm:$0xff] %v317_v22  ;;  %320 = vst [vmem:[%s1077_s27 + $0xb8] sm:$0xff] %v319_v23  ;;  %v321_v24 = vld [vmem:[%s1072_s26 + $0x180] sm:$0xff]  ;;  %v323_v25 = vld [vmem:[%s1072_s26 + $0x190] sm:$0xff] }
  0x1c   : > { %v325_v26 = vld [vmem:[%s1072_s26 + $0x1a0] sm:$0xff]  ;;  %322 = vst [vmem:[%s1077_s27 + $0xc0] sm:$0xff] %v321_v24  ;;  %324 = vst [vmem:[%s1077_s27 + $0xc8] sm:$0xff] %v323_v25  ;;  %v327_v27 = vld [vmem:[%s1072_s26 + $0x1b0] sm:$0xff] }
  0x1d   : > { %326 = vst [vmem:[%s1077_s27 + $0xd0] sm:$0xff] %v325_v26  ;;  %v329_v28 = vld [vmem:[%s1072_s26 + $0x1c0] sm:$0xff]  ;;  %v331_v29 = vld [vmem:[%s1072_s26 + $0x1d0] sm:$0xff]  ;;  %328 = vst [vmem:[%s1077_s27 + $0xd8] sm:$0xff] %v327_v27 }
  0x1e   : > { %330 = vst [vmem:[%s1077_s27 + $0xe0] sm:$0xff] %v329_v28  ;;  %332 = vst [vmem:[%s1077_s27 + $0xe8] sm:$0xff] %v331_v29  ;;  %v333_v30 = vld [vmem:[%s1072_s26 + $0x1e0] sm:$0xff]  ;;  %v335_v31 = vld [vmem:[%s1072_s26 + $0x1f0] sm:$0xff] }
  0x1f   : > { %334 = vst [vmem:[%s1077_s27 + $0xf0] sm:$0xff] %v333_v30  ;;  %336 = vst [vmem:[%s1077_s27 + $0xf8] sm:$0xff] %v335_v31 }
  0x20 PF: > { %p835_p6 = scmp.ge.s32.totalorder %s1007_s16, 1  ;;  %p349_p7 = scmp.lt.s32.totalorder %s1007_s16, 3 }
  0x22   : > { %p350_p8 = pnand %p835_p6, %p349_p7 }
  0x23   : > { %s356_s28 = sand.u32 (!%p350_p8), 1, %s991_s12   ;;  %s837_s6 = sshll.u32 (!%p350_p8), %s999_s14, 1 }
  0x24   : > { %353 = sbr.rel (%p350_p8) target bundleno = 306 (0x132), region = 66  ;;  %s836_s4 = sshll.u32 (!%p350_p8), %s356_s28, 8 }
  0x25   : > { %s1150_s5 = scalar_lea.vmem (!%p350_p8), [#allocation3], %s836_s4  ;;  %p409_p9 = scmp.lt.s32.totalorder (!%p350_p8), %s837_s6, 3 }
  0x29   : > { %v1146_v32 = vld [vmem:[%s1208_s0] sm:$0xff]  ;;  %v919_v34 = vld [vmem:[%s1150_s5 + $0x74] ss:$8 sps:$4 sm:$0xff]   ;;  %v921_v35 = vld [vmem:[%s1150_s5 + $0x70] ss:$8 sps:$4 sm:$0xff]   ;;  %v683_v3 = vlaneseq  ;;  %s1219_s6 = smov (!%p409_p9, %s837_s6), 3 }
  0x2a   : > { %v841_v33 = vcombine.high %v1146_v32, %v1146_v32  ;;  %631 = vmatprep.subr.bf16.mxu0 %v919_v34  ;;  %v922_v36 = vld [vmem:[%s1150_s5 + $0x64] ss:$8 sps:$4 sm:$0xff]   ;;  %v924_v37 = vld [vmem:[%s1150_s5 + $0x60] ss:$8 sps:$4 sm:$0xff]   ;;  %v925_v38 = vld [vmem:[%s1150_s5 + $0x54] ss:$8 sps:$4 sm:$0xff]   ;;  %v840_v2 = vcombine.low %v1146_v32, %v1146_v32  ;;  %s411_s9 = scalar_lea.vmem %s1210_s2, %s1219_s6 }
  0x2b   : > { %632 = vmatpush1.bf16.msra.mxu0 %v921_v35  ;;  %v927_v39 = vld [vmem:[%s1150_s5 + $0x50] ss:$8 sps:$4 sm:$0xff]   ;;  %v928_v40 = vld [vmem:[%s1150_s5 + $0x44] ss:$8 sps:$4 sm:$0xff]   ;;  %v930_v41 = vld [vmem:[%s1150_s5 + $0x40] ss:$8 sps:$4 sm:$0xff]  }
  0x2c   : > { %663 = vmatprep.mubr.bf16.mxu0 %v841_v33  ;;  %633 = vmatprep.subr.bf16.mxu0 %v922_v36  ;;  %v931_v42 = vld [vmem:[%s1150_s5 + $0x34] ss:$8 sps:$4 sm:$0xff]   ;;  %v933_v43 = vld [vmem:[%s1150_s5 + $0x30] ss:$8 sps:$4 sm:$0xff]   ;;  %v934_v44 = vld [vmem:[%s1150_s5 + $0x24] ss:$8 sps:$4 sm:$0xff]  }
  0x2d   : > { %v936_v45 = vld [vmem:[%s1150_s5 + $0x20] ss:$8 sps:$4 sm:$0xff]   ;;  %v937_v46 = vld [vmem:[%s1150_s5 + $0x14] ss:$8 sps:$4 sm:$0xff]   ;;  %v939_v47 = vld [vmem:[%s1150_s5 + $0x10] ss:$8 sps:$4 sm:$0xff]  }
  0x2e   : > { %v940_v48 = vld [vmem:[%s1150_s5 + $0x4] ss:$8 sps:$4 sm:$0xff]   ;;  %v942_v49 = vld [vmem:[%s1150_s5] ss:$8 sps:$4 sm:$0xff]   ;;  %v943_v50 = vld [vmem:[%s1150_s5 + $0xf4] ss:$8 sps:$4 sm:$0xff]  }
  0x2f   : > { %634 = vmatpush1.bf16.msra.mxu0 %v924_v37  ;;  %v945_v51 = vld [vmem:[%s1150_s5 + $0xf0] ss:$8 sps:$4 sm:$0xff]   ;;  %v946_v52 = vld [vmem:[%s1150_s5 + $0xe4] ss:$8 sps:$4 sm:$0xff]   ;;  %v948_v53 = vld [vmem:[%s1150_s5 + $0xe0] ss:$8 sps:$4 sm:$0xff]  }
  0x30   : > { %635 = vmatprep.subr.bf16.mxu0 %v925_v38  ;;  %v949_v54 = vld [vmem:[%s1150_s5 + $0xd4] ss:$8 sps:$4 sm:$0xff]   ;;  %v951_v55 = vld [vmem:[%s1150_s5 + $0xd0] ss:$8 sps:$4 sm:$0xff]   ;;  %v952_v56 = vld [vmem:[%s1150_s5 + $0xc4] ss:$8 sps:$4 sm:$0xff]  }
  0x31   : > { %v954_v57 = vld [vmem:[%s1150_s5 + $0xc0] ss:$8 sps:$4 sm:$0xff]   ;;  %v955_v58 = vld [vmem:[%s1150_s5 + $0xb4] ss:$8 sps:$4 sm:$0xff]   ;;  %v957_v59 = vld [vmem:[%s1150_s5 + $0xb0] ss:$8 sps:$4 sm:$0xff]  }
  0x32   : > { %v958_v60 = vld [vmem:[%s1150_s5 + $0xa4] ss:$8 sps:$4 sm:$0xff]   ;;  %v960_v61 = vld [vmem:[%s1150_s5 + $0xa0] ss:$8 sps:$4 sm:$0xff]   ;;  %v961_v62 = vld [vmem:[%s1150_s5 + $0x94] ss:$8 sps:$4 sm:$0xff]  }
  0x33   : > { %636 = vmatpush1.bf16.msra.mxu0 %v927_v39  ;;  %v963_v63 = vld [vmem:[%s1150_s5 + $0x90] ss:$8 sps:$4 sm:$0xff]   ;;  %v964_v0 = vld [vmem:[%s1150_s5 + $0x84] ss:$8 sps:$4 sm:$0xff]   ;;  %v966_v1 = vld [vmem:[%s1150_s5 + $0x80] ss:$8 sps:$4 sm:$0xff]  }
  0x34   : > { %637 = vmatprep.subr.bf16.mxu0 %v928_v40  ;;  %v684_v4 = vshrl.u32 %v683_v3, 7  ;;  %v681_v7 = vld [vmem:[%s411_s9] sm:$0x3]  ;;  %s839_s10 = sshll.u32 %s1219_s6, 2 }
  0x35   : > { %s421_s14 = scalar_lea.vmem %s1211_s3, %s839_s10 }
  0x36   : > { %v685_v5 = vsub.s32 0, %v684_v4  ;;  %v689_v6 = vsub.s32 1, %v684_v4 }
  0x37   : > { %638 = vmatpush1.bf16.msra.mxu0 %v930_v41 }
  0x38   : > { %639 = vmatprep.subr.bf16.mxu0 %v931_v42  ;;  %v686_v8 = vrot.slane %v681_v7, %v685_v5  ;;  %v690_v9 = vrot.slane %v681_v7, %v689_v6 }
  0x3b   : > { %640 = vmatpush1.bf16.msra.mxu0 %v933_v43 }
  0x3c   : > { %641 = vmatprep.subr.bf16.mxu0 %v934_v44 }
  0x3f   : > { %642 = vmatpush1.bf16.msra.mxu0 %v936_v45 }
  0x40   : > { %643 = vmatprep.subr.bf16.mxu0 %v937_v46 }
  0x43   : > { %644 = vmatpush1.bf16.msra.mxu0 %v939_v47 }
  0x44   : > { %645 = vmatprep.subr.bf16.mxu0 %v940_v48 }
  0x47   : > { %646 = vmatpush1.bf16.msra.mxu0 %v942_v49 }
  0x48   : > { %647 = vmatprep.subr.bf16.mxu0 %v943_v50 }
  0x4b   : > { %648 = vmatpush2.bf16.msra.mxu0 %v945_v51 }
  0x4c   : > { %649 = vmatprep.subr.bf16.mxu0 %v946_v52 }
  0x4f   : > { %650 = vmatpush2.bf16.msra.mxu0 %v948_v53 }
  0x50   : > { %651 = vmatprep.subr.bf16.mxu0 %v949_v54 }
  0x53   : > { %652 = vmatpush2.bf16.msra.mxu0 %v951_v55 }
  0x54   : > { %653 = vmatprep.subr.bf16.mxu0 %v952_v56 }
  0x57   : > { %654 = vmatpush2.bf16.msra.mxu0 %v954_v57 }
  0x58   : > { %655 = vmatprep.subr.bf16.mxu0 %v955_v58 }
  0x5b   : > { %656 = vmatpush2.bf16.msra.mxu0 %v957_v59 }
  0x5c   : > { %657 = vmatprep.subr.bf16.mxu0 %v958_v60 }
  0x5f   : > { %658 = vmatpush2.bf16.msra.mxu0 %v960_v61 }
  0x60   : > { %659 = vmatprep.subr.bf16.mxu0 %v961_v62 }
  0x63   : > { %660 = vmatpush2.bf16.msra.mxu0 %v963_v63 }
  0x64   : > { %661 = vmatprep.subr.bf16.mxu0 %v964_v0 }
  0x67   : > { %662 = vmatpush2.bf16.msra.mxu0 %v966_v1 }
  0x6a   : > { %664 = vmatmul.mubr.bf16.vlgmr.msra.gmra.mxu0 %v840_v2 }
 0x12a   : > { %v665_v10 = vpop.f32.mrf.mxu0 }
 0x12b   : > { %v693_v12 = vadd.f32 %v686_v8, %v665_v10 }
 0x12c   : > { %v667_v11 = vpop.f32.mrf.mxu0 }
 0x12d   : > { %v694_v13 = vadd.f32 %v690_v9, %v667_v11 }
 0x12e   : > { %v669_v14 = vpop.f32.mrf.mxu0 }
 0x12f   : > { %v878_v15 = vpack.c.bf16 %v694_v13, %v693_v12 }
 0x130   : > { %v670_v16 = vpop.f32.mrf.mxu0 }
 0x131   : > { %703 = vst [vmem:[%s421_s14] sm:$0xff] %v878_v15 }
 0x132 PF: > { %s13_s16 = sadd.s32 1, %s1007_s16   ;;  %s1212_s12 = smov %s995_s13 }
 0x133   : > { %p10_p10 = scmp.ge.s32.totalorder %s13_s16, 4   ;;  %s1213_s13 = smov %s1064_s20 }
 0x134   : > { %s1214_s14 = smov %s1003_s15  ;;  %s1215_s15 = smov %s1217_s17 }
 0x135   :  { %12 = sbr.rel (!%p10_p10) target bundleno = 3 (0x3), region = 119 }

// kernel: morphclr_dual_forward.61
= control target key start
LH: loop header
LB: loop body
LE: loop exit
PB: predicated region body
PF: predicated region fallthrough
CT: control target
= control target key end

     0   :  { %s1617_s15 = smov 0   ;;  %s1619_s16 = smov 0   ;;  %s1934_s0 = inlined_call_operand.vmem [shape: bf16[8,4608], index: 0, kind: input, shape index: {}]   ;;  %s1935_s1 = inlined_call_operand.vmem [shape: bf16[4608,512], index: 1, kind: input, shape index: {}]   ;;  %s1936_s2 = inlined_call_operand.vmem [shape: f32[1,512], index: 2, kind: input, shape index: {}]   ;;  %s1937_s3 = inlined_call_operand.vmem [shape: bf16[8,512], index: 3, kind: input, shape index: {}]   ;;  %s1938_s4 = inlined_call_operand.vmem [shape: bf16[8,512], index: 4, kind: output, shape index: {}]  }
   0x1   :  { %s1621_s17 = smov 0   ;;  %s1623_s18 = smov 0  }
   0x2   :  { %s1625_s19 = smov 0   ;;  %s1627_s20 = smov 0  }
   0x3   :  { %s1629_s21 = smov 0  }
   0x4 LB: > { %s26_s22 = sadd.s32 1, %s1581_s19  ;;  %s29_s23 = sadd.s32 1, %s1585_s20  ;;  %s1589_s21 = sphi %s1629_s21, %s14_s21   ;;  %s1585_s20 = sphi %s1627_s20, %s1944_s20   ;;  %s1581_s19 = sphi %s1625_s19, %s1943_s19   ;;  %s1577_s18 = sphi %s1623_s18, %s1942_s18   ;;  %s1573_s17 = sphi %s1621_s17, %s1941_s17   ;;  %s1569_s16 = sphi %s1619_s16, %s1940_s16   ;;  %s1565_s15 = sphi %s1617_s15, %s1939_s15  }
   0x5   : > { %p27_p0 = scmp.ge.s32.totalorder %s26_s22, 9  ;;  %p77_p1 = scmp.ne.s32.totalorder %s1569_s16, %s1565_s15 }
   0x6   : > { %p78_p2 = scmp.eq.s32.totalorder %s1589_s21, 0  ;;  %s70_s27 = sadd.s32 1, %s1569_s16 }
   0x7   : > { %s1946_s22 = smov (%p27_p0, %s26_s22), 0  ;;  %s1948_s23 = smov (!%p27_p0, %s29_s23), %s1585_s20 }
   0x8   : > { %p79_p3 = por %p78_p2, %p77_p1  ;;  %p31_p4 = scmp.ge.s32.totalorder %s1948_s23, 2 }
   0x9   : > { %s65_s24 = ssub.s32 %s1581_s19, %s1946_s22  ;;  %p1288_p6 = scmp.ge.s32.totalorder %s1589_s21, 18 }
   0xa   : > { %s1950_s23 = smov (%p31_p4, %s1948_s23), 0 }
   0xb   : > { %s66_s25 = ssub.s32 %s1585_s20, %s1950_s23  ;;  %185 = sbr.rel (%p1288_p6) target bundleno = 55 (0x37), region = 16 }
   0xc   : > { %s67_s26 = sor.u32 %s66_s25, %s65_s24 }
   0xd   : > { %p68_p5 = scmp.eq.s32.totalorder %s67_s26, 0 }
   0xf   : > { %s1668_s28 = scalar_select %p68_p5, %s1569_s16, %s70_s27  }
  0x10   : > { %201 = sbr.rel (!%p79_p3) target bundleno = 55 (0x37), region = 24  ;;  %s203_s29 = sand.u32 (%p79_p3), 1, %s1569_s16  }
  0x11   : > { %s1291_s30 = sshll.u32 (%p79_p3), %s1585_s20, 1  ;;  %s1289_s5 = sshll.u32 (%p79_p3), %s203_s29, 9 }
  0x12   : > { %s1376_s6 = sshll.u32 (%p79_p3), %s1581_s19, 8  ;;  %s1682_s12 = scalar_lea.vmem (%p79_p3), [#allocation3], %s1289_s5 }
  0x13   : > { %s209_s7 = sadd.s32 (%p79_p3), %s1376_s6, %s1291_s30 }
  0x14   : > { %s1293_s8 = sshll.u32 (%p79_p3), %s209_s7, 2 }
  0x15   : > { %s1677_s11 = scalar_lea.vmem %s1935_s1, %s1293_s8 }
  0x16   : > { %v366_v0 = vld [vmem:[%s1677_s11] sm:$0xff]  ;;  %v368_v1 = vld [vmem:[%s1677_s11 + $0x10] sm:$0xff] }
  0x17   : > { %v370_v2 = vld [vmem:[%s1677_s11 + $0x20] sm:$0xff]  ;;  %367 = vst [vmem:[%s1682_s12] sm:$0xff] %v366_v0  ;;  %369 = vst [vmem:[%s1682_s12 + $0x8] sm:$0xff] %v368_v1  ;;  %v372_v3 = vld [vmem:[%s1677_s11 + $0x30] sm:$0xff] }
  0x18   : > { %371 = vst [vmem:[%s1682_s12 + $0x10] sm:$0xff] %v370_v2  ;;  %v374_v4 = vld [vmem:[%s1677_s11 + $0x40] sm:$0xff]  ;;  %v376_v5 = vld [vmem:[%s1677_s11 + $0x50] sm:$0xff]  ;;  %373 = vst [vmem:[%s1682_s12 + $0x18] sm:$0xff] %v372_v3 }
  0x19   : > { %375 = vst [vmem:[%s1682_s12 + $0x20] sm:$0xff] %v374_v4  ;;  %377 = vst [vmem:[%s1682_s12 + $0x28] sm:$0xff] %v376_v5  ;;  %v378_v6 = vld [vmem:[%s1677_s11 + $0x60] sm:$0xff]  ;;  %v380_v7 = vld [vmem:[%s1677_s11 + $0x70] sm:$0xff] }
  0x1a   : > { %v382_v8 = vld [vmem:[%s1677_s11 + $0x80] sm:$0xff]  ;;  %379 = vst [vmem:[%s1682_s12 + $0x30] sm:$0xff] %v378_v6  ;;  %381 = vst [vmem:[%s1682_s12 + $0x38] sm:$0xff] %v380_v7  ;;  %v384_v9 = vld [vmem:[%s1677_s11 + $0x90] sm:$0xff] }
  0x1b   : > { %383 = vst [vmem:[%s1682_s12 + $0x40] sm:$0xff] %v382_v8  ;;  %v386_v10 = vld [vmem:[%s1677_s11 + $0xa0] sm:$0xff]  ;;  %v388_v11 = vld [vmem:[%s1677_s11 + $0xb0] sm:$0xff]  ;;  %385 = vst [vmem:[%s1682_s12 + $0x48] sm:$0xff] %v384_v9 }
  0x1c   : > { %387 = vst [vmem:[%s1682_s12 + $0x50] sm:$0xff] %v386_v10  ;;  %389 = vst [vmem:[%s1682_s12 + $0x58] sm:$0xff] %v388_v11  ;;  %v390_v12 = vld [vmem:[%s1677_s11 + $0xc0] sm:$0xff]  ;;  %v392_v13 = vld [vmem:[%s1677_s11 + $0xd0] sm:$0xff] }
  0x1d   : > { %v394_v14 = vld [vmem:[%s1677_s11 + $0xe0] sm:$0xff]  ;;  %391 = vst [vmem:[%s1682_s12 + $0x60] sm:$0xff] %v390_v12  ;;  %393 = vst [vmem:[%s1682_s12 + $0x68] sm:$0xff] %v392_v13  ;;  %v396_v15 = vld [vmem:[%s1677_s11 + $0xf0] sm:$0xff] }
  0x1e   : > { %395 = vst [vmem:[%s1682_s12 + $0x70] sm:$0xff] %v394_v14  ;;  %v398_v16 = vld [vmem:[%s1677_s11 + $0x100] sm:$0xff]  ;;  %v400_v17 = vld [vmem:[%s1677_s11 + $0x110] sm:$0xff]  ;;  %397 = vst [vmem:[%s1682_s12 + $0x78] sm:$0xff] %v396_v15 }
  0x1f   : > { %399 = vst [vmem:[%s1682_s12 + $0x80] sm:$0xff] %v398_v16  ;;  %401 = vst [vmem:[%s1682_s12 + $0x88] sm:$0xff] %v400_v17  ;;  %v402_v18 = vld [vmem:[%s1677_s11 + $0x120] sm:$0xff]  ;;  %v404_v19 = vld [vmem:[%s1677_s11 + $0x130] sm:$0xff] }
  0x20   : > { %v406_v20 = vld [vmem:[%s1677_s11 + $0x140] sm:$0xff]  ;;  %403 = vst [vmem:[%s1682_s12 + $0x90] sm:$0xff] %v402_v18  ;;  %405 = vst [vmem:[%s1682_s12 + $0x98] sm:$0xff] %v404_v19  ;;  %v408_v21 = vld [vmem:[%s1677_s11 + $0x150] sm:$0xff] }
  0x21   : > { %407 = vst [vmem:[%s1682_s12 + $0xa0] sm:$0xff] %v406_v20  ;;  %v410_v22 = vld [vmem:[%s1677_s11 + $0x160] sm:$0xff]  ;;  %v412_v23 = vld [vmem:[%s1677_s11 + $0x170] sm:$0xff]  ;;  %409 = vst [vmem:[%s1682_s12 + $0xa8] sm:$0xff] %v408_v21 }
  0x22   : > { %411 = vst [vmem:[%s1682_s12 + $0xb0] sm:$0xff] %v410_v22  ;;  %413 = vst [vmem:[%s1682_s12 + $0xb8] sm:$0xff] %v412_v23  ;;  %v414_v24 = vld [vmem:[%s1677_s11 + $0x180] sm:$0xff]  ;;  %v416_v25 = vld [vmem:[%s1677_s11 + $0x190] sm:$0xff] }
  0x23   : > { %v418_v26 = vld [vmem:[%s1677_s11 + $0x1a0] sm:$0xff]  ;;  %415 = vst [vmem:[%s1682_s12 + $0xc0] sm:$0xff] %v414_v24  ;;  %417 = vst [vmem:[%s1682_s12 + $0xc8] sm:$0xff] %v416_v25  ;;  %v420_v27 = vld [vmem:[%s1677_s11 + $0x1b0] sm:$0xff] }
  0x24   : > { %419 = vst [vmem:[%s1682_s12 + $0xd0] sm:$0xff] %v418_v26  ;;  %v422_v28 = vld [vmem:[%s1677_s11 + $0x1c0] sm:$0xff]  ;;  %v424_v29 = vld [vmem:[%s1677_s11 + $0x1d0] sm:$0xff]  ;;  %421 = vst [vmem:[%s1682_s12 + $0xd8] sm:$0xff] %v420_v27 }
  0x25   : > { %423 = vst [vmem:[%s1682_s12 + $0xe0] sm:$0xff] %v422_v28  ;;  %425 = vst [vmem:[%s1682_s12 + $0xe8] sm:$0xff] %v424_v29  ;;  %v426_v30 = vld [vmem:[%s1677_s11 + $0x1e0] sm:$0xff]  ;;  %v428_v31 = vld [vmem:[%s1677_s11 + $0x1f0] sm:$0xff] }
  0x26   : > { %v430_v32 = vld [vmem:[%s1677_s11 + $0x200] sm:$0xff]  ;;  %427 = vst [vmem:[%s1682_s12 + $0xf0] sm:$0xff] %v426_v30  ;;  %429 = vst [vmem:[%s1682_s12 + $0xf8] sm:$0xff] %v428_v31  ;;  %v432_v33 = vld [vmem:[%s1677_s11 + $0x210] sm:$0xff] }
  0x27   : > { %431 = vst [vmem:[%s1682_s12 + $0x100] sm:$0xff] %v430_v32  ;;  %v434_v34 = vld [vmem:[%s1677_s11 + $0x220] sm:$0xff]  ;;  %v436_v35 = vld [vmem:[%s1677_s11 + $0x230] sm:$0xff]  ;;  %433 = vst [vmem:[%s1682_s12 + $0x108] sm:$0xff] %v432_v33 }
  0x28   : > { %435 = vst [vmem:[%s1682_s12 + $0x110] sm:$0xff] %v434_v34  ;;  %437 = vst [vmem:[%s1682_s12 + $0x118] sm:$0xff] %v436_v35  ;;  %v438_v36 = vld [vmem:[%s1677_s11 + $0x240] sm:$0xff]  ;;  %v440_v37 = vld [vmem:[%s1677_s11 + $0x250] sm:$0xff] }
  0x29   : > { %v442_v38 = vld [vmem:[%s1677_s11 + $0x260] sm:$0xff]  ;;  %439 = vst [vmem:[%s1682_s12 + $0x120] sm:$0xff] %v438_v36  ;;  %441 = vst [vmem:[%s1682_s12 + $0x128] sm:$0xff] %v440_v37  ;;  %v444_v39 = vld [vmem:[%s1677_s11 + $0x270] sm:$0xff] }
  0x2a   : > { %443 = vst [vmem:[%s1682_s12 + $0x130] sm:$0xff] %v442_v38  ;;  %v446_v40 = vld [vmem:[%s1677_s11 + $0x280] sm:$0xff]  ;;  %v448_v41 = vld [vmem:[%s1677_s11 + $0x290] sm:$0xff]  ;;  %445 = vst [vmem:[%s1682_s12 + $0x138] sm:$0xff] %v444_v39 }
  0x2b   : > { %447 = vst [vmem:[%s1682_s12 + $0x140] sm:$0xff] %v446_v40  ;;  %449 = vst [vmem:[%s1682_s12 + $0x148] sm:$0xff] %v448_v41  ;;  %v450_v42 = vld [vmem:[%s1677_s11 + $0x2a0] sm:$0xff]  ;;  %v452_v43 = vld [vmem:[%s1677_s11 + $0x2b0] sm:$0xff] }
  0x2c   : > { %v454_v44 = vld [vmem:[%s1677_s11 + $0x2c0] sm:$0xff]  ;;  %451 = vst [vmem:[%s1682_s12 + $0x150] sm:$0xff] %v450_v42  ;;  %453 = vst [vmem:[%s1682_s12 + $0x158] sm:$0xff] %v452_v43  ;;  %v456_v45 = vld [vmem:[%s1677_s11 + $0x2d0] sm:$0xff] }
  0x2d   : > { %455 = vst [vmem:[%s1682_s12 + $0x160] sm:$0xff] %v454_v44  ;;  %v458_v46 = vld [vmem:[%s1677_s11 + $0x2e0] sm:$0xff]  ;;  %v460_v47 = vld [vmem:[%s1677_s11 + $0x2f0] sm:$0xff]  ;;  %457 = vst [vmem:[%s1682_s12 + $0x168] sm:$0xff] %v456_v45 }
  0x2e   : > { %459 = vst [vmem:[%s1682_s12 + $0x170] sm:$0xff] %v458_v46  ;;  %461 = vst [vmem:[%s1682_s12 + $0x178] sm:$0xff] %v460_v47  ;;  %v462_v48 = vld [vmem:[%s1677_s11 + $0x300] sm:$0xff]  ;;  %v464_v49 = vld [vmem:[%s1677_s11 + $0x310] sm:$0xff] }
  0x2f   : > { %v466_v50 = vld [vmem:[%s1677_s11 + $0x320] sm:$0xff]  ;;  %463 = vst [vmem:[%s1682_s12 + $0x180] sm:$0xff] %v462_v48  ;;  %465 = vst [vmem:[%s1682_s12 + $0x188] sm:$0xff] %v464_v49  ;;  %v468_v51 = vld [vmem:[%s1677_s11 + $0x330] sm:$0xff] }
  0x30   : > { %467 = vst [vmem:[%s1682_s12 + $0x190] sm:$0xff] %v466_v50  ;;  %v470_v52 = vld [vmem:[%s1677_s11 + $0x340] sm:$0xff]  ;;  %v472_v53 = vld [vmem:[%s1677_s11 + $0x350] sm:$0xff]  ;;  %469 = vst [vmem:[%s1682_s12 + $0x198] sm:$0xff] %v468_v51 }
  0x31   : > { %471 = vst [vmem:[%s1682_s12 + $0x1a0] sm:$0xff] %v470_v52  ;;  %473 = vst [vmem:[%s1682_s12 + $0x1a8] sm:$0xff] %v472_v53  ;;  %v474_v54 = vld [vmem:[%s1677_s11 + $0x360] sm:$0xff]  ;;  %v476_v55 = vld [vmem:[%s1677_s11 + $0x370] sm:$0xff] }
  0x32   : > { %v478_v56 = vld [vmem:[%s1677_s11 + $0x380] sm:$0xff]  ;;  %475 = vst [vmem:[%s1682_s12 + $0x1b0] sm:$0xff] %v474_v54  ;;  %477 = vst [vmem:[%s1682_s12 + $0x1b8] sm:$0xff] %v476_v55  ;;  %v480_v57 = vld [vmem:[%s1677_s11 + $0x390] sm:$0xff] }
  0x33   : > { %479 = vst [vmem:[%s1682_s12 + $0x1c0] sm:$0xff] %v478_v56  ;;  %v482_v58 = vld [vmem:[%s1677_s11 + $0x3a0] sm:$0xff]  ;;  %v484_v59 = vld [vmem:[%s1677_s11 + $0x3b0] sm:$0xff]  ;;  %481 = vst [vmem:[%s1682_s12 + $0x1c8] sm:$0xff] %v480_v57 }
  0x34   : > { %483 = vst [vmem:[%s1682_s12 + $0x1d0] sm:$0xff] %v482_v58  ;;  %485 = vst [vmem:[%s1682_s12 + $0x1d8] sm:$0xff] %v484_v59  ;;  %v486_v60 = vld [vmem:[%s1677_s11 + $0x3c0] sm:$0xff]  ;;  %v488_v61 = vld [vmem:[%s1677_s11 + $0x3d0] sm:$0xff] }
  0x35   : > { %v490_v62 = vld [vmem:[%s1677_s11 + $0x3e0] sm:$0xff]  ;;  %487 = vst [vmem:[%s1682_s12 + $0x1e0] sm:$0xff] %v486_v60  ;;  %489 = vst [vmem:[%s1682_s12 + $0x1e8] sm:$0xff] %v488_v61  ;;  %v492_v63 = vld [vmem:[%s1677_s11 + $0x3f0] sm:$0xff] }
  0x36   : > { %491 = vst [vmem:[%s1682_s12 + $0x1f0] sm:$0xff] %v490_v62  ;;  %493 = vst [vmem:[%s1682_s12 + $0x1f8] sm:$0xff] %v492_v63 }
  0x37 PF: > { %p1294_p7 = scmp.ge.s32.totalorder %s1589_s21, 1  ;;  %p519_p8 = scmp.lt.s32.totalorder %s1589_s21, 19 }
  0x39   : > { %p520_p9 = pnand %p1294_p7, %p519_p8 }
  0x3a   : > { %s526_s13 = sand.u32 (!%p520_p9), 1, %s1565_s15   ;;  %s1296_s14 = sshll.u32 (!%p520_p9), %s1573_s17, 2 }
  0x3b   : > { %523 = sbr.rel (%p520_p9) target bundleno = 358 (0x166), region = 70  ;;  %s1295_s24 = sshll.u32 (!%p520_p9), %s526_s13, 9 }
  0x3c   : > { %p580_p10 = scmp.lt.s32.totalorder (!%p520_p9), %s1296_s14, 35  ;;  %s1298_s25 = sshll.u32 (!%p520_p9), %s1577_s18, 1 }
  0x3d   : > { %p590_p11 = scmp.lt.s32.totalorder (!%p520_p9), %s1298_s25, 3  ;;  %s1836_s13 = scalar_lea.vmem (!%p520_p9), [#allocation3], %s1295_s24 }
  0x3e   : > { %p1303_p12 = scmp.ne.s32.totalorder (!%p520_p9), %s1573_s17, 0 }
  0x40   : > { %s1952_s14 = smov (!%p580_p10, %s1296_s14), 35  ;;  %s1954_s25 = smov (!%p590_p11, %s1298_s25), 3 }
  0x41   : > { %s1297_s26 = sshll.u32 %s1952_s14, 2  ;;  %s592_s15 = scalar_lea.vmem %s1936_s2, %s1954_s25 }
  0x42   : > { %s1817_s30 = scalar_lea.vmem %s1934_s0, %s1297_s26  ;;  %s1300_s7 = sshll.u32 %s1954_s25, 2 }
  0x43   : > { %s1829_s18 = scalar_lea.vmem %s1937_s3, %s1300_s7  ;;  %s1834_s12 = scalar_lea.vmem %s1938_s4, %s1300_s7 }
  0x44   : > { %617 = sbr.rel (%p1303_p12) target bundleno = 75 (0x4b), region = 78 }
  0x49   : > { %v1591_v0 = vmov 0.0  }
  0x4a   : > { %618 = vst [vmem:[#allocation2] sm:$0xff] %v1591_v0  ;;  %619 = vst [vmem:[#allocation2 + $0x8] sm:$0xff] %v1591_v0 }
  0x4b PF: > { %v1435_v1 = vld [vmem:[%s1836_s13 + $0x74] ss:$8 sps:$4 sm:$0xff]   ;;  %v1439_v3 = vld [vmem:[%s1836_s13 + $0x70] ss:$8 sps:$4 sm:$0xff]   ;;  %v1441_v5 = vld [vmem:[%s1836_s13 + $0x64] ss:$8 sps:$4 sm:$0xff]  }
  0x4c   : > { %v1437_v2 = vld [vmem:[%s1836_s13 + $0x174] ss:$8 sps:$4 sm:$0xff]   ;;  %1022 = vmatprep.subr.bf16.mxu0 %v1435_v1  ;;  %v1440_v4 = vld [vmem:[%s1836_s13 + $0x170] ss:$8 sps:$4 sm:$0xff]   ;;  %v1443_v6 = vld [vmem:[%s1836_s13 + $0x164] ss:$8 sps:$4 sm:$0xff]  }
  0x4d   : > { %1063 = vmatprep.subr.bf16.mxu1 %v1437_v2  ;;  %1023 = vmatpush1.bf16.msra.mxu0 %v1439_v3  ;;  %v1445_v7 = vld [vmem:[%s1836_s13 + $0x60] ss:$8 sps:$4 sm:$0xff]   ;;  %v1447_v9 = vld [vmem:[%s1836_s13 + $0x54] ss:$8 sps:$4 sm:$0xff]   ;;  %v1451_v11 = vld [vmem:[%s1836_s13 + $0x50] ss:$8 sps:$4 sm:$0xff]  }
  0x4e   : > { %1064 = vmatpush1.bf16.msra.mxu1 %v1440_v4  ;;  %1024 = vmatprep.subr.bf16.mxu0 %v1441_v5  ;;  %v1446_v8 = vld [vmem:[%s1836_s13 + $0x160] ss:$8 sps:$4 sm:$0xff]   ;;  %v1449_v10 = vld [vmem:[%s1836_s13 + $0x154] ss:$8 sps:$4 sm:$0xff]   ;;  %v1452_v12 = vld [vmem:[%s1836_s13 + $0x150] ss:$8 sps:$4 sm:$0xff]  }
  0x4f   : > { %1065 = vmatprep.subr.bf16.mxu1 %v1443_v6  ;;  %v1453_v13 = vld [vmem:[%s1836_s13 + $0x44] ss:$8 sps:$4 sm:$0xff]   ;;  %v1457_v15 = vld [vmem:[%s1836_s13 + $0x40] ss:$8 sps:$4 sm:$0xff]   ;;  %v1459_v17 = vld [vmem:[%s1836_s13 + $0x34] ss:$8 sps:$4 sm:$0xff]  }
  0x50   : > { %v1455_v14 = vld [vmem:[%s1836_s13 + $0x144] ss:$8 sps:$4 sm:$0xff]   ;;  %v1458_v16 = vld [vmem:[%s1836_s13 + $0x140] ss:$8 sps:$4 sm:$0xff]   ;;  %v1461_v18 = vld [vmem:[%s1836_s13 + $0x134] ss:$8 sps:$4 sm:$0xff]  }
  0x51   : > { %1025 = vmatpush1.bf16.msra.mxu0 %v1445_v7  ;;  %v1463_v19 = vld [vmem:[%s1836_s13 + $0x30] ss:$8 sps:$4 sm:$0xff]   ;;  %v1465_v21 = vld [vmem:[%s1836_s13 + $0x24] ss:$8 sps:$4 sm:$0xff]   ;;  %v1469_v23 = vld [vmem:[%s1836_s13 + $0x20] ss:$8 sps:$4 sm:$0xff]  }
  0x52   : > { %1066 = vmatpush1.bf16.msra.mxu1 %v1446_v8  ;;  %1026 = vmatprep.subr.bf16.mxu0 %v1447_v9  ;;  %v1464_v20 = vld [vmem:[%s1836_s13 + $0x130] ss:$8 sps:$4 sm:$0xff]   ;;  %v1467_v22 = vld [vmem:[%s1836_s13 + $0x124] ss:$8 sps:$4 sm:$0xff]   ;;  %v1470_v24 = vld [vmem:[%s1836_s13 + $0x120] ss:$8 sps:$4 sm:$0xff]  }
  0x53   : > { %1067 = vmatprep.subr.bf16.mxu1 %v1449_v10  ;;  %v1471_v25 = vld [vmem:[%s1836_s13 + $0x14] ss:$8 sps:$4 sm:$0xff]   ;;  %v1475_v27 = vld [vmem:[%s1836_s13 + $0x10] ss:$8 sps:$4 sm:$0xff]   ;;  %v1477_v29 = vld [vmem:[%s1836_s13 + $0x4] ss:$8 sps:$4 sm:$0xff]  }
  0x54   : > { %v1473_v26 = vld [vmem:[%s1836_s13 + $0x114] ss:$8 sps:$4 sm:$0xff]   ;;  %v1476_v28 = vld [vmem:[%s1836_s13 + $0x110] ss:$8 sps:$4 sm:$0xff]   ;;  %v1479_v30 = vld [vmem:[%s1836_s13 + $0x104] ss:$8 sps:$4 sm:$0xff]  }
  0x55   : > { %1027 = vmatpush1.bf16.msra.mxu0 %v1451_v11  ;;  %v1481_v31 = vld [vmem:[%s1836_s13] ss:$8 sps:$4 sm:$0xff]   ;;  %v1483_v33 = vld [vmem:[%s1836_s13 + $0xf4] ss:$8 sps:$4 sm:$0xff]   ;;  %v1487_v35 = vld [vmem:[%s1836_s13 + $0xf0] ss:$8 sps:$4 sm:$0xff]  }
  0x56   : > { %1068 = vmatpush1.bf16.msra.mxu1 %v1452_v12  ;;  %1028 = vmatprep.subr.bf16.mxu0 %v1453_v13  ;;  %v1482_v32 = vld [vmem:[%s1836_s13 + $0x100] ss:$8 sps:$4 sm:$0xff]   ;;  %v1485_v34 = vld [vmem:[%s1836_s13 + $0x1f4] ss:$8 sps:$4 sm:$0xff]   ;;  %v1488_v36 = vld [vmem:[%s1836_s13 + $0x1f0] ss:$8 sps:$4 sm:$0xff]  }
  0x57   : > { %1069 = vmatprep.subr.bf16.mxu1 %v1455_v14  ;;  %v1489_v37 = vld [vmem:[%s1836_s13 + $0xe4] ss:$8 sps:$4 sm:$0xff]   ;;  %v1493_v39 = vld [vmem:[%s1836_s13 + $0xe0] ss:$8 sps:$4 sm:$0xff]   ;;  %v1495_v41 = vld [vmem:[%s1836_s13 + $0xd4] ss:$8 sps:$4 sm:$0xff]  }
  0x58   : > { %v1491_v38 = vld [vmem:[%s1836_s13 + $0x1e4] ss:$8 sps:$4 sm:$0xff]   ;;  %v1494_v40 = vld [vmem:[%s1836_s13 + $0x1e0] ss:$8 sps:$4 sm:$0xff]   ;;  %v1497_v42 = vld [vmem:[%s1836_s13 + $0x1d4] ss:$8 sps:$4 sm:$0xff]  }
  0x59   : > { %1029 = vmatpush1.bf16.msra.mxu0 %v1457_v15  ;;  %v1499_v43 = vld [vmem:[%s1836_s13 + $0xd0] ss:$8 sps:$4 sm:$0xff]   ;;  %v1501_v45 = vld [vmem:[%s1836_s13 + $0xc4] ss:$8 sps:$4 sm:$0xff]   ;;  %v1505_v50 = vld [vmem:[%s1836_s13 + $0xc0] ss:$8 sps:$4 sm:$0xff]  }
  0x5a   : > { %1070 = vmatpush1.bf16.msra.mxu1 %v1458_v16  ;;  %1030 = vmatprep.subr.bf16.mxu0 %v1459_v17  ;;  %v1500_v44 = vld [vmem:[%s1836_s13 + $0x1d0] ss:$8 sps:$4 sm:$0xff]   ;;  %v1503_v46 = vld [vmem:[%s1836_s13 + $0x1c4] ss:$8 sps:$4 sm:$0xff]   ;;  %v1506_v51 = vld [vmem:[%s1836_s13 + $0x1c0] ss:$8 sps:$4 sm:$0xff]  }
  0x5b   : > { %1071 = vmatprep.subr.bf16.mxu1 %v1461_v18  ;;  %v622_v47 = vld [vmem:[%s1817_s30] sm:$0xff]  ;;  %v623_v49 = vld [vmem:[%s1817_s30 + $0x8] sm:$0xff]  ;;  %v1513_v57 = vld [vmem:[%s1836_s13 + $0xa4] ss:$8 sps:$4 sm:$0xff]   ;;  %p1372_p13 = scmp.ne.s32.totalorder %s1573_s17, 8 }
  0x5c   : > { %v1305_v48 = vcombine.high %v622_v47, %v622_v47  ;;  %v1307_v52 = vcombine.high %v623_v49, %v623_v49  ;;  %v1507_v53 = vld [vmem:[%s1836_s13 + $0xb4] ss:$8 sps:$4 sm:$0xff]   ;;  %v1511_v55 = vld [vmem:[%s1836_s13 + $0xb0] ss:$8 sps:$4 sm:$0xff]   ;;  %v1515_v58 = vld [vmem:[%s1836_s13 + $0x1a4] ss:$8 sps:$4 sm:$0xff]   ;;  %v1304_v5 = vcombine.low %v622_v47, %v622_v47  ;;  %v1306_v6 = vcombine.low %v623_v49, %v623_v49 }
  0x5d   : > { %1031 = vmatpush1.bf16.msra.mxu0 %v1463_v19  ;;  %v1509_v54 = vld [vmem:[%s1836_s13 + $0x1b4] ss:$8 sps:$4 sm:$0xff]   ;;  %v1512_v56 = vld [vmem:[%s1836_s13 + $0x1b0] ss:$8 sps:$4 sm:$0xff]   ;;  %v1517_v59 = vld [vmem:[%s1836_s13 + $0xa0] ss:$8 sps:$4 sm:$0xff]  }
  0x5e   : > { %1072 = vmatpush1.bf16.msra.mxu1 %v1464_v20  ;;  %1032 = vmatprep.subr.bf16.mxu0 %v1465_v21  ;;  %v1518_v60 = vld [vmem:[%s1836_s13 + $0x1a0] ss:$8 sps:$4 sm:$0xff]   ;;  %v1519_v61 = vld [vmem:[%s1836_s13 + $0x94] ss:$8 sps:$4 sm:$0xff]   ;;  %v1523_v63 = vld [vmem:[%s1836_s13 + $0x90] ss:$8 sps:$4 sm:$0xff]  }
  0x5f   : > { %1073 = vmatprep.subr.bf16.mxu1 %v1467_v22  ;;  %1054 = vmatprep.mubr.bf16.mxu0 %v1305_v48  ;;  %v1521_v62 = vld [vmem:[%s1836_s13 + $0x194] ss:$8 sps:$4 sm:$0xff]   ;;  %v1524_v0 = vld [vmem:[%s1836_s13 + $0x190] ss:$8 sps:$4 sm:$0xff]   ;;  %v1525_v1 = vld [vmem:[%s1836_s13 + $0x84] ss:$8 sps:$4 sm:$0xff]  }
  0x60   : > { %1095 = vmatprep.mubr.bf16.mxu1 %v1307_v52  ;;  %v1527_v2 = vld [vmem:[%s1836_s13 + $0x184] ss:$8 sps:$4 sm:$0xff]   ;;  %v1529_v3 = vld [vmem:[%s1836_s13 + $0x80] ss:$8 sps:$4 sm:$0xff]   ;;  %v620_v8 = vld [vmem:[#allocation2] sm:$0xff] }
  0x61   : > { %1033 = vmatpush1.bf16.msra.mxu0 %v1469_v23  ;;  %v1530_v4 = vld [vmem:[%s1836_s13 + $0x180] ss:$8 sps:$4 sm:$0xff]   ;;  %v621_v12 = vld [vmem:[#allocation2 + $0x8] sm:$0xff] }
  0x62   : > { %1074 = vmatpush1.bf16.msra.mxu1 %v1470_v24  ;;  %1034 = vmatprep.subr.bf16.mxu0 %v1471_v25 }
  0x63   : > { %1075 = vmatprep.subr.bf16.mxu1 %v1473_v26 }
  0x65   : > { %1035 = vmatpush1.bf16.msra.mxu0 %v1475_v27 }
  0x66   : > { %1076 = vmatpush1.bf16.msra.mxu1 %v1476_v28  ;;  %1036 = vmatprep.subr.bf16.mxu0 %v1477_v29 }
  0x67   : > { %1077 = vmatprep.subr.bf16.mxu1 %v1479_v30 }
  0x69   : > { %1037 = vmatpush1.bf16.msra.mxu0 %v1481_v31 }
  0x6a   : > { %1078 = vmatpush1.bf16.msra.mxu1 %v1482_v32  ;;  %1038 = vmatprep.subr.bf16.mxu0 %v1483_v33 }
  0x6b   : > { %1079 = vmatprep.subr.bf16.mxu1 %v1485_v34 }
  0x6d   : > { %1039 = vmatpush2.bf16.msra.mxu0 %v1487_v35 }
  0x6e   : > { %1080 = vmatpush2.bf16.msra.mxu1 %v1488_v36  ;;  %1040 = vmatprep.subr.bf16.mxu0 %v1489_v37 }
  0x6f   : > { %1081 = vmatprep.subr.bf16.mxu1 %v1491_v38 }
  0x71   : > { %1041 = vmatpush2.bf16.msra.mxu0 %v1493_v39 }
  0x72   : > { %1082 = vmatpush2.bf16.msra.mxu1 %v1494_v40  ;;  %1042 = vmatprep.subr.bf16.mxu0 %v1495_v41 }
  0x73   : > { %1083 = vmatprep.subr.bf16.mxu1 %v1497_v42 }
  0x75   : > { %1043 = vmatpush2.bf16.msra.mxu0 %v1499_v43 }
  0x76   : > { %1084 = vmatpush2.bf16.msra.mxu1 %v1500_v44  ;;  %1044 = vmatprep.subr.bf16.mxu0 %v1501_v45 }
  0x77   : > { %1085 = vmatprep.subr.bf16.mxu1 %v1503_v46 }
  0x79   : > { %1045 = vmatpush2.bf16.msra.mxu0 %v1505_v50 }
  0x7a   : > { %1086 = vmatpush2.bf16.msra.mxu1 %v1506_v51  ;;  %1046 = vmatprep.subr.bf16.mxu0 %v1507_v53 }
  0x7b   : > { %1087 = vmatprep.subr.bf16.mxu1 %v1509_v54 }
  0x7d   : > { %1047 = vmatpush2.bf16.msra.mxu0 %v1511_v55 }
  0x7e   : > { %1088 = vmatpush2.bf16.msra.mxu1 %v1512_v56  ;;  %1048 = vmatprep.subr.bf16.mxu0 %v1513_v57 }
  0x7f   : > { %1089 = vmatprep.subr.bf16.mxu1 %v1515_v58 }
  0x81   : > { %1049 = vmatpush2.bf16.msra.mxu0 %v1517_v59 }
  0x82   : > { %1090 = vmatpush2.bf16.msra.mxu1 %v1518_v60  ;;  %1050 = vmatprep.subr.bf16.mxu0 %v1519_v61 }
  0x83   : > { %1091 = vmatprep.subr.bf16.mxu1 %v1521_v62 }
  0x85   : > { %1051 = vmatpush2.bf16.msra.mxu0 %v1523_v63 }
  0x86   : > { %1092 = vmatpush2.bf16.msra.mxu1 %v1524_v0  ;;  %1052 = vmatprep.subr.bf16.mxu0 %v1525_v1 }
  0x87   : > { %1093 = vmatprep.subr.bf16.mxu1 %v1527_v2 }
  0x89   : > { %1053 = vmatpush2.bf16.msra.mxu0 %v1529_v3 }
  0x8a   : > { %1094 = vmatpush2.bf16.msra.mxu1 %v1530_v4 }
  0x8c   : > { %1055 = vmatmul.mubr.bf16.vlgmr.msra.gmra.mxu0 %v1304_v5 }
  0x8d   : > { %1096 = vmatmul.mubr.bf16.vlgmr.msra.gmra.mxu1 %v1306_v6 }
 0x14c   : > { %v1056_v7 = vpop.f32.mrf.mxu0 }
 0x14d   : > { %v1097_v9 = vpop.f32.mrf.mxu1 }
 0x14e   : > { %v1098_v10 = vadd.f32 %v1097_v9, %v1056_v7  ;;  %v1058_v11 = vpop.f32.mrf.mxu0 }
 0x14f   : > { %v1099_v13 = vpop.f32.mrf.mxu1 }
 0x150   : > { %v1104_v14 = vadd.f32 %v1098_v10, %v620_v8  ;;  %v1100_v15 = vadd.f32 %v1099_v13, %v1058_v11  ;;  %v1060_v16 = vpop.f32.mrf.mxu0  ;;  %1111 = sbr.rel (%p1372_p13) target bundleno = 358 (0x166), region = 82 }
 0x151   : > { %v1101_v17 = vpop.f32.mrf.mxu1 }
 0x152   : > { %1106 = vst [vmem:[#allocation2] sm:$0xff] %v1104_v14  ;;  %v1105_v18 = vadd.f32 %v1100_v15, %v621_v12  ;;  %v1061_v19 = vpop.f32.mrf.mxu0 }
 0x153   : > { %v1102_v20 = vpop.f32.mrf.mxu1 }
 0x154   : > { %1107 = vst [vmem:[#allocation2 + $0x8] sm:$0xff] %v1105_v18 }
 0x155   : > { %v1116_v21 = vlaneseq  ;;  %v1114_v23 = vld [vmem:[%s592_s15] sm:$0x3] }
 0x156   : > { %v1128_v24 = vld [vmem:[%s1829_s18] sm:$0xff] }
 0x157   : > { %v1117_v22 = vshrl.u32 %v1116_v21, 7  ;;  %v1129_v31 = vunpack.c.l.bf16 %v1128_v24  ;;  %v1130_v32 = vunpack.c.h.bf16 %v1128_v24 }
 0x159   : > { %v1118_v25 = vsub.s32 0, %v1117_v22  ;;  %v1122_v26 = vsub.s32 1, %v1117_v22  ;;  %v1112_v27 = vld [vmem:[#allocation2] sm:$0xff] }
 0x15b   : > { %v1113_v28 = vld [vmem:[#allocation2 + $0x8] sm:$0xff]  ;;  %v1119_v29 = vrot.slane %v1114_v23, %v1118_v25  ;;  %v1123_v30 = vrot.slane %v1114_v23, %v1122_v26 }
 0x15d   : > { %v1126_v33 = vadd.f32 %v1119_v29, %v1112_v27  ;;  %v1127_v34 = vadd.f32 %v1123_v30, %v1113_v28 }
 0x15f   : > { %v1131_v35 = vadd.f32 %v1129_v31, %v1126_v33  ;;  %v1132_v36 = vadd.f32 %v1130_v32, %v1127_v34 }
 0x161   : > { %v1133_v37 = vmax.f32 %v1131_v35, 0.0  ;;  %v1134_v38 = vmax.f32 %v1132_v36, 0.0 }
 0x163   : > { %v1377_v39 = vpack.c.bf16 %v1134_v38, %v1133_v37 }
 0x165   : > { %1143 = vst [vmem:[%s1834_s12] sm:$0xff] %v1377_v39 }
 0x166 PF: > { %s14_s21 = sadd.s32 1, %s1589_s21   ;;  %s1939_s15 = smov %s1569_s16 }
 0x167   : > { %p11_p0 = scmp.ge.s32.totalorder %s14_s21, 20   ;;  %s1940_s16 = smov %s1668_s28 }
 0x168   : > { %s1941_s17 = smov %s1581_s19  ;;  %s1942_s18 = smov %s1585_s20 }
 0x169   : > { %s1943_s19 = smov %s1946_s22  ;;  %s1944_s20 = smov %s1950_s23 }
 0x16a   :  { %13 = sbr.rel (!%p11_p0) target bundleno = 4 (0x4), region = 126 }

// kernel: morphclr_dual_forward.62
= control target key start
LH: loop header
LB: loop body
LE: loop exit
PB: predicated region body
PF: predicated region fallthrough
CT: control target
= control target key end

     0   :  { %s1524_s12 = smov 0   ;;  %s1526_s13 = smov 0   ;;  %s1835_s0 = inlined_call_operand.vmem [shape: bf16[8,4608], index: 0, kind: input, shape index: {}]   ;;  %s1836_s1 = inlined_call_operand.vmem [shape: bf16[4608,512], index: 1, kind: input, shape index: {}]   ;;  %s1837_s2 = inlined_call_operand.vmem [shape: f32[1,512], index: 2, kind: input, shape index: {}]   ;;  %s1838_s3 = inlined_call_operand.vmem [shape: bf16[8,512], index: 3, kind: output, shape index: {}]  }
   0x1   :  { %s1528_s14 = smov 0   ;;  %s1530_s15 = smov 0  }
   0x2   :  { %s1532_s16 = smov 0   ;;  %s1534_s17 = smov 0  }
   0x3   :  { %s1536_s18 = smov 0  }
   0x4 LB: > { %s25_s19 = sadd.s32 1, %s1493_s16  ;;  %s28_s20 = sadd.s32 1, %s1497_s17  ;;  %s1501_s18 = sphi %s1536_s18, %s13_s18   ;;  %s1497_s17 = sphi %s1534_s17, %s1844_s17   ;;  %s1493_s16 = sphi %s1532_s16, %s1843_s16   ;;  %s1489_s15 = sphi %s1530_s15, %s1842_s15   ;;  %s1485_s14 = sphi %s1528_s14, %s1841_s14   ;;  %s1481_s13 = sphi %s1526_s13, %s1840_s13   ;;  %s1477_s12 = sphi %s1524_s12, %s1839_s12  }
   0x5   : > { %p26_p0 = scmp.ge.s32.totalorder %s25_s19, 9  ;;  %p76_p1 = scmp.ne.s32.totalorder %s1481_s13, %s1477_s12 }
   0x6   : > { %p77_p2 = scmp.eq.s32.totalorder %s1501_s18, 0  ;;  %s69_s24 = sadd.s32 1, %s1481_s13 }
   0x7   : > { %s1846_s19 = smov (%p26_p0, %s25_s19), 0  ;;  %s1848_s20 = smov (!%p26_p0, %s28_s20), %s1497_s17 }
   0x8   : > { %p78_p3 = por %p77_p2, %p76_p1  ;;  %p30_p4 = scmp.ge.s32.totalorder %s1848_s20, 2 }
   0x9   : > { %s64_s21 = ssub.s32 %s1493_s16, %s1846_s19  ;;  %p1202_p6 = scmp.ge.s32.totalorder %s1501_s18, 18 }
   0xa   : > { %s1850_s20 = smov (%p30_p4, %s1848_s20), 0 }
   0xb   : > { %s65_s22 = ssub.s32 %s1497_s17, %s1850_s20  ;;  %156 = sbr.rel (%p1202_p6) target bundleno = 55 (0x37), region = 16 }
   0xc   : > { %s66_s23 = sor.u32 %s65_s22, %s64_s21 }
   0xd   : > { %p67_p5 = scmp.eq.s32.totalorder %s66_s23, 0 }
   0xf   : > { %s1575_s25 = scalar_select %p67_p5, %s1481_s13, %s69_s24  }
  0x10   : > { %172 = sbr.rel (!%p78_p3) target bundleno = 55 (0x37), region = 24  ;;  %s174_s26 = sand.u32 (%p78_p3), 1, %s1481_s13  }
  0x11   : > { %s1205_s27 = sshll.u32 (%p78_p3), %s1497_s17, 1  ;;  %s1203_s28 = sshll.u32 (%p78_p3), %s174_s26, 9 }
  0x12   : > { %s1288_s29 = sshll.u32 (%p78_p3), %s1493_s16, 8  ;;  %s1589_s8 = scalar_lea.vmem (%p78_p3), [#allocation3], %s1203_s28 }
  0x13   : > { %s180_s30 = sadd.s32 (%p78_p3), %s1288_s29, %s1205_s27 }
  0x14   : > { %s1207_s4 = sshll.u32 (%p78_p3), %s180_s30, 2 }
  0x15   : > { %s1584_s7 = scalar_lea.vmem %s1836_s1, %s1207_s4 }
  0x16   : > { %v337_v0 = vld [vmem:[%s1584_s7] sm:$0xff]  ;;  %v339_v1 = vld [vmem:[%s1584_s7 + $0x10] sm:$0xff] }
  0x17   : > { %v341_v2 = vld [vmem:[%s1584_s7 + $0x20] sm:$0xff]  ;;  %338 = vst [vmem:[%s1589_s8] sm:$0xff] %v337_v0  ;;  %340 = vst [vmem:[%s1589_s8 + $0x8] sm:$0xff] %v339_v1  ;;  %v343_v3 = vld [vmem:[%s1584_s7 + $0x30] sm:$0xff] }
  0x18   : > { %342 = vst [vmem:[%s1589_s8 + $0x10] sm:$0xff] %v341_v2  ;;  %v345_v4 = vld [vmem:[%s1584_s7 + $0x40] sm:$0xff]  ;;  %v347_v5 = vld [vmem:[%s1584_s7 + $0x50] sm:$0xff]  ;;  %344 = vst [vmem:[%s1589_s8 + $0x18] sm:$0xff] %v343_v3 }
  0x19   : > { %346 = vst [vmem:[%s1589_s8 + $0x20] sm:$0xff] %v345_v4  ;;  %348 = vst [vmem:[%s1589_s8 + $0x28] sm:$0xff] %v347_v5  ;;  %v349_v6 = vld [vmem:[%s1584_s7 + $0x60] sm:$0xff]  ;;  %v351_v7 = vld [vmem:[%s1584_s7 + $0x70] sm:$0xff] }
  0x1a   : > { %v353_v8 = vld [vmem:[%s1584_s7 + $0x80] sm:$0xff]  ;;  %350 = vst [vmem:[%s1589_s8 + $0x30] sm:$0xff] %v349_v6  ;;  %352 = vst [vmem:[%s1589_s8 + $0x38] sm:$0xff] %v351_v7  ;;  %v355_v9 = vld [vmem:[%s1584_s7 + $0x90] sm:$0xff] }
  0x1b   : > { %354 = vst [vmem:[%s1589_s8 + $0x40] sm:$0xff] %v353_v8  ;;  %v357_v10 = vld [vmem:[%s1584_s7 + $0xa0] sm:$0xff]  ;;  %v359_v11 = vld [vmem:[%s1584_s7 + $0xb0] sm:$0xff]  ;;  %356 = vst [vmem:[%s1589_s8 + $0x48] sm:$0xff] %v355_v9 }
  0x1c   : > { %358 = vst [vmem:[%s1589_s8 + $0x50] sm:$0xff] %v357_v10  ;;  %360 = vst [vmem:[%s1589_s8 + $0x58] sm:$0xff] %v359_v11  ;;  %v361_v12 = vld [vmem:[%s1584_s7 + $0xc0] sm:$0xff]  ;;  %v363_v13 = vld [vmem:[%s1584_s7 + $0xd0] sm:$0xff] }
  0x1d   : > { %v365_v14 = vld [vmem:[%s1584_s7 + $0xe0] sm:$0xff]  ;;  %362 = vst [vmem:[%s1589_s8 + $0x60] sm:$0xff] %v361_v12  ;;  %364 = vst [vmem:[%s1589_s8 + $0x68] sm:$0xff] %v363_v13  ;;  %v367_v15 = vld [vmem:[%s1584_s7 + $0xf0] sm:$0xff] }
  0x1e   : > { %366 = vst [vmem:[%s1589_s8 + $0x70] sm:$0xff] %v365_v14  ;;  %v369_v16 = vld [vmem:[%s1584_s7 + $0x100] sm:$0xff]  ;;  %v371_v17 = vld [vmem:[%s1584_s7 + $0x110] sm:$0xff]  ;;  %368 = vst [vmem:[%s1589_s8 + $0x78] sm:$0xff] %v367_v15 }
  0x1f   : > { %370 = vst [vmem:[%s1589_s8 + $0x80] sm:$0xff] %v369_v16  ;;  %372 = vst [vmem:[%s1589_s8 + $0x88] sm:$0xff] %v371_v17  ;;  %v373_v18 = vld [vmem:[%s1584_s7 + $0x120] sm:$0xff]  ;;  %v375_v19 = vld [vmem:[%s1584_s7 + $0x130] sm:$0xff] }
  0x20   : > { %v377_v20 = vld [vmem:[%s1584_s7 + $0x140] sm:$0xff]  ;;  %374 = vst [vmem:[%s1589_s8 + $0x90] sm:$0xff] %v373_v18  ;;  %376 = vst [vmem:[%s1589_s8 + $0x98] sm:$0xff] %v375_v19  ;;  %v379_v21 = vld [vmem:[%s1584_s7 + $0x150] sm:$0xff] }
  0x21   : > { %378 = vst [vmem:[%s1589_s8 + $0xa0] sm:$0xff] %v377_v20  ;;  %v381_v22 = vld [vmem:[%s1584_s7 + $0x160] sm:$0xff]  ;;  %v383_v23 = vld [vmem:[%s1584_s7 + $0x170] sm:$0xff]  ;;  %380 = vst [vmem:[%s1589_s8 + $0xa8] sm:$0xff] %v379_v21 }
  0x22   : > { %382 = vst [vmem:[%s1589_s8 + $0xb0] sm:$0xff] %v381_v22  ;;  %384 = vst [vmem:[%s1589_s8 + $0xb8] sm:$0xff] %v383_v23  ;;  %v385_v24 = vld [vmem:[%s1584_s7 + $0x180] sm:$0xff]  ;;  %v387_v25 = vld [vmem:[%s1584_s7 + $0x190] sm:$0xff] }
  0x23   : > { %v389_v26 = vld [vmem:[%s1584_s7 + $0x1a0] sm:$0xff]  ;;  %386 = vst [vmem:[%s1589_s8 + $0xc0] sm:$0xff] %v385_v24  ;;  %388 = vst [vmem:[%s1589_s8 + $0xc8] sm:$0xff] %v387_v25  ;;  %v391_v27 = vld [vmem:[%s1584_s7 + $0x1b0] sm:$0xff] }
  0x24   : > { %390 = vst [vmem:[%s1589_s8 + $0xd0] sm:$0xff] %v389_v26  ;;  %v393_v28 = vld [vmem:[%s1584_s7 + $0x1c0] sm:$0xff]  ;;  %v395_v29 = vld [vmem:[%s1584_s7 + $0x1d0] sm:$0xff]  ;;  %392 = vst [vmem:[%s1589_s8 + $0xd8] sm:$0xff] %v391_v27 }
  0x25   : > { %394 = vst [vmem:[%s1589_s8 + $0xe0] sm:$0xff] %v393_v28  ;;  %396 = vst [vmem:[%s1589_s8 + $0xe8] sm:$0xff] %v395_v29  ;;  %v397_v30 = vld [vmem:[%s1584_s7 + $0x1e0] sm:$0xff]  ;;  %v399_v31 = vld [vmem:[%s1584_s7 + $0x1f0] sm:$0xff] }
  0x26   : > { %v401_v32 = vld [vmem:[%s1584_s7 + $0x200] sm:$0xff]  ;;  %398 = vst [vmem:[%s1589_s8 + $0xf0] sm:$0xff] %v397_v30  ;;  %400 = vst [vmem:[%s1589_s8 + $0xf8] sm:$0xff] %v399_v31  ;;  %v403_v33 = vld [vmem:[%s1584_s7 + $0x210] sm:$0xff] }
  0x27   : > { %402 = vst [vmem:[%s1589_s8 + $0x100] sm:$0xff] %v401_v32  ;;  %v405_v34 = vld [vmem:[%s1584_s7 + $0x220] sm:$0xff]  ;;  %v407_v35 = vld [vmem:[%s1584_s7 + $0x230] sm:$0xff]  ;;  %404 = vst [vmem:[%s1589_s8 + $0x108] sm:$0xff] %v403_v33 }
  0x28   : > { %406 = vst [vmem:[%s1589_s8 + $0x110] sm:$0xff] %v405_v34  ;;  %408 = vst [vmem:[%s1589_s8 + $0x118] sm:$0xff] %v407_v35  ;;  %v409_v36 = vld [vmem:[%s1584_s7 + $0x240] sm:$0xff]  ;;  %v411_v37 = vld [vmem:[%s1584_s7 + $0x250] sm:$0xff] }
  0x29   : > { %v413_v38 = vld [vmem:[%s1584_s7 + $0x260] sm:$0xff]  ;;  %410 = vst [vmem:[%s1589_s8 + $0x120] sm:$0xff] %v409_v36  ;;  %412 = vst [vmem:[%s1589_s8 + $0x128] sm:$0xff] %v411_v37  ;;  %v415_v39 = vld [vmem:[%s1584_s7 + $0x270] sm:$0xff] }
  0x2a   : > { %414 = vst [vmem:[%s1589_s8 + $0x130] sm:$0xff] %v413_v38  ;;  %v417_v40 = vld [vmem:[%s1584_s7 + $0x280] sm:$0xff]  ;;  %v419_v41 = vld [vmem:[%s1584_s7 + $0x290] sm:$0xff]  ;;  %416 = vst [vmem:[%s1589_s8 + $0x138] sm:$0xff] %v415_v39 }
  0x2b   : > { %418 = vst [vmem:[%s1589_s8 + $0x140] sm:$0xff] %v417_v40  ;;  %420 = vst [vmem:[%s1589_s8 + $0x148] sm:$0xff] %v419_v41  ;;  %v421_v42 = vld [vmem:[%s1584_s7 + $0x2a0] sm:$0xff]  ;;  %v423_v43 = vld [vmem:[%s1584_s7 + $0x2b0] sm:$0xff] }
  0x2c   : > { %v425_v44 = vld [vmem:[%s1584_s7 + $0x2c0] sm:$0xff]  ;;  %422 = vst [vmem:[%s1589_s8 + $0x150] sm:$0xff] %v421_v42  ;;  %424 = vst [vmem:[%s1589_s8 + $0x158] sm:$0xff] %v423_v43  ;;  %v427_v45 = vld [vmem:[%s1584_s7 + $0x2d0] sm:$0xff] }
  0x2d   : > { %426 = vst [vmem:[%s1589_s8 + $0x160] sm:$0xff] %v425_v44  ;;  %v429_v46 = vld [vmem:[%s1584_s7 + $0x2e0] sm:$0xff]  ;;  %v431_v47 = vld [vmem:[%s1584_s7 + $0x2f0] sm:$0xff]  ;;  %428 = vst [vmem:[%s1589_s8 + $0x168] sm:$0xff] %v427_v45 }
  0x2e   : > { %430 = vst [vmem:[%s1589_s8 + $0x170] sm:$0xff] %v429_v46  ;;  %432 = vst [vmem:[%s1589_s8 + $0x178] sm:$0xff] %v431_v47  ;;  %v433_v48 = vld [vmem:[%s1584_s7 + $0x300] sm:$0xff]  ;;  %v435_v49 = vld [vmem:[%s1584_s7 + $0x310] sm:$0xff] }
  0x2f   : > { %v437_v50 = vld [vmem:[%s1584_s7 + $0x320] sm:$0xff]  ;;  %434 = vst [vmem:[%s1589_s8 + $0x180] sm:$0xff] %v433_v48  ;;  %436 = vst [vmem:[%s1589_s8 + $0x188] sm:$0xff] %v435_v49  ;;  %v439_v51 = vld [vmem:[%s1584_s7 + $0x330] sm:$0xff] }
  0x30   : > { %438 = vst [vmem:[%s1589_s8 + $0x190] sm:$0xff] %v437_v50  ;;  %v441_v52 = vld [vmem:[%s1584_s7 + $0x340] sm:$0xff]  ;;  %v443_v53 = vld [vmem:[%s1584_s7 + $0x350] sm:$0xff]  ;;  %440 = vst [vmem:[%s1589_s8 + $0x198] sm:$0xff] %v439_v51 }
  0x31   : > { %442 = vst [vmem:[%s1589_s8 + $0x1a0] sm:$0xff] %v441_v52  ;;  %444 = vst [vmem:[%s1589_s8 + $0x1a8] sm:$0xff] %v443_v53  ;;  %v445_v54 = vld [vmem:[%s1584_s7 + $0x360] sm:$0xff]  ;;  %v447_v55 = vld [vmem:[%s1584_s7 + $0x370] sm:$0xff] }
  0x32   : > { %v449_v56 = vld [vmem:[%s1584_s7 + $0x380] sm:$0xff]  ;;  %446 = vst [vmem:[%s1589_s8 + $0x1b0] sm:$0xff] %v445_v54  ;;  %448 = vst [vmem:[%s1589_s8 + $0x1b8] sm:$0xff] %v447_v55  ;;  %v451_v57 = vld [vmem:[%s1584_s7 + $0x390] sm:$0xff] }
  0x33   : > { %450 = vst [vmem:[%s1589_s8 + $0x1c0] sm:$0xff] %v449_v56  ;;  %v453_v58 = vld [vmem:[%s1584_s7 + $0x3a0] sm:$0xff]  ;;  %v455_v59 = vld [vmem:[%s1584_s7 + $0x3b0] sm:$0xff]  ;;  %452 = vst [vmem:[%s1589_s8 + $0x1c8] sm:$0xff] %v451_v57 }
  0x34   : > { %454 = vst [vmem:[%s1589_s8 + $0x1d0] sm:$0xff] %v453_v58  ;;  %456 = vst [vmem:[%s1589_s8 + $0x1d8] sm:$0xff] %v455_v59  ;;  %v457_v60 = vld [vmem:[%s1584_s7 + $0x3c0] sm:$0xff]  ;;  %v459_v61 = vld [vmem:[%s1584_s7 + $0x3d0] sm:$0xff] }
  0x35   : > { %v461_v62 = vld [vmem:[%s1584_s7 + $0x3e0] sm:$0xff]  ;;  %458 = vst [vmem:[%s1589_s8 + $0x1e0] sm:$0xff] %v457_v60  ;;  %460 = vst [vmem:[%s1589_s8 + $0x1e8] sm:$0xff] %v459_v61  ;;  %v463_v63 = vld [vmem:[%s1584_s7 + $0x3f0] sm:$0xff] }
  0x36   : > { %462 = vst [vmem:[%s1589_s8 + $0x1f0] sm:$0xff] %v461_v62  ;;  %464 = vst [vmem:[%s1589_s8 + $0x1f8] sm:$0xff] %v463_v63 }
  0x37 PF: > { %p1208_p7 = scmp.ge.s32.totalorder %s1501_s18, 1  ;;  %p477_p8 = scmp.lt.s32.totalorder %s1501_s18, 19 }
  0x39   : > { %p478_p9 = pnand %p1208_p7, %p477_p8 }
  0x3a   : > { %s484_s9 = sand.u32 (!%p478_p9), 1, %s1477_s12   ;;  %s1210_s10 = sshll.u32 (!%p478_p9), %s1485_s14, 2 }
  0x3b   : > { %481 = sbr.rel (%p478_p9) target bundleno = 355 (0x163), region = 66  ;;  %s1209_s11 = sshll.u32 (!%p478_p9), %s484_s9, 9 }
  0x3c   : > { %p527_p10 = scmp.lt.s32.totalorder (!%p478_p9), %s1210_s10, 35  ;;  %s1212_s21 = sshll.u32 (!%p478_p9), %s1489_s15, 1 }
  0x3d   : > { %p537_p11 = scmp.lt.s32.totalorder (!%p478_p9), %s1212_s21, 3  ;;  %s1738_s5 = scalar_lea.vmem (!%p478_p9), [#allocation3], %s1209_s11 }
  0x3e   : > { %p1215_p12 = scmp.ne.s32.totalorder (!%p478_p9), %s1485_s14, 0 }
  0x40   : > { %s1852_s10 = smov (!%p527_p10, %s1210_s10), 35  ;;  %s1854_s21 = smov (!%p537_p11, %s1212_s21), 3 }
  0x41   : > { %s1211_s22 = sshll.u32 %s1852_s10, 2  ;;  %s539_s12 = scalar_lea.vmem %s1837_s2, %s1854_s21 }
  0x42   : > { %s1724_s26 = scalar_lea.vmem %s1835_s0, %s1211_s22  ;;  %s1214_s29 = sshll.u32 %s1854_s21, 2 }
  0x43   : > { %s1736_s15 = scalar_lea.vmem %s1838_s3, %s1214_s29  ;;  %554 = sbr.rel (%p1215_p12) target bundleno = 74 (0x4a), region = 74 }
  0x48   : > { %v1503_v0 = vmov 0.0  }
  0x49   : > { %555 = vst [vmem:[#allocation2] sm:$0xff] %v1503_v0  ;;  %556 = vst [vmem:[#allocation2 + $0x8] sm:$0xff] %v1503_v0 }
  0x4a PF: > { %v1347_v1 = vld [vmem:[%s1738_s5 + $0x74] ss:$8 sps:$4 sm:$0xff]   ;;  %v1351_v3 = vld [vmem:[%s1738_s5 + $0x70] ss:$8 sps:$4 sm:$0xff]   ;;  %v1353_v5 = vld [vmem:[%s1738_s5 + $0x64] ss:$8 sps:$4 sm:$0xff]  }
  0x4b   : > { %v1349_v2 = vld [vmem:[%s1738_s5 + $0x174] ss:$8 sps:$4 sm:$0xff]   ;;  %959 = vmatprep.subr.bf16.mxu0 %v1347_v1  ;;  %v1352_v4 = vld [vmem:[%s1738_s5 + $0x170] ss:$8 sps:$4 sm:$0xff]   ;;  %v1355_v6 = vld [vmem:[%s1738_s5 + $0x164] ss:$8 sps:$4 sm:$0xff]  }
  0x4c   : > { %1000 = vmatprep.subr.bf16.mxu1 %v1349_v2  ;;  %960 = vmatpush1.bf16.msra.mxu0 %v1351_v3  ;;  %v1357_v7 = vld [vmem:[%s1738_s5 + $0x60] ss:$8 sps:$4 sm:$0xff]   ;;  %v1359_v9 = vld [vmem:[%s1738_s5 + $0x54] ss:$8 sps:$4 sm:$0xff]   ;;  %v1363_v11 = vld [vmem:[%s1738_s5 + $0x50] ss:$8 sps:$4 sm:$0xff]  }
  0x4d   : > { %1001 = vmatpush1.bf16.msra.mxu1 %v1352_v4  ;;  %961 = vmatprep.subr.bf16.mxu0 %v1353_v5  ;;  %v1358_v8 = vld [vmem:[%s1738_s5 + $0x160] ss:$8 sps:$4 sm:$0xff]   ;;  %v1361_v10 = vld [vmem:[%s1738_s5 + $0x154] ss:$8 sps:$4 sm:$0xff]   ;;  %v1364_v12 = vld [vmem:[%s1738_s5 + $0x150] ss:$8 sps:$4 sm:$0xff]  }
  0x4e   : > { %1002 = vmatprep.subr.bf16.mxu1 %v1355_v6  ;;  %v1365_v13 = vld [vmem:[%s1738_s5 + $0x44] ss:$8 sps:$4 sm:$0xff]   ;;  %v1369_v15 = vld [vmem:[%s1738_s5 + $0x40] ss:$8 sps:$4 sm:$0xff]   ;;  %v1371_v17 = vld [vmem:[%s1738_s5 + $0x34] ss:$8 sps:$4 sm:$0xff]  }
  0x4f   : > { %v1367_v14 = vld [vmem:[%s1738_s5 + $0x144] ss:$8 sps:$4 sm:$0xff]   ;;  %v1370_v16 = vld [vmem:[%s1738_s5 + $0x140] ss:$8 sps:$4 sm:$0xff]   ;;  %v1373_v18 = vld [vmem:[%s1738_s5 + $0x134] ss:$8 sps:$4 sm:$0xff]  }
  0x50   : > { %962 = vmatpush1.bf16.msra.mxu0 %v1357_v7  ;;  %v1375_v19 = vld [vmem:[%s1738_s5 + $0x30] ss:$8 sps:$4 sm:$0xff]   ;;  %v1377_v21 = vld [vmem:[%s1738_s5 + $0x24] ss:$8 sps:$4 sm:$0xff]   ;;  %v1381_v23 = vld [vmem:[%s1738_s5 + $0x20] ss:$8 sps:$4 sm:$0xff]  }
  0x51   : > { %1003 = vmatpush1.bf16.msra.mxu1 %v1358_v8  ;;  %963 = vmatprep.subr.bf16.mxu0 %v1359_v9  ;;  %v1376_v20 = vld [vmem:[%s1738_s5 + $0x130] ss:$8 sps:$4 sm:$0xff]   ;;  %v1379_v22 = vld [vmem:[%s1738_s5 + $0x124] ss:$8 sps:$4 sm:$0xff]   ;;  %v1382_v24 = vld [vmem:[%s1738_s5 + $0x120] ss:$8 sps:$4 sm:$0xff]  }
  0x52   : > { %1004 = vmatprep.subr.bf16.mxu1 %v1361_v10  ;;  %v1383_v25 = vld [vmem:[%s1738_s5 + $0x14] ss:$8 sps:$4 sm:$0xff]   ;;  %v1387_v27 = vld [vmem:[%s1738_s5 + $0x10] ss:$8 sps:$4 sm:$0xff]   ;;  %v1389_v29 = vld [vmem:[%s1738_s5 + $0x4] ss:$8 sps:$4 sm:$0xff]  }
  0x53   : > { %v1385_v26 = vld [vmem:[%s1738_s5 + $0x114] ss:$8 sps:$4 sm:$0xff]   ;;  %v1388_v28 = vld [vmem:[%s1738_s5 + $0x110] ss:$8 sps:$4 sm:$0xff]   ;;  %v1391_v30 = vld [vmem:[%s1738_s5 + $0x104] ss:$8 sps:$4 sm:$0xff]  }
  0x54   : > { %964 = vmatpush1.bf16.msra.mxu0 %v1363_v11  ;;  %v1393_v31 = vld [vmem:[%s1738_s5] ss:$8 sps:$4 sm:$0xff]   ;;  %v1395_v33 = vld [vmem:[%s1738_s5 + $0xf4] ss:$8 sps:$4 sm:$0xff]   ;;  %v1399_v35 = vld [vmem:[%s1738_s5 + $0xf0] ss:$8 sps:$4 sm:$0xff]  }
  0x55   : > { %1005 = vmatpush1.bf16.msra.mxu1 %v1364_v12  ;;  %965 = vmatprep.subr.bf16.mxu0 %v1365_v13  ;;  %v1394_v32 = vld [vmem:[%s1738_s5 + $0x100] ss:$8 sps:$4 sm:$0xff]   ;;  %v1397_v34 = vld [vmem:[%s1738_s5 + $0x1f4] ss:$8 sps:$4 sm:$0xff]   ;;  %v1400_v36 = vld [vmem:[%s1738_s5 + $0x1f0] ss:$8 sps:$4 sm:$0xff]  }
  0x56   : > { %1006 = vmatprep.subr.bf16.mxu1 %v1367_v14  ;;  %v1401_v37 = vld [vmem:[%s1738_s5 + $0xe4] ss:$8 sps:$4 sm:$0xff]   ;;  %v1405_v39 = vld [vmem:[%s1738_s5 + $0xe0] ss:$8 sps:$4 sm:$0xff]   ;;  %v1407_v41 = vld [vmem:[%s1738_s5 + $0xd4] ss:$8 sps:$4 sm:$0xff]  }
  0x57   : > { %v1403_v38 = vld [vmem:[%s1738_s5 + $0x1e4] ss:$8 sps:$4 sm:$0xff]   ;;  %v1406_v40 = vld [vmem:[%s1738_s5 + $0x1e0] ss:$8 sps:$4 sm:$0xff]   ;;  %v1409_v42 = vld [vmem:[%s1738_s5 + $0x1d4] ss:$8 sps:$4 sm:$0xff]  }
  0x58   : > { %966 = vmatpush1.bf16.msra.mxu0 %v1369_v15  ;;  %v1411_v43 = vld [vmem:[%s1738_s5 + $0xd0] ss:$8 sps:$4 sm:$0xff]   ;;  %v1413_v45 = vld [vmem:[%s1738_s5 + $0xc4] ss:$8 sps:$4 sm:$0xff]   ;;  %v1417_v50 = vld [vmem:[%s1738_s5 + $0xc0] ss:$8 sps:$4 sm:$0xff]  }
  0x59   : > { %1007 = vmatpush1.bf16.msra.mxu1 %v1370_v16  ;;  %967 = vmatprep.subr.bf16.mxu0 %v1371_v17  ;;  %v1412_v44 = vld [vmem:[%s1738_s5 + $0x1d0] ss:$8 sps:$4 sm:$0xff]   ;;  %v1415_v46 = vld [vmem:[%s1738_s5 + $0x1c4] ss:$8 sps:$4 sm:$0xff]   ;;  %v1418_v51 = vld [vmem:[%s1738_s5 + $0x1c0] ss:$8 sps:$4 sm:$0xff]  }
  0x5a   : > { %1008 = vmatprep.subr.bf16.mxu1 %v1373_v18  ;;  %v559_v47 = vld [vmem:[%s1724_s26] sm:$0xff]  ;;  %v560_v49 = vld [vmem:[%s1724_s26 + $0x8] sm:$0xff]  ;;  %v1425_v57 = vld [vmem:[%s1738_s5 + $0xa4] ss:$8 sps:$4 sm:$0xff]   ;;  %p1284_p13 = scmp.ne.s32.totalorder %s1485_s14, 8 }
  0x5b   : > { %v1217_v48 = vcombine.high %v559_v47, %v559_v47  ;;  %v1219_v52 = vcombine.high %v560_v49, %v560_v49  ;;  %v1419_v53 = vld [vmem:[%s1738_s5 + $0xb4] ss:$8 sps:$4 sm:$0xff]   ;;  %v1423_v55 = vld [vmem:[%s1738_s5 + $0xb0] ss:$8 sps:$4 sm:$0xff]   ;;  %v1427_v58 = vld [vmem:[%s1738_s5 + $0x1a4] ss:$8 sps:$4 sm:$0xff]   ;;  %v1216_v5 = vcombine.low %v559_v47, %v559_v47  ;;  %v1218_v6 = vcombine.low %v560_v49, %v560_v49 }
  0x5c   : > { %968 = vmatpush1.bf16.msra.mxu0 %v1375_v19  ;;  %v1421_v54 = vld [vmem:[%s1738_s5 + $0x1b4] ss:$8 sps:$4 sm:$0xff]   ;;  %v1424_v56 = vld [vmem:[%s1738_s5 + $0x1b0] ss:$8 sps:$4 sm:$0xff]   ;;  %v1429_v59 = vld [vmem:[%s1738_s5 + $0xa0] ss:$8 sps:$4 sm:$0xff]  }
  0x5d   : > { %1009 = vmatpush1.bf16.msra.mxu1 %v1376_v20  ;;  %969 = vmatprep.subr.bf16.mxu0 %v1377_v21  ;;  %v1430_v60 = vld [vmem:[%s1738_s5 + $0x1a0] ss:$8 sps:$4 sm:$0xff]   ;;  %v1431_v61 = vld [vmem:[%s1738_s5 + $0x94] ss:$8 sps:$4 sm:$0xff]   ;;  %v1435_v63 = vld [vmem:[%s1738_s5 + $0x90] ss:$8 sps:$4 sm:$0xff]  }
  0x5e   : > { %1010 = vmatprep.subr.bf16.mxu1 %v1379_v22  ;;  %991 = vmatprep.mubr.bf16.mxu0 %v1217_v48  ;;  %v1433_v62 = vld [vmem:[%s1738_s5 + $0x194] ss:$8 sps:$4 sm:$0xff]   ;;  %v1436_v0 = vld [vmem:[%s1738_s5 + $0x190] ss:$8 sps:$4 sm:$0xff]   ;;  %v1437_v1 = vld [vmem:[%s1738_s5 + $0x84] ss:$8 sps:$4 sm:$0xff]  }
  0x5f   : > { %1032 = vmatprep.mubr.bf16.mxu1 %v1219_v52  ;;  %v1439_v2 = vld [vmem:[%s1738_s5 + $0x184] ss:$8 sps:$4 sm:$0xff]   ;;  %v1441_v3 = vld [vmem:[%s1738_s5 + $0x80] ss:$8 sps:$4 sm:$0xff]   ;;  %v557_v8 = vld [vmem:[#allocation2] sm:$0xff] }
  0x60   : > { %970 = vmatpush1.bf16.msra.mxu0 %v1381_v23  ;;  %v1442_v4 = vld [vmem:[%s1738_s5 + $0x180] ss:$8 sps:$4 sm:$0xff]   ;;  %v558_v12 = vld [vmem:[#allocation2 + $0x8] sm:$0xff] }
  0x61   : > { %1011 = vmatpush1.bf16.msra.mxu1 %v1382_v24  ;;  %971 = vmatprep.subr.bf16.mxu0 %v1383_v25 }
  0x62   : > { %1012 = vmatprep.subr.bf16.mxu1 %v1385_v26 }
  0x64   : > { %972 = vmatpush1.bf16.msra.mxu0 %v1387_v27 }
  0x65   : > { %1013 = vmatpush1.bf16.msra.mxu1 %v1388_v28  ;;  %973 = vmatprep.subr.bf16.mxu0 %v1389_v29 }
  0x66   : > { %1014 = vmatprep.subr.bf16.mxu1 %v1391_v30 }
  0x68   : > { %974 = vmatpush1.bf16.msra.mxu0 %v1393_v31 }
  0x69   : > { %1015 = vmatpush1.bf16.msra.mxu1 %v1394_v32  ;;  %975 = vmatprep.subr.bf16.mxu0 %v1395_v33 }
  0x6a   : > { %1016 = vmatprep.subr.bf16.mxu1 %v1397_v34 }
  0x6c   : > { %976 = vmatpush2.bf16.msra.mxu0 %v1399_v35 }
  0x6d   : > { %1017 = vmatpush2.bf16.msra.mxu1 %v1400_v36  ;;  %977 = vmatprep.subr.bf16.mxu0 %v1401_v37 }
  0x6e   : > { %1018 = vmatprep.subr.bf16.mxu1 %v1403_v38 }
  0x70   : > { %978 = vmatpush2.bf16.msra.mxu0 %v1405_v39 }
  0x71   : > { %1019 = vmatpush2.bf16.msra.mxu1 %v1406_v40  ;;  %979 = vmatprep.subr.bf16.mxu0 %v1407_v41 }
  0x72   : > { %1020 = vmatprep.subr.bf16.mxu1 %v1409_v42 }
  0x74   : > { %980 = vmatpush2.bf16.msra.mxu0 %v1411_v43 }
  0x75   : > { %1021 = vmatpush2.bf16.msra.mxu1 %v1412_v44  ;;  %981 = vmatprep.subr.bf16.mxu0 %v1413_v45 }
  0x76   : > { %1022 = vmatprep.subr.bf16.mxu1 %v1415_v46 }
  0x78   : > { %982 = vmatpush2.bf16.msra.mxu0 %v1417_v50 }
  0x79   : > { %1023 = vmatpush2.bf16.msra.mxu1 %v1418_v51  ;;  %983 = vmatprep.subr.bf16.mxu0 %v1419_v53 }
  0x7a   : > { %1024 = vmatprep.subr.bf16.mxu1 %v1421_v54 }
  0x7c   : > { %984 = vmatpush2.bf16.msra.mxu0 %v1423_v55 }
  0x7d   : > { %1025 = vmatpush2.bf16.msra.mxu1 %v1424_v56  ;;  %985 = vmatprep.subr.bf16.mxu0 %v1425_v57 }
  0x7e   : > { %1026 = vmatprep.subr.bf16.mxu1 %v1427_v58 }
  0x80   : > { %986 = vmatpush2.bf16.msra.mxu0 %v1429_v59 }
  0x81   : > { %1027 = vmatpush2.bf16.msra.mxu1 %v1430_v60  ;;  %987 = vmatprep.subr.bf16.mxu0 %v1431_v61 }
  0x82   : > { %1028 = vmatprep.subr.bf16.mxu1 %v1433_v62 }
  0x84   : > { %988 = vmatpush2.bf16.msra.mxu0 %v1435_v63 }
  0x85   : > { %1029 = vmatpush2.bf16.msra.mxu1 %v1436_v0  ;;  %989 = vmatprep.subr.bf16.mxu0 %v1437_v1 }
  0x86   : > { %1030 = vmatprep.subr.bf16.mxu1 %v1439_v2 }
  0x88   : > { %990 = vmatpush2.bf16.msra.mxu0 %v1441_v3 }
  0x89   : > { %1031 = vmatpush2.bf16.msra.mxu1 %v1442_v4 }
  0x8b   : > { %992 = vmatmul.mubr.bf16.vlgmr.msra.gmra.mxu0 %v1216_v5 }
  0x8c   : > { %1033 = vmatmul.mubr.bf16.vlgmr.msra.gmra.mxu1 %v1218_v6 }
 0x14b   : > { %v993_v7 = vpop.f32.mrf.mxu0 }
 0x14c   : > { %v1034_v9 = vpop.f32.mrf.mxu1 }
 0x14d   : > { %v1035_v10 = vadd.f32 %v1034_v9, %v993_v7  ;;  %v995_v11 = vpop.f32.mrf.mxu0 }
 0x14e   : > { %v1036_v13 = vpop.f32.mrf.mxu1 }
 0x14f   : > { %v1041_v14 = vadd.f32 %v1035_v10, %v557_v8  ;;  %v1037_v15 = vadd.f32 %v1036_v13, %v995_v11  ;;  %v997_v16 = vpop.f32.mrf.mxu0  ;;  %1048 = sbr.rel (%p1284_p13) target bundleno = 355 (0x163), region = 78 }
 0x150   : > { %v1038_v17 = vpop.f32.mrf.mxu1 }
 0x151   : > { %1043 = vst [vmem:[#allocation2] sm:$0xff] %v1041_v14  ;;  %v1042_v18 = vadd.f32 %v1037_v15, %v558_v12  ;;  %v998_v19 = vpop.f32.mrf.mxu0 }
 0x152   : > { %v1039_v20 = vpop.f32.mrf.mxu1 }
 0x153   : > { %1044 = vst [vmem:[#allocation2 + $0x8] sm:$0xff] %v1042_v18 }
 0x154   : > { %v1053_v21 = vlaneseq  ;;  %v1051_v23 = vld [vmem:[%s539_s12] sm:$0x3] }
 0x156   : > { %v1054_v22 = vshrl.u32 %v1053_v21, 7 }
 0x158   : > { %v1055_v24 = vsub.s32 0, %v1054_v22  ;;  %v1059_v25 = vsub.s32 1, %v1054_v22  ;;  %v1049_v26 = vld [vmem:[#allocation2] sm:$0xff] }
 0x15a   : > { %v1050_v27 = vld [vmem:[#allocation2 + $0x8] sm:$0xff]  ;;  %v1056_v28 = vrot.slane %v1051_v23, %v1055_v24  ;;  %v1060_v29 = vrot.slane %v1051_v23, %v1059_v25 }
 0x15c   : > { %v1063_v30 = vadd.f32 %v1056_v28, %v1049_v26  ;;  %v1064_v31 = vadd.f32 %v1060_v29, %v1050_v27 }
 0x15e   : > { %v1065_v32 = vmax.f32 %v1063_v30, 0.0  ;;  %v1066_v33 = vmax.f32 %v1064_v31, 0.0 }
 0x160   : > { %v1289_v34 = vpack.c.bf16 %v1066_v33, %v1065_v32 }
 0x162   : > { %1075 = vst [vmem:[%s1736_s15] sm:$0xff] %v1289_v34 }
 0x163 PF: > { %s13_s18 = sadd.s32 1, %s1501_s18   ;;  %s1839_s12 = smov %s1481_s13 }
 0x164   : > { %p10_p0 = scmp.ge.s32.totalorder %s13_s18, 20   ;;  %s1840_s13 = smov %s1575_s25 }
 0x165   : > { %s1841_s14 = smov %s1493_s16  ;;  %s1842_s15 = smov %s1497_s17 }
 0x166   : > { %s1843_s16 = smov %s1846_s19  ;;  %s1844_s17 = smov %s1850_s20 }
 0x167   :  { %12 = sbr.rel (!%p10_p0) target bundleno = 4 (0x4), region = 119 }

// kernel: morphclr_dual_forward.64
= control target key start
LH: loop header
LB: loop body
LE: loop exit
PB: predicated region body
PF: predicated region fallthrough
CT: control target
= control target key end

     0   :  { %vm21_vm0 = vcmask 1041409   ;;  %vm23_vm1 = vcmask 1043459   ;;  %vm25_vm2 = vcmask 1045509   ;;  %vm27_vm3 = vcmask 1047559   ;;  %s55_s0 = inlined_call_operand.vmem [shape: bf16[2,1,512], index: 0, kind: input, shape index: {}]   ;;  %s56_s1 = inlined_call_operand.vmem [shape: f32[2,512], index: 1, kind: output, shape index: {}]  }
   0x1   :  { %v36_v0 = vld [vmem:[%s55_s0] sm:$0xff]  }
   0x2   :  { %v37_v1 = vunpack.c.l.bf16 %v36_v0  ;;  %v38_v2 = vunpack.c.h.bf16 %v36_v0 }
   0x4   :  { %v20_v3 = vrot.slane %v38_v2, 7 }
   0x6   :  { %v22_v4 = vsel %vm21_vm0, %v20_v3, %v37_v1 }
   0x7   :  { %v24_v5 = vsel %vm23_vm1, %v20_v3, %v22_v4 }
   0x8   :  { %v26_v6 = vsel %vm25_vm2, %v20_v3, %v24_v5 }
   0x9   :  { %v28_v7 = vsel %vm27_vm3, %v20_v3, %v26_v6 }
   0xa   :  { %30 = vst [vmem:[%s56_s1] sm:$0xff] %v28_v7 }

// kernel: morphclr_dual_forward.86
= control target key start
LH: loop header
LB: loop body
LE: loop exit
PB: predicated region body
PF: predicated region fallthrough
CT: control target
= control target key end

     0   :  { %s1524_s12 = smov 0   ;;  %s1526_s13 = smov 0   ;;  %s1835_s0 = inlined_call_operand.vmem [shape: bf16[8,1024], index: 0, kind: input, shape index: {}]   ;;  %s1836_s1 = inlined_call_operand.vmem [shape: bf16[1024,1024], index: 1, kind: input, shape index: {}]   ;;  %s1837_s2 = inlined_call_operand.vmem [shape: f32[1,1024], index: 2, kind: input, shape index: {}]   ;;  %s1838_s3 = inlined_call_operand.vmem [shape: bf16[8,1024], index: 3, kind: output, shape index: {}]  }
   0x1   :  { %s1528_s14 = smov 0   ;;  %s1530_s15 = smov 0  }
   0x2   :  { %s1532_s16 = smov 0   ;;  %s1534_s17 = smov 0  }
   0x3   :  { %s1536_s18 = smov 0  }
   0x4 LB: > { %s25_s19 = sadd.s32 1, %s1493_s16  ;;  %s28_s20 = sadd.s32 1, %s1497_s17  ;;  %s1501_s18 = sphi %s1536_s18, %s13_s18   ;;  %s1497_s17 = sphi %s1534_s17, %s1844_s17   ;;  %s1493_s16 = sphi %s1532_s16, %s1843_s16   ;;  %s1489_s15 = sphi %s1530_s15, %s1842_s15   ;;  %s1485_s14 = sphi %s1528_s14, %s1841_s14   ;;  %s1481_s13 = sphi %s1526_s13, %s1840_s13   ;;  %s1477_s12 = sphi %s1524_s12, %s1839_s12  }
   0x5   : > { %p26_p0 = scmp.ge.s32.totalorder %s25_s19, 2  ;;  %p76_p1 = scmp.ne.s32.totalorder %s1481_s13, %s1477_s12 }
   0x6   : > { %p77_p2 = scmp.eq.s32.totalorder %s1501_s18, 0  ;;  %s69_s24 = sadd.s32 1, %s1481_s13 }
   0x7   : > { %s1846_s19 = smov (%p26_p0, %s25_s19), 0  ;;  %s1848_s20 = smov (!%p26_p0, %s28_s20), %s1497_s17 }
   0x8   : > { %p78_p3 = por %p77_p2, %p76_p1  ;;  %p30_p4 = scmp.ge.s32.totalorder %s1848_s20, 4 }
   0x9   : > { %s64_s21 = ssub.s32 %s1493_s16, %s1846_s19  ;;  %p1202_p6 = scmp.ge.s32.totalorder %s1501_s18, 8 }
   0xa   : > { %s1850_s20 = smov (%p30_p4, %s1848_s20), 0 }
   0xb   : > { %s65_s22 = ssub.s32 %s1497_s17, %s1850_s20  ;;  %156 = sbr.rel (%p1202_p6) target bundleno = 87 (0x57), region = 16 }
   0xc   : > { %s66_s23 = sor.u32 %s65_s22, %s64_s21 }
   0xd   : > { %p67_p5 = scmp.eq.s32.totalorder %s66_s23, 0 }
   0xf   : > { %s1575_s25 = scalar_select %p67_p5, %s1481_s13, %s69_s24  }
  0x10   : > { %172 = sbr.rel (!%p78_p3) target bundleno = 87 (0x57), region = 24  ;;  %s174_s26 = sand.u32 (%p78_p3), 1, %s1481_s13  }
  0x11   : > { %s1205_s27 = sshll.u32 (%p78_p3), %s1497_s17, 1  ;;  %s1203_s28 = sshll.u32 (%p78_p3), %s174_s26, 9 }
  0x12   : > { %s1288_s29 = sshll.u32 (%p78_p3), %s1493_s16, 9  ;;  %s1589_s8 = scalar_lea.vmem (%p78_p3), [#allocation3], %s1203_s28 }
  0x13   : > { %s180_s30 = sadd.s32 (%p78_p3), %s1288_s29, %s1205_s27 }
  0x14   : > { %s1207_s4 = sshll.u32 (%p78_p3), %s180_s30, 2 }
  0x15   : > { %s1584_s7 = scalar_lea.vmem %s1836_s1, %s1207_s4 }
  0x16   : > { %v337_v0 = vld [vmem:[%s1584_s7] sm:$0xff] }
  0x17   : > { %v339_v1 = vld [vmem:[%s1584_s7 + $0x20] sm:$0xff]  ;;  %338 = vst [vmem:[%s1589_s8] sm:$0xff] %v337_v0 }
  0x18   : > { %v341_v2 = vld [vmem:[%s1584_s7 + $0x40] sm:$0xff]  ;;  %340 = vst [vmem:[%s1589_s8 + $0x8] sm:$0xff] %v339_v1 }
  0x19   : > { %342 = vst [vmem:[%s1589_s8 + $0x10] sm:$0xff] %v341_v2  ;;  %v343_v3 = vld [vmem:[%s1584_s7 + $0x60] sm:$0xff] }
  0x1a   : > { %v345_v4 = vld [vmem:[%s1584_s7 + $0x80] sm:$0xff]  ;;  %344 = vst [vmem:[%s1589_s8 + $0x18] sm:$0xff] %v343_v3 }
  0x1b   : > { %v347_v5 = vld [vmem:[%s1584_s7 + $0xa0] sm:$0xff]  ;;  %346 = vst [vmem:[%s1589_s8 + $0x20] sm:$0xff] %v345_v4 }
  0x1c   : > { %348 = vst [vmem:[%s1589_s8 + $0x28] sm:$0xff] %v347_v5  ;;  %v349_v6 = vld [vmem:[%s1584_s7 + $0xc0] sm:$0xff] }
  0x1d   : > { %v351_v7 = vld [vmem:[%s1584_s7 + $0xe0] sm:$0xff]  ;;  %350 = vst [vmem:[%s1589_s8 + $0x30] sm:$0xff] %v349_v6 }
  0x1e   : > { %v353_v8 = vld [vmem:[%s1584_s7 + $0x100] sm:$0xff]  ;;  %352 = vst [vmem:[%s1589_s8 + $0x38] sm:$0xff] %v351_v7 }
  0x1f   : > { %354 = vst [vmem:[%s1589_s8 + $0x40] sm:$0xff] %v353_v8  ;;  %v355_v9 = vld [vmem:[%s1584_s7 + $0x120] sm:$0xff] }
  0x20   : > { %v357_v10 = vld [vmem:[%s1584_s7 + $0x140] sm:$0xff]  ;;  %356 = vst [vmem:[%s1589_s8 + $0x48] sm:$0xff] %v355_v9 }
  0x21   : > { %v359_v11 = vld [vmem:[%s1584_s7 + $0x160] sm:$0xff]  ;;  %358 = vst [vmem:[%s1589_s8 + $0x50] sm:$0xff] %v357_v10 }
  0x22   : > { %360 = vst [vmem:[%s1589_s8 + $0x58] sm:$0xff] %v359_v11  ;;  %v361_v12 = vld [vmem:[%s1584_s7 + $0x180] sm:$0xff] }
  0x23   : > { %v363_v13 = vld [vmem:[%s1584_s7 + $0x1a0] sm:$0xff]  ;;  %362 = vst [vmem:[%s1589_s8 + $0x60] sm:$0xff] %v361_v12 }
  0x24   : > { %v365_v14 = vld [vmem:[%s1584_s7 + $0x1c0] sm:$0xff]  ;;  %364 = vst [vmem:[%s1589_s8 + $0x68] sm:$0xff] %v363_v13 }
  0x25   : > { %366 = vst [vmem:[%s1589_s8 + $0x70] sm:$0xff] %v365_v14  ;;  %v367_v15 = vld [vmem:[%s1584_s7 + $0x1e0] sm:$0xff] }
  0x26   : > { %v369_v16 = vld [vmem:[%s1584_s7 + $0x200] sm:$0xff]  ;;  %368 = vst [vmem:[%s1589_s8 + $0x78] sm:$0xff] %v367_v15 }
  0x27   : > { %v371_v17 = vld [vmem:[%s1584_s7 + $0x220] sm:$0xff]  ;;  %370 = vst [vmem:[%s1589_s8 + $0x80] sm:$0xff] %v369_v16 }
  0x28   : > { %372 = vst [vmem:[%s1589_s8 + $0x88] sm:$0xff] %v371_v17  ;;  %v373_v18 = vld [vmem:[%s1584_s7 + $0x240] sm:$0xff] }
  0x29   : > { %v375_v19 = vld [vmem:[%s1584_s7 + $0x260] sm:$0xff]  ;;  %374 = vst [vmem:[%s1589_s8 + $0x90] sm:$0xff] %v373_v18 }
  0x2a   : > { %v377_v20 = vld [vmem:[%s1584_s7 + $0x280] sm:$0xff]  ;;  %376 = vst [vmem:[%s1589_s8 + $0x98] sm:$0xff] %v375_v19 }
  0x2b   : > { %378 = vst [vmem:[%s1589_s8 + $0xa0] sm:$0xff] %v377_v20  ;;  %v379_v21 = vld [vmem:[%s1584_s7 + $0x2a0] sm:$0xff] }
  0x2c   : > { %v381_v22 = vld [vmem:[%s1584_s7 + $0x2c0] sm:$0xff]  ;;  %380 = vst [vmem:[%s1589_s8 + $0xa8] sm:$0xff] %v379_v21 }
  0x2d   : > { %v383_v23 = vld [vmem:[%s1584_s7 + $0x2e0] sm:$0xff]  ;;  %382 = vst [vmem:[%s1589_s8 + $0xb0] sm:$0xff] %v381_v22 }
  0x2e   : > { %384 = vst [vmem:[%s1589_s8 + $0xb8] sm:$0xff] %v383_v23  ;;  %v385_v24 = vld [vmem:[%s1584_s7 + $0x300] sm:$0xff] }
  0x2f   : > { %v387_v25 = vld [vmem:[%s1584_s7 + $0x320] sm:$0xff]  ;;  %386 = vst [vmem:[%s1589_s8 + $0xc0] sm:$0xff] %v385_v24 }
  0x30   : > { %v389_v26 = vld [vmem:[%s1584_s7 + $0x340] sm:$0xff]  ;;  %388 = vst [vmem:[%s1589_s8 + $0xc8] sm:$0xff] %v387_v25 }
  0x31   : > { %390 = vst [vmem:[%s1589_s8 + $0xd0] sm:$0xff] %v389_v26  ;;  %v391_v27 = vld [vmem:[%s1584_s7 + $0x360] sm:$0xff] }
  0x32   : > { %v393_v28 = vld [vmem:[%s1584_s7 + $0x380] sm:$0xff]  ;;  %392 = vst [vmem:[%s1589_s8 + $0xd8] sm:$0xff] %v391_v27 }
  0x33   : > { %v395_v29 = vld [vmem:[%s1584_s7 + $0x3a0] sm:$0xff]  ;;  %394 = vst [vmem:[%s1589_s8 + $0xe0] sm:$0xff] %v393_v28 }
  0x34   : > { %396 = vst [vmem:[%s1589_s8 + $0xe8] sm:$0xff] %v395_v29  ;;  %v397_v30 = vld [vmem:[%s1584_s7 + $0x3c0] sm:$0xff] }
  0x35   : > { %v399_v31 = vld [vmem:[%s1584_s7 + $0x3e0] sm:$0xff]  ;;  %398 = vst [vmem:[%s1589_s8 + $0xf0] sm:$0xff] %v397_v30 }
  0x36   : > { %v401_v32 = vld [vmem:[%s1584_s7 + $0x400] sm:$0xff]  ;;  %400 = vst [vmem:[%s1589_s8 + $0xf8] sm:$0xff] %v399_v31 }
  0x37   : > { %402 = vst [vmem:[%s1589_s8 + $0x100] sm:$0xff] %v401_v32  ;;  %v403_v33 = vld [vmem:[%s1584_s7 + $0x420] sm:$0xff] }
  0x38   : > { %v405_v34 = vld [vmem:[%s1584_s7 + $0x440] sm:$0xff]  ;;  %404 = vst [vmem:[%s1589_s8 + $0x108] sm:$0xff] %v403_v33 }
  0x39   : > { %v407_v35 = vld [vmem:[%s1584_s7 + $0x460] sm:$0xff]  ;;  %406 = vst [vmem:[%s1589_s8 + $0x110] sm:$0xff] %v405_v34 }
  0x3a   : > { %408 = vst [vmem:[%s1589_s8 + $0x118] sm:$0xff] %v407_v35  ;;  %v409_v36 = vld [vmem:[%s1584_s7 + $0x480] sm:$0xff] }
  0x3b   : > { %v411_v37 = vld [vmem:[%s1584_s7 + $0x4a0] sm:$0xff]  ;;  %410 = vst [vmem:[%s1589_s8 + $0x120] sm:$0xff] %v409_v36 }
  0x3c   : > { %v413_v38 = vld [vmem:[%s1584_s7 + $0x4c0] sm:$0xff]  ;;  %412 = vst [vmem:[%s1589_s8 + $0x128] sm:$0xff] %v411_v37 }
  0x3d   : > { %414 = vst [vmem:[%s1589_s8 + $0x130] sm:$0xff] %v413_v38  ;;  %v415_v39 = vld [vmem:[%s1584_s7 + $0x4e0] sm:$0xff] }
  0x3e   : > { %v417_v40 = vld [vmem:[%s1584_s7 + $0x500] sm:$0xff]  ;;  %416 = vst [vmem:[%s1589_s8 + $0x138] sm:$0xff] %v415_v39 }
  0x3f   : > { %v419_v41 = vld [vmem:[%s1584_s7 + $0x520] sm:$0xff]  ;;  %418 = vst [vmem:[%s1589_s8 + $0x140] sm:$0xff] %v417_v40 }
  0x40   : > { %420 = vst [vmem:[%s1589_s8 + $0x148] sm:$0xff] %v419_v41  ;;  %v421_v42 = vld [vmem:[%s1584_s7 + $0x540] sm:$0xff] }
  0x41   : > { %v423_v43 = vld [vmem:[%s1584_s7 + $0x560] sm:$0xff]  ;;  %422 = vst [vmem:[%s1589_s8 + $0x150] sm:$0xff] %v421_v42 }
  0x42   : > { %v425_v44 = vld [vmem:[%s1584_s7 + $0x580] sm:$0xff]  ;;  %424 = vst [vmem:[%s1589_s8 + $0x158] sm:$0xff] %v423_v43 }
  0x43   : > { %426 = vst [vmem:[%s1589_s8 + $0x160] sm:$0xff] %v425_v44  ;;  %v427_v45 = vld [vmem:[%s1584_s7 + $0x5a0] sm:$0xff] }
  0x44   : > { %v429_v46 = vld [vmem:[%s1584_s7 + $0x5c0] sm:$0xff]  ;;  %428 = vst [vmem:[%s1589_s8 + $0x168] sm:$0xff] %v427_v45 }
  0x45   : > { %v431_v47 = vld [vmem:[%s1584_s7 + $0x5e0] sm:$0xff]  ;;  %430 = vst [vmem:[%s1589_s8 + $0x170] sm:$0xff] %v429_v46 }
  0x46   : > { %432 = vst [vmem:[%s1589_s8 + $0x178] sm:$0xff] %v431_v47  ;;  %v433_v48 = vld [vmem:[%s1584_s7 + $0x600] sm:$0xff] }
  0x47   : > { %v435_v49 = vld [vmem:[%s1584_s7 + $0x620] sm:$0xff]  ;;  %434 = vst [vmem:[%s1589_s8 + $0x180] sm:$0xff] %v433_v48 }
  0x48   : > { %v437_v50 = vld [vmem:[%s1584_s7 + $0x640] sm:$0xff]  ;;  %436 = vst [vmem:[%s1589_s8 + $0x188] sm:$0xff] %v435_v49 }
  0x49   : > { %438 = vst [vmem:[%s1589_s8 + $0x190] sm:$0xff] %v437_v50  ;;  %v439_v51 = vld [vmem:[%s1584_s7 + $0x660] sm:$0xff] }
  0x4a   : > { %v441_v52 = vld [vmem:[%s1584_s7 + $0x680] sm:$0xff]  ;;  %440 = vst [vmem:[%s1589_s8 + $0x198] sm:$0xff] %v439_v51 }
  0x4b   : > { %v443_v53 = vld [vmem:[%s1584_s7 + $0x6a0] sm:$0xff]  ;;  %442 = vst [vmem:[%s1589_s8 + $0x1a0] sm:$0xff] %v441_v52 }
  0x4c   : > { %444 = vst [vmem:[%s1589_s8 + $0x1a8] sm:$0xff] %v443_v53  ;;  %v445_v54 = vld [vmem:[%s1584_s7 + $0x6c0] sm:$0xff] }
  0x4d   : > { %v447_v55 = vld [vmem:[%s1584_s7 + $0x6e0] sm:$0xff]  ;;  %446 = vst [vmem:[%s1589_s8 + $0x1b0] sm:$0xff] %v445_v54 }
  0x4e   : > { %v449_v56 = vld [vmem:[%s1584_s7 + $0x700] sm:$0xff]  ;;  %448 = vst [vmem:[%s1589_s8 + $0x1b8] sm:$0xff] %v447_v55 }
  0x4f   : > { %450 = vst [vmem:[%s1589_s8 + $0x1c0] sm:$0xff] %v449_v56  ;;  %v451_v57 = vld [vmem:[%s1584_s7 + $0x720] sm:$0xff] }
  0x50   : > { %v453_v58 = vld [vmem:[%s1584_s7 + $0x740] sm:$0xff]  ;;  %452 = vst [vmem:[%s1589_s8 + $0x1c8] sm:$0xff] %v451_v57 }
  0x51   : > { %v455_v59 = vld [vmem:[%s1584_s7 + $0x760] sm:$0xff]  ;;  %454 = vst [vmem:[%s1589_s8 + $0x1d0] sm:$0xff] %v453_v58 }
  0x52   : > { %456 = vst [vmem:[%s1589_s8 + $0x1d8] sm:$0xff] %v455_v59  ;;  %v457_v60 = vld [vmem:[%s1584_s7 + $0x780] sm:$0xff] }
  0x53   : > { %v459_v61 = vld [vmem:[%s1584_s7 + $0x7a0] sm:$0xff]  ;;  %458 = vst [vmem:[%s1589_s8 + $0x1e0] sm:$0xff] %v457_v60 }
  0x54   : > { %v461_v62 = vld [vmem:[%s1584_s7 + $0x7c0] sm:$0xff]  ;;  %460 = vst [vmem:[%s1589_s8 + $0x1e8] sm:$0xff] %v459_v61 }
  0x55   : > { %462 = vst [vmem:[%s1589_s8 + $0x1f0] sm:$0xff] %v461_v62  ;;  %v463_v63 = vld [vmem:[%s1584_s7 + $0x7e0] sm:$0xff] }
  0x56   : > { %464 = vst [vmem:[%s1589_s8 + $0x1f8] sm:$0xff] %v463_v63 }
  0x57 PF: > { %p1208_p7 = scmp.ge.s32.totalorder %s1501_s18, 1  ;;  %p477_p8 = scmp.lt.s32.totalorder %s1501_s18, 9 }
  0x59   : > { %p478_p9 = pnand %p1208_p7, %p477_p8 }
  0x5a   : > { %s484_s9 = sand.u32 (!%p478_p9), 1, %s1477_s12   ;;  %s1210_s10 = sshll.u32 (!%p478_p9), %s1485_s14, 2 }
  0x5b   : > { %481 = sbr.rel (%p478_p9) target bundleno = 387 (0x183), region = 66  ;;  %s1209_s11 = sshll.u32 (!%p478_p9), %s484_s9, 9 }
  0x5c   : > { %p527_p10 = scmp.lt.s32.totalorder (!%p478_p9), %s1210_s10, 7  ;;  %s1212_s21 = sshll.u32 (!%p478_p9), %s1489_s15, 1 }
  0x5d   : > { %p537_p11 = scmp.lt.s32.totalorder (!%p478_p9), %s1212_s21, 7  ;;  %s1738_s5 = scalar_lea.vmem (!%p478_p9), [#allocation3], %s1209_s11 }
  0x5e   : > { %p1215_p12 = scmp.ne.s32.totalorder (!%p478_p9), %s1485_s14, 0 }
  0x60   : > { %s1852_s10 = smov (!%p527_p10, %s1210_s10), 7  ;;  %s1854_s21 = smov (!%p537_p11, %s1212_s21), 7 }
  0x61   : > { %s1211_s22 = sshll.u32 %s1852_s10, 2  ;;  %s539_s12 = scalar_lea.vmem %s1837_s2, %s1854_s21 }
  0x62   : > { %s1724_s26 = scalar_lea.vmem %s1835_s0, %s1211_s22  ;;  %s1214_s29 = sshll.u32 %s1854_s21, 2 }
  0x63   : > { %s1736_s15 = scalar_lea.vmem %s1838_s3, %s1214_s29  ;;  %554 = sbr.rel (%p1215_p12) target bundleno = 106 (0x6a), region = 74 }
  0x68   : > { %v1503_v0 = vmov 0.0  }
  0x69   : > { %555 = vst [vmem:[#allocation2] sm:$0xff] %v1503_v0  ;;  %556 = vst [vmem:[#allocation2 + $0x8] sm:$0xff] %v1503_v0 }
  0x6a PF: > { %v1347_v1 = vld [vmem:[%s1738_s5 + $0x74] ss:$8 sps:$4 sm:$0xff]   ;;  %v1351_v3 = vld [vmem:[%s1738_s5 + $0x70] ss:$8 sps:$4 sm:$0xff]   ;;  %v1353_v5 = vld [vmem:[%s1738_s5 + $0x64] ss:$8 sps:$4 sm:$0xff]  }
  0x6b   : > { %v1349_v2 = vld [vmem:[%s1738_s5 + $0x174] ss:$8 sps:$4 sm:$0xff]   ;;  %959 = vmatprep.subr.bf16.mxu0 %v1347_v1  ;;  %v1352_v4 = vld [vmem:[%s1738_s5 + $0x170] ss:$8 sps:$4 sm:$0xff]   ;;  %v1355_v6 = vld [vmem:[%s1738_s5 + $0x164] ss:$8 sps:$4 sm:$0xff]  }
  0x6c   : > { %1000 = vmatprep.subr.bf16.mxu1 %v1349_v2  ;;  %960 = vmatpush1.bf16.msra.mxu0 %v1351_v3  ;;  %v1357_v7 = vld [vmem:[%s1738_s5 + $0x60] ss:$8 sps:$4 sm:$0xff]   ;;  %v1359_v9 = vld [vmem:[%s1738_s5 + $0x54] ss:$8 sps:$4 sm:$0xff]   ;;  %v1363_v11 = vld [vmem:[%s1738_s5 + $0x50] ss:$8 sps:$4 sm:$0xff]  }
  0x6d   : > { %1001 = vmatpush1.bf16.msra.mxu1 %v1352_v4  ;;  %961 = vmatprep.subr.bf16.mxu0 %v1353_v5  ;;  %v1358_v8 = vld [vmem:[%s1738_s5 + $0x160] ss:$8 sps:$4 sm:$0xff]   ;;  %v1361_v10 = vld [vmem:[%s1738_s5 + $0x154] ss:$8 sps:$4 sm:$0xff]   ;;  %v1364_v12 = vld [vmem:[%s1738_s5 + $0x150] ss:$8 sps:$4 sm:$0xff]  }
  0x6e   : > { %1002 = vmatprep.subr.bf16.mxu1 %v1355_v6  ;;  %v1365_v13 = vld [vmem:[%s1738_s5 + $0x44] ss:$8 sps:$4 sm:$0xff]   ;;  %v1369_v15 = vld [vmem:[%s1738_s5 + $0x40] ss:$8 sps:$4 sm:$0xff]   ;;  %v1371_v17 = vld [vmem:[%s1738_s5 + $0x34] ss:$8 sps:$4 sm:$0xff]  }
  0x6f   : > { %v1367_v14 = vld [vmem:[%s1738_s5 + $0x144] ss:$8 sps:$4 sm:$0xff]   ;;  %v1370_v16 = vld [vmem:[%s1738_s5 + $0x140] ss:$8 sps:$4 sm:$0xff]   ;;  %v1373_v18 = vld [vmem:[%s1738_s5 + $0x134] ss:$8 sps:$4 sm:$0xff]  }
  0x70   : > { %962 = vmatpush1.bf16.msra.mxu0 %v1357_v7  ;;  %v1375_v19 = vld [vmem:[%s1738_s5 + $0x30] ss:$8 sps:$4 sm:$0xff]   ;;  %v1377_v21 = vld [vmem:[%s1738_s5 + $0x24] ss:$8 sps:$4 sm:$0xff]   ;;  %v1381_v23 = vld [vmem:[%s1738_s5 + $0x20] ss:$8 sps:$4 sm:$0xff]  }
  0x71   : > { %1003 = vmatpush1.bf16.msra.mxu1 %v1358_v8  ;;  %963 = vmatprep.subr.bf16.mxu0 %v1359_v9  ;;  %v1376_v20 = vld [vmem:[%s1738_s5 + $0x130] ss:$8 sps:$4 sm:$0xff]   ;;  %v1379_v22 = vld [vmem:[%s1738_s5 + $0x124] ss:$8 sps:$4 sm:$0xff]   ;;  %v1382_v24 = vld [vmem:[%s1738_s5 + $0x120] ss:$8 sps:$4 sm:$0xff]  }
  0x72   : > { %1004 = vmatprep.subr.bf16.mxu1 %v1361_v10  ;;  %v1383_v25 = vld [vmem:[%s1738_s5 + $0x14] ss:$8 sps:$4 sm:$0xff]   ;;  %v1387_v27 = vld [vmem:[%s1738_s5 + $0x10] ss:$8 sps:$4 sm:$0xff]   ;;  %v1389_v29 = vld [vmem:[%s1738_s5 + $0x4] ss:$8 sps:$4 sm:$0xff]  }
  0x73   : > { %v1385_v26 = vld [vmem:[%s1738_s5 + $0x114] ss:$8 sps:$4 sm:$0xff]   ;;  %v1388_v28 = vld [vmem:[%s1738_s5 + $0x110] ss:$8 sps:$4 sm:$0xff]   ;;  %v1391_v30 = vld [vmem:[%s1738_s5 + $0x104] ss:$8 sps:$4 sm:$0xff]  }
  0x74   : > { %964 = vmatpush1.bf16.msra.mxu0 %v1363_v11  ;;  %v1393_v31 = vld [vmem:[%s1738_s5] ss:$8 sps:$4 sm:$0xff]   ;;  %v1395_v33 = vld [vmem:[%s1738_s5 + $0xf4] ss:$8 sps:$4 sm:$0xff]   ;;  %v1399_v35 = vld [vmem:[%s1738_s5 + $0xf0] ss:$8 sps:$4 sm:$0xff]  }
  0x75   : > { %1005 = vmatpush1.bf16.msra.mxu1 %v1364_v12  ;;  %965 = vmatprep.subr.bf16.mxu0 %v1365_v13  ;;  %v1394_v32 = vld [vmem:[%s1738_s5 + $0x100] ss:$8 sps:$4 sm:$0xff]   ;;  %v1397_v34 = vld [vmem:[%s1738_s5 + $0x1f4] ss:$8 sps:$4 sm:$0xff]   ;;  %v1400_v36 = vld [vmem:[%s1738_s5 + $0x1f0] ss:$8 sps:$4 sm:$0xff]  }
  0x76   : > { %1006 = vmatprep.subr.bf16.mxu1 %v1367_v14  ;;  %v1401_v37 = vld [vmem:[%s1738_s5 + $0xe4] ss:$8 sps:$4 sm:$0xff]   ;;  %v1405_v39 = vld [vmem:[%s1738_s5 + $0xe0] ss:$8 sps:$4 sm:$0xff]   ;;  %v1407_v41 = vld [vmem:[%s1738_s5 + $0xd4] ss:$8 sps:$4 sm:$0xff]  }
  0x77   : > { %v1403_v38 = vld [vmem:[%s1738_s5 + $0x1e4] ss:$8 sps:$4 sm:$0xff]   ;;  %v1406_v40 = vld [vmem:[%s1738_s5 + $0x1e0] ss:$8 sps:$4 sm:$0xff]   ;;  %v1409_v42 = vld [vmem:[%s1738_s5 + $0x1d4] ss:$8 sps:$4 sm:$0xff]  }
  0x78   : > { %966 = vmatpush1.bf16.msra.mxu0 %v1369_v15  ;;  %v1411_v43 = vld [vmem:[%s1738_s5 + $0xd0] ss:$8 sps:$4 sm:$0xff]   ;;  %v1413_v45 = vld [vmem:[%s1738_s5 + $0xc4] ss:$8 sps:$4 sm:$0xff]   ;;  %v1417_v50 = vld [vmem:[%s1738_s5 + $0xc0] ss:$8 sps:$4 sm:$0xff]  }
  0x79   : > { %1007 = vmatpush1.bf16.msra.mxu1 %v1370_v16  ;;  %967 = vmatprep.subr.bf16.mxu0 %v1371_v17  ;;  %v1412_v44 = vld [vmem:[%s1738_s5 + $0x1d0] ss:$8 sps:$4 sm:$0xff]   ;;  %v1415_v46 = vld [vmem:[%s1738_s5 + $0x1c4] ss:$8 sps:$4 sm:$0xff]   ;;  %v1418_v51 = vld [vmem:[%s1738_s5 + $0x1c0] ss:$8 sps:$4 sm:$0xff]  }
  0x7a   : > { %1008 = vmatprep.subr.bf16.mxu1 %v1373_v18  ;;  %v559_v47 = vld [vmem:[%s1724_s26] sm:$0xff]  ;;  %v560_v49 = vld [vmem:[%s1724_s26 + $0x8] sm:$0xff]  ;;  %v1425_v57 = vld [vmem:[%s1738_s5 + $0xa4] ss:$8 sps:$4 sm:$0xff]   ;;  %p1284_p13 = scmp.ne.s32.totalorder %s1485_s14, 1 }
  0x7b   : > { %v1217_v48 = vcombine.high %v559_v47, %v559_v47  ;;  %v1219_v52 = vcombine.high %v560_v49, %v560_v49  ;;  %v1419_v53 = vld [vmem:[%s1738_s5 + $0xb4] ss:$8 sps:$4 sm:$0xff]   ;;  %v1423_v55 = vld [vmem:[%s1738_s5 + $0xb0] ss:$8 sps:$4 sm:$0xff]   ;;  %v1427_v58 = vld [vmem:[%s1738_s5 + $0x1a4] ss:$8 sps:$4 sm:$0xff]   ;;  %v1216_v5 = vcombine.low %v559_v47, %v559_v47  ;;  %v1218_v6 = vcombine.low %v560_v49, %v560_v49 }
  0x7c   : > { %968 = vmatpush1.bf16.msra.mxu0 %v1375_v19  ;;  %v1421_v54 = vld [vmem:[%s1738_s5 + $0x1b4] ss:$8 sps:$4 sm:$0xff]   ;;  %v1424_v56 = vld [vmem:[%s1738_s5 + $0x1b0] ss:$8 sps:$4 sm:$0xff]   ;;  %v1429_v59 = vld [vmem:[%s1738_s5 + $0xa0] ss:$8 sps:$4 sm:$0xff]  }
  0x7d   : > { %1009 = vmatpush1.bf16.msra.mxu1 %v1376_v20  ;;  %969 = vmatprep.subr.bf16.mxu0 %v1377_v21  ;;  %v1430_v60 = vld [vmem:[%s1738_s5 + $0x1a0] ss:$8 sps:$4 sm:$0xff]   ;;  %v1431_v61 = vld [vmem:[%s1738_s5 + $0x94] ss:$8 sps:$4 sm:$0xff]   ;;  %v1435_v63 = vld [vmem:[%s1738_s5 + $0x90] ss:$8 sps:$4 sm:$0xff]  }
  0x7e   : > { %1010 = vmatprep.subr.bf16.mxu1 %v1379_v22  ;;  %991 = vmatprep.mubr.bf16.mxu0 %v1217_v48  ;;  %v1433_v62 = vld [vmem:[%s1738_s5 + $0x194] ss:$8 sps:$4 sm:$0xff]   ;;  %v1436_v0 = vld [vmem:[%s1738_s5 + $0x190] ss:$8 sps:$4 sm:$0xff]   ;;  %v1437_v1 = vld [vmem:[%s1738_s5 + $0x84] ss:$8 sps:$4 sm:$0xff]  }
  0x7f   : > { %1032 = vmatprep.mubr.bf16.mxu1 %v1219_v52  ;;  %v1439_v2 = vld [vmem:[%s1738_s5 + $0x184] ss:$8 sps:$4 sm:$0xff]   ;;  %v1441_v3 = vld [vmem:[%s1738_s5 + $0x80] ss:$8 sps:$4 sm:$0xff]   ;;  %v557_v8 = vld [vmem:[#allocation2] sm:$0xff] }
  0x80   : > { %970 = vmatpush1.bf16.msra.mxu0 %v1381_v23  ;;  %v1442_v4 = vld [vmem:[%s1738_s5 + $0x180] ss:$8 sps:$4 sm:$0xff]   ;;  %v558_v12 = vld [vmem:[#allocation2 + $0x8] sm:$0xff] }
  0x81   : > { %1011 = vmatpush1.bf16.msra.mxu1 %v1382_v24  ;;  %971 = vmatprep.subr.bf16.mxu0 %v1383_v25 }
  0x82   : > { %1012 = vmatprep.subr.bf16.mxu1 %v1385_v26 }
  0x84   : > { %972 = vmatpush1.bf16.msra.mxu0 %v1387_v27 }
  0x85   : > { %1013 = vmatpush1.bf16.msra.mxu1 %v1388_v28  ;;  %973 = vmatprep.subr.bf16.mxu0 %v1389_v29 }
  0x86   : > { %1014 = vmatprep.subr.bf16.mxu1 %v1391_v30 }
  0x88   : > { %974 = vmatpush1.bf16.msra.mxu0 %v1393_v31 }
  0x89   : > { %1015 = vmatpush1.bf16.msra.mxu1 %v1394_v32  ;;  %975 = vmatprep.subr.bf16.mxu0 %v1395_v33 }
  0x8a   : > { %1016 = vmatprep.subr.bf16.mxu1 %v1397_v34 }
  0x8c   : > { %976 = vmatpush2.bf16.msra.mxu0 %v1399_v35 }
  0x8d   : > { %1017 = vmatpush2.bf16.msra.mxu1 %v1400_v36  ;;  %977 = vmatprep.subr.bf16.mxu0 %v1401_v37 }
  0x8e   : > { %1018 = vmatprep.subr.bf16.mxu1 %v1403_v38 }
  0x90   : > { %978 = vmatpush2.bf16.msra.mxu0 %v1405_v39 }
  0x91   : > { %1019 = vmatpush2.bf16.msra.mxu1 %v1406_v40  ;;  %979 = vmatprep.subr.bf16.mxu0 %v1407_v41 }
  0x92   : > { %1020 = vmatprep.subr.bf16.mxu1 %v1409_v42 }
  0x94   : > { %980 = vmatpush2.bf16.msra.mxu0 %v1411_v43 }
  0x95   : > { %1021 = vmatpush2.bf16.msra.mxu1 %v1412_v44  ;;  %981 = vmatprep.subr.bf16.mxu0 %v1413_v45 }
  0x96   : > { %1022 = vmatprep.subr.bf16.mxu1 %v1415_v46 }
  0x98   : > { %982 = vmatpush2.bf16.msra.mxu0 %v1417_v50 }
  0x99   : > { %1023 = vmatpush2.bf16.msra.mxu1 %v1418_v51  ;;  %983 = vmatprep.subr.bf16.mxu0 %v1419_v53 }
  0x9a   : > { %1024 = vmatprep.subr.bf16.mxu1 %v1421_v54 }
  0x9c   : > { %984 = vmatpush2.bf16.msra.mxu0 %v1423_v55 }
  0x9d   : > { %1025 = vmatpush2.bf16.msra.mxu1 %v1424_v56  ;;  %985 = vmatprep.subr.bf16.mxu0 %v1425_v57 }
  0x9e   : > { %1026 = vmatprep.subr.bf16.mxu1 %v1427_v58 }
  0xa0   : > { %986 = vmatpush2.bf16.msra.mxu0 %v1429_v59 }
  0xa1   : > { %1027 = vmatpush2.bf16.msra.mxu1 %v1430_v60  ;;  %987 = vmatprep.subr.bf16.mxu0 %v1431_v61 }
  0xa2   : > { %1028 = vmatprep.subr.bf16.mxu1 %v1433_v62 }
  0xa4   : > { %988 = vmatpush2.bf16.msra.mxu0 %v1435_v63 }
  0xa5   : > { %1029 = vmatpush2.bf16.msra.mxu1 %v1436_v0  ;;  %989 = vmatprep.subr.bf16.mxu0 %v1437_v1 }
  0xa6   : > { %1030 = vmatprep.subr.bf16.mxu1 %v1439_v2 }
  0xa8   : > { %990 = vmatpush2.bf16.msra.mxu0 %v1441_v3 }
  0xa9   : > { %1031 = vmatpush2.bf16.msra.mxu1 %v1442_v4 }
  0xab   : > { %992 = vmatmul.mubr.bf16.vlgmr.msra.gmra.mxu0 %v1216_v5 }
  0xac   : > { %1033 = vmatmul.mubr.bf16.vlgmr.msra.gmra.mxu1 %v1218_v6 }
 0x16b   : > { %v993_v7 = vpop.f32.mrf.mxu0 }
 0x16c   : > { %v1034_v9 = vpop.f32.mrf.mxu1 }
 0x16d   : > { %v1035_v10 = vadd.f32 %v1034_v9, %v993_v7  ;;  %v995_v11 = vpop.f32.mrf.mxu0 }
 0x16e   : > { %v1036_v13 = vpop.f32.mrf.mxu1 }
 0x16f   : > { %v1041_v14 = vadd.f32 %v1035_v10, %v557_v8  ;;  %v1037_v15 = vadd.f32 %v1036_v13, %v995_v11  ;;  %v997_v16 = vpop.f32.mrf.mxu0  ;;  %1048 = sbr.rel (%p1284_p13) target bundleno = 387 (0x183), region = 78 }
 0x170   : > { %v1038_v17 = vpop.f32.mrf.mxu1 }
 0x171   : > { %1043 = vst [vmem:[#allocation2] sm:$0xff] %v1041_v14  ;;  %v1042_v18 = vadd.f32 %v1037_v15, %v558_v12  ;;  %v998_v19 = vpop.f32.mrf.mxu0 }
 0x172   : > { %v1039_v20 = vpop.f32.mrf.mxu1 }
 0x173   : > { %1044 = vst [vmem:[#allocation2 + $0x8] sm:$0xff] %v1042_v18 }
 0x174   : > { %v1053_v21 = vlaneseq  ;;  %v1051_v23 = vld [vmem:[%s539_s12] sm:$0x3] }
 0x176   : > { %v1054_v22 = vshrl.u32 %v1053_v21, 7 }
 0x178   : > { %v1055_v24 = vsub.s32 0, %v1054_v22  ;;  %v1059_v25 = vsub.s32 1, %v1054_v22  ;;  %v1049_v26 = vld [vmem:[#allocation2] sm:$0xff] }
 0x17a   : > { %v1050_v27 = vld [vmem:[#allocation2 + $0x8] sm:$0xff]  ;;  %v1056_v28 = vrot.slane %v1051_v23, %v1055_v24  ;;  %v1060_v29 = vrot.slane %v1051_v23, %v1059_v25 }
 0x17c   : > { %v1063_v30 = vadd.f32 %v1056_v28, %v1049_v26  ;;  %v1064_v31 = vadd.f32 %v1060_v29, %v1050_v27 }
 0x17e   : > { %v1065_v32 = vmax.f32 %v1063_v30, 0.0  ;;  %v1066_v33 = vmax.f32 %v1064_v31, 0.0 }
 0x180   : > { %v1289_v34 = vpack.c.bf16 %v1066_v33, %v1065_v32 }
 0x182   : > { %1075 = vst [vmem:[%s1736_s15] sm:$0xff] %v1289_v34 }
 0x183 PF: > { %s13_s18 = sadd.s32 1, %s1501_s18   ;;  %s1839_s12 = smov %s1481_s13 }
 0x184   : > { %p10_p0 = scmp.ge.s32.totalorder %s13_s18, 10   ;;  %s1840_s13 = smov %s1575_s25 }
 0x185   : > { %s1841_s14 = smov %s1493_s16  ;;  %s1842_s15 = smov %s1497_s17 }
 0x186   : > { %s1843_s16 = smov %s1846_s19  ;;  %s1844_s17 = smov %s1850_s20 }
 0x187   :  { %12 = sbr.rel (!%p10_p0) target bundleno = 4 (0x4), region = 119 }

// kernel: morphclr_dual_forward.87
= control target key start
LH: loop header
LB: loop body
LE: loop exit
PB: predicated region body
PF: predicated region fallthrough
CT: control target
= control target key end

     0   :  { %s940_s12 = smov 0   ;;  %s942_s13 = smov 0   ;;  %s1023_s0 = inlined_call_operand.vmem [shape: bf16[8,1024], index: 0, kind: input, shape index: {}]   ;;  %s1024_s1 = inlined_call_operand.vmem [shape: bf16[1024,128], index: 1, kind: input, shape index: {}]   ;;  %s1025_s2 = inlined_call_operand.vmem [shape: f32[1,128], index: 2, kind: input, shape index: {}]   ;;  %s1026_s3 = inlined_call_operand.vmem [shape: f32[8,128], index: 3, kind: output, shape index: {}]  }
   0x1   :  { %s944_s14 = smov 0  }
   0x2 LB: > { %s25_s15 = sadd.s32 1, %s913_s13  ;;  %p743_p0 = scmp.ge.s32.totalorder %s917_s14, 1  ;;  %s917_s14 = sphi %s944_s14, %s13_s14   ;;  %s913_s13 = sphi %s942_s13, %s1028_s13   ;;  %s909_s12 = sphi %s940_s12, %s1027_s12  }
   0x3   : > { %p26_p1 = scmp.ge.s32.totalorder %s25_s15, 2  ;;  %p189_p2 = scmp.lt.s32.totalorder %s917_s14, 3 }
   0x5   : > { %s1030_s15 = smov (%p26_p1, %s25_s15), 0  ;;  %p190_p3 = pnand %p743_p0, %p189_p2 }
   0x6   : > { %s744_s16 = sshll.u32 (!%p190_p3), %s909_s12, 2  ;;  %s746_s17 = sshll.u32 (!%p190_p3), %s909_s12, 6 }
   0x7   : > { %193 = sbr.rel (%p190_p3) target bundleno = 269 (0x10d), region = 32  ;;  %p233_p4 = scmp.lt.s32.totalorder (!%p190_p3), %s744_s16, 7 }
   0x8   : > { %p241_p5 = scmp.lt.s32.totalorder (!%p190_p3), %s746_s17, 127  ;;  %p748_p6 = scmp.ne.s32.totalorder (!%p190_p3), %s909_s12, 0 }
   0xc   : > { %s1032_s16 = smov (!%p233_p4, %s744_s16), 7  ;;  %s1034_s17 = smov (!%p241_p5, %s746_s17), 127 }
   0xd   : > { %s745_s18 = sshll.u32 %s1032_s16, 2  ;;  %s747_s22 = sshll.u32 %s1034_s17, 2 }
   0xe   : > { %s965_s21 = scalar_lea.vmem %s1023_s0, %s745_s18  ;;  %s970_s25 = scalar_lea.vmem %s1024_s1, %s747_s22 }
   0xf   : > { %263 = sbr.rel (%p748_p6) target bundleno = 22 (0x16), region = 36 }
  0x14   : > { %v919_v0 = vmov 0.0  }
  0x15   : > { %264 = vst [vmem:[#allocation2] sm:$0xff] %v919_v0 }
  0x16 PF: > { %v859_v1 = vld [vmem:[%s970_s25 + $0x78] sm:$0xff]   ;;  %v863_v5 = vld [vmem:[%s970_s25 + $0x70] sm:$0xff]   ;;  %v867_v9 = vld [vmem:[%s970_s25 + $0x68] sm:$0xff]   ;;  %p785_p7 = scmp.ne.s32.totalorder %s909_s12, 1 }
  0x17   : > { %v860_v2 = vld [vmem:[%s970_s25 + $0xf8] sm:$0xff]   ;;  %790 = vmatprep.subr.bf16.mxu0 %v859_v1  ;;  %v864_v6 = vld [vmem:[%s970_s25 + $0xf0] sm:$0xff]   ;;  %v868_v10 = vld [vmem:[%s970_s25 + $0xe8] sm:$0xff]  }
  0x18   : > { %v861_v3 = vld [vmem:[%s970_s25 + $0x38] sm:$0xff]   ;;  %812 = vmatprep.subr.bf16.mxu1 %v860_v2  ;;  %v865_v7 = vld [vmem:[%s970_s25 + $0x30] sm:$0xff]   ;;  %v869_v11 = vld [vmem:[%s970_s25 + $0x28] sm:$0xff]  }
  0x19   : > { %v862_v4 = vld [vmem:[%s970_s25 + $0xb8] sm:$0xff]   ;;  %791 = vmatpush3.bf16.msra.mxu0 %v861_v3  ;;  %v866_v8 = vld [vmem:[%s970_s25 + $0xb0] sm:$0xff]   ;;  %v870_v12 = vld [vmem:[%s970_s25 + $0xa8] sm:$0xff]  }
  0x1a   : > { %813 = vmatpush3.bf16.msra.mxu1 %v862_v4  ;;  %792 = vmatprep.subr.bf16.mxu0 %v863_v5  ;;  %v871_v13 = vld [vmem:[%s970_s25 + $0x60] sm:$0xff]   ;;  %v875_v17 = vld [vmem:[%s970_s25 + $0x58] sm:$0xff]   ;;  %v879_v21 = vld [vmem:[%s970_s25 + $0x50] sm:$0xff]  }
  0x1b   : > { %814 = vmatprep.subr.bf16.mxu1 %v864_v6  ;;  %v872_v14 = vld [vmem:[%s970_s25 + $0xe0] sm:$0xff]   ;;  %v876_v18 = vld [vmem:[%s970_s25 + $0xd8] sm:$0xff]   ;;  %v880_v22 = vld [vmem:[%s970_s25 + $0xd0] sm:$0xff]  }
  0x1c   : > { %v873_v15 = vld [vmem:[%s970_s25 + $0x20] sm:$0xff]   ;;  %v877_v19 = vld [vmem:[%s970_s25 + $0x18] sm:$0xff]   ;;  %v881_v23 = vld [vmem:[%s970_s25 + $0x10] sm:$0xff]  }
  0x1d   : > { %793 = vmatpush3.bf16.msra.mxu0 %v865_v7  ;;  %v874_v16 = vld [vmem:[%s970_s25 + $0xa0] sm:$0xff]   ;;  %v878_v20 = vld [vmem:[%s970_s25 + $0x98] sm:$0xff]   ;;  %v882_v24 = vld [vmem:[%s970_s25 + $0x90] sm:$0xff]  }
  0x1e   : > { %815 = vmatpush3.bf16.msra.mxu1 %v866_v8  ;;  %794 = vmatprep.subr.bf16.mxu0 %v867_v9  ;;  %v883_v25 = vld [vmem:[%s970_s25 + $0x48] sm:$0xff]   ;;  %v887_v29 = vld [vmem:[%s970_s25 + $0x40] sm:$0xff]  }
  0x1f   : > { %816 = vmatprep.subr.bf16.mxu1 %v868_v10  ;;  %v884_v26 = vld [vmem:[%s970_s25 + $0xc8] sm:$0xff]   ;;  %v888_v30 = vld [vmem:[%s970_s25 + $0xc0] sm:$0xff]  }
  0x20   : > { %v885_v27 = vld [vmem:[%s970_s25 + $0x8] sm:$0xff]   ;;  %v889_v31 = vld [vmem:[%s970_s25] sm:$0xff]  }
  0x21   : > { %795 = vmatpush3.bf16.msra.mxu0 %v869_v11  ;;  %v886_v28 = vld [vmem:[%s970_s25 + $0x88] sm:$0xff]   ;;  %v890_v32 = vld [vmem:[%s970_s25 + $0x80] sm:$0xff]  }
  0x22   : > { %817 = vmatpush3.bf16.msra.mxu1 %v870_v12  ;;  %796 = vmatprep.subr.bf16.mxu0 %v871_v13  ;;  %v266_v33 = vld [vmem:[%s965_s21] sm:$0xff]  ;;  %v267_v34 = vld [vmem:[%s965_s21 + $0x8] sm:$0xff] }
  0x23   : > { %818 = vmatprep.subr.bf16.mxu1 %v872_v14  ;;  %v749_v35 = vcombine.low %v266_v33, %v266_v33  ;;  %v750_v36 = vcombine.high %v266_v33, %v266_v33  ;;  %v751_v37 = vcombine.low %v267_v34, %v267_v34  ;;  %v752_v38 = vcombine.high %v267_v34, %v267_v34  ;;  %v265_v45 = vld [vmem:[#allocation2] sm:$0xff] }
  0x25   : > { %797 = vmatpush3.bf16.msra.mxu0 %v873_v15  ;;  %570 = vmatprep.mubr.bf16.mxu0 %v750_v36 }
  0x26   : > { %819 = vmatpush3.bf16.msra.mxu1 %v874_v16  ;;  %798 = vmatprep.subr.bf16.mxu0 %v875_v17 }
  0x27   : > { %820 = vmatprep.subr.bf16.mxu1 %v876_v18  ;;  %610 = vmatprep.mubr.bf16.mxu1 %v752_v38 }
  0x29   : > { %799 = vmatpush3.bf16.msra.mxu0 %v877_v19 }
  0x2a   : > { %821 = vmatpush3.bf16.msra.mxu1 %v878_v20  ;;  %800 = vmatprep.subr.bf16.mxu0 %v879_v21 }
  0x2b   : > { %822 = vmatprep.subr.bf16.mxu1 %v880_v22 }
  0x2d   : > { %801 = vmatpush3.bf16.msra.mxu0 %v881_v23 }
  0x2e   : > { %823 = vmatpush3.bf16.msra.mxu1 %v882_v24  ;;  %802 = vmatprep.subr.bf16.mxu0 %v883_v25 }
  0x2f   : > { %824 = vmatprep.subr.bf16.mxu1 %v884_v26 }
  0x31   : > { %803 = vmatpush3.bf16.msra.mxu0 %v885_v27 }
  0x32   : > { %825 = vmatpush3.bf16.msra.mxu1 %v886_v28  ;;  %804 = vmatprep.subr.bf16.mxu0 %v887_v29 }
  0x33   : > { %826 = vmatprep.subr.bf16.mxu1 %v888_v30 }
  0x35   : > { %805 = vmatpush3.bf16.msra.mxu0 %v889_v31 }
  0x36   : > { %827 = vmatpush3.bf16.msra.mxu1 %v890_v32 }
  0x38   : > { %571 = vmatmul.mubr.bf16.vlgmr.msra.gmra.mxu0 %v749_v35 }
  0x39   : > { %611 = vmatmul.mubr.bf16.vlgmr.msra.gmra.mxu1 %v751_v37 }
  0xf8   : > { %v806_v39 = vpop.f32.mrf.mxu0 }
  0xf9   : > { %v828_v40 = vpop.f32.mrf.mxu1 }
  0xfa   : > { %v807_v41 = vpop.f32.mrf.mxu0 }
  0xfb   : > { %v829_v42 = vpop.f32.mrf.mxu1  ;;  %v808_v43 = vadd.f32 %v807_v41, %v806_v39 }
  0xfc   : > { %v830_v44 = vadd.f32 %v829_v42, %v828_v40  ;;  %v809_v46 = vpop.f32.mrf.mxu0 }
  0xfd   : > { %v831_v47 = vpop.f32.mrf.mxu1 }
  0xfe   : > { %v613_v48 = vadd.f32 %v830_v44, %v808_v43  ;;  %v810_v49 = vpop.f32.mrf.mxu0  ;;  %623 = sbr.rel (%p785_p7) target bundleno = 269 (0x10d), region = 40 }
  0xff   : > { %v832_v50 = vpop.f32.mrf.mxu1 }
 0x100   : > { %v618_v51 = vadd.f32 %v613_v48, %v265_v45 }
 0x102   : > { %619 = vst [vmem:[#allocation2] sm:$0xff] %v618_v51 }
 0x103   : > { %v786_v53 = vld [vmem:[%s1025_s2] ss:$0 sm:$0xff] }
 0x109   : > { %v624_v52 = vld [vmem:[#allocation2] sm:$0xff] }
 0x10a   : > { %v632_v54 = vadd.f32 %v786_v53, %v624_v52 }
 0x10c   : > { %633 = vst [vmem:[%s1026_s3] sm:$0xff] %v632_v54 }
 0x10d PF: > { %s13_s14 = sadd.s32 1, %s917_s14   ;;  %s1027_s12 = smov %s913_s13 }
 0x10e   : > { %p10_p8 = scmp.ge.s32.totalorder %s13_s14, 4   ;;  %s1028_s13 = smov %s1030_s15 }
 0x110   :  { %12 = sbr.rel (!%p10_p8) target bundleno = 2 (0x2), region = 76 }

</bundles_post_ra>
